<compile_context>
chip_gen: v6e
topology: v6e:2x2x1
jax: 0.10.0
libtpu: 0.0.40
codegen_flags: <defaults>
</compile_context>

<pallas_src>
import functools
import math

import jax
import jax.numpy as jnp
from jax import lax
from jax.experimental import pallas as pl
from jax.experimental.pallas import tpu as pltpu


# ----------------------------------------------------------------------------
# Fused kernel: MHA + residual + LN + FFN + residual + LN for one (batch, q-tile)
# ----------------------------------------------------------------------------
def _cross_block_kernel(
    q_in_ref, kv_in_ref, resid_ref, mask_ref,
    w_q_ref, b_q_ref, w_k_ref, b_k_ref, w_v_ref, b_v_ref,
    w_out_ref, b_out_ref,
    ln1_g_ref, ln1_b_ref, w1_ref, b1_ref, w2_ref, b2_ref,
    ln2_g_ref, ln2_b_ref,
    o_ref,
    *, n_heads, eps):
  f32 = jnp.float32
  mxu = w_q_ref.dtype                       # bf16 weights -> bf16 MXU operands

  def mm(a, b):                             # MXU matmul, f32 accumulation
    return jnp.dot(a, b, preferred_element_type=f32)

  xq = q_in_ref[0]                          # (tq, D)  already mxu dtype
  xkv = kv_in_ref[0]                        # (Lk, D)
  tq = xq.shape[0]
  lk = xkv.shape[0]

  # Additive key-padding mask broadcast ONCE (hoisted out of the head loop).
  mask2d = jnp.broadcast_to(mask_ref[0].astype(f32), (tq, lk))    # (tq, Lk)

  # --- per-head attention with head-major weights (leading-dim indexing only) ---
  attn = b_out_ref[...].astype(f32)         # (1, D), broadcasts on first add
  for h in range(n_heads):
    # per-head projections; 1/sqrt(dh) already folded into w_q / b_q
    q_h = (mm(xq, w_q_ref[h]) + b_q_ref[h]).astype(mxu)           # (tq, dh)
    k_h = (mm(xkv, w_k_ref[h]) + b_k_ref[h]).astype(mxu)          # (Lk, dh)
    v_h = (mm(xkv, w_v_ref[h]) + b_v_ref[h]).astype(mxu)          # (Lk, dh)
    # scores: contract the head dim of both operands (no k.T materialized)
    s = lax.dot_general(q_h, k_h, (((1,), (1,)), ((), ())),
                        preferred_element_type=f32) + mask2d      # (tq, Lk)
    s_max = jnp.max(s, axis=-1, keepdims=True)
    e = jnp.exp(s - s_max)
    p = e * pl.reciprocal(jnp.sum(e, axis=-1, keepdims=True), approx=True)
    o_h = mm(p.astype(mxu), v_h)                                  # (tq, dh) f32
    # accumulate the output projection head by head (no head concat needed)
    attn = attn + mm(o_h.astype(mxu), w_out_ref[h])               # (tq, D)  f32

  def layernorm(x, g_ref, b_ref):
    m = jnp.mean(x, axis=-1, keepdims=True)
    v = jnp.mean(jnp.square(x - m), axis=-1, keepdims=True)
    return ((x - m) * lax.rsqrt(v + eps)
            * g_ref[...].astype(f32) + b_ref[...].astype(f32))

  # residual + LN1
  z = layernorm(resid_ref[0].astype(f32) + attn, ln1_g_ref, ln1_b_ref)

  # FFN (hidden never leaves VMEM/vregs) + residual + LN2
  hid = jnp.maximum(mm(z.astype(mxu), w1_ref[...]) + b1_ref[...], 0.0)   # (tq, F)
  y = mm(hid.astype(mxu), w2_ref[...]) + b2_ref[...]                     # (tq, D)
  o_ref[0] = layernorm(z + y, ln2_g_ref, ln2_b_ref).astype(o_ref.dtype)


def cross_block(q_in, kv_in, resid, add_mask, p, *, n_heads, eps=1e-5,
                q_tile=None, single_buffer_weights=True):
  """One branch: LN2(x + FFN(x)) with x = LN1(resid + MHA(q_in, kv_in, kv_in))."""
  b, lq, d = q_in.shape
  lk = kv_in.shape[1]
  dh = d // n_heads
  dff = p["w1"].shape[1]

  tq = lq if q_tile is None else min(q_tile, lq)
  assert lq % tq == 0, "q_tile must divide Lq"
  nq = lq // tq

  kernel = functools.partial(_cross_block_kernel, n_heads=n_heads, eps=eps)

  def wspec(shape):
    # constant-index weights/biases: single-buffer them (double-buffering a block
    # whose index_map never changes only wastes VMEM).
    zero = lambda bi, qi, _n=len(shape): (0,) * _n
    if single_buffer_weights:
      return pl.BlockSpec(shape, zero, pipeline_mode=pl.Buffered(1))
    return pl.BlockSpec(shape, zero)

  return pl.pallas_call(
      kernel,
      out_shape=jax.ShapeDtypeStruct((b, lq, d), q_in.dtype),
      grid=(b, nq),
      in_specs=[
          pl.BlockSpec((1, tq, d), lambda bi, qi: (bi, qi, 0)),   # q_in
          pl.BlockSpec((1, lk, d), lambda bi, qi: (bi, 0, 0)),    # kv_in
          pl.BlockSpec((1, tq, d), lambda bi, qi: (bi, qi, 0)),   # residual
          pl.BlockSpec((1, 1, lk), lambda bi, qi: (bi, 0, 0)),    # additive key mask
          wspec((n_heads, d, dh)),    # w_q  (scale folded in)
          wspec((n_heads, 1, dh)),    # b_q  (scale folded in)
          wspec((n_heads, d, dh)),    # w_k
          wspec((n_heads, 1, dh)),    # b_k
          wspec((n_heads, d, dh)),    # w_v
          wspec((n_heads, 1, dh)),    # b_v
          wspec((n_heads, dh, d)),    # w_out (head-major)
          wspec((1, d)),              # b_out
          wspec((1, d)),              # ln1_g
          wspec((1, d)),              # ln1_b
          wspec((d, dff)),            # w1
          wspec((1, dff)),            # b1
          wspec((dff, d)),            # w2
          wspec((1, d)),              # b2
          wspec((1, d)),              # ln2_g
          wspec((1, d)),              # ln2_b
      ],
      out_specs=pl.BlockSpec((1, tq, d), lambda bi, qi: (bi, qi, 0)),
      compiler_params=pltpu.CompilerParams(
          dimension_semantics=("parallel", "parallel")),   # shards across TCs on v7x
  )(q_in, kv_in, resid, add_mask,
    p["w_q"], p["b_q"], p["w_k"], p["b_k"], p["w_v"], p["b_v"],
    p["w_out"], p["b_out"],
    p["ln1_g"], p["ln1_b"], p["w1"], p["b1"], p["w2"], p["b2"],
    p["ln2_g"], p["ln2_b"])


# ----------------------------------------------------------------------------
# Full CrossAttentionLayer forward (2 pallas_calls total)
# ----------------------------------------------------------------------------
def cross_attention_layer(vis_feats, vis_key_padding_mask, text_feats,
                          text_key_padding_mask, pos_feats, params, *,
                          n_heads, act_dtype=jnp.bfloat16,
                          single_buffer_weights=True):
  # activations cross the pallas_call boundary in the MXU dtype (bf16)
  vis = vis_feats.astype(act_dtype)
  text = text_feats.astype(act_dtype)
  pos = pos_feats.astype(act_dtype)

  vis_add = jnp.where(vis_key_padding_mask, -1e9, 0.0).astype(jnp.float32)[:, None, :]
  text_add = jnp.where(text_key_padding_mask, -1e9, 0.0).astype(jnp.float32)[:, None, :]

  # language attends to vision: query/residual = text, key/value = vis_feats
  text_out = cross_block(text, vis, text, vis_add, params["lv"],
                         n_heads=n_heads,
                         single_buffer_weights=single_buffer_weights)
  # vision attends to language: query = vis + pos, residual = vis,
  # key/value = ORIGINAL text feats (captured before the text branch update)
  vis_out = cross_block(vis + pos, text, vis, text_add, params["vl"],
                        n_heads=n_heads,
                        single_buffer_weights=single_buffer_weights)
  return vis_out, text_out


# ----------------------------------------------------------------------------
# Parameters: PyTorch-layout raw params + one-time kernel-layout preparation
# ----------------------------------------------------------------------------
def make_raw_params(key, d_model, dim_feedforward):
  def nxt():
    nonlocal key
    key, sub = jax.random.split(key)
    return sub

  def mha_params():
    return {
        "in_proj_w": jax.random.normal(nxt(), (3 * d_model, d_model), jnp.float32) * 0.05,
        "in_proj_b": jax.random.normal(nxt(), (3 * d_model,), jnp.float32) * 0.02,
        "out_w": jax.random.normal(nxt(), (d_model, d_model), jnp.float32) * 0.05,
        "out_b": jax.random.normal(nxt(), (d_model,), jnp.float32) * 0.02,
    }

  def ffn_params():
    return {
        "w1": jax.random.normal(nxt(), (dim_feedforward, d_model), jnp.float32) * 0.05,
        "b1": jax.random.normal(nxt(), (dim_feedforward,), jnp.float32) * 0.02,
        "w2": jax.random.normal(nxt(), (d_model, dim_feedforward), jnp.float32) * 0.05,
        "b2": jax.random.normal(nxt(), (d_model,), jnp.float32) * 0.02,
    }

  def branch():
    return {
        "mha": mha_params(),
        "ln1_g": jnp.ones((d_model,), jnp.float32),
        "ln1_b": jnp.zeros((d_model,), jnp.float32),
        "ffn": ffn_params(),
        "ln2_g": jnp.ones((d_model,), jnp.float32),
        "ln2_b": jnp.zeros((d_model,), jnp.float32),
    }

  return {"lv": branch(), "vl": branch()}


def prepare_params(raw, d_model, n_heads, weight_dtype=jnp.bfloat16):
  """One-time (outside jit) head-major re-layout, scale folding, bf16 cast."""
  dh = d_model // n_heads
  scale = 1.0 / math.sqrt(dh)

  def head_major_in(w):
    # torch layout (rows = output features), applied as x @ W.T.
    # -> (H, D, dh) so that x @ w_hm[h] is head h's projection.
    return jnp.transpose(w.reshape(n_heads, dh, d_model), (0, 2, 1))

  def branch(p):
    mha, ffn = p["mha"], p["ffn"]
    wq, wk, wv = jnp.split(mha["in_proj_w"], 3, axis=0)   # (D, D) each
    bq, bk, bv = jnp.split(mha["in_proj_b"], 3, axis=0)
    return {
        "w_q": (head_major_in(wq) * scale).astype(weight_dtype),   # scale folded
        "b_q": (bq.reshape(n_heads, 1, dh) * scale).astype(jnp.float32),
        "w_k": head_major_in(wk).astype(weight_dtype),
        "b_k": bk.reshape(n_heads, 1, dh).astype(jnp.float32),
        "w_v": head_major_in(wv).astype(weight_dtype),
        "b_v": bv.reshape(n_heads, 1, dh).astype(jnp.float32),
        # out proj head-major: attn = sum_h o_h @ w_out[h] + b_out
        "w_out": mha["out_w"].T.reshape(n_heads, dh, d_model).astype(weight_dtype),
        "b_out": mha["out_b"].reshape(1, d_model).astype(jnp.float32),
        "ln1_g": p["ln1_g"].reshape(1, d_model),
        "ln1_b": p["ln1_b"].reshape(1, d_model),
        "w1": ffn["w1"].T.astype(weight_dtype),            # (D, F)
        "b1": ffn["b1"].reshape(1, -1).astype(jnp.float32),
        "w2": ffn["w2"].T.astype(weight_dtype),            # (F, D)
        "b2": ffn["b2"].reshape(1, d_model).astype(jnp.float32),
        "ln2_g": p["ln2_g"].reshape(1, d_model),
        "ln2_b": p["ln2_b"].reshape(1, d_model),
    }

  return {"lv": branch(raw["lv"]), "vl": branch(raw["vl"])}


# ----------------------------------------------------------------------------
# Pure-JAX f32 reference (PyTorch semantics), for a sanity check
# ----------------------------------------------------------------------------
def reference_forward(vis_feats, vis_mask, text_feats, text_mask, pos_feats,
                      raw, n_heads, eps=1e-5):
  def mha(q, k, v, kpm, p):
    b, lq, d = q.shape
    lk = k.shape[1]
    dh = d // n_heads
    wq, wk, wv = jnp.split(p["in_proj_w"], 3, axis=0)
    bq, bk, bv = jnp.split(p["in_proj_b"], 3, axis=0)
    qh = (q @ wq.T + bq).reshape(b, lq, n_heads, dh).transpose(0, 2, 1, 3)
    kh = (k @ wk.T + bk).reshape(b, lk, n_heads, dh).transpose(0, 2, 1, 3)
    vh = (v @ wv.T + bv).reshape(b, lk, n_heads, dh).transpose(0, 2, 1, 3)
    s = jnp.einsum("bhqd,bhkd->bhqk", qh, kh, precision="highest") / math.sqrt(dh)
    s = s + jnp.where(kpm, -1e9, 0.0)[:, None, None, :]
    a = jax.nn.softmax(s, axis=-1)
    o = jnp.einsum("bhqk,bhkd->bhqd", a, vh, precision="highest")
    o = o.transpose(0, 2, 1, 3).reshape(b, lq, d)
    return o @ p["out_w"].T + p["out_b"]

  def ln(x, g, b):
    m = x.mean(-1, keepdims=True)
    v = ((x - m) ** 2).mean(-1, keepdims=True)
    return (x - m) * jax.lax.rsqrt(v + eps) * g + b

  def ffn(x, p):
    return jnp.maximum(x @ p["w1"].T + p["b1"], 0.0) @ p["w2"].T + p["b2"]

  def branch(q, kv, resid, kpm, p):
    z = ln(resid + mha(q, kv, kv, kpm, p["mha"]), p["ln1_g"], p["ln1_b"])
    return ln(z + ffn(z, p["ffn"]), p["ln2_g"], p["ln2_b"])

  text_out = branch(text_feats, vis_feats, text_feats, vis_mask, raw["lv"])
  vis_out = branch(vis_feats + pos_feats, text_feats, vis_feats, text_mask, raw["vl"])
  return vis_out, text_out


if __name__ == "__main__":
  d_model, n_heads, dim_feedforward = 32, 4, 32
  B, V, L = 2, 16, 8

  root = jax.random.PRNGKey(0)
  k_params, k_vis, k_text, k_pos = jax.random.split(root, 4)

  raw_params = make_raw_params(k_params, d_model, dim_feedforward)
  params = prepare_params(raw_params, d_model, n_heads, weight_dtype=jnp.bfloat16)

  vis_feats = jax.random.normal(k_vis, (B, V, d_model), jnp.float32)
  text_feats = jax.random.normal(k_text, (B, L, d_model), jnp.float32)
  pos_feats = jax.random.normal(k_pos, (B, V, d_model), jnp.float32)

  # key padding masks: True = padded / ignore
  vis_key_padding_mask = jnp.zeros((B, V), dtype=bool).at[1, -3:].set(True)
  text_key_padding_mask = jnp.zeros((B, L), dtype=bool).at[1, -2:].set(True)

  def run(single_buffer_weights):
    fwd = jax.jit(functools.partial(cross_attention_layer, n_heads=n_heads,
                                    single_buffer_weights=single_buffer_weights))
    out = fwd(vis_feats, vis_key_padding_mask, text_feats,
              text_key_padding_mask, pos_feats, params)
    jax.block_until_ready(out)
    return out

  try:
    vis_out, text_out = run(True)
  except Exception:
    # pipeline_mode=pl.Buffered(1) is a recent Mosaic feature; fall back to the
    # default (double-buffered) weight specs if the installed toolchain rejects it.
    vis_out, text_out = run(False)

  assert vis_out.shape == (B, V, d_model)
  assert text_out.shape == (B, L, d_model)
  assert bool(jnp.all(jnp.isfinite(vis_out.astype(jnp.float32))))
  assert bool(jnp.all(jnp.isfinite(text_out.astype(jnp.float32))))

  # sanity check against a pure-JAX f32 reference (bf16 activations/MXU => loose tol)
  ref_vis, ref_text = jax.jit(functools.partial(reference_forward, n_heads=n_heads))(
      vis_feats, vis_key_padding_mask, text_feats, text_key_padding_mask,
      pos_feats, raw_params)
  assert float(jnp.max(jnp.abs(vis_out.astype(jnp.float32) - ref_vis))) < 0.1
  assert float(jnp.max(jnp.abs(text_out.astype(jnp.float32) - ref_text))) < 0.1

  print("KERNEL_OK")
</pallas_src>

<mosaic_0001>
module attributes {stable_mosaic.version = 11 : i64} {
  func.func @_cross_block_kernel(%arg0: i32, %arg1: i32, %arg2: memref<1x16x32xbf16, #tpu.memory_space<vmem>>, %arg3: memref<1x8x32xbf16, #tpu.memory_space<vmem>>, %arg4: memref<1x16x32xbf16, #tpu.memory_space<vmem>>, %arg5: memref<1x1x8xf32, #tpu.memory_space<vmem>>, %arg6: memref<4x32x8xbf16, #tpu.memory_space<vmem>>, %arg7: memref<4x1x8xf32, #tpu.memory_space<vmem>>, %arg8: memref<4x32x8xbf16, #tpu.memory_space<vmem>>, %arg9: memref<4x1x8xf32, #tpu.memory_space<vmem>>, %arg10: memref<4x32x8xbf16, #tpu.memory_space<vmem>>, %arg11: memref<4x1x8xf32, #tpu.memory_space<vmem>>, %arg12: memref<4x8x32xbf16, #tpu.memory_space<vmem>>, %arg13: memref<1x32xf32, #tpu.memory_space<vmem>>, %arg14: memref<1x32xf32, #tpu.memory_space<vmem>>, %arg15: memref<1x32xf32, #tpu.memory_space<vmem>>, %arg16: memref<32x32xbf16, #tpu.memory_space<vmem>>, %arg17: memref<1x32xf32, #tpu.memory_space<vmem>>, %arg18: memref<32x32xbf16, #tpu.memory_space<vmem>>, %arg19: memref<1x32xf32, #tpu.memory_space<vmem>>, %arg20: memref<1x32xf32, #tpu.memory_space<vmem>>, %arg21: memref<1x32xf32, #tpu.memory_space<vmem>>, %arg22: memref<1x16x32xbf16, #tpu.memory_space<vmem>>) attributes {dimension_semantics = [#tpu.dimension_semantics<parallel>, #tpu.dimension_semantics<parallel>], iteration_bounds = array<i64: 2, 1>, scalar_prefetch = 0 : i64, scratch_operands = 0 : i64, tpu.core_type = #tpu.core_type<tc>, window_params = [{transform_indices = @transform_0, window_bounds = array<i64: 1, 16, 32>}, {transform_indices = @transform_1, window_bounds = array<i64: 1, 8, 32>}, {transform_indices = @transform_2, window_bounds = array<i64: 1, 16, 32>}, {transform_indices = @transform_3, window_bounds = array<i64: 1, 1, 8>}, {pipeline_mode = #tpu.pipeline_mode<synchronous>, transform_indices = @transform_4, window_bounds = array<i64: 4, 32, 8>}, {pipeline_mode = #tpu.pipeline_mode<synchronous>, transform_indices = @transform_5, window_bounds = array<i64: 4, 1, 8>}, {pipeline_mode = #tpu.pipeline_mode<synchronous>, transform_indices = @transform_6, window_bounds = array<i64: 4, 32, 8>}, {pipeline_mode = #tpu.pipeline_mode<synchronous>, transform_indices = @transform_7, window_bounds = array<i64: 4, 1, 8>}, {pipeline_mode = #tpu.pipeline_mode<synchronous>, transform_indices = @transform_8, window_bounds = array<i64: 4, 32, 8>}, {pipeline_mode = #tpu.pipeline_mode<synchronous>, transform_indices = @transform_9, window_bounds = array<i64: 4, 1, 8>}, {pipeline_mode = #tpu.pipeline_mode<synchronous>, transform_indices = @transform_10, window_bounds = array<i64: 4, 8, 32>}, {pipeline_mode = #tpu.pipeline_mode<synchronous>, transform_indices = @transform_11, window_bounds = array<i64: 1, 32>}, {pipeline_mode = #tpu.pipeline_mode<synchronous>, transform_indices = @transform_12, window_bounds = array<i64: 1, 32>}, {pipeline_mode = #tpu.pipeline_mode<synchronous>, transform_indices = @transform_13, window_bounds = array<i64: 1, 32>}, {pipeline_mode = #tpu.pipeline_mode<synchronous>, transform_indices = @transform_14, window_bounds = array<i64: 32, 32>}, {pipeline_mode = #tpu.pipeline_mode<synchronous>, transform_indices = @transform_15, window_bounds = array<i64: 1, 32>}, {pipeline_mode = #tpu.pipeline_mode<synchronous>, transform_indices = @transform_16, window_bounds = array<i64: 32, 32>}, {pipeline_mode = #tpu.pipeline_mode<synchronous>, transform_indices = @transform_17, window_bounds = array<i64: 1, 32>}, {pipeline_mode = #tpu.pipeline_mode<synchronous>, transform_indices = @transform_18, window_bounds = array<i64: 1, 32>}, {pipeline_mode = #tpu.pipeline_mode<synchronous>, transform_indices = @transform_19, window_bounds = array<i64: 1, 32>}, {transform_indices = @transform_20, window_bounds = array<i64: 1, 16, 32>}]} {
    %c0 = arith.constant 0 : index
    %c0_0 = arith.constant 0 : index
    %c0_1 = arith.constant 0 : index
    %0 = vector.load %arg2[%c0, %c0_0, %c0_1] : memref<1x16x32xbf16, #tpu.memory_space<vmem>>, vector<1x16x32xbf16>
    %1 = vector.shape_cast %0 : vector<1x16x32xbf16> to vector<16x32xbf16>
    %c0_2 = arith.constant 0 : index
    %c0_3 = arith.constant 0 : index
    %c0_4 = arith.constant 0 : index
    %2 = vector.load %arg3[%c0_2, %c0_3, %c0_4] : memref<1x8x32xbf16, #tpu.memory_space<vmem>>, vector<1x8x32xbf16>
    %3 = vector.shape_cast %2 : vector<1x8x32xbf16> to vector<8x32xbf16>
    %c0_5 = arith.constant 0 : index
    %c0_6 = arith.constant 0 : index
    %c0_7 = arith.constant 0 : index
    %4 = vector.load %arg5[%c0_5, %c0_6, %c0_7] : memref<1x1x8xf32, #tpu.memory_space<vmem>>, vector<1x1x8xf32>
    %5 = vector.shape_cast %4 : vector<1x1x8xf32> to vector<1x8xf32>
    %6 = vector.shape_cast %5 : vector<1x8xf32> to vector<1x8xf32>
    %7 = vector.broadcast %6 : vector<1x8xf32> to vector<16x8xf32>
    %c0_8 = arith.constant 0 : index
    %c0_9 = arith.constant 0 : index
    %8 = vector.load %arg13[%c0_8, %c0_9] : memref<1x32xf32, #tpu.memory_space<vmem>>, vector<1x32xf32>
    %c0_10 = arith.constant 0 : index
    %c0_11 = arith.constant 0 : index
    %c0_12 = arith.constant 0 : index
    %9 = vector.load %arg6[%c0_10, %c0_11, %c0_12] : memref<4x32x8xbf16, #tpu.memory_space<vmem>>, vector<1x32x8xbf16>
    %10 = vector.shape_cast %9 : vector<1x32x8xbf16> to vector<32x8xbf16>
    %cst = arith.constant dense<0.000000e+00> : vector<16x8xf32>
    %11 = tpu.matmul %1, %10, %cst {dimension_numbers = #tpu.dot_dimension_numbers<[1], [0], [0], [1], [0, 0, 1, 1], [], []>} : vector<16x32xbf16>, vector<32x8xbf16>, vector<16x8xf32> -> vector<16x8xf32>
    %c0_13 = arith.constant 0 : index
    %c0_14 = arith.constant 0 : index
    %c0_15 = arith.constant 0 : index
    %12 = vector.load %arg7[%c0_13, %c0_14, %c0_15] : memref<4x1x8xf32, #tpu.memory_space<vmem>>, vector<1x1x8xf32>
    %13 = vector.shape_cast %12 : vector<1x1x8xf32> to vector<1x8xf32>
    %14 = vector.broadcast %13 : vector<1x8xf32> to vector<16x8xf32>
    %15 = arith.addf %11, %14 : vector<16x8xf32>
    %16 = arith.truncf %15 : vector<16x8xf32> to vector<16x8xbf16>
    %c0_16 = arith.constant 0 : index
    %c0_17 = arith.constant 0 : index
    %c0_18 = arith.constant 0 : index
    %17 = vector.load %arg8[%c0_16, %c0_17, %c0_18] : memref<4x32x8xbf16, #tpu.memory_space<vmem>>, vector<1x32x8xbf16>
    %18 = vector.shape_cast %17 : vector<1x32x8xbf16> to vector<32x8xbf16>
    %cst_19 = arith.constant dense<0.000000e+00> : vector<8x8xf32>
    %19 = tpu.matmul %3, %18, %cst_19 {dimension_numbers = #tpu.dot_dimension_numbers<[1], [0], [0], [1], [0, 0, 1, 1], [], []>} : vector<8x32xbf16>, vector<32x8xbf16>, vector<8x8xf32> -> vector<8x8xf32>
    %c0_20 = arith.constant 0 : index
    %c0_21 = arith.constant 0 : index
    %c0_22 = arith.constant 0 : index
    %20 = vector.load %arg9[%c0_20, %c0_21, %c0_22] : memref<4x1x8xf32, #tpu.memory_space<vmem>>, vector<1x1x8xf32>
    %21 = vector.shape_cast %20 : vector<1x1x8xf32> to vector<1x8xf32>
    %22 = vector.broadcast %21 : vector<1x8xf32> to vector<8x8xf32>
    %23 = arith.addf %19, %22 : vector<8x8xf32>
    %24 = arith.truncf %23 : vector<8x8xf32> to vector<8x8xbf16>
    %c0_23 = arith.constant 0 : index
    %c0_24 = arith.constant 0 : index
    %c0_25 = arith.constant 0 : index
    %25 = vector.load %arg10[%c0_23, %c0_24, %c0_25] : memref<4x32x8xbf16, #tpu.memory_space<vmem>>, vector<1x32x8xbf16>
    %26 = vector.shape_cast %25 : vector<1x32x8xbf16> to vector<32x8xbf16>
    %cst_26 = arith.constant dense<0.000000e+00> : vector<8x8xf32>
    %27 = tpu.matmul %3, %26, %cst_26 {dimension_numbers = #tpu.dot_dimension_numbers<[1], [0], [0], [1], [0, 0, 1, 1], [], []>} : vector<8x32xbf16>, vector<32x8xbf16>, vector<8x8xf32> -> vector<8x8xf32>
    %c0_27 = arith.constant 0 : index
    %c0_28 = arith.constant 0 : index
    %c0_29 = arith.constant 0 : index
    %28 = vector.load %arg11[%c0_27, %c0_28, %c0_29] : memref<4x1x8xf32, #tpu.memory_space<vmem>>, vector<1x1x8xf32>
    %29 = vector.shape_cast %28 : vector<1x1x8xf32> to vector<1x8xf32>
    %30 = vector.broadcast %29 : vector<1x8xf32> to vector<8x8xf32>
    %31 = arith.addf %27, %30 : vector<8x8xf32>
    %32 = arith.truncf %31 : vector<8x8xf32> to vector<8x8xbf16>
    %cst_30 = arith.constant dense<0.000000e+00> : vector<16x8xf32>
    %33 = tpu.matmul %16, %24, %cst_30 {dimension_numbers = #tpu.dot_dimension_numbers<[1], [1], [0], [0], [0, 0, 1, 0], [], []>} : vector<16x8xbf16>, vector<8x8xbf16>, vector<16x8xf32> -> vector<16x8xf32>
    %34 = arith.addf %33, %7 : vector<16x8xf32>
    %cst_31 = arith.constant dense<0xFF800000> : vector<16xf32>
    %35 = vector.multi_reduction <maximumf>, %34, %cst_31 [1] : vector<16x8xf32> to vector<16xf32>
    %36 = vector.shape_cast %35 : vector<16xf32> to vector<16x1xf32>
    %37 = vector.broadcast %36 : vector<16x1xf32> to vector<16x8xf32>
    %38 = arith.subf %34, %37 : vector<16x8xf32>
    %39 = math.exp %38 : vector<16x8xf32>
    %cst_32 = arith.constant dense<0.000000e+00> : vector<16xf32>
    %40 = vector.multi_reduction <add>, %39, %cst_32 [1] : vector<16x8xf32> to vector<16xf32>
    %41 = vector.shape_cast %40 : vector<16xf32> to vector<16x1xf32>
    %42 = tpu.reciprocal %41 {approx = true} : vector<16x1xf32> -> vector<16x1xf32>
    %43 = vector.broadcast %42 : vector<16x1xf32> to vector<16x8xf32>
    %44 = arith.mulf %39, %43 : vector<16x8xf32>
    %45 = arith.truncf %44 : vector<16x8xf32> to vector<16x8xbf16>
    %cst_33 = arith.constant dense<0.000000e+00> : vector<16x8xf32>
    %46 = tpu.matmul %45, %32, %cst_33 {dimension_numbers = #tpu.dot_dimension_numbers<[1], [0], [0], [1], [0, 0, 1, 1], [], []>} : vector<16x8xbf16>, vector<8x8xbf16>, vector<16x8xf32> -> vector<16x8xf32>
    %47 = arith.truncf %46 : vector<16x8xf32> to vector<16x8xbf16>
    %c0_34 = arith.constant 0 : index
    %c0_35 = arith.constant 0 : index
    %c0_36 = arith.constant 0 : index
    %48 = vector.load %arg12[%c0_34, %c0_35, %c0_36] : memref<4x8x32xbf16, #tpu.memory_space<vmem>>, vector<1x8x32xbf16>
    %49 = vector.shape_cast %48 : vector<1x8x32xbf16> to vector<8x32xbf16>
    %cst_37 = arith.constant dense<0.000000e+00> : vector<16x32xf32>
    %50 = tpu.matmul %47, %49, %cst_37 {dimension_numbers = #tpu.dot_dimension_numbers<[1], [0], [0], [1], [0, 0, 1, 1], [], []>} : vector<16x8xbf16>, vector<8x32xbf16>, vector<16x32xf32> -> vector<16x32xf32>
    %51 = vector.broadcast %8 : vector<1x32xf32> to vector<16x32xf32>
    %52 = arith.addf %51, %50 : vector<16x32xf32>
    %c1 = arith.constant 1 : index
    %c0_38 = arith.constant 0 : index
    %c0_39 = arith.constant 0 : index
    %53 = vector.load %arg6[%c1, %c0_38, %c0_39] : memref<4x32x8xbf16, #tpu.memory_space<vmem>>, vector<1x32x8xbf16>
    %54 = vector.shape_cast %53 : vector<1x32x8xbf16> to vector<32x8xbf16>
    %cst_40 = arith.constant dense<0.000000e+00> : vector<16x8xf32>
    %55 = tpu.matmul %1, %54, %cst_40 {dimension_numbers = #tpu.dot_dimension_numbers<[1], [0], [0], [1], [0, 0, 1, 1], [], []>} : vector<16x32xbf16>, vector<32x8xbf16>, vector<16x8xf32> -> vector<16x8xf32>
    %c1_41 = arith.constant 1 : index
    %c0_42 = arith.constant 0 : index
    %c0_43 = arith.constant 0 : index
    %56 = vector.load %arg7[%c1_41, %c0_42, %c0_43] : memref<4x1x8xf32, #tpu.memory_space<vmem>>, vector<1x1x8xf32>
    %57 = vector.shape_cast %56 : vector<1x1x8xf32> to vector<1x8xf32>
    %58 = vector.broadcast %57 : vector<1x8xf32> to vector<16x8xf32>
    %59 = arith.addf %55, %58 : vector<16x8xf32>
    %60 = arith.truncf %59 : vector<16x8xf32> to vector<16x8xbf16>
    %c1_44 = arith.constant 1 : index
    %c0_45 = arith.constant 0 : index
    %c0_46 = arith.constant 0 : index
    %61 = vector.load %arg8[%c1_44, %c0_45, %c0_46] : memref<4x32x8xbf16, #tpu.memory_space<vmem>>, vector<1x32x8xbf16>
    %62 = vector.shape_cast %61 : vector<1x32x8xbf16> to vector<32x8xbf16>
    %cst_47 = arith.constant dense<0.000000e+00> : vector<8x8xf32>
    %63 = tpu.matmul %3, %62, %cst_47 {dimension_numbers = #tpu.dot_dimension_numbers<[1], [0], [0], [1], [0, 0, 1, 1], [], []>} : vector<8x32xbf16>, vector<32x8xbf16>, vector<8x8xf32> -> vector<8x8xf32>
    %c1_48 = arith.constant 1 : index
    %c0_49 = arith.constant 0 : index
    %c0_50 = arith.constant 0 : index
    %64 = vector.load %arg9[%c1_48, %c0_49, %c0_50] : memref<4x1x8xf32, #tpu.memory_space<vmem>>, vector<1x1x8xf32>
    %65 = vector.shape_cast %64 : vector<1x1x8xf32> to vector<1x8xf32>
    %66 = vector.broadcast %65 : vector<1x8xf32> to vector<8x8xf32>
    %67 = arith.addf %63, %66 : vector<8x8xf32>
    %68 = arith.truncf %67 : vector<8x8xf32> to vector<8x8xbf16>
    %c1_51 = arith.constant 1 : index
    %c0_52 = arith.constant 0 : index
    %c0_53 = arith.constant 0 : index
    %69 = vector.load %arg10[%c1_51, %c0_52, %c0_53] : memref<4x32x8xbf16, #tpu.memory_space<vmem>>, vector<1x32x8xbf16>
    %70 = vector.shape_cast %69 : vector<1x32x8xbf16> to vector<32x8xbf16>
    %cst_54 = arith.constant dense<0.000000e+00> : vector<8x8xf32>
    %71 = tpu.matmul %3, %70, %cst_54 {dimension_numbers = #tpu.dot_dimension_numbers<[1], [0], [0], [1], [0, 0, 1, 1], [], []>} : vector<8x32xbf16>, vector<32x8xbf16>, vector<8x8xf32> -> vector<8x8xf32>
    %c1_55 = arith.constant 1 : index
    %c0_56 = arith.constant 0 : index
    %c0_57 = arith.constant 0 : index
    %72 = vector.load %arg11[%c1_55, %c0_56, %c0_57] : memref<4x1x8xf32, #tpu.memory_space<vmem>>, vector<1x1x8xf32>
    %73 = vector.shape_cast %72 : vector<1x1x8xf32> to vector<1x8xf32>
    %74 = vector.broadcast %73 : vector<1x8xf32> to vector<8x8xf32>
    %75 = arith.addf %71, %74 : vector<8x8xf32>
    %76 = arith.truncf %75 : vector<8x8xf32> to vector<8x8xbf16>
    %cst_58 = arith.constant dense<0.000000e+00> : vector<16x8xf32>
    %77 = tpu.matmul %60, %68, %cst_58 {dimension_numbers = #tpu.dot_dimension_numbers<[1], [1], [0], [0], [0, 0, 1, 0], [], []>} : vector<16x8xbf16>, vector<8x8xbf16>, vector<16x8xf32> -> vector<16x8xf32>
    %78 = arith.addf %77, %7 : vector<16x8xf32>
    %cst_59 = arith.constant dense<0xFF800000> : vector<16xf32>
    %79 = vector.multi_reduction <maximumf>, %78, %cst_59 [1] : vector<16x8xf32> to vector<16xf32>
    %80 = vector.shape_cast %79 : vector<16xf32> to vector<16x1xf32>
    %81 = vector.broadcast %80 : vector<16x1xf32> to vector<16x8xf32>
    %82 = arith.subf %78, %81 : vector<16x8xf32>
    %83 = math.exp %82 : vector<16x8xf32>
    %cst_60 = arith.constant dense<0.000000e+00> : vector<16xf32>
    %84 = vector.multi_reduction <add>, %83, %cst_60 [1] : vector<16x8xf32> to vector<16xf32>
    %85 = vector.shape_cast %84 : vector<16xf32> to vector<16x1xf32>
    %86 = tpu.reciprocal %85 {approx = true} : vector<16x1xf32> -> vector<16x1xf32>
    %87 = vector.broadcast %86 : vector<16x1xf32> to vector<16x8xf32>
    %88 = arith.mulf %83, %87 : vector<16x8xf32>
    %89 = arith.truncf %88 : vector<16x8xf32> to vector<16x8xbf16>
    %cst_61 = arith.constant dense<0.000000e+00> : vector<16x8xf32>
    %90 = tpu.matmul %89, %76, %cst_61 {dimension_numbers = #tpu.dot_dimension_numbers<[1], [0], [0], [1], [0, 0, 1, 1], [], []>} : vector<16x8xbf16>, vector<8x8xbf16>, vector<16x8xf32> -> vector<16x8xf32>
    %91 = arith.truncf %90 : vector<16x8xf32> to vector<16x8xbf16>
    %c1_62 = arith.constant 1 : index
    %c0_63 = arith.constant 0 : index
    %c0_64 = arith.constant 0 : index
    %92 = vector.load %arg12[%c1_62, %c0_63, %c0_64] : memref<4x8x32xbf16, #tpu.memory_space<vmem>>, vector<1x8x32xbf16>
    %93 = vector.shape_cast %92 : vector<1x8x32xbf16> to vector<8x32xbf16>
    %cst_65 = arith.constant dense<0.000000e+00> : vector<16x32xf32>
    %94 = tpu.matmul %91, %93, %cst_65 {dimension_numbers = #tpu.dot_dimension_numbers<[1], [0], [0], [1], [0, 0, 1, 1], [], []>} : vector<16x8xbf16>, vector<8x32xbf16>, vector<16x32xf32> -> vector<16x32xf32>
    %95 = arith.addf %52, %94 : vector<16x32xf32>
    %c2 = arith.constant 2 : index
    %c0_66 = arith.constant 0 : index
    %c0_67 = arith.constant 0 : index
    %96 = vector.load %arg6[%c2, %c0_66, %c0_67] : memref<4x32x8xbf16, #tpu.memory_space<vmem>>, vector<1x32x8xbf16>
    %97 = vector.shape_cast %96 : vector<1x32x8xbf16> to vector<32x8xbf16>
    %cst_68 = arith.constant dense<0.000000e+00> : vector<16x8xf32>
    %98 = tpu.matmul %1, %97, %cst_68 {dimension_numbers = #tpu.dot_dimension_numbers<[1], [0], [0], [1], [0, 0, 1, 1], [], []>} : vector<16x32xbf16>, vector<32x8xbf16>, vector<16x8xf32> -> vector<16x8xf32>
    %c2_69 = arith.constant 2 : index
    %c0_70 = arith.constant 0 : index
    %c0_71 = arith.constant 0 : index
    %99 = vector.load %arg7[%c2_69, %c0_70, %c0_71] : memref<4x1x8xf32, #tpu.memory_space<vmem>>, vector<1x1x8xf32>
    %100 = vector.shape_cast %99 : vector<1x1x8xf32> to vector<1x8xf32>
    %101 = vector.broadcast %100 : vector<1x8xf32> to vector<16x8xf32>
    %102 = arith.addf %98, %101 : vector<16x8xf32>
    %103 = arith.truncf %102 : vector<16x8xf32> to vector<16x8xbf16>
    %c2_72 = arith.constant 2 : index
    %c0_73 = arith.constant 0 : index
    %c0_74 = arith.constant 0 : index
    %104 = vector.load %arg8[%c2_72, %c0_73, %c0_74] : memref<4x32x8xbf16, #tpu.memory_space<vmem>>, vector<1x32x8xbf16>
    %105 = vector.shape_cast %104 : vector<1x32x8xbf16> to vector<32x8xbf16>
    %cst_75 = arith.constant dense<0.000000e+00> : vector<8x8xf32>
    %106 = tpu.matmul %3, %105, %cst_75 {dimension_numbers = #tpu.dot_dimension_numbers<[1], [0], [0], [1], [0, 0, 1, 1], [], []>} : vector<8x32xbf16>, vector<32x8xbf16>, vector<8x8xf32> -> vector<8x8xf32>
    %c2_76 = arith.constant 2 : index
    %c0_77 = arith.constant 0 : index
    %c0_78 = arith.constant 0 : index
    %107 = vector.load %arg9[%c2_76, %c0_77, %c0_78] : memref<4x1x8xf32, #tpu.memory_space<vmem>>, vector<1x1x8xf32>
    %108 = vector.shape_cast %107 : vector<1x1x8xf32> to vector<1x8xf32>
    %109 = vector.broadcast %108 : vector<1x8xf32> to vector<8x8xf32>
    %110 = arith.addf %106, %109 : vector<8x8xf32>
    %111 = arith.truncf %110 : vector<8x8xf32> to vector<8x8xbf16>
    %c2_79 = arith.constant 2 : index
    %c0_80 = arith.constant 0 : index
    %c0_81 = arith.constant 0 : index
    %112 = vector.load %arg10[%c2_79, %c0_80, %c0_81] : memref<4x32x8xbf16, #tpu.memory_space<vmem>>, vector<1x32x8xbf16>
    %113 = vector.shape_cast %112 : vector<1x32x8xbf16> to vector<32x8xbf16>
    %cst_82 = arith.constant dense<0.000000e+00> : vector<8x8xf32>
    %114 = tpu.matmul %3, %113, %cst_82 {dimension_numbers = #tpu.dot_dimension_numbers<[1], [0], [0], [1], [0, 0, 1, 1], [], []>} : vector<8x32xbf16>, vector<32x8xbf16>, vector<8x8xf32> -> vector<8x8xf32>
    %c2_83 = arith.constant 2 : index
    %c0_84 = arith.constant 0 : index
    %c0_85 = arith.constant 0 : index
    %115 = vector.load %arg11[%c2_83, %c0_84, %c0_85] : memref<4x1x8xf32, #tpu.memory_space<vmem>>, vector<1x1x8xf32>
    %116 = vector.shape_cast %115 : vector<1x1x8xf32> to vector<1x8xf32>
    %117 = vector.broadcast %116 : vector<1x8xf32> to vector<8x8xf32>
    %118 = arith.addf %114, %117 : vector<8x8xf32>
    %119 = arith.truncf %118 : vector<8x8xf32> to vector<8x8xbf16>
    %cst_86 = arith.constant dense<0.000000e+00> : vector<16x8xf32>
    %120 = tpu.matmul %103, %111, %cst_86 {dimension_numbers = #tpu.dot_dimension_numbers<[1], [1], [0], [0], [0, 0, 1, 0], [], []>} : vector<16x8xbf16>, vector<8x8xbf16>, vector<16x8xf32> -> vector<16x8xf32>
    %121 = arith.addf %120, %7 : vector<16x8xf32>
    %cst_87 = arith.constant dense<0xFF800000> : vector<16xf32>
    %122 = vector.multi_reduction <maximumf>, %121, %cst_87 [1] : vector<16x8xf32> to vector<16xf32>
    %123 = vector.shape_cast %122 : vector<16xf32> to vector<16x1xf32>
    %124 = vector.broadcast %123 : vector<16x1xf32> to vector<16x8xf32>
    %125 = arith.subf %121, %124 : vector<16x8xf32>
    %126 = math.exp %125 : vector<16x8xf32>
    %cst_88 = arith.constant dense<0.000000e+00> : vector<16xf32>
    %127 = vector.multi_reduction <add>, %126, %cst_88 [1] : vector<16x8xf32> to vector<16xf32>
    %128 = vector.shape_cast %127 : vector<16xf32> to vector<16x1xf32>
    %129 = tpu.reciprocal %128 {approx = true} : vector<16x1xf32> -> vector<16x1xf32>
    %130 = vector.broadcast %129 : vector<16x1xf32> to vector<16x8xf32>
    %131 = arith.mulf %126, %130 : vector<16x8xf32>
    %132 = arith.truncf %131 : vector<16x8xf32> to vector<16x8xbf16>
    %cst_89 = arith.constant dense<0.000000e+00> : vector<16x8xf32>
    %133 = tpu.matmul %132, %119, %cst_89 {dimension_numbers = #tpu.dot_dimension_numbers<[1], [0], [0], [1], [0, 0, 1, 1], [], []>} : vector<16x8xbf16>, vector<8x8xbf16>, vector<16x8xf32> -> vector<16x8xf32>
    %134 = arith.truncf %133 : vector<16x8xf32> to vector<16x8xbf16>
    %c2_90 = arith.constant 2 : index
    %c0_91 = arith.constant 0 : index
    %c0_92 = arith.constant 0 : index
    %135 = vector.load %arg12[%c2_90, %c0_91, %c0_92] : memref<4x8x32xbf16, #tpu.memory_space<vmem>>, vector<1x8x32xbf16>
    %136 = vector.shape_cast %135 : vector<1x8x32xbf16> to vector<8x32xbf16>
    %cst_93 = arith.constant dense<0.000000e+00> : vector<16x32xf32>
    %137 = tpu.matmul %134, %136, %cst_93 {dimension_numbers = #tpu.dot_dimension_numbers<[1], [0], [0], [1], [0, 0, 1, 1], [], []>} : vector<16x8xbf16>, vector<8x32xbf16>, vector<16x32xf32> -> vector<16x32xf32>
    %138 = arith.addf %95, %137 : vector<16x32xf32>
    %c3 = arith.constant 3 : index
    %c0_94 = arith.constant 0 : index
    %c0_95 = arith.constant 0 : index
    %139 = vector.load %arg6[%c3, %c0_94, %c0_95] : memref<4x32x8xbf16, #tpu.memory_space<vmem>>, vector<1x32x8xbf16>
    %140 = vector.shape_cast %139 : vector<1x32x8xbf16> to vector<32x8xbf16>
    %cst_96 = arith.constant dense<0.000000e+00> : vector<16x8xf32>
    %141 = tpu.matmul %1, %140, %cst_96 {dimension_numbers = #tpu.dot_dimension_numbers<[1], [0], [0], [1], [0, 0, 1, 1], [], []>} : vector<16x32xbf16>, vector<32x8xbf16>, vector<16x8xf32> -> vector<16x8xf32>
    %c3_97 = arith.constant 3 : index
    %c0_98 = arith.constant 0 : index
    %c0_99 = arith.constant 0 : index
    %142 = vector.load %arg7[%c3_97, %c0_98, %c0_99] : memref<4x1x8xf32, #tpu.memory_space<vmem>>, vector<1x1x8xf32>
    %143 = vector.shape_cast %142 : vector<1x1x8xf32> to vector<1x8xf32>
    %144 = vector.broadcast %143 : vector<1x8xf32> to vector<16x8xf32>
    %145 = arith.addf %141, %144 : vector<16x8xf32>
    %146 = arith.truncf %145 : vector<16x8xf32> to vector<16x8xbf16>
    %c3_100 = arith.constant 3 : index
    %c0_101 = arith.constant 0 : index
    %c0_102 = arith.constant 0 : index
    %147 = vector.load %arg8[%c3_100, %c0_101, %c0_102] : memref<4x32x8xbf16, #tpu.memory_space<vmem>>, vector<1x32x8xbf16>
    %148 = vector.shape_cast %147 : vector<1x32x8xbf16> to vector<32x8xbf16>
    %cst_103 = arith.constant dense<0.000000e+00> : vector<8x8xf32>
    %149 = tpu.matmul %3, %148, %cst_103 {dimension_numbers = #tpu.dot_dimension_numbers<[1], [0], [0], [1], [0, 0, 1, 1], [], []>} : vector<8x32xbf16>, vector<32x8xbf16>, vector<8x8xf32> -> vector<8x8xf32>
    %c3_104 = arith.constant 3 : index
    %c0_105 = arith.constant 0 : index
    %c0_106 = arith.constant 0 : index
    %150 = vector.load %arg9[%c3_104, %c0_105, %c0_106] : memref<4x1x8xf32, #tpu.memory_space<vmem>>, vector<1x1x8xf32>
    %151 = vector.shape_cast %150 : vector<1x1x8xf32> to vector<1x8xf32>
    %152 = vector.broadcast %151 : vector<1x8xf32> to vector<8x8xf32>
    %153 = arith.addf %149, %152 : vector<8x8xf32>
    %154 = arith.truncf %153 : vector<8x8xf32> to vector<8x8xbf16>
    %c3_107 = arith.constant 3 : index
    %c0_108 = arith.constant 0 : index
    %c0_109 = arith.constant 0 : index
    %155 = vector.load %arg10[%c3_107, %c0_108, %c0_109] : memref<4x32x8xbf16, #tpu.memory_space<vmem>>, vector<1x32x8xbf16>
    %156 = vector.shape_cast %155 : vector<1x32x8xbf16> to vector<32x8xbf16>
    %cst_110 = arith.constant dense<0.000000e+00> : vector<8x8xf32>
    %157 = tpu.matmul %3, %156, %cst_110 {dimension_numbers = #tpu.dot_dimension_numbers<[1], [0], [0], [1], [0, 0, 1, 1], [], []>} : vector<8x32xbf16>, vector<32x8xbf16>, vector<8x8xf32> -> vector<8x8xf32>
    %c3_111 = arith.constant 3 : index
    %c0_112 = arith.constant 0 : index
    %c0_113 = arith.constant 0 : index
    %158 = vector.load %arg11[%c3_111, %c0_112, %c0_113] : memref<4x1x8xf32, #tpu.memory_space<vmem>>, vector<1x1x8xf32>
    %159 = vector.shape_cast %158 : vector<1x1x8xf32> to vector<1x8xf32>
    %160 = vector.broadcast %159 : vector<1x8xf32> to vector<8x8xf32>
    %161 = arith.addf %157, %160 : vector<8x8xf32>
    %162 = arith.truncf %161 : vector<8x8xf32> to vector<8x8xbf16>
    %cst_114 = arith.constant dense<0.000000e+00> : vector<16x8xf32>
    %163 = tpu.matmul %146, %154, %cst_114 {dimension_numbers = #tpu.dot_dimension_numbers<[1], [1], [0], [0], [0, 0, 1, 0], [], []>} : vector<16x8xbf16>, vector<8x8xbf16>, vector<16x8xf32> -> vector<16x8xf32>
    %164 = arith.addf %163, %7 : vector<16x8xf32>
    %cst_115 = arith.constant dense<0xFF800000> : vector<16xf32>
    %165 = vector.multi_reduction <maximumf>, %164, %cst_115 [1] : vector<16x8xf32> to vector<16xf32>
    %166 = vector.shape_cast %165 : vector<16xf32> to vector<16x1xf32>
    %167 = vector.broadcast %166 : vector<16x1xf32> to vector<16x8xf32>
    %168 = arith.subf %164, %167 : vector<16x8xf32>
    %169 = math.exp %168 : vector<16x8xf32>
    %cst_116 = arith.constant dense<0.000000e+00> : vector<16xf32>
    %170 = vector.multi_reduction <add>, %169, %cst_116 [1] : vector<16x8xf32> to vector<16xf32>
    %171 = vector.shape_cast %170 : vector<16xf32> to vector<16x1xf32>
    %172 = tpu.reciprocal %171 {approx = true} : vector<16x1xf32> -> vector<16x1xf32>
    %173 = vector.broadcast %172 : vector<16x1xf32> to vector<16x8xf32>
    %174 = arith.mulf %169, %173 : vector<16x8xf32>
    %175 = arith.truncf %174 : vector<16x8xf32> to vector<16x8xbf16>
    %cst_117 = arith.constant dense<0.000000e+00> : vector<16x8xf32>
    %176 = tpu.matmul %175, %162, %cst_117 {dimension_numbers = #tpu.dot_dimension_numbers<[1], [0], [0], [1], [0, 0, 1, 1], [], []>} : vector<16x8xbf16>, vector<8x8xbf16>, vector<16x8xf32> -> vector<16x8xf32>
    %177 = arith.truncf %176 : vector<16x8xf32> to vector<16x8xbf16>
    %c3_118 = arith.constant 3 : index
    %c0_119 = arith.constant 0 : index
    %c0_120 = arith.constant 0 : index
    %178 = vector.load %arg12[%c3_118, %c0_119, %c0_120] : memref<4x8x32xbf16, #tpu.memory_space<vmem>>, vector<1x8x32xbf16>
    %179 = vector.shape_cast %178 : vector<1x8x32xbf16> to vector<8x32xbf16>
    %cst_121 = arith.constant dense<0.000000e+00> : vector<16x32xf32>
    %180 = tpu.matmul %177, %179, %cst_121 {dimension_numbers = #tpu.dot_dimension_numbers<[1], [0], [0], [1], [0, 0, 1, 1], [], []>} : vector<16x8xbf16>, vector<8x32xbf16>, vector<16x32xf32> -> vector<16x32xf32>
    %181 = arith.addf %138, %180 : vector<16x32xf32>
    %c0_122 = arith.constant 0 : index
    %c0_123 = arith.constant 0 : index
    %c0_124 = arith.constant 0 : index
    %182 = vector.load %arg4[%c0_122, %c0_123, %c0_124] : memref<1x16x32xbf16, #tpu.memory_space<vmem>>, vector<1x16x32xbf16>
    %183 = vector.shape_cast %182 : vector<1x16x32xbf16> to vector<16x32xbf16>
    %184 = arith.extf %183 : vector<16x32xbf16> to vector<16x32xf32>
    %185 = arith.addf %184, %181 : vector<16x32xf32>
    %cst_125 = arith.constant dense<0.000000e+00> : vector<16xf32>
    %186 = vector.multi_reduction <add>, %185, %cst_125 [1] : vector<16x32xf32> to vector<16xf32>
    %187 = vector.shape_cast %186 : vector<16xf32> to vector<16x1xf32>
    %cst_126 = arith.constant 3.200000e+01 : f32
    %188 = vector.broadcast %cst_126 : f32 to vector<16x1xf32>
    %189 = arith.divf %187, %188 : vector<16x1xf32>
    %190 = vector.broadcast %189 : vector<16x1xf32> to vector<16x32xf32>
    %191 = arith.subf %185, %190 : vector<16x32xf32>
    %192 = arith.mulf %191, %191 : vector<16x32xf32>
    %cst_127 = arith.constant dense<0.000000e+00> : vector<16xf32>
    %193 = vector.multi_reduction <add>, %192, %cst_127 [1] : vector<16x32xf32> to vector<16xf32>
    %194 = vector.shape_cast %193 : vector<16xf32> to vector<16x1xf32>
    %cst_128 = arith.constant 3.200000e+01 : f32
    %195 = vector.broadcast %cst_128 : f32 to vector<16x1xf32>
    %196 = arith.divf %194, %195 : vector<16x1xf32>
    %197 = vector.broadcast %189 : vector<16x1xf32> to vector<16x32xf32>
    %198 = arith.subf %185, %197 : vector<16x32xf32>
    %cst_129 = arith.constant 9.99999974E-6 : f32
    %199 = vector.broadcast %cst_129 : f32 to vector<16x1xf32>
    %200 = arith.addf %196, %199 : vector<16x1xf32>
    %201 = math.rsqrt %200 : vector<16x1xf32>
    %202 = vector.broadcast %201 : vector<16x1xf32> to vector<16x32xf32>
    %203 = arith.mulf %198, %202 : vector<16x32xf32>
    %c0_130 = arith.constant 0 : index
    %c0_131 = arith.constant 0 : index
    %204 = vector.load %arg14[%c0_130, %c0_131] : memref<1x32xf32, #tpu.memory_space<vmem>>, vector<1x32xf32>
    %205 = vector.broadcast %204 : vector<1x32xf32> to vector<16x32xf32>
    %206 = arith.mulf %203, %205 : vector<16x32xf32>
    %c0_132 = arith.constant 0 : index
    %c0_133 = arith.constant 0 : index
    %207 = vector.load %arg15[%c0_132, %c0_133] : memref<1x32xf32, #tpu.memory_space<vmem>>, vector<1x32xf32>
    %208 = vector.broadcast %207 : vector<1x32xf32> to vector<16x32xf32>
    %209 = arith.addf %206, %208 : vector<16x32xf32>
    %210 = arith.truncf %209 : vector<16x32xf32> to vector<16x32xbf16>
    %c0_134 = arith.constant 0 : index
    %c0_135 = arith.constant 0 : index
    %211 = vector.load %arg16[%c0_134, %c0_135] : memref<32x32xbf16, #tpu.memory_space<vmem>>, vector<32x32xbf16>
    %cst_136 = arith.constant dense<0.000000e+00> : vector<16x32xf32>
    %212 = tpu.matmul %210, %211, %cst_136 {dimension_numbers = #tpu.dot_dimension_numbers<[1], [0], [0], [1], [0, 0, 1, 1], [], []>} : vector<16x32xbf16>, vector<32x32xbf16>, vector<16x32xf32> -> vector<16x32xf32>
    %c0_137 = arith.constant 0 : index
    %c0_138 = arith.constant 0 : index
    %213 = vector.load %arg17[%c0_137, %c0_138] : memref<1x32xf32, #tpu.memory_space<vmem>>, vector<1x32xf32>
    %214 = vector.broadcast %213 : vector<1x32xf32> to vector<16x32xf32>
    %215 = arith.addf %212, %214 : vector<16x32xf32>
    %cst_139 = arith.constant 0.000000e+00 : f32
    %216 = vector.broadcast %cst_139 : f32 to vector<16x32xf32>
    %217 = arith.maximumf %215, %216 : vector<16x32xf32>
    %218 = arith.truncf %217 : vector<16x32xf32> to vector<16x32xbf16>
    %c0_140 = arith.constant 0 : index
    %c0_141 = arith.constant 0 : index
    %219 = vector.load %arg18[%c0_140, %c0_141] : memref<32x32xbf16, #tpu.memory_space<vmem>>, vector<32x32xbf16>
    %cst_142 = arith.constant dense<0.000000e+00> : vector<16x32xf32>
    %220 = tpu.matmul %218, %219, %cst_142 {dimension_numbers = #tpu.dot_dimension_numbers<[1], [0], [0], [1], [0, 0, 1, 1], [], []>} : vector<16x32xbf16>, vector<32x32xbf16>, vector<16x32xf32> -> vector<16x32xf32>
    %c0_143 = arith.constant 0 : index
    %c0_144 = arith.constant 0 : index
    %221 = vector.load %arg19[%c0_143, %c0_144] : memref<1x32xf32, #tpu.memory_space<vmem>>, vector<1x32xf32>
    %222 = vector.broadcast %221 : vector<1x32xf32> to vector<16x32xf32>
    %223 = arith.addf %220, %222 : vector<16x32xf32>
    %224 = arith.addf %209, %223 : vector<16x32xf32>
    %cst_145 = arith.constant dense<0.000000e+00> : vector<16xf32>
    %225 = vector.multi_reduction <add>, %224, %cst_145 [1] : vector<16x32xf32> to vector<16xf32>
    %226 = vector.shape_cast %225 : vector<16xf32> to vector<16x1xf32>
    %cst_146 = arith.constant 3.200000e+01 : f32
    %227 = vector.broadcast %cst_146 : f32 to vector<16x1xf32>
    %228 = arith.divf %226, %227 : vector<16x1xf32>
    %229 = vector.broadcast %228 : vector<16x1xf32> to vector<16x32xf32>
    %230 = arith.subf %224, %229 : vector<16x32xf32>
    %231 = arith.mulf %230, %230 : vector<16x32xf32>
    %cst_147 = arith.constant dense<0.000000e+00> : vector<16xf32>
    %232 = vector.multi_reduction <add>, %231, %cst_147 [1] : vector<16x32xf32> to vector<16xf32>
    %233 = vector.shape_cast %232 : vector<16xf32> to vector<16x1xf32>
    %cst_148 = arith.constant 3.200000e+01 : f32
    %234 = vector.broadcast %cst_148 : f32 to vector<16x1xf32>
    %235 = arith.divf %233, %234 : vector<16x1xf32>
    %236 = vector.broadcast %228 : vector<16x1xf32> to vector<16x32xf32>
    %237 = arith.subf %224, %236 : vector<16x32xf32>
    %cst_149 = arith.constant 9.99999974E-6 : f32
    %238 = vector.broadcast %cst_149 : f32 to vector<16x1xf32>
    %239 = arith.addf %235, %238 : vector<16x1xf32>
    %240 = math.rsqrt %239 : vector<16x1xf32>
    %241 = vector.broadcast %240 : vector<16x1xf32> to vector<16x32xf32>
    %242 = arith.mulf %237, %241 : vector<16x32xf32>
    %c0_150 = arith.constant 0 : index
    %c0_151 = arith.constant 0 : index
    %243 = vector.load %arg20[%c0_150, %c0_151] : memref<1x32xf32, #tpu.memory_space<vmem>>, vector<1x32xf32>
    %244 = vector.broadcast %243 : vector<1x32xf32> to vector<16x32xf32>
    %245 = arith.mulf %242, %244 : vector<16x32xf32>
    %c0_152 = arith.constant 0 : index
    %c0_153 = arith.constant 0 : index
    %246 = vector.load %arg21[%c0_152, %c0_153] : memref<1x32xf32, #tpu.memory_space<vmem>>, vector<1x32xf32>
    %247 = vector.broadcast %246 : vector<1x32xf32> to vector<16x32xf32>
    %248 = arith.addf %245, %247 : vector<16x32xf32>
    %249 = arith.truncf %248 : vector<16x32xf32> to vector<16x32xbf16>
    %c0_154 = arith.constant 0 : index
    %c0_155 = arith.constant 0 : index
    %c0_156 = arith.constant 0 : index
    %250 = vector.load %arg22[%c0_154, %c0_155, %c0_156] : memref<1x16x32xbf16, #tpu.memory_space<vmem>>, vector<1x16x32xbf16>
    %251 = vector.shape_cast %250 : vector<1x16x32xbf16> to vector<16x32xbf16>
    %252 = vector.shape_cast %249 : vector<16x32xbf16> to vector<1x16x32xbf16>
    tpu.vector_store %arg22[%c0_154, %c0_155, %c0_156], %252 {strides = array<i32>} : memref<1x16x32xbf16, #tpu.memory_space<vmem>>, vector<1x16x32xbf16>,
    return
  }
  func.func @transform_0(%arg0: i32, %arg1: i32) -> (i32, i32, i32) {
    %c0_i32 = arith.constant 0 : i32
    %c0_i32_0 = arith.constant 0 : i32
    return %arg0, %arg1, %c0_i32 : i32, i32, i32
  }
  func.func @transform_1(%arg0: i32, %arg1: i32) -> (i32, i32, i32) {
    %c0_i32 = arith.constant 0 : i32
    %c0_i32_0 = arith.constant 0 : i32
    %c0_i32_1 = arith.constant 0 : i32
    return %arg0, %c0_i32, %c0_i32_0 : i32, i32, i32
  }
  func.func @transform_2(%arg0: i32, %arg1: i32) -> (i32, i32, i32) {
    %c0_i32 = arith.constant 0 : i32
    %c0_i32_0 = arith.constant 0 : i32
    return %arg0, %arg1, %c0_i32 : i32, i32, i32
  }
  func.func @transform_3(%arg0: i32, %arg1: i32) -> (i32, i32, i32) {
    %c0_i32 = arith.constant 0 : i32
    %c0_i32_0 = arith.constant 0 : i32
    %c0_i32_1 = arith.constant 0 : i32
    return %arg0, %c0_i32, %c0_i32_0 : i32, i32, i32
  }
  func.func @transform_4(%arg0: i32, %arg1: i32) -> (i32, i32, i32) {
    %c0_i32 = arith.constant 0 : i32
    %c0_i32_0 = arith.constant 0 : i32
    %c0_i32_1 = arith.constant 0 : i32
    %c0_i32_2 = arith.constant 0 : i32
    return %c0_i32, %c0_i32_0, %c0_i32_1 : i32, i32, i32
  }
  func.func @transform_5(%arg0: i32, %arg1: i32) -> (i32, i32, i32) {
    %c0_i32 = arith.constant 0 : i32
    %c0_i32_0 = arith.constant 0 : i32
    %c0_i32_1 = arith.constant 0 : i32
    %c0_i32_2 = arith.constant 0 : i32
    return %c0_i32, %c0_i32_0, %c0_i32_1 : i32, i32, i32
  }
  func.func @transform_6(%arg0: i32, %arg1: i32) -> (i32, i32, i32) {
    %c0_i32 = arith.constant 0 : i32
    %c0_i32_0 = arith.constant 0 : i32
    %c0_i32_1 = arith.constant 0 : i32
    %c0_i32_2 = arith.constant 0 : i32
    return %c0_i32, %c0_i32_0, %c0_i32_1 : i32, i32, i32
  }
  func.func @transform_7(%arg0: i32, %arg1: i32) -> (i32, i32, i32) {
    %c0_i32 = arith.constant 0 : i32
    %c0_i32_0 = arith.constant 0 : i32
    %c0_i32_1 = arith.constant 0 : i32
    %c0_i32_2 = arith.constant 0 : i32
    return %c0_i32, %c0_i32_0, %c0_i32_1 : i32, i32, i32
  }
  func.func @transform_8(%arg0: i32, %arg1: i32) -> (i32, i32, i32) {
    %c0_i32 = arith.constant 0 : i32
    %c0_i32_0 = arith.constant 0 : i32
    %c0_i32_1 = arith.constant 0 : i32
    %c0_i32_2 = arith.constant 0 : i32
    return %c0_i32, %c0_i32_0, %c0_i32_1 : i32, i32, i32
  }
  func.func @transform_9(%arg0: i32, %arg1: i32) -> (i32, i32, i32) {
    %c0_i32 = arith.constant 0 : i32
    %c0_i32_0 = arith.constant 0 : i32
    %c0_i32_1 = arith.constant 0 : i32
    %c0_i32_2 = arith.constant 0 : i32
    return %c0_i32, %c0_i32_0, %c0_i32_1 : i32, i32, i32
  }
  func.func @transform_10(%arg0: i32, %arg1: i32) -> (i32, i32, i32) {
    %c0_i32 = arith.constant 0 : i32
    %c0_i32_0 = arith.constant 0 : i32
    %c0_i32_1 = arith.constant 0 : i32
    %c0_i32_2 = arith.constant 0 : i32
    return %c0_i32, %c0_i32_0, %c0_i32_1 : i32, i32, i32
  }
  func.func @transform_11(%arg0: i32, %arg1: i32) -> (i32, i32) {
    %c0_i32 = arith.constant 0 : i32
    %c0_i32_0 = arith.constant 0 : i32
    %c0_i32_1 = arith.constant 0 : i32
    return %c0_i32, %c0_i32_0 : i32, i32
  }
  func.func @transform_12(%arg0: i32, %arg1: i32) -> (i32, i32) {
    %c0_i32 = arith.constant 0 : i32
    %c0_i32_0 = arith.constant 0 : i32
    %c0_i32_1 = arith.constant 0 : i32
    return %c0_i32, %c0_i32_0 : i32, i32
  }
  func.func @transform_13(%arg0: i32, %arg1: i32) -> (i32, i32) {
    %c0_i32 = arith.constant 0 : i32
    %c0_i32_0 = arith.constant 0 : i32
    %c0_i32_1 = arith.constant 0 : i32
    return %c0_i32, %c0_i32_0 : i32, i32
  }
  func.func @transform_14(%arg0: i32, %arg1: i32) -> (i32, i32) {
    %c0_i32 = arith.constant 0 : i32
    %c0_i32_0 = arith.constant 0 : i32
    %c0_i32_1 = arith.constant 0 : i32
    return %c0_i32, %c0_i32_0 : i32, i32
  }
  func.func @transform_15(%arg0: i32, %arg1: i32) -> (i32, i32) {
    %c0_i32 = arith.constant 0 : i32
    %c0_i32_0 = arith.constant 0 : i32
    %c0_i32_1 = arith.constant 0 : i32
    return %c0_i32, %c0_i32_0 : i32, i32
  }
  func.func @transform_16(%arg0: i32, %arg1: i32) -> (i32, i32) {
    %c0_i32 = arith.constant 0 : i32
    %c0_i32_0 = arith.constant 0 : i32
    %c0_i32_1 = arith.constant 0 : i32
    return %c0_i32, %c0_i32_0 : i32, i32
  }
  func.func @transform_17(%arg0: i32, %arg1: i32) -> (i32, i32) {
    %c0_i32 = arith.constant 0 : i32
    %c0_i32_0 = arith.constant 0 : i32
    %c0_i32_1 = arith.constant 0 : i32
    return %c0_i32, %c0_i32_0 : i32, i32
  }
  func.func @transform_18(%arg0: i32, %arg1: i32) -> (i32, i32) {
    %c0_i32 = arith.constant 0 : i32
    %c0_i32_0 = arith.constant 0 : i32
    %c0_i32_1 = arith.constant 0 : i32
    return %c0_i32, %c0_i32_0 : i32, i32
  }
  func.func @transform_19(%arg0: i32, %arg1: i32) -> (i32, i32) {
    %c0_i32 = arith.constant 0 : i32
    %c0_i32_0 = arith.constant 0 : i32
    %c0_i32_1 = arith.constant 0 : i32
    return %c0_i32, %c0_i32_0 : i32, i32
  }
  func.func @transform_20(%arg0: i32, %arg1: i32) -> (i32, i32, i32) {
    %c0_i32 = arith.constant 0 : i32
    %c0_i32_0 = arith.constant 0 : i32
    return %arg0, %arg1, %c0_i32 : i32, i32, i32
  }
}

module attributes {stable_mosaic.version = 11 : i64} {
  func.func @_cross_block_kernel(%arg0: i32, %arg1: i32, %arg2: memref<1x8x32xbf16, #tpu.memory_space<vmem>>, %arg3: memref<1x16x32xbf16, #tpu.memory_space<vmem>>, %arg4: memref<1x8x32xbf16, #tpu.memory_space<vmem>>, %arg5: memref<1x1x16xf32, #tpu.memory_space<vmem>>, %arg6: memref<4x32x8xbf16, #tpu.memory_space<vmem>>, %arg7: memref<4x1x8xf32, #tpu.memory_space<vmem>>, %arg8: memref<4x32x8xbf16, #tpu.memory_space<vmem>>, %arg9: memref<4x1x8xf32, #tpu.memory_space<vmem>>, %arg10: memref<4x32x8xbf16, #tpu.memory_space<vmem>>, %arg11: memref<4x1x8xf32, #tpu.memory_space<vmem>>, %arg12: memref<4x8x32xbf16, #tpu.memory_space<vmem>>, %arg13: memref<1x32xf32, #tpu.memory_space<vmem>>, %arg14: memref<1x32xf32, #tpu.memory_space<vmem>>, %arg15: memref<1x32xf32, #tpu.memory_space<vmem>>, %arg16: memref<32x32xbf16, #tpu.memory_space<vmem>>, %arg17: memref<1x32xf32, #tpu.memory_space<vmem>>, %arg18: memref<32x32xbf16, #tpu.memory_space<vmem>>, %arg19: memref<1x32xf32, #tpu.memory_space<vmem>>, %arg20: memref<1x32xf32, #tpu.memory_space<vmem>>, %arg21: memref<1x32xf32, #tpu.memory_space<vmem>>, %arg22: memref<1x8x32xbf16, #tpu.memory_space<vmem>>) attributes {dimension_semantics = [#tpu.dimension_semantics<parallel>, #tpu.dimension_semantics<parallel>], iteration_bounds = array<i64: 2, 1>, scalar_prefetch = 0 : i64, scratch_operands = 0 : i64, tpu.core_type = #tpu.core_type<tc>, window_params = [{transform_indices = @transform_0, window_bounds = array<i64: 1, 8, 32>}, {transform_indices = @transform_1, window_bounds = array<i64: 1, 16, 32>}, {transform_indices = @transform_2, window_bounds = array<i64: 1, 8, 32>}, {transform_indices = @transform_3, window_bounds = array<i64: 1, 1, 16>}, {pipeline_mode = #tpu.pipeline_mode<synchronous>, transform_indices = @transform_4, window_bounds = array<i64: 4, 32, 8>}, {pipeline_mode = #tpu.pipeline_mode<synchronous>, transform_indices = @transform_5, window_bounds = array<i64: 4, 1, 8>}, {pipeline_mode = #tpu.pipeline_mode<synchronous>, transform_indices = @transform_6, window_bounds = array<i64: 4, 32, 8>}, {pipeline_mode = #tpu.pipeline_mode<synchronous>, transform_indices = @transform_7, window_bounds = array<i64: 4, 1, 8>}, {pipeline_mode = #tpu.pipeline_mode<synchronous>, transform_indices = @transform_8, window_bounds = array<i64: 4, 32, 8>}, {pipeline_mode = #tpu.pipeline_mode<synchronous>, transform_indices = @transform_9, window_bounds = array<i64: 4, 1, 8>}, {pipeline_mode = #tpu.pipeline_mode<synchronous>, transform_indices = @transform_10, window_bounds = array<i64: 4, 8, 32>}, {pipeline_mode = #tpu.pipeline_mode<synchronous>, transform_indices = @transform_11, window_bounds = array<i64: 1, 32>}, {pipeline_mode = #tpu.pipeline_mode<synchronous>, transform_indices = @transform_12, window_bounds = array<i64: 1, 32>}, {pipeline_mode = #tpu.pipeline_mode<synchronous>, transform_indices = @transform_13, window_bounds = array<i64: 1, 32>}, {pipeline_mode = #tpu.pipeline_mode<synchronous>, transform_indices = @transform_14, window_bounds = array<i64: 32, 32>}, {pipeline_mode = #tpu.pipeline_mode<synchronous>, transform_indices = @transform_15, window_bounds = array<i64: 1, 32>}, {pipeline_mode = #tpu.pipeline_mode<synchronous>, transform_indices = @transform_16, window_bounds = array<i64: 32, 32>}, {pipeline_mode = #tpu.pipeline_mode<synchronous>, transform_indices = @transform_17, window_bounds = array<i64: 1, 32>}, {pipeline_mode = #tpu.pipeline_mode<synchronous>, transform_indices = @transform_18, window_bounds = array<i64: 1, 32>}, {pipeline_mode = #tpu.pipeline_mode<synchronous>, transform_indices = @transform_19, window_bounds = array<i64: 1, 32>}, {transform_indices = @transform_20, window_bounds = array<i64: 1, 8, 32>}]} {
    %c0 = arith.constant 0 : index
    %c0_0 = arith.constant 0 : index
    %c0_1 = arith.constant 0 : index
    %0 = vector.load %arg2[%c0, %c0_0, %c0_1] : memref<1x8x32xbf16, #tpu.memory_space<vmem>>, vector<1x8x32xbf16>
    %1 = vector.shape_cast %0 : vector<1x8x32xbf16> to vector<8x32xbf16>
    %c0_2 = arith.constant 0 : index
    %c0_3 = arith.constant 0 : index
    %c0_4 = arith.constant 0 : index
    %2 = vector.load %arg3[%c0_2, %c0_3, %c0_4] : memref<1x16x32xbf16, #tpu.memory_space<vmem>>, vector<1x16x32xbf16>
    %3 = vector.shape_cast %2 : vector<1x16x32xbf16> to vector<16x32xbf16>
    %c0_5 = arith.constant 0 : index
    %c0_6 = arith.constant 0 : index
    %c0_7 = arith.constant 0 : index
    %4 = vector.load %arg5[%c0_5, %c0_6, %c0_7] : memref<1x1x16xf32, #tpu.memory_space<vmem>>, vector<1x1x16xf32>
    %5 = vector.shape_cast %4 : vector<1x1x16xf32> to vector<1x16xf32>
    %6 = vector.shape_cast %5 : vector<1x16xf32> to vector<1x16xf32>
    %7 = vector.broadcast %6 : vector<1x16xf32> to vector<8x16xf32>
    %c0_8 = arith.constant 0 : index
    %c0_9 = arith.constant 0 : index
    %8 = vector.load %arg13[%c0_8, %c0_9] : memref<1x32xf32, #tpu.memory_space<vmem>>, vector<1x32xf32>
    %c0_10 = arith.constant 0 : index
    %c0_11 = arith.constant 0 : index
    %c0_12 = arith.constant 0 : index
    %9 = vector.load %arg6[%c0_10, %c0_11, %c0_12] : memref<4x32x8xbf16, #tpu.memory_space<vmem>>, vector<1x32x8xbf16>
    %10 = vector.shape_cast %9 : vector<1x32x8xbf16> to vector<32x8xbf16>
    %cst = arith.constant dense<0.000000e+00> : vector<8x8xf32>
    %11 = tpu.matmul %1, %10, %cst {dimension_numbers = #tpu.dot_dimension_numbers<[1], [0], [0], [1], [0, 0, 1, 1], [], []>} : vector<8x32xbf16>, vector<32x8xbf16>, vector<8x8xf32> -> vector<8x8xf32>
    %c0_13 = arith.constant 0 : index
    %c0_14 = arith.constant 0 : index
    %c0_15 = arith.constant 0 : index
    %12 = vector.load %arg7[%c0_13, %c0_14, %c0_15] : memref<4x1x8xf32, #tpu.memory_space<vmem>>, vector<1x1x8xf32>
    %13 = vector.shape_cast %12 : vector<1x1x8xf32> to vector<1x8xf32>
    %14 = vector.broadcast %13 : vector<1x8xf32> to vector<8x8xf32>
    %15 = arith.addf %11, %14 : vector<8x8xf32>
    %16 = arith.truncf %15 : vector<8x8xf32> to vector<8x8xbf16>
    %c0_16 = arith.constant 0 : index
    %c0_17 = arith.constant 0 : index
    %c0_18 = arith.constant 0 : index
    %17 = vector.load %arg8[%c0_16, %c0_17, %c0_18] : memref<4x32x8xbf16, #tpu.memory_space<vmem>>, vector<1x32x8xbf16>
    %18 = vector.shape_cast %17 : vector<1x32x8xbf16> to vector<32x8xbf16>
    %cst_19 = arith.constant dense<0.000000e+00> : vector<16x8xf32>
    %19 = tpu.matmul %3, %18, %cst_19 {dimension_numbers = #tpu.dot_dimension_numbers<[1], [0], [0], [1], [0, 0, 1, 1], [], []>} : vector<16x32xbf16>, vector<32x8xbf16>, vector<16x8xf32> -> vector<16x8xf32>
    %c0_20 = arith.constant 0 : index
    %c0_21 = arith.constant 0 : index
    %c0_22 = arith.constant 0 : index
    %20 = vector.load %arg9[%c0_20, %c0_21, %c0_22] : memref<4x1x8xf32, #tpu.memory_space<vmem>>, vector<1x1x8xf32>
    %21 = vector.shape_cast %20 : vector<1x1x8xf32> to vector<1x8xf32>
    %22 = vector.broadcast %21 : vector<1x8xf32> to vector<16x8xf32>
    %23 = arith.addf %19, %22 : vector<16x8xf32>
    %24 = arith.truncf %23 : vector<16x8xf32> to vector<16x8xbf16>
    %c0_23 = arith.constant 0 : index
    %c0_24 = arith.constant 0 : index
    %c0_25 = arith.constant 0 : index
    %25 = vector.load %arg10[%c0_23, %c0_24, %c0_25] : memref<4x32x8xbf16, #tpu.memory_space<vmem>>, vector<1x32x8xbf16>
    %26 = vector.shape_cast %25 : vector<1x32x8xbf16> to vector<32x8xbf16>
    %cst_26 = arith.constant dense<0.000000e+00> : vector<16x8xf32>
    %27 = tpu.matmul %3, %26, %cst_26 {dimension_numbers = #tpu.dot_dimension_numbers<[1], [0], [0], [1], [0, 0, 1, 1], [], []>} : vector<16x32xbf16>, vector<32x8xbf16>, vector<16x8xf32> -> vector<16x8xf32>
    %c0_27 = arith.constant 0 : index
    %c0_28 = arith.constant 0 : index
    %c0_29 = arith.constant 0 : index
    %28 = vector.load %arg11[%c0_27, %c0_28, %c0_29] : memref<4x1x8xf32, #tpu.memory_space<vmem>>, vector<1x1x8xf32>
    %29 = vector.shape_cast %28 : vector<1x1x8xf32> to vector<1x8xf32>
    %30 = vector.broadcast %29 : vector<1x8xf32> to vector<16x8xf32>
    %31 = arith.addf %27, %30 : vector<16x8xf32>
    %32 = arith.truncf %31 : vector<16x8xf32> to vector<16x8xbf16>
    %cst_30 = arith.constant dense<0.000000e+00> : vector<8x16xf32>
    %33 = tpu.matmul %16, %24, %cst_30 {dimension_numbers = #tpu.dot_dimension_numbers<[1], [1], [0], [0], [0, 0, 1, 0], [], []>} : vector<8x8xbf16>, vector<16x8xbf16>, vector<8x16xf32> -> vector<8x16xf32>
    %34 = arith.addf %33, %7 : vector<8x16xf32>
    %cst_31 = arith.constant dense<0xFF800000> : vector<8xf32>
    %35 = vector.multi_reduction <maximumf>, %34, %cst_31 [1] : vector<8x16xf32> to vector<8xf32>
    %36 = vector.shape_cast %35 : vector<8xf32> to vector<8x1xf32>
    %37 = vector.broadcast %36 : vector<8x1xf32> to vector<8x16xf32>
    %38 = arith.subf %34, %37 : vector<8x16xf32>
    %39 = math.exp %38 : vector<8x16xf32>
    %cst_32 = arith.constant dense<0.000000e+00> : vector<8xf32>
    %40 = vector.multi_reduction <add>, %39, %cst_32 [1] : vector<8x16xf32> to vector<8xf32>
    %41 = vector.shape_cast %40 : vector<8xf32> to vector<8x1xf32>
    %42 = tpu.reciprocal %41 {approx = true} : vector<8x1xf32> -> vector<8x1xf32>
    %43 = vector.broadcast %42 : vector<8x1xf32> to vector<8x16xf32>
    %44 = arith.mulf %39, %43 : vector<8x16xf32>
    %45 = arith.truncf %44 : vector<8x16xf32> to vector<8x16xbf16>
    %cst_33 = arith.constant dense<0.000000e+00> : vector<8x8xf32>
    %46 = tpu.matmul %45, %32, %cst_33 {dimension_numbers = #tpu.dot_dimension_numbers<[1], [0], [0], [1], [0, 0, 1, 1], [], []>} : vector<8x16xbf16>, vector<16x8xbf16>, vector<8x8xf32> -> vector<8x8xf32>
    %47 = arith.truncf %46 : vector<8x8xf32> to vector<8x8xbf16>
    %c0_34 = arith.constant 0 : index
    %c0_35 = arith.constant 0 : index
    %c0_36 = arith.constant 0 : index
    %48 = vector.load %arg12[%c0_34, %c0_35, %c0_36] : memref<4x8x32xbf16, #tpu.memory_space<vmem>>, vector<1x8x32xbf16>
    %49 = vector.shape_cast %48 : vector<1x8x32xbf16> to vector<8x32xbf16>
    %cst_37 = arith.constant dense<0.000000e+00> : vector<8x32xf32>
    %50 = tpu.matmul %47, %49, %cst_37 {dimension_numbers = #tpu.dot_dimension_numbers<[1], [0], [0], [1], [0, 0, 1, 1], [], []>} : vector<8x8xbf16>, vector<8x32xbf16>, vector<8x32xf32> -> vector<8x32xf32>
    %51 = vector.broadcast %8 : vector<1x32xf32> to vector<8x32xf32>
    %52 = arith.addf %51, %50 : vector<8x32xf32>
    %c1 = arith.constant 1 : index
    %c0_38 = arith.constant 0 : index
    %c0_39 = arith.constant 0 : index
    %53 = vector.load %arg6[%c1, %c0_38, %c0_39] : memref<4x32x8xbf16, #tpu.memory_space<vmem>>, vector<1x32x8xbf16>
    %54 = vector.shape_cast %53 : vector<1x32x8xbf16> to vector<32x8xbf16>
    %cst_40 = arith.constant dense<0.000000e+00> : vector<8x8xf32>
    %55 = tpu.matmul %1, %54, %cst_40 {dimension_numbers = #tpu.dot_dimension_numbers<[1], [0], [0], [1], [0, 0, 1, 1], [], []>} : vector<8x32xbf16>, vector<32x8xbf16>, vector<8x8xf32> -> vector<8x8xf32>
    %c1_41 = arith.constant 1 : index
    %c0_42 = arith.constant 0 : index
    %c0_43 = arith.constant 0 : index
    %56 = vector.load %arg7[%c1_41, %c0_42, %c0_43] : memref<4x1x8xf32, #tpu.memory_space<vmem>>, vector<1x1x8xf32>
    %57 = vector.shape_cast %56 : vector<1x1x8xf32> to vector<1x8xf32>
    %58 = vector.broadcast %57 : vector<1x8xf32> to vector<8x8xf32>
    %59 = arith.addf %55, %58 : vector<8x8xf32>
    %60 = arith.truncf %59 : vector<8x8xf32> to vector<8x8xbf16>
    %c1_44 = arith.constant 1 : index
    %c0_45 = arith.constant 0 : index
    %c0_46 = arith.constant 0 : index
    %61 = vector.load %arg8[%c1_44, %c0_45, %c0_46] : memref<4x32x8xbf16, #tpu.memory_space<vmem>>, vector<1x32x8xbf16>
    %62 = vector.shape_cast %61 : vector<1x32x8xbf16> to vector<32x8xbf16>
    %cst_47 = arith.constant dense<0.000000e+00> : vector<16x8xf32>
    %63 = tpu.matmul %3, %62, %cst_47 {dimension_numbers = #tpu.dot_dimension_numbers<[1], [0], [0], [1], [0, 0, 1, 1], [], []>} : vector<16x32xbf16>, vector<32x8xbf16>, vector<16x8xf32> -> vector<16x8xf32>
    %c1_48 = arith.constant 1 : index
    %c0_49 = arith.constant 0 : index
    %c0_50 = arith.constant 0 : index
    %64 = vector.load %arg9[%c1_48, %c0_49, %c0_50] : memref<4x1x8xf32, #tpu.memory_space<vmem>>, vector<1x1x8xf32>
    %65 = vector.shape_cast %64 : vector<1x1x8xf32> to vector<1x8xf32>
    %66 = vector.broadcast %65 : vector<1x8xf32> to vector<16x8xf32>
    %67 = arith.addf %63, %66 : vector<16x8xf32>
    %68 = arith.truncf %67 : vector<16x8xf32> to vector<16x8xbf16>
    %c1_51 = arith.constant 1 : index
    %c0_52 = arith.constant 0 : index
    %c0_53 = arith.constant 0 : index
    %69 = vector.load %arg10[%c1_51, %c0_52, %c0_53] : memref<4x32x8xbf16, #tpu.memory_space<vmem>>, vector<1x32x8xbf16>
    %70 = vector.shape_cast %69 : vector<1x32x8xbf16> to vector<32x8xbf16>
    %cst_54 = arith.constant dense<0.000000e+00> : vector<16x8xf32>
    %71 = tpu.matmul %3, %70, %cst_54 {dimension_numbers = #tpu.dot_dimension_numbers<[1], [0], [0], [1], [0, 0, 1, 1], [], []>} : vector<16x32xbf16>, vector<32x8xbf16>, vector<16x8xf32> -> vector<16x8xf32>
    %c1_55 = arith.constant 1 : index
    %c0_56 = arith.constant 0 : index
    %c0_57 = arith.constant 0 : index
    %72 = vector.load %arg11[%c1_55, %c0_56, %c0_57] : memref<4x1x8xf32, #tpu.memory_space<vmem>>, vector<1x1x8xf32>
    %73 = vector.shape_cast %72 : vector<1x1x8xf32> to vector<1x8xf32>
    %74 = vector.broadcast %73 : vector<1x8xf32> to vector<16x8xf32>
    %75 = arith.addf %71, %74 : vector<16x8xf32>
    %76 = arith.truncf %75 : vector<16x8xf32> to vector<16x8xbf16>
    %cst_58 = arith.constant dense<0.000000e+00> : vector<8x16xf32>
    %77 = tpu.matmul %60, %68, %cst_58 {dimension_numbers = #tpu.dot_dimension_numbers<[1], [1], [0], [0], [0, 0, 1, 0], [], []>} : vector<8x8xbf16>, vector<16x8xbf16>, vector<8x16xf32> -> vector<8x16xf32>
    %78 = arith.addf %77, %7 : vector<8x16xf32>
    %cst_59 = arith.constant dense<0xFF800000> : vector<8xf32>
    %79 = vector.multi_reduction <maximumf>, %78, %cst_59 [1] : vector<8x16xf32> to vector<8xf32>
    %80 = vector.shape_cast %79 : vector<8xf32> to vector<8x1xf32>
    %81 = vector.broadcast %80 : vector<8x1xf32> to vector<8x16xf32>
    %82 = arith.subf %78, %81 : vector<8x16xf32>
    %83 = math.exp %82 : vector<8x16xf32>
    %cst_60 = arith.constant dense<0.000000e+00> : vector<8xf32>
    %84 = vector.multi_reduction <add>, %83, %cst_60 [1] : vector<8x16xf32> to vector<8xf32>
    %85 = vector.shape_cast %84 : vector<8xf32> to vector<8x1xf32>
    %86 = tpu.reciprocal %85 {approx = true} : vector<8x1xf32> -> vector<8x1xf32>
    %87 = vector.broadcast %86 : vector<8x1xf32> to vector<8x16xf32>
    %88 = arith.mulf %83, %87 : vector<8x16xf32>
    %89 = arith.truncf %88 : vector<8x16xf32> to vector<8x16xbf16>
    %cst_61 = arith.constant dense<0.000000e+00> : vector<8x8xf32>
    %90 = tpu.matmul %89, %76, %cst_61 {dimension_numbers = #tpu.dot_dimension_numbers<[1], [0], [0], [1], [0, 0, 1, 1], [], []>} : vector<8x16xbf16>, vector<16x8xbf16>, vector<8x8xf32> -> vector<8x8xf32>
    %91 = arith.truncf %90 : vector<8x8xf32> to vector<8x8xbf16>
    %c1_62 = arith.constant 1 : index
    %c0_63 = arith.constant 0 : index
    %c0_64 = arith.constant 0 : index
    %92 = vector.load %arg12[%c1_62, %c0_63, %c0_64] : memref<4x8x32xbf16, #tpu.memory_space<vmem>>, vector<1x8x32xbf16>
    %93 = vector.shape_cast %92 : vector<1x8x32xbf16> to vector<8x32xbf16>
    %cst_65 = arith.constant dense<0.000000e+00> : vector<8x32xf32>
    %94 = tpu.matmul %91, %93, %cst_65 {dimension_numbers = #tpu.dot_dimension_numbers<[1], [0], [0], [1], [0, 0, 1, 1], [], []>} : vector<8x8xbf16>, vector<8x32xbf16>, vector<8x32xf32> -> vector<8x32xf32>
    %95 = arith.addf %52, %94 : vector<8x32xf32>
    %c2 = arith.constant 2 : index
    %c0_66 = arith.constant 0 : index
    %c0_67 = arith.constant 0 : index
    %96 = vector.load %arg6[%c2, %c0_66, %c0_67] : memref<4x32x8xbf16, #tpu.memory_space<vmem>>, vector<1x32x8xbf16>
    %97 = vector.shape_cast %96 : vector<1x32x8xbf16> to vector<32x8xbf16>
    %cst_68 = arith.constant dense<0.000000e+00> : vector<8x8xf32>
    %98 = tpu.matmul %1, %97, %cst_68 {dimension_numbers = #tpu.dot_dimension_numbers<[1], [0], [0], [1], [0, 0, 1, 1], [], []>} : vector<8x32xbf16>, vector<32x8xbf16>, vector<8x8xf32> -> vector<8x8xf32>
    %c2_69 = arith.constant 2 : index
    %c0_70 = arith.constant 0 : index
    %c0_71 = arith.constant 0 : index
    %99 = vector.load %arg7[%c2_69, %c0_70, %c0_71] : memref<4x1x8xf32, #tpu.memory_space<vmem>>, vector<1x1x8xf32>
    %100 = vector.shape_cast %99 : vector<1x1x8xf32> to vector<1x8xf32>
    %101 = vector.broadcast %100 : vector<1x8xf32> to vector<8x8xf32>
    %102 = arith.addf %98, %101 : vector<8x8xf32>
    %103 = arith.truncf %102 : vector<8x8xf32> to vector<8x8xbf16>
    %c2_72 = arith.constant 2 : index
    %c0_73 = arith.constant 0 : index
    %c0_74 = arith.constant 0 : index
    %104 = vector.load %arg8[%c2_72, %c0_73, %c0_74] : memref<4x32x8xbf16, #tpu.memory_space<vmem>>, vector<1x32x8xbf16>
    %105 = vector.shape_cast %104 : vector<1x32x8xbf16> to vector<32x8xbf16>
    %cst_75 = arith.constant dense<0.000000e+00> : vector<16x8xf32>
    %106 = tpu.matmul %3, %105, %cst_75 {dimension_numbers = #tpu.dot_dimension_numbers<[1], [0], [0], [1], [0, 0, 1, 1], [], []>} : vector<16x32xbf16>, vector<32x8xbf16>, vector<16x8xf32> -> vector<16x8xf32>
    %c2_76 = arith.constant 2 : index
    %c0_77 = arith.constant 0 : index
    %c0_78 = arith.constant 0 : index
    %107 = vector.load %arg9[%c2_76, %c0_77, %c0_78] : memref<4x1x8xf32, #tpu.memory_space<vmem>>, vector<1x1x8xf32>
    %108 = vector.shape_cast %107 : vector<1x1x8xf32> to vector<1x8xf32>
    %109 = vector.broadcast %108 : vector<1x8xf32> to vector<16x8xf32>
    %110 = arith.addf %106, %109 : vector<16x8xf32>
    %111 = arith.truncf %110 : vector<16x8xf32> to vector<16x8xbf16>
    %c2_79 = arith.constant 2 : index
    %c0_80 = arith.constant 0 : index
    %c0_81 = arith.constant 0 : index
    %112 = vector.load %arg10[%c2_79, %c0_80, %c0_81] : memref<4x32x8xbf16, #tpu.memory_space<vmem>>, vector<1x32x8xbf16>
    %113 = vector.shape_cast %112 : vector<1x32x8xbf16> to vector<32x8xbf16>
    %cst_82 = arith.constant dense<0.000000e+00> : vector<16x8xf32>
    %114 = tpu.matmul %3, %113, %cst_82 {dimension_numbers = #tpu.dot_dimension_numbers<[1], [0], [0], [1], [0, 0, 1, 1], [], []>} : vector<16x32xbf16>, vector<32x8xbf16>, vector<16x8xf32> -> vector<16x8xf32>
    %c2_83 = arith.constant 2 : index
    %c0_84 = arith.constant 0 : index
    %c0_85 = arith.constant 0 : index
    %115 = vector.load %arg11[%c2_83, %c0_84, %c0_85] : memref<4x1x8xf32, #tpu.memory_space<vmem>>, vector<1x1x8xf32>
    %116 = vector.shape_cast %115 : vector<1x1x8xf32> to vector<1x8xf32>
    %117 = vector.broadcast %116 : vector<1x8xf32> to vector<16x8xf32>
    %118 = arith.addf %114, %117 : vector<16x8xf32>
    %119 = arith.truncf %118 : vector<16x8xf32> to vector<16x8xbf16>
    %cst_86 = arith.constant dense<0.000000e+00> : vector<8x16xf32>
    %120 = tpu.matmul %103, %111, %cst_86 {dimension_numbers = #tpu.dot_dimension_numbers<[1], [1], [0], [0], [0, 0, 1, 0], [], []>} : vector<8x8xbf16>, vector<16x8xbf16>, vector<8x16xf32> -> vector<8x16xf32>
    %121 = arith.addf %120, %7 : vector<8x16xf32>
    %cst_87 = arith.constant dense<0xFF800000> : vector<8xf32>
    %122 = vector.multi_reduction <maximumf>, %121, %cst_87 [1] : vector<8x16xf32> to vector<8xf32>
    %123 = vector.shape_cast %122 : vector<8xf32> to vector<8x1xf32>
    %124 = vector.broadcast %123 : vector<8x1xf32> to vector<8x16xf32>
    %125 = arith.subf %121, %124 : vector<8x16xf32>
    %126 = math.exp %125 : vector<8x16xf32>
    %cst_88 = arith.constant dense<0.000000e+00> : vector<8xf32>
    %127 = vector.multi_reduction <add>, %126, %cst_88 [1] : vector<8x16xf32> to vector<8xf32>
    %128 = vector.shape_cast %127 : vector<8xf32> to vector<8x1xf32>
    %129 = tpu.reciprocal %128 {approx = true} : vector<8x1xf32> -> vector<8x1xf32>
    %130 = vector.broadcast %129 : vector<8x1xf32> to vector<8x16xf32>
    %131 = arith.mulf %126, %130 : vector<8x16xf32>
    %132 = arith.truncf %131 : vector<8x16xf32> to vector<8x16xbf16>
    %cst_89 = arith.constant dense<0.000000e+00> : vector<8x8xf32>
    %133 = tpu.matmul %132, %119, %cst_89 {dimension_numbers = #tpu.dot_dimension_numbers<[1], [0], [0], [1], [0, 0, 1, 1], [], []>} : vector<8x16xbf16>, vector<16x8xbf16>, vector<8x8xf32> -> vector<8x8xf32>
    %134 = arith.truncf %133 : vector<8x8xf32> to vector<8x8xbf16>
    %c2_90 = arith.constant 2 : index
    %c0_91 = arith.constant 0 : index
    %c0_92 = arith.constant 0 : index
    %135 = vector.load %arg12[%c2_90, %c0_91, %c0_92] : memref<4x8x32xbf16, #tpu.memory_space<vmem>>, vector<1x8x32xbf16>
    %136 = vector.shape_cast %135 : vector<1x8x32xbf16> to vector<8x32xbf16>
    %cst_93 = arith.constant dense<0.000000e+00> : vector<8x32xf32>
    %137 = tpu.matmul %134, %136, %cst_93 {dimension_numbers = #tpu.dot_dimension_numbers<[1], [0], [0], [1], [0, 0, 1, 1], [], []>} : vector<8x8xbf16>, vector<8x32xbf16>, vector<8x32xf32> -> vector<8x32xf32>
    %138 = arith.addf %95, %137 : vector<8x32xf32>
    %c3 = arith.constant 3 : index
    %c0_94 = arith.constant 0 : index
    %c0_95 = arith.constant 0 : index
    %139 = vector.load %arg6[%c3, %c0_94, %c0_95] : memref<4x32x8xbf16, #tpu.memory_space<vmem>>, vector<1x32x8xbf16>
    %140 = vector.shape_cast %139 : vector<1x32x8xbf16> to vector<32x8xbf16>
    %cst_96 = arith.constant dense<0.000000e+00> : vector<8x8xf32>
    %141 = tpu.matmul %1, %140, %cst_96 {dimension_numbers = #tpu.dot_dimension_numbers<[1], [0], [0], [1], [0, 0, 1, 1], [], []>} : vector<8x32xbf16>, vector<32x8xbf16>, vector<8x8xf32> -> vector<8x8xf32>
    %c3_97 = arith.constant 3 : index
    %c0_98 = arith.constant 0 : index
    %c0_99 = arith.constant 0 : index
    %142 = vector.load %arg7[%c3_97, %c0_98, %c0_99] : memref<4x1x8xf32, #tpu.memory_space<vmem>>, vector<1x1x8xf32>
    %143 = vector.shape_cast %142 : vector<1x1x8xf32> to vector<1x8xf32>
    %144 = vector.broadcast %143 : vector<1x8xf32> to vector<8x8xf32>
    %145 = arith.addf %141, %144 : vector<8x8xf32>
    %146 = arith.truncf %145 : vector<8x8xf32> to vector<8x8xbf16>
    %c3_100 = arith.constant 3 : index
    %c0_101 = arith.constant 0 : index
    %c0_102 = arith.constant 0 : index
    %147 = vector.load %arg8[%c3_100, %c0_101, %c0_102] : memref<4x32x8xbf16, #tpu.memory_space<vmem>>, vector<1x32x8xbf16>
    %148 = vector.shape_cast %147 : vector<1x32x8xbf16> to vector<32x8xbf16>
    %cst_103 = arith.constant dense<0.000000e+00> : vector<16x8xf32>
    %149 = tpu.matmul %3, %148, %cst_103 {dimension_numbers = #tpu.dot_dimension_numbers<[1], [0], [0], [1], [0, 0, 1, 1], [], []>} : vector<16x32xbf16>, vector<32x8xbf16>, vector<16x8xf32> -> vector<16x8xf32>
    %c3_104 = arith.constant 3 : index
    %c0_105 = arith.constant 0 : index
    %c0_106 = arith.constant 0 : index
    %150 = vector.load %arg9[%c3_104, %c0_105, %c0_106] : memref<4x1x8xf32, #tpu.memory_space<vmem>>, vector<1x1x8xf32>
    %151 = vector.shape_cast %150 : vector<1x1x8xf32> to vector<1x8xf32>
    %152 = vector.broadcast %151 : vector<1x8xf32> to vector<16x8xf32>
    %153 = arith.addf %149, %152 : vector<16x8xf32>
    %154 = arith.truncf %153 : vector<16x8xf32> to vector<16x8xbf16>
    %c3_107 = arith.constant 3 : index
    %c0_108 = arith.constant 0 : index
    %c0_109 = arith.constant 0 : index
    %155 = vector.load %arg10[%c3_107, %c0_108, %c0_109] : memref<4x32x8xbf16, #tpu.memory_space<vmem>>, vector<1x32x8xbf16>
    %156 = vector.shape_cast %155 : vector<1x32x8xbf16> to vector<32x8xbf16>
    %cst_110 = arith.constant dense<0.000000e+00> : vector<16x8xf32>
    %157 = tpu.matmul %3, %156, %cst_110 {dimension_numbers = #tpu.dot_dimension_numbers<[1], [0], [0], [1], [0, 0, 1, 1], [], []>} : vector<16x32xbf16>, vector<32x8xbf16>, vector<16x8xf32> -> vector<16x8xf32>
    %c3_111 = arith.constant 3 : index
    %c0_112 = arith.constant 0 : index
    %c0_113 = arith.constant 0 : index
    %158 = vector.load %arg11[%c3_111, %c0_112, %c0_113] : memref<4x1x8xf32, #tpu.memory_space<vmem>>, vector<1x1x8xf32>
    %159 = vector.shape_cast %158 : vector<1x1x8xf32> to vector<1x8xf32>
    %160 = vector.broadcast %159 : vector<1x8xf32> to vector<16x8xf32>
    %161 = arith.addf %157, %160 : vector<16x8xf32>
    %162 = arith.truncf %161 : vector<16x8xf32> to vector<16x8xbf16>
    %cst_114 = arith.constant dense<0.000000e+00> : vector<8x16xf32>
    %163 = tpu.matmul %146, %154, %cst_114 {dimension_numbers = #tpu.dot_dimension_numbers<[1], [1], [0], [0], [0, 0, 1, 0], [], []>} : vector<8x8xbf16>, vector<16x8xbf16>, vector<8x16xf32> -> vector<8x16xf32>
    %164 = arith.addf %163, %7 : vector<8x16xf32>
    %cst_115 = arith.constant dense<0xFF800000> : vector<8xf32>
    %165 = vector.multi_reduction <maximumf>, %164, %cst_115 [1] : vector<8x16xf32> to vector<8xf32>
    %166 = vector.shape_cast %165 : vector<8xf32> to vector<8x1xf32>
    %167 = vector.broadcast %166 : vector<8x1xf32> to vector<8x16xf32>
    %168 = arith.subf %164, %167 : vector<8x16xf32>
    %169 = math.exp %168 : vector<8x16xf32>
    %cst_116 = arith.constant dense<0.000000e+00> : vector<8xf32>
    %170 = vector.multi_reduction <add>, %169, %cst_116 [1] : vector<8x16xf32> to vector<8xf32>
    %171 = vector.shape_cast %170 : vector<8xf32> to vector<8x1xf32>
    %172 = tpu.reciprocal %171 {approx = true} : vector<8x1xf32> -> vector<8x1xf32>
    %173 = vector.broadcast %172 : vector<8x1xf32> to vector<8x16xf32>
    %174 = arith.mulf %169, %173 : vector<8x16xf32>
    %175 = arith.truncf %174 : vector<8x16xf32> to vector<8x16xbf16>
    %cst_117 = arith.constant dense<0.000000e+00> : vector<8x8xf32>
    %176 = tpu.matmul %175, %162, %cst_117 {dimension_numbers = #tpu.dot_dimension_numbers<[1], [0], [0], [1], [0, 0, 1, 1], [], []>} : vector<8x16xbf16>, vector<16x8xbf16>, vector<8x8xf32> -> vector<8x8xf32>
    %177 = arith.truncf %176 : vector<8x8xf32> to vector<8x8xbf16>
    %c3_118 = arith.constant 3 : index
    %c0_119 = arith.constant 0 : index
    %c0_120 = arith.constant 0 : index
    %178 = vector.load %arg12[%c3_118, %c0_119, %c0_120] : memref<4x8x32xbf16, #tpu.memory_space<vmem>>, vector<1x8x32xbf16>
    %179 = vector.shape_cast %178 : vector<1x8x32xbf16> to vector<8x32xbf16>
    %cst_121 = arith.constant dense<0.000000e+00> : vector<8x32xf32>
    %180 = tpu.matmul %177, %179, %cst_121 {dimension_numbers = #tpu.dot_dimension_numbers<[1], [0], [0], [1], [0, 0, 1, 1], [], []>} : vector<8x8xbf16>, vector<8x32xbf16>, vector<8x32xf32> -> vector<8x32xf32>
    %181 = arith.addf %138, %180 : vector<8x32xf32>
    %c0_122 = arith.constant 0 : index
    %c0_123 = arith.constant 0 : index
    %c0_124 = arith.constant 0 : index
    %182 = vector.load %arg4[%c0_122, %c0_123, %c0_124] : memref<1x8x32xbf16, #tpu.memory_space<vmem>>, vector<1x8x32xbf16>
    %183 = vector.shape_cast %182 : vector<1x8x32xbf16> to vector<8x32xbf16>
    %184 = arith.extf %183 : vector<8x32xbf16> to vector<8x32xf32>
    %185 = arith.addf %184, %181 : vector<8x32xf32>
    %cst_125 = arith.constant dense<0.000000e+00> : vector<8xf32>
    %186 = vector.multi_reduction <add>, %185, %cst_125 [1] : vector<8x32xf32> to vector<8xf32>
    %187 = vector.shape_cast %186 : vector<8xf32> to vector<8x1xf32>
    %cst_126 = arith.constant 3.200000e+01 : f32
    %188 = vector.broadcast %cst_126 : f32 to vector<8x1xf32>
    %189 = arith.divf %187, %188 : vector<8x1xf32>
    %190 = vector.broadcast %189 : vector<8x1xf32> to vector<8x32xf32>
    %191 = arith.subf %185, %190 : vector<8x32xf32>
    %192 = arith.mulf %191, %191 : vector<8x32xf32>
    %cst_127 = arith.constant dense<0.000000e+00> : vector<8xf32>
    %193 = vector.multi_reduction <add>, %192, %cst_127 [1] : vector<8x32xf32> to vector<8xf32>
    %194 = vector.shape_cast %193 : vector<8xf32> to vector<8x1xf32>
    %cst_128 = arith.constant 3.200000e+01 : f32
    %195 = vector.broadcast %cst_128 : f32 to vector<8x1xf32>
    %196 = arith.divf %194, %195 : vector<8x1xf32>
    %197 = vector.broadcast %189 : vector<8x1xf32> to vector<8x32xf32>
    %198 = arith.subf %185, %197 : vector<8x32xf32>
    %cst_129 = arith.constant 9.99999974E-6 : f32
    %199 = vector.broadcast %cst_129 : f32 to vector<8x1xf32>
    %200 = arith.addf %196, %199 : vector<8x1xf32>
    %201 = math.rsqrt %200 : vector<8x1xf32>
    %202 = vector.broadcast %201 : vector<8x1xf32> to vector<8x32xf32>
    %203 = arith.mulf %198, %202 : vector<8x32xf32>
    %c0_130 = arith.constant 0 : index
    %c0_131 = arith.constant 0 : index
    %204 = vector.load %arg14[%c0_130, %c0_131] : memref<1x32xf32, #tpu.memory_space<vmem>>, vector<1x32xf32>
    %205 = vector.broadcast %204 : vector<1x32xf32> to vector<8x32xf32>
    %206 = arith.mulf %203, %205 : vector<8x32xf32>
    %c0_132 = arith.constant 0 : index
    %c0_133 = arith.constant 0 : index
    %207 = vector.load %arg15[%c0_132, %c0_133] : memref<1x32xf32, #tpu.memory_space<vmem>>, vector<1x32xf32>
    %208 = vector.broadcast %207 : vector<1x32xf32> to vector<8x32xf32>
    %209 = arith.addf %206, %208 : vector<8x32xf32>
    %210 = arith.truncf %209 : vector<8x32xf32> to vector<8x32xbf16>
    %c0_134 = arith.constant 0 : index
    %c0_135 = arith.constant 0 : index
    %211 = vector.load %arg16[%c0_134, %c0_135] : memref<32x32xbf16, #tpu.memory_space<vmem>>, vector<32x32xbf16>
    %cst_136 = arith.constant dense<0.000000e+00> : vector<8x32xf32>
    %212 = tpu.matmul %210, %211, %cst_136 {dimension_numbers = #tpu.dot_dimension_numbers<[1], [0], [0], [1], [0, 0, 1, 1], [], []>} : vector<8x32xbf16>, vector<32x32xbf16>, vector<8x32xf32> -> vector<8x32xf32>
    %c0_137 = arith.constant 0 : index
    %c0_138 = arith.constant 0 : index
    %213 = vector.load %arg17[%c0_137, %c0_138] : memref<1x32xf32, #tpu.memory_space<vmem>>, vector<1x32xf32>
    %214 = vector.broadcast %213 : vector<1x32xf32> to vector<8x32xf32>
    %215 = arith.addf %212, %214 : vector<8x32xf32>
    %cst_139 = arith.constant 0.000000e+00 : f32
    %216 = vector.broadcast %cst_139 : f32 to vector<8x32xf32>
    %217 = arith.maximumf %215, %216 : vector<8x32xf32>
    %218 = arith.truncf %217 : vector<8x32xf32> to vector<8x32xbf16>
    %c0_140 = arith.constant 0 : index
    %c0_141 = arith.constant 0 : index
    %219 = vector.load %arg18[%c0_140, %c0_141] : memref<32x32xbf16, #tpu.memory_space<vmem>>, vector<32x32xbf16>
    %cst_142 = arith.constant dense<0.000000e+00> : vector<8x32xf32>
    %220 = tpu.matmul %218, %219, %cst_142 {dimension_numbers = #tpu.dot_dimension_numbers<[1], [0], [0], [1], [0, 0, 1, 1], [], []>} : vector<8x32xbf16>, vector<32x32xbf16>, vector<8x32xf32> -> vector<8x32xf32>
    %c0_143 = arith.constant 0 : index
    %c0_144 = arith.constant 0 : index
    %221 = vector.load %arg19[%c0_143, %c0_144] : memref<1x32xf32, #tpu.memory_space<vmem>>, vector<1x32xf32>
    %222 = vector.broadcast %221 : vector<1x32xf32> to vector<8x32xf32>
    %223 = arith.addf %220, %222 : vector<8x32xf32>
    %224 = arith.addf %209, %223 : vector<8x32xf32>
    %cst_145 = arith.constant dense<0.000000e+00> : vector<8xf32>
    %225 = vector.multi_reduction <add>, %224, %cst_145 [1] : vector<8x32xf32> to vector<8xf32>
    %226 = vector.shape_cast %225 : vector<8xf32> to vector<8x1xf32>
    %cst_146 = arith.constant 3.200000e+01 : f32
    %227 = vector.broadcast %cst_146 : f32 to vector<8x1xf32>
    %228 = arith.divf %226, %227 : vector<8x1xf32>
    %229 = vector.broadcast %228 : vector<8x1xf32> to vector<8x32xf32>
    %230 = arith.subf %224, %229 : vector<8x32xf32>
    %231 = arith.mulf %230, %230 : vector<8x32xf32>
    %cst_147 = arith.constant dense<0.000000e+00> : vector<8xf32>
    %232 = vector.multi_reduction <add>, %231, %cst_147 [1] : vector<8x32xf32> to vector<8xf32>
    %233 = vector.shape_cast %232 : vector<8xf32> to vector<8x1xf32>
    %cst_148 = arith.constant 3.200000e+01 : f32
    %234 = vector.broadcast %cst_148 : f32 to vector<8x1xf32>
    %235 = arith.divf %233, %234 : vector<8x1xf32>
    %236 = vector.broadcast %228 : vector<8x1xf32> to vector<8x32xf32>
    %237 = arith.subf %224, %236 : vector<8x32xf32>
    %cst_149 = arith.constant 9.99999974E-6 : f32
    %238 = vector.broadcast %cst_149 : f32 to vector<8x1xf32>
    %239 = arith.addf %235, %238 : vector<8x1xf32>
    %240 = math.rsqrt %239 : vector<8x1xf32>
    %241 = vector.broadcast %240 : vector<8x1xf32> to vector<8x32xf32>
    %242 = arith.mulf %237, %241 : vector<8x32xf32>
    %c0_150 = arith.constant 0 : index
    %c0_151 = arith.constant 0 : index
    %243 = vector.load %arg20[%c0_150, %c0_151] : memref<1x32xf32, #tpu.memory_space<vmem>>, vector<1x32xf32>
    %244 = vector.broadcast %243 : vector<1x32xf32> to vector<8x32xf32>
    %245 = arith.mulf %242, %244 : vector<8x32xf32>
    %c0_152 = arith.constant 0 : index
    %c0_153 = arith.constant 0 : index
    %246 = vector.load %arg21[%c0_152, %c0_153] : memref<1x32xf32, #tpu.memory_space<vmem>>, vector<1x32xf32>
    %247 = vector.broadcast %246 : vector<1x32xf32> to vector<8x32xf32>
    %248 = arith.addf %245, %247 : vector<8x32xf32>
    %249 = arith.truncf %248 : vector<8x32xf32> to vector<8x32xbf16>
    %c0_154 = arith.constant 0 : index
    %c0_155 = arith.constant 0 : index
    %c0_156 = arith.constant 0 : index
    %250 = vector.load %arg22[%c0_154, %c0_155, %c0_156] : memref<1x8x32xbf16, #tpu.memory_space<vmem>>, vector<1x8x32xbf16>
    %251 = vector.shape_cast %250 : vector<1x8x32xbf16> to vector<8x32xbf16>
    %252 = vector.shape_cast %249 : vector<8x32xbf16> to vector<1x8x32xbf16>
    tpu.vector_store %arg22[%c0_154, %c0_155, %c0_156], %252 {strides = array<i32>} : memref<1x8x32xbf16, #tpu.memory_space<vmem>>, vector<1x8x32xbf16>,
    return
  }
  func.func @transform_0(%arg0: i32, %arg1: i32) -> (i32, i32, i32) {
    %c0_i32 = arith.constant 0 : i32
    %c0_i32_0 = arith.constant 0 : i32
    return %arg0, %arg1, %c0_i32 : i32, i32, i32
  }
  func.func @transform_1(%arg0: i32, %arg1: i32) -> (i32, i32, i32) {
    %c0_i32 = arith.constant 0 : i32
    %c0_i32_0 = arith.constant 0 : i32
    %c0_i32_1 = arith.constant 0 : i32
    return %arg0, %c0_i32, %c0_i32_0 : i32, i32, i32
  }
  func.func @transform_2(%arg0: i32, %arg1: i32) -> (i32, i32, i32) {
    %c0_i32 = arith.constant 0 : i32
    %c0_i32_0 = arith.constant 0 : i32
    return %arg0, %arg1, %c0_i32 : i32, i32, i32
  }
  func.func @transform_3(%arg0: i32, %arg1: i32) -> (i32, i32, i32) {
    %c0_i32 = arith.constant 0 : i32
    %c0_i32_0 = arith.constant 0 : i32
    %c0_i32_1 = arith.constant 0 : i32
    return %arg0, %c0_i32, %c0_i32_0 : i32, i32, i32
  }
  func.func @transform_4(%arg0: i32, %arg1: i32) -> (i32, i32, i32) {
    %c0_i32 = arith.constant 0 : i32
    %c0_i32_0 = arith.constant 0 : i32
    %c0_i32_1 = arith.constant 0 : i32
    %c0_i32_2 = arith.constant 0 : i32
    return %c0_i32, %c0_i32_0, %c0_i32_1 : i32, i32, i32
  }
  func.func @transform_5(%arg0: i32, %arg1: i32) -> (i32, i32, i32) {
    %c0_i32 = arith.constant 0 : i32
    %c0_i32_0 = arith.constant 0 : i32
    %c0_i32_1 = arith.constant 0 : i32
    %c0_i32_2 = arith.constant 0 : i32
    return %c0_i32, %c0_i32_0, %c0_i32_1 : i32, i32, i32
  }
  func.func @transform_6(%arg0: i32, %arg1: i32) -> (i32, i32, i32) {
    %c0_i32 = arith.constant 0 : i32
    %c0_i32_0 = arith.constant 0 : i32
    %c0_i32_1 = arith.constant 0 : i32
    %c0_i32_2 = arith.constant 0 : i32
    return %c0_i32, %c0_i32_0, %c0_i32_1 : i32, i32, i32
  }
  func.func @transform_7(%arg0: i32, %arg1: i32) -> (i32, i32, i32) {
    %c0_i32 = arith.constant 0 : i32
    %c0_i32_0 = arith.constant 0 : i32
    %c0_i32_1 = arith.constant 0 : i32
    %c0_i32_2 = arith.constant 0 : i32
    return %c0_i32, %c0_i32_0, %c0_i32_1 : i32, i32, i32
  }
  func.func @transform_8(%arg0: i32, %arg1: i32) -> (i32, i32, i32) {
    %c0_i32 = arith.constant 0 : i32
    %c0_i32_0 = arith.constant 0 : i32
    %c0_i32_1 = arith.constant 0 : i32
    %c0_i32_2 = arith.constant 0 : i32
    return %c0_i32, %c0_i32_0, %c0_i32_1 : i32, i32, i32
  }
  func.func @transform_9(%arg0: i32, %arg1: i32) -> (i32, i32, i32) {
    %c0_i32 = arith.constant 0 : i32
    %c0_i32_0 = arith.constant 0 : i32
    %c0_i32_1 = arith.constant 0 : i32
    %c0_i32_2 = arith.constant 0 : i32
    return %c0_i32, %c0_i32_0, %c0_i32_1 : i32, i32, i32
  }
  func.func @transform_10(%arg0: i32, %arg1: i32) -> (i32, i32, i32) {
    %c0_i32 = arith.constant 0 : i32
    %c0_i32_0 = arith.constant 0 : i32
    %c0_i32_1 = arith.constant 0 : i32
    %c0_i32_2 = arith.constant 0 : i32
    return %c0_i32, %c0_i32_0, %c0_i32_1 : i32, i32, i32
  }
  func.func @transform_11(%arg0: i32, %arg1: i32) -> (i32, i32) {
    %c0_i32 = arith.constant 0 : i32
    %c0_i32_0 = arith.constant 0 : i32
    %c0_i32_1 = arith.constant 0 : i32
    return %c0_i32, %c0_i32_0 : i32, i32
  }
  func.func @transform_12(%arg0: i32, %arg1: i32) -> (i32, i32) {
    %c0_i32 = arith.constant 0 : i32
    %c0_i32_0 = arith.constant 0 : i32
    %c0_i32_1 = arith.constant 0 : i32
    return %c0_i32, %c0_i32_0 : i32, i32
  }
  func.func @transform_13(%arg0: i32, %arg1: i32) -> (i32, i32) {
    %c0_i32 = arith.constant 0 : i32
    %c0_i32_0 = arith.constant 0 : i32
    %c0_i32_1 = arith.constant 0 : i32
    return %c0_i32, %c0_i32_0 : i32, i32
  }
  func.func @transform_14(%arg0: i32, %arg1: i32) -> (i32, i32) {
    %c0_i32 = arith.constant 0 : i32
    %c0_i32_0 = arith.constant 0 : i32
    %c0_i32_1 = arith.constant 0 : i32
    return %c0_i32, %c0_i32_0 : i32, i32
  }
  func.func @transform_15(%arg0: i32, %arg1: i32) -> (i32, i32) {
    %c0_i32 = arith.constant 0 : i32
    %c0_i32_0 = arith.constant 0 : i32
    %c0_i32_1 = arith.constant 0 : i32
    return %c0_i32, %c0_i32_0 : i32, i32
  }
  func.func @transform_16(%arg0: i32, %arg1: i32) -> (i32, i32) {
    %c0_i32 = arith.constant 0 : i32
    %c0_i32_0 = arith.constant 0 : i32
    %c0_i32_1 = arith.constant 0 : i32
    return %c0_i32, %c0_i32_0 : i32, i32
  }
  func.func @transform_17(%arg0: i32, %arg1: i32) -> (i32, i32) {
    %c0_i32 = arith.constant 0 : i32
    %c0_i32_0 = arith.constant 0 : i32
    %c0_i32_1 = arith.constant 0 : i32
    return %c0_i32, %c0_i32_0 : i32, i32
  }
  func.func @transform_18(%arg0: i32, %arg1: i32) -> (i32, i32) {
    %c0_i32 = arith.constant 0 : i32
    %c0_i32_0 = arith.constant 0 : i32
    %c0_i32_1 = arith.constant 0 : i32
    return %c0_i32, %c0_i32_0 : i32, i32
  }
  func.func @transform_19(%arg0: i32, %arg1: i32) -> (i32, i32) {
    %c0_i32 = arith.constant 0 : i32
    %c0_i32_0 = arith.constant 0 : i32
    %c0_i32_1 = arith.constant 0 : i32
    return %c0_i32, %c0_i32_0 : i32, i32
  }
  func.func @transform_20(%arg0: i32, %arg1: i32) -> (i32, i32, i32) {
    %c0_i32 = arith.constant 0 : i32
    %c0_i32_0 = arith.constant 0 : i32
    return %arg0, %arg1, %c0_i32 : i32, i32, i32
  }
}

module attributes {stable_mosaic.version = 11 : i64} {
  func.func @_cross_block_kernel(%arg0: i32, %arg1: i32, %arg2: memref<1x16x32xbf16, #tpu.memory_space<vmem>>, %arg3: memref<1x8x32xbf16, #tpu.memory_space<vmem>>, %arg4: memref<1x16x32xbf16, #tpu.memory_space<vmem>>, %arg5: memref<1x1x8xf32, #tpu.memory_space<vmem>>, %arg6: memref<4x32x8xbf16, #tpu.memory_space<vmem>>, %arg7: memref<4x1x8xf32, #tpu.memory_space<vmem>>, %arg8: memref<4x32x8xbf16, #tpu.memory_space<vmem>>, %arg9: memref<4x1x8xf32, #tpu.memory_space<vmem>>, %arg10: memref<4x32x8xbf16, #tpu.memory_space<vmem>>, %arg11: memref<4x1x8xf32, #tpu.memory_space<vmem>>, %arg12: memref<4x8x32xbf16, #tpu.memory_space<vmem>>, %arg13: memref<1x32xf32, #tpu.memory_space<vmem>>, %arg14: memref<1x32xf32, #tpu.memory_space<vmem>>, %arg15: memref<1x32xf32, #tpu.memory_space<vmem>>, %arg16: memref<32x32xbf16, #tpu.memory_space<vmem>>, %arg17: memref<1x32xf32, #tpu.memory_space<vmem>>, %arg18: memref<32x32xbf16, #tpu.memory_space<vmem>>, %arg19: memref<1x32xf32, #tpu.memory_space<vmem>>, %arg20: memref<1x32xf32, #tpu.memory_space<vmem>>, %arg21: memref<1x32xf32, #tpu.memory_space<vmem>>, %arg22: memref<1x16x32xbf16, #tpu.memory_space<vmem>>) attributes {dimension_semantics = [#tpu.dimension_semantics<parallel>, #tpu.dimension_semantics<parallel>], iteration_bounds = array<i64: 2, 1>, scalar_prefetch = 0 : i64, scratch_operands = 0 : i64, tpu.core_type = #tpu.core_type<tc>, window_params = [{transform_indices = @transform_0, window_bounds = array<i64: 1, 16, 32>}, {transform_indices = @transform_1, window_bounds = array<i64: 1, 8, 32>}, {transform_indices = @transform_2, window_bounds = array<i64: 1, 16, 32>}, {transform_indices = @transform_3, window_bounds = array<i64: 1, 1, 8>}, {pipeline_mode = #tpu.pipeline_mode<synchronous>, transform_indices = @transform_4, window_bounds = array<i64: 4, 32, 8>}, {pipeline_mode = #tpu.pipeline_mode<synchronous>, transform_indices = @transform_5, window_bounds = array<i64: 4, 1, 8>}, {pipeline_mode = #tpu.pipeline_mode<synchronous>, transform_indices = @transform_6, window_bounds = array<i64: 4, 32, 8>}, {pipeline_mode = #tpu.pipeline_mode<synchronous>, transform_indices = @transform_7, window_bounds = array<i64: 4, 1, 8>}, {pipeline_mode = #tpu.pipeline_mode<synchronous>, transform_indices = @transform_8, window_bounds = array<i64: 4, 32, 8>}, {pipeline_mode = #tpu.pipeline_mode<synchronous>, transform_indices = @transform_9, window_bounds = array<i64: 4, 1, 8>}, {pipeline_mode = #tpu.pipeline_mode<synchronous>, transform_indices = @transform_10, window_bounds = array<i64: 4, 8, 32>}, {pipeline_mode = #tpu.pipeline_mode<synchronous>, transform_indices = @transform_11, window_bounds = array<i64: 1, 32>}, {pipeline_mode = #tpu.pipeline_mode<synchronous>, transform_indices = @transform_12, window_bounds = array<i64: 1, 32>}, {pipeline_mode = #tpu.pipeline_mode<synchronous>, transform_indices = @transform_13, window_bounds = array<i64: 1, 32>}, {pipeline_mode = #tpu.pipeline_mode<synchronous>, transform_indices = @transform_14, window_bounds = array<i64: 32, 32>}, {pipeline_mode = #tpu.pipeline_mode<synchronous>, transform_indices = @transform_15, window_bounds = array<i64: 1, 32>}, {pipeline_mode = #tpu.pipeline_mode<synchronous>, transform_indices = @transform_16, window_bounds = array<i64: 32, 32>}, {pipeline_mode = #tpu.pipeline_mode<synchronous>, transform_indices = @transform_17, window_bounds = array<i64: 1, 32>}, {pipeline_mode = #tpu.pipeline_mode<synchronous>, transform_indices = @transform_18, window_bounds = array<i64: 1, 32>}, {pipeline_mode = #tpu.pipeline_mode<synchronous>, transform_indices = @transform_19, window_bounds = array<i64: 1, 32>}, {transform_indices = @transform_20, window_bounds = array<i64: 1, 16, 32>}]} {
    %c0 = arith.constant 0 : index
    %c0_0 = arith.constant 0 : index
    %c0_1 = arith.constant 0 : index
    %0 = vector.load %arg2[%c0, %c0_0, %c0_1] : memref<1x16x32xbf16, #tpu.memory_space<vmem>>, vector<1x16x32xbf16>
    %1 = vector.shape_cast %0 : vector<1x16x32xbf16> to vector<16x32xbf16>
    %c0_2 = arith.constant 0 : index
    %c0_3 = arith.constant 0 : index
    %c0_4 = arith.constant 0 : index
    %2 = vector.load %arg3[%c0_2, %c0_3, %c0_4] : memref<1x8x32xbf16, #tpu.memory_space<vmem>>, vector<1x8x32xbf16>
    %3 = vector.shape_cast %2 : vector<1x8x32xbf16> to vector<8x32xbf16>
    %c0_5 = arith.constant 0 : index
    %c0_6 = arith.constant 0 : index
    %c0_7 = arith.constant 0 : index
    %4 = vector.load %arg5[%c0_5, %c0_6, %c0_7] : memref<1x1x8xf32, #tpu.memory_space<vmem>>, vector<1x1x8xf32>
    %5 = vector.shape_cast %4 : vector<1x1x8xf32> to vector<1x8xf32>
    %6 = vector.shape_cast %5 : vector<1x8xf32> to vector<1x8xf32>
    %7 = vector.broadcast %6 : vector<1x8xf32> to vector<16x8xf32>
    %c0_8 = arith.constant 0 : index
    %c0_9 = arith.constant 0 : index
    %8 = vector.load %arg13[%c0_8, %c0_9] : memref<1x32xf32, #tpu.memory_space<vmem>>, vector<1x32xf32>
    %c0_10 = arith.constant 0 : index
    %c0_11 = arith.constant 0 : index
    %c0_12 = arith.constant 0 : index
    %9 = vector.load %arg6[%c0_10, %c0_11, %c0_12] : memref<4x32x8xbf16, #tpu.memory_space<vmem>>, vector<1x32x8xbf16>
    %10 = vector.shape_cast %9 : vector<1x32x8xbf16> to vector<32x8xbf16>
    %cst = arith.constant dense<0.000000e+00> : vector<16x8xf32>
    %11 = tpu.matmul %1, %10, %cst {dimension_numbers = #tpu.dot_dimension_numbers<[1], [0], [0], [1], [0, 0, 1, 1], [], []>} : vector<16x32xbf16>, vector<32x8xbf16>, vector<16x8xf32> -> vector<16x8xf32>
    %c0_13 = arith.constant 0 : index
    %c0_14 = arith.constant 0 : index
    %c0_15 = arith.constant 0 : index
    %12 = vector.load %arg7[%c0_13, %c0_14, %c0_15] : memref<4x1x8xf32, #tpu.memory_space<vmem>>, vector<1x1x8xf32>
    %13 = vector.shape_cast %12 : vector<1x1x8xf32> to vector<1x8xf32>
    %14 = vector.broadcast %13 : vector<1x8xf32> to vector<16x8xf32>
    %15 = arith.addf %11, %14 : vector<16x8xf32>
    %16 = arith.truncf %15 : vector<16x8xf32> to vector<16x8xbf16>
    %c0_16 = arith.constant 0 : index
    %c0_17 = arith.constant 0 : index
    %c0_18 = arith.constant 0 : index
    %17 = vector.load %arg8[%c0_16, %c0_17, %c0_18] : memref<4x32x8xbf16, #tpu.memory_space<vmem>>, vector<1x32x8xbf16>
    %18 = vector.shape_cast %17 : vector<1x32x8xbf16> to vector<32x8xbf16>
    %cst_19 = arith.constant dense<0.000000e+00> : vector<8x8xf32>
    %19 = tpu.matmul %3, %18, %cst_19 {dimension_numbers = #tpu.dot_dimension_numbers<[1], [0], [0], [1], [0, 0, 1, 1], [], []>} : vector<8x32xbf16>, vector<32x8xbf16>, vector<8x8xf32> -> vector<8x8xf32>
    %c0_20 = arith.constant 0 : index
    %c0_21 = arith.constant 0 : index
    %c0_22 = arith.constant 0 : index
    %20 = vector.load %arg9[%c0_20, %c0_21, %c0_22] : memref<4x1x8xf32, #tpu.memory_space<vmem>>, vector<1x1x8xf32>
    %21 = vector.shape_cast %20 : vector<1x1x8xf32> to vector<1x8xf32>
    %22 = vector.broadcast %21 : vector<1x8xf32> to vector<8x8xf32>
    %23 = arith.addf %19, %22 : vector<8x8xf32>
    %24 = arith.truncf %23 : vector<8x8xf32> to vector<8x8xbf16>
    %c0_23 = arith.constant 0 : index
    %c0_24 = arith.constant 0 : index
    %c0_25 = arith.constant 0 : index
    %25 = vector.load %arg10[%c0_23, %c0_24, %c0_25] : memref<4x32x8xbf16, #tpu.memory_space<vmem>>, vector<1x32x8xbf16>
    %26 = vector.shape_cast %25 : vector<1x32x8xbf16> to vector<32x8xbf16>
    %cst_26 = arith.constant dense<0.000000e+00> : vector<8x8xf32>
    %27 = tpu.matmul %3, %26, %cst_26 {dimension_numbers = #tpu.dot_dimension_numbers<[1], [0], [0], [1], [0, 0, 1, 1], [], []>} : vector<8x32xbf16>, vector<32x8xbf16>, vector<8x8xf32> -> vector<8x8xf32>
    %c0_27 = arith.constant 0 : index
    %c0_28 = arith.constant 0 : index
    %c0_29 = arith.constant 0 : index
    %28 = vector.load %arg11[%c0_27, %c0_28, %c0_29] : memref<4x1x8xf32, #tpu.memory_space<vmem>>, vector<1x1x8xf32>
    %29 = vector.shape_cast %28 : vector<1x1x8xf32> to vector<1x8xf32>
    %30 = vector.broadcast %29 : vector<1x8xf32> to vector<8x8xf32>
    %31 = arith.addf %27, %30 : vector<8x8xf32>
    %32 = arith.truncf %31 : vector<8x8xf32> to vector<8x8xbf16>
    %cst_30 = arith.constant dense<0.000000e+00> : vector<16x8xf32>
    %33 = tpu.matmul %16, %24, %cst_30 {dimension_numbers = #tpu.dot_dimension_numbers<[1], [1], [0], [0], [0, 0, 1, 0], [], []>} : vector<16x8xbf16>, vector<8x8xbf16>, vector<16x8xf32> -> vector<16x8xf32>
    %34 = arith.addf %33, %7 : vector<16x8xf32>
    %cst_31 = arith.constant dense<0xFF800000> : vector<16xf32>
    %35 = vector.multi_reduction <maximumf>, %34, %cst_31 [1] : vector<16x8xf32> to vector<16xf32>
    %36 = vector.shape_cast %35 : vector<16xf32> to vector<16x1xf32>
    %37 = vector.broadcast %36 : vector<16x1xf32> to vector<16x8xf32>
    %38 = arith.subf %34, %37 : vector<16x8xf32>
    %39 = math.exp %38 : vector<16x8xf32>
    %cst_32 = arith.constant dense<0.000000e+00> : vector<16xf32>
    %40 = vector.multi_reduction <add>, %39, %cst_32 [1] : vector<16x8xf32> to vector<16xf32>
    %41 = vector.shape_cast %40 : vector<16xf32> to vector<16x1xf32>
    %42 = tpu.reciprocal %41 {approx = true} : vector<16x1xf32> -> vector<16x1xf32>
    %43 = vector.broadcast %42 : vector<16x1xf32> to vector<16x8xf32>
    %44 = arith.mulf %39, %43 : vector<16x8xf32>
    %45 = arith.truncf %44 : vector<16x8xf32> to vector<16x8xbf16>
    %cst_33 = arith.constant dense<0.000000e+00> : vector<16x8xf32>
    %46 = tpu.matmul %45, %32, %cst_33 {dimension_numbers = #tpu.dot_dimension_numbers<[1], [0], [0], [1], [0, 0, 1, 1], [], []>} : vector<16x8xbf16>, vector<8x8xbf16>, vector<16x8xf32> -> vector<16x8xf32>
    %47 = arith.truncf %46 : vector<16x8xf32> to vector<16x8xbf16>
    %c0_34 = arith.constant 0 : index
    %c0_35 = arith.constant 0 : index
    %c0_36 = arith.constant 0 : index
    %48 = vector.load %arg12[%c0_34, %c0_35, %c0_36] : memref<4x8x32xbf16, #tpu.memory_space<vmem>>, vector<1x8x32xbf16>
    %49 = vector.shape_cast %48 : vector<1x8x32xbf16> to vector<8x32xbf16>
    %cst_37 = arith.constant dense<0.000000e+00> : vector<16x32xf32>
    %50 = tpu.matmul %47, %49, %cst_37 {dimension_numbers = #tpu.dot_dimension_numbers<[1], [0], [0], [1], [0, 0, 1, 1], [], []>} : vector<16x8xbf16>, vector<8x32xbf16>, vector<16x32xf32> -> vector<16x32xf32>
    %51 = vector.broadcast %8 : vector<1x32xf32> to vector<16x32xf32>
    %52 = arith.addf %51, %50 : vector<16x32xf32>
    %c1 = arith.constant 1 : index
    %c0_38 = arith.constant 0 : index
    %c0_39 = arith.constant 0 : index
    %53 = vector.load %arg6[%c1, %c0_38, %c0_39] : memref<4x32x8xbf16, #tpu.memory_space<vmem>>, vector<1x32x8xbf16>
    %54 = vector.shape_cast %53 : vector<1x32x8xbf16> to vector<32x8xbf16>
    %cst_40 = arith.constant dense<0.000000e+00> : vector<16x8xf32>
    %55 = tpu.matmul %1, %54, %cst_40 {dimension_numbers = #tpu.dot_dimension_numbers<[1], [0], [0], [1], [0, 0, 1, 1], [], []>} : vector<16x32xbf16>, vector<32x8xbf16>, vector<16x8xf32> -> vector<16x8xf32>
    %c1_41 = arith.constant 1 : index
    %c0_42 = arith.constant 0 : index
    %c0_43 = arith.constant 0 : index
    %56 = vector.load %arg7[%c1_41, %c0_42, %c0_43] : memref<4x1x8xf32, #tpu.memory_space<vmem>>, vector<1x1x8xf32>
    %57 = vector.shape_cast %56 : vector<1x1x8xf32> to vector<1x8xf32>
    %58 = vector.broadcast %57 : vector<1x8xf32> to vector<16x8xf32>
    %59 = arith.addf %55, %58 : vector<16x8xf32>
    %60 = arith.truncf %59 : vector<16x8xf32> to vector<16x8xbf16>
    %c1_44 = arith.constant 1 : index
    %c0_45 = arith.constant 0 : index
    %c0_46 = arith.constant 0 : index
    %61 = vector.load %arg8[%c1_44, %c0_45, %c0_46] : memref<4x32x8xbf16, #tpu.memory_space<vmem>>, vector<1x32x8xbf16>
    %62 = vector.shape_cast %61 : vector<1x32x8xbf16> to vector<32x8xbf16>
    %cst_47 = arith.constant dense<0.000000e+00> : vector<8x8xf32>
    %63 = tpu.matmul %3, %62, %cst_47 {dimension_numbers = #tpu.dot_dimension_numbers<[1], [0], [0], [1], [0, 0, 1, 1], [], []>} : vector<8x32xbf16>, vector<32x8xbf16>, vector<8x8xf32> -> vector<8x8xf32>
    %c1_48 = arith.constant 1 : index
    %c0_49 = arith.constant 0 : index
    %c0_50 = arith.constant 0 : index
    %64 = vector.load %arg9[%c1_48, %c0_49, %c0_50] : memref<4x1x8xf32, #tpu.memory_space<vmem>>, vector<1x1x8xf32>
    %65 = vector.shape_cast %64 : vector<1x1x8xf32> to vector<1x8xf32>
    %66 = vector.broadcast %65 : vector<1x8xf32> to vector<8x8xf32>
    %67 = arith.addf %63, %66 : vector<8x8xf32>
    %68 = arith.truncf %67 : vector<8x8xf32> to vector<8x8xbf16>
    %c1_51 = arith.constant 1 : index
    %c0_52 = arith.constant 0 : index
    %c0_53 = arith.constant 0 : index
    %69 = vector.load %arg10[%c1_51, %c0_52, %c0_53] : memref<4x32x8xbf16, #tpu.memory_space<vmem>>, vector<1x32x8xbf16>
    %70 = vector.shape_cast %69 : vector<1x32x8xbf16> to vector<32x8xbf16>
    %cst_54 = arith.constant dense<0.000000e+00> : vector<8x8xf32>
    %71 = tpu.matmul %3, %70, %cst_54 {dimension_numbers = #tpu.dot_dimension_numbers<[1], [0], [0], [1], [0, 0, 1, 1], [], []>} : vector<8x32xbf16>, vector<32x8xbf16>, vector<8x8xf32> -> vector<8x8xf32>
    %c1_55 = arith.constant 1 : index
    %c0_56 = arith.constant 0 : index
    %c0_57 = arith.constant 0 : index
    %72 = vector.load %arg11[%c1_55, %c0_56, %c0_57] : memref<4x1x8xf32, #tpu.memory_space<vmem>>, vector<1x1x8xf32>
    %73 = vector.shape_cast %72 : vector<1x1x8xf32> to vector<1x8xf32>
    %74 = vector.broadcast %73 : vector<1x8xf32> to vector<8x8xf32>
    %75 = arith.addf %71, %74 : vector<8x8xf32>
    %76 = arith.truncf %75 : vector<8x8xf32> to vector<8x8xbf16>
    %cst_58 = arith.constant dense<0.000000e+00> : vector<16x8xf32>
    %77 = tpu.matmul %60, %68, %cst_58 {dimension_numbers = #tpu.dot_dimension_numbers<[1], [1], [0], [0], [0, 0, 1, 0], [], []>} : vector<16x8xbf16>, vector<8x8xbf16>, vector<16x8xf32> -> vector<16x8xf32>
    %78 = arith.addf %77, %7 : vector<16x8xf32>
    %cst_59 = arith.constant dense<0xFF800000> : vector<16xf32>
    %79 = vector.multi_reduction <maximumf>, %78, %cst_59 [1] : vector<16x8xf32> to vector<16xf32>
    %80 = vector.shape_cast %79 : vector<16xf32> to vector<16x1xf32>
    %81 = vector.broadcast %80 : vector<16x1xf32> to vector<16x8xf32>
    %82 = arith.subf %78, %81 : vector<16x8xf32>
    %83 = math.exp %82 : vector<16x8xf32>
    %cst_60 = arith.constant dense<0.000000e+00> : vector<16xf32>
    %84 = vector.multi_reduction <add>, %83, %cst_60 [1] : vector<16x8xf32> to vector<16xf32>
    %85 = vector.shape_cast %84 : vector<16xf32> to vector<16x1xf32>
    %86 = tpu.reciprocal %85 {approx = true} : vector<16x1xf32> -> vector<16x1xf32>
    %87 = vector.broadcast %86 : vector<16x1xf32> to vector<16x8xf32>
    %88 = arith.mulf %83, %87 : vector<16x8xf32>
    %89 = arith.truncf %88 : vector<16x8xf32> to vector<16x8xbf16>
    %cst_61 = arith.constant dense<0.000000e+00> : vector<16x8xf32>
    %90 = tpu.matmul %89, %76, %cst_61 {dimension_numbers = #tpu.dot_dimension_numbers<[1], [0], [0], [1], [0, 0, 1, 1], [], []>} : vector<16x8xbf16>, vector<8x8xbf16>, vector<16x8xf32> -> vector<16x8xf32>
    %91 = arith.truncf %90 : vector<16x8xf32> to vector<16x8xbf16>
    %c1_62 = arith.constant 1 : index
    %c0_63 = arith.constant 0 : index
    %c0_64 = arith.constant 0 : index
    %92 = vector.load %arg12[%c1_62, %c0_63, %c0_64] : memref<4x8x32xbf16, #tpu.memory_space<vmem>>, vector<1x8x32xbf16>
    %93 = vector.shape_cast %92 : vector<1x8x32xbf16> to vector<8x32xbf16>
    %cst_65 = arith.constant dense<0.000000e+00> : vector<16x32xf32>
    %94 = tpu.matmul %91, %93, %cst_65 {dimension_numbers = #tpu.dot_dimension_numbers<[1], [0], [0], [1], [0, 0, 1, 1], [], []>} : vector<16x8xbf16>, vector<8x32xbf16>, vector<16x32xf32> -> vector<16x32xf32>
    %95 = arith.addf %52, %94 : vector<16x32xf32>
    %c2 = arith.constant 2 : index
    %c0_66 = arith.constant 0 : index
    %c0_67 = arith.constant 0 : index
    %96 = vector.load %arg6[%c2, %c0_66, %c0_67] : memref<4x32x8xbf16, #tpu.memory_space<vmem>>, vector<1x32x8xbf16>
    %97 = vector.shape_cast %96 : vector<1x32x8xbf16> to vector<32x8xbf16>
    %cst_68 = arith.constant dense<0.000000e+00> : vector<16x8xf32>
    %98 = tpu.matmul %1, %97, %cst_68 {dimension_numbers = #tpu.dot_dimension_numbers<[1], [0], [0], [1], [0, 0, 1, 1], [], []>} : vector<16x32xbf16>, vector<32x8xbf16>, vector<16x8xf32> -> vector<16x8xf32>
    %c2_69 = arith.constant 2 : index
    %c0_70 = arith.constant 0 : index
    %c0_71 = arith.constant 0 : index
    %99 = vector.load %arg7[%c2_69, %c0_70, %c0_71] : memref<4x1x8xf32, #tpu.memory_space<vmem>>, vector<1x1x8xf32>
    %100 = vector.shape_cast %99 : vector<1x1x8xf32> to vector<1x8xf32>
    %101 = vector.broadcast %100 : vector<1x8xf32> to vector<16x8xf32>
    %102 = arith.addf %98, %101 : vector<16x8xf32>
    %103 = arith.truncf %102 : vector<16x8xf32> to vector<16x8xbf16>
    %c2_72 = arith.constant 2 : index
    %c0_73 = arith.constant 0 : index
    %c0_74 = arith.constant 0 : index
    %104 = vector.load %arg8[%c2_72, %c0_73, %c0_74] : memref<4x32x8xbf16, #tpu.memory_space<vmem>>, vector<1x32x8xbf16>
    %105 = vector.shape_cast %104 : vector<1x32x8xbf16> to vector<32x8xbf16>
    %cst_75 = arith.constant dense<0.000000e+00> : vector<8x8xf32>
    %106 = tpu.matmul %3, %105, %cst_75 {dimension_numbers = #tpu.dot_dimension_numbers<[1], [0], [0], [1], [0, 0, 1, 1], [], []>} : vector<8x32xbf16>, vector<32x8xbf16>, vector<8x8xf32> -> vector<8x8xf32>
    %c2_76 = arith.constant 2 : index
    %c0_77 = arith.constant 0 : index
    %c0_78 = arith.constant 0 : index
    %107 = vector.load %arg9[%c2_76, %c0_77, %c0_78] : memref<4x1x8xf32, #tpu.memory_space<vmem>>, vector<1x1x8xf32>
    %108 = vector.shape_cast %107 : vector<1x1x8xf32> to vector<1x8xf32>
    %109 = vector.broadcast %108 : vector<1x8xf32> to vector<8x8xf32>
    %110 = arith.addf %106, %109 : vector<8x8xf32>
    %111 = arith.truncf %110 : vector<8x8xf32> to vector<8x8xbf16>
    %c2_79 = arith.constant 2 : index
    %c0_80 = arith.constant 0 : index
    %c0_81 = arith.constant 0 : index
    %112 = vector.load %arg10[%c2_79, %c0_80, %c0_81] : memref<4x32x8xbf16, #tpu.memory_space<vmem>>, vector<1x32x8xbf16>
    %113 = vector.shape_cast %112 : vector<1x32x8xbf16> to vector<32x8xbf16>
    %cst_82 = arith.constant dense<0.000000e+00> : vector<8x8xf32>
    %114 = tpu.matmul %3, %113, %cst_82 {dimension_numbers = #tpu.dot_dimension_numbers<[1], [0], [0], [1], [0, 0, 1, 1], [], []>} : vector<8x32xbf16>, vector<32x8xbf16>, vector<8x8xf32> -> vector<8x8xf32>
    %c2_83 = arith.constant 2 : index
    %c0_84 = arith.constant 0 : index
    %c0_85 = arith.constant 0 : index
    %115 = vector.load %arg11[%c2_83, %c0_84, %c0_85] : memref<4x1x8xf32, #tpu.memory_space<vmem>>, vector<1x1x8xf32>
    %116 = vector.shape_cast %115 : vector<1x1x8xf32> to vector<1x8xf32>
    %117 = vector.broadcast %116 : vector<1x8xf32> to vector<8x8xf32>
    %118 = arith.addf %114, %117 : vector<8x8xf32>
    %119 = arith.truncf %118 : vector<8x8xf32> to vector<8x8xbf16>
    %cst_86 = arith.constant dense<0.000000e+00> : vector<16x8xf32>
    %120 = tpu.matmul %103, %111, %cst_86 {dimension_numbers = #tpu.dot_dimension_numbers<[1], [1], [0], [0], [0, 0, 1, 0], [], []>} : vector<16x8xbf16>, vector<8x8xbf16>, vector<16x8xf32> -> vector<16x8xf32>
    %121 = arith.addf %120, %7 : vector<16x8xf32>
    %cst_87 = arith.constant dense<0xFF800000> : vector<16xf32>
    %122 = vector.multi_reduction <maximumf>, %121, %cst_87 [1] : vector<16x8xf32> to vector<16xf32>
    %123 = vector.shape_cast %122 : vector<16xf32> to vector<16x1xf32>
    %124 = vector.broadcast %123 : vector<16x1xf32> to vector<16x8xf32>
    %125 = arith.subf %121, %124 : vector<16x8xf32>
    %126 = math.exp %125 : vector<16x8xf32>
    %cst_88 = arith.constant dense<0.000000e+00> : vector<16xf32>
    %127 = vector.multi_reduction <add>, %126, %cst_88 [1] : vector<16x8xf32> to vector<16xf32>
    %128 = vector.shape_cast %127 : vector<16xf32> to vector<16x1xf32>
    %129 = tpu.reciprocal %128 {approx = true} : vector<16x1xf32> -> vector<16x1xf32>
    %130 = vector.broadcast %129 : vector<16x1xf32> to vector<16x8xf32>
    %131 = arith.mulf %126, %130 : vector<16x8xf32>
    %132 = arith.truncf %131 : vector<16x8xf32> to vector<16x8xbf16>
    %cst_89 = arith.constant dense<0.000000e+00> : vector<16x8xf32>
    %133 = tpu.matmul %132, %119, %cst_89 {dimension_numbers = #tpu.dot_dimension_numbers<[1], [0], [0], [1], [0, 0, 1, 1], [], []>} : vector<16x8xbf16>, vector<8x8xbf16>, vector<16x8xf32> -> vector<16x8xf32>
    %134 = arith.truncf %133 : vector<16x8xf32> to vector<16x8xbf16>
    %c2_90 = arith.constant 2 : index
    %c0_91 = arith.constant 0 : index
    %c0_92 = arith.constant 0 : index
    %135 = vector.load %arg12[%c2_90, %c0_91, %c0_92] : memref<4x8x32xbf16, #tpu.memory_space<vmem>>, vector<1x8x32xbf16>
    %136 = vector.shape_cast %135 : vector<1x8x32xbf16> to vector<8x32xbf16>
    %cst_93 = arith.constant dense<0.000000e+00> : vector<16x32xf32>
    %137 = tpu.matmul %134, %136, %cst_93 {dimension_numbers = #tpu.dot_dimension_numbers<[1], [0], [0], [1], [0, 0, 1, 1], [], []>} : vector<16x8xbf16>, vector<8x32xbf16>, vector<16x32xf32> -> vector<16x32xf32>
    %138 = arith.addf %95, %137 : vector<16x32xf32>
    %c3 = arith.constant 3 : index
    %c0_94 = arith.constant 0 : index
    %c0_95 = arith.constant 0 : index
    %139 = vector.load %arg6[%c3, %c0_94, %c0_95] : memref<4x32x8xbf16, #tpu.memory_space<vmem>>, vector<1x32x8xbf16>
    %140 = vector.shape_cast %139 : vector<1x32x8xbf16> to vector<32x8xbf16>
    %cst_96 = arith.constant dense<0.000000e+00> : vector<16x8xf32>
    %141 = tpu.matmul %1, %140, %cst_96 {dimension_numbers = #tpu.dot_dimension_numbers<[1], [0], [0], [1], [0, 0, 1, 1], [], []>} : vector<16x32xbf16>, vector<32x8xbf16>, vector<16x8xf32> -> vector<16x8xf32>
    %c3_97 = arith.constant 3 : index
    %c0_98 = arith.constant 0 : index
    %c0_99 = arith.constant 0 : index
    %142 = vector.load %arg7[%c3_97, %c0_98, %c0_99] : memref<4x1x8xf32, #tpu.memory_space<vmem>>, vector<1x1x8xf32>
    %143 = vector.shape_cast %142 : vector<1x1x8xf32> to vector<1x8xf32>
    %144 = vector.broadcast %143 : vector<1x8xf32> to vector<16x8xf32>
    %145 = arith.addf %141, %144 : vector<16x8xf32>
    %146 = arith.truncf %145 : vector<16x8xf32> to vector<16x8xbf16>
    %c3_100 = arith.constant 3 : index
    %c0_101 = arith.constant 0 : index
    %c0_102 = arith.constant 0 : index
    %147 = vector.load %arg8[%c3_100, %c0_101, %c0_102] : memref<4x32x8xbf16, #tpu.memory_space<vmem>>, vector<1x32x8xbf16>
    %148 = vector.shape_cast %147 : vector<1x32x8xbf16> to vector<32x8xbf16>
    %cst_103 = arith.constant dense<0.000000e+00> : vector<8x8xf32>
    %149 = tpu.matmul %3, %148, %cst_103 {dimension_numbers = #tpu.dot_dimension_numbers<[1], [0], [0], [1], [0, 0, 1, 1], [], []>} : vector<8x32xbf16>, vector<32x8xbf16>, vector<8x8xf32> -> vector<8x8xf32>
    %c3_104 = arith.constant 3 : index
    %c0_105 = arith.constant 0 : index
    %c0_106 = arith.constant 0 : index
    %150 = vector.load %arg9[%c3_104, %c0_105, %c0_106] : memref<4x1x8xf32, #tpu.memory_space<vmem>>, vector<1x1x8xf32>
    %151 = vector.shape_cast %150 : vector<1x1x8xf32> to vector<1x8xf32>
    %152 = vector.broadcast %151 : vector<1x8xf32> to vector<8x8xf32>
    %153 = arith.addf %149, %152 : vector<8x8xf32>
    %154 = arith.truncf %153 : vector<8x8xf32> to vector<8x8xbf16>
    %c3_107 = arith.constant 3 : index
    %c0_108 = arith.constant 0 : index
    %c0_109 = arith.constant 0 : index
    %155 = vector.load %arg10[%c3_107, %c0_108, %c0_109] : memref<4x32x8xbf16, #tpu.memory_space<vmem>>, vector<1x32x8xbf16>
    %156 = vector.shape_cast %155 : vector<1x32x8xbf16> to vector<32x8xbf16>
    %cst_110 = arith.constant dense<0.000000e+00> : vector<8x8xf32>
    %157 = tpu.matmul %3, %156, %cst_110 {dimension_numbers = #tpu.dot_dimension_numbers<[1], [0], [0], [1], [0, 0, 1, 1], [], []>} : vector<8x32xbf16>, vector<32x8xbf16>, vector<8x8xf32> -> vector<8x8xf32>
    %c3_111 = arith.constant 3 : index
    %c0_112 = arith.constant 0 : index
    %c0_113 = arith.constant 0 : index
    %158 = vector.load %arg11[%c3_111, %c0_112, %c0_113] : memref<4x1x8xf32, #tpu.memory_space<vmem>>, vector<1x1x8xf32>
    %159 = vector.shape_cast %158 : vector<1x1x8xf32> to vector<1x8xf32>
    %160 = vector.broadcast %159 : vector<1x8xf32> to vector<8x8xf32>
    %161 = arith.addf %157, %160 : vector<8x8xf32>
    %162 = arith.truncf %161 : vector<8x8xf32> to vector<8x8xbf16>
    %cst_114 = arith.constant dense<0.000000e+00> : vector<16x8xf32>
    %163 = tpu.matmul %146, %154, %cst_114 {dimension_numbers = #tpu.dot_dimension_numbers<[1], [1], [0], [0], [0, 0, 1, 0], [], []>} : vector<16x8xbf16>, vector<8x8xbf16>, vector<16x8xf32> -> vector<16x8xf32>
    %164 = arith.addf %163, %7 : vector<16x8xf32>
    %cst_115 = arith.constant dense<0xFF800000> : vector<16xf32>
    %165 = vector.multi_reduction <maximumf>, %164, %cst_115 [1] : vector<16x8xf32> to vector<16xf32>
    %166 = vector.shape_cast %165 : vector<16xf32> to vector<16x1xf32>
    %167 = vector.broadcast %166 : vector<16x1xf32> to vector<16x8xf32>
    %168 = arith.subf %164, %167 : vector<16x8xf32>
    %169 = math.exp %168 : vector<16x8xf32>
    %cst_116 = arith.constant dense<0.000000e+00> : vector<16xf32>
    %170 = vector.multi_reduction <add>, %169, %cst_116 [1] : vector<16x8xf32> to vector<16xf32>
    %171 = vector.shape_cast %170 : vector<16xf32> to vector<16x1xf32>
    %172 = tpu.reciprocal %171 {approx = true} : vector<16x1xf32> -> vector<16x1xf32>
    %173 = vector.broadcast %172 : vector<16x1xf32> to vector<16x8xf32>
    %174 = arith.mulf %169, %173 : vector<16x8xf32>
    %175 = arith.truncf %174 : vector<16x8xf32> to vector<16x8xbf16>
    %cst_117 = arith.constant dense<0.000000e+00> : vector<16x8xf32>
    %176 = tpu.matmul %175, %162, %cst_117 {dimension_numbers = #tpu.dot_dimension_numbers<[1], [0], [0], [1], [0, 0, 1, 1], [], []>} : vector<16x8xbf16>, vector<8x8xbf16>, vector<16x8xf32> -> vector<16x8xf32>
    %177 = arith.truncf %176 : vector<16x8xf32> to vector<16x8xbf16>
    %c3_118 = arith.constant 3 : index
    %c0_119 = arith.constant 0 : index
    %c0_120 = arith.constant 0 : index
    %178 = vector.load %arg12[%c3_118, %c0_119, %c0_120] : memref<4x8x32xbf16, #tpu.memory_space<vmem>>, vector<1x8x32xbf16>
    %179 = vector.shape_cast %178 : vector<1x8x32xbf16> to vector<8x32xbf16>
    %cst_121 = arith.constant dense<0.000000e+00> : vector<16x32xf32>
    %180 = tpu.matmul %177, %179, %cst_121 {dimension_numbers = #tpu.dot_dimension_numbers<[1], [0], [0], [1], [0, 0, 1, 1], [], []>} : vector<16x8xbf16>, vector<8x32xbf16>, vector<16x32xf32> -> vector<16x32xf32>
    %181 = arith.addf %138, %180 : vector<16x32xf32>
    %c0_122 = arith.constant 0 : index
    %c0_123 = arith.constant 0 : index
    %c0_124 = arith.constant 0 : index
    %182 = vector.load %arg4[%c0_122, %c0_123, %c0_124] : memref<1x16x32xbf16, #tpu.memory_space<vmem>>, vector<1x16x32xbf16>
    %183 = vector.shape_cast %182 : vector<1x16x32xbf16> to vector<16x32xbf16>
    %184 = arith.extf %183 : vector<16x32xbf16> to vector<16x32xf32>
    %185 = arith.addf %184, %181 : vector<16x32xf32>
    %cst_125 = arith.constant dense<0.000000e+00> : vector<16xf32>
    %186 = vector.multi_reduction <add>, %185, %cst_125 [1] : vector<16x32xf32> to vector<16xf32>
    %187 = vector.shape_cast %186 : vector<16xf32> to vector<16x1xf32>
    %cst_126 = arith.constant 3.200000e+01 : f32
    %188 = vector.broadcast %cst_126 : f32 to vector<16x1xf32>
    %189 = arith.divf %187, %188 : vector<16x1xf32>
    %190 = vector.broadcast %189 : vector<16x1xf32> to vector<16x32xf32>
    %191 = arith.subf %185, %190 : vector<16x32xf32>
    %192 = arith.mulf %191, %191 : vector<16x32xf32>
    %cst_127 = arith.constant dense<0.000000e+00> : vector<16xf32>
    %193 = vector.multi_reduction <add>, %192, %cst_127 [1] : vector<16x32xf32> to vector<16xf32>
    %194 = vector.shape_cast %193 : vector<16xf32> to vector<16x1xf32>
    %cst_128 = arith.constant 3.200000e+01 : f32
    %195 = vector.broadcast %cst_128 : f32 to vector<16x1xf32>
    %196 = arith.divf %194, %195 : vector<16x1xf32>
    %197 = vector.broadcast %189 : vector<16x1xf32> to vector<16x32xf32>
    %198 = arith.subf %185, %197 : vector<16x32xf32>
    %cst_129 = arith.constant 9.99999974E-6 : f32
    %199 = vector.broadcast %cst_129 : f32 to vector<16x1xf32>
    %200 = arith.addf %196, %199 : vector<16x1xf32>
    %201 = math.rsqrt %200 : vector<16x1xf32>
    %202 = vector.broadcast %201 : vector<16x1xf32> to vector<16x32xf32>
    %203 = arith.mulf %198, %202 : vector<16x32xf32>
    %c0_130 = arith.constant 0 : index
    %c0_131 = arith.constant 0 : index
    %204 = vector.load %arg14[%c0_130, %c0_131] : memref<1x32xf32, #tpu.memory_space<vmem>>, vector<1x32xf32>
    %205 = vector.broadcast %204 : vector<1x32xf32> to vector<16x32xf32>
    %206 = arith.mulf %203, %205 : vector<16x32xf32>
    %c0_132 = arith.constant 0 : index
    %c0_133 = arith.constant 0 : index
    %207 = vector.load %arg15[%c0_132, %c0_133] : memref<1x32xf32, #tpu.memory_space<vmem>>, vector<1x32xf32>
    %208 = vector.broadcast %207 : vector<1x32xf32> to vector<16x32xf32>
    %209 = arith.addf %206, %208 : vector<16x32xf32>
    %210 = arith.truncf %209 : vector<16x32xf32> to vector<16x32xbf16>
    %c0_134 = arith.constant 0 : index
    %c0_135 = arith.constant 0 : index
    %211 = vector.load %arg16[%c0_134, %c0_135] : memref<32x32xbf16, #tpu.memory_space<vmem>>, vector<32x32xbf16>
    %cst_136 = arith.constant dense<0.000000e+00> : vector<16x32xf32>
    %212 = tpu.matmul %210, %211, %cst_136 {dimension_numbers = #tpu.dot_dimension_numbers<[1], [0], [0], [1], [0, 0, 1, 1], [], []>} : vector<16x32xbf16>, vector<32x32xbf16>, vector<16x32xf32> -> vector<16x32xf32>
    %c0_137 = arith.constant 0 : index
    %c0_138 = arith.constant 0 : index
    %213 = vector.load %arg17[%c0_137, %c0_138] : memref<1x32xf32, #tpu.memory_space<vmem>>, vector<1x32xf32>
    %214 = vector.broadcast %213 : vector<1x32xf32> to vector<16x32xf32>
    %215 = arith.addf %212, %214 : vector<16x32xf32>
    %cst_139 = arith.constant 0.000000e+00 : f32
    %216 = vector.broadcast %cst_139 : f32 to vector<16x32xf32>
    %217 = arith.maximumf %215, %216 : vector<16x32xf32>
    %218 = arith.truncf %217 : vector<16x32xf32> to vector<16x32xbf16>
    %c0_140 = arith.constant 0 : index
    %c0_141 = arith.constant 0 : index
    %219 = vector.load %arg18[%c0_140, %c0_141] : memref<32x32xbf16, #tpu.memory_space<vmem>>, vector<32x32xbf16>
    %cst_142 = arith.constant dense<0.000000e+00> : vector<16x32xf32>
    %220 = tpu.matmul %218, %219, %cst_142 {dimension_numbers = #tpu.dot_dimension_numbers<[1], [0], [0], [1], [0, 0, 1, 1], [], []>} : vector<16x32xbf16>, vector<32x32xbf16>, vector<16x32xf32> -> vector<16x32xf32>
    %c0_143 = arith.constant 0 : index
    %c0_144 = arith.constant 0 : index
    %221 = vector.load %arg19[%c0_143, %c0_144] : memref<1x32xf32, #tpu.memory_space<vmem>>, vector<1x32xf32>
    %222 = vector.broadcast %221 : vector<1x32xf32> to vector<16x32xf32>
    %223 = arith.addf %220, %222 : vector<16x32xf32>
    %224 = arith.addf %209, %223 : vector<16x32xf32>
    %cst_145 = arith.constant dense<0.000000e+00> : vector<16xf32>
    %225 = vector.multi_reduction <add>, %224, %cst_145 [1] : vector<16x32xf32> to vector<16xf32>
    %226 = vector.shape_cast %225 : vector<16xf32> to vector<16x1xf32>
    %cst_146 = arith.constant 3.200000e+01 : f32
    %227 = vector.broadcast %cst_146 : f32 to vector<16x1xf32>
    %228 = arith.divf %226, %227 : vector<16x1xf32>
    %229 = vector.broadcast %228 : vector<16x1xf32> to vector<16x32xf32>
    %230 = arith.subf %224, %229 : vector<16x32xf32>
    %231 = arith.mulf %230, %230 : vector<16x32xf32>
    %cst_147 = arith.constant dense<0.000000e+00> : vector<16xf32>
    %232 = vector.multi_reduction <add>, %231, %cst_147 [1] : vector<16x32xf32> to vector<16xf32>
    %233 = vector.shape_cast %232 : vector<16xf32> to vector<16x1xf32>
    %cst_148 = arith.constant 3.200000e+01 : f32
    %234 = vector.broadcast %cst_148 : f32 to vector<16x1xf32>
    %235 = arith.divf %233, %234 : vector<16x1xf32>
    %236 = vector.broadcast %228 : vector<16x1xf32> to vector<16x32xf32>
    %237 = arith.subf %224, %236 : vector<16x32xf32>
    %cst_149 = arith.constant 9.99999974E-6 : f32
    %238 = vector.broadcast %cst_149 : f32 to vector<16x1xf32>
    %239 = arith.addf %235, %238 : vector<16x1xf32>
    %240 = math.rsqrt %239 : vector<16x1xf32>
    %241 = vector.broadcast %240 : vector<16x1xf32> to vector<16x32xf32>
    %242 = arith.mulf %237, %241 : vector<16x32xf32>
    %c0_150 = arith.constant 0 : index
    %c0_151 = arith.constant 0 : index
    %243 = vector.load %arg20[%c0_150, %c0_151] : memref<1x32xf32, #tpu.memory_space<vmem>>, vector<1x32xf32>
    %244 = vector.broadcast %243 : vector<1x32xf32> to vector<16x32xf32>
    %245 = arith.mulf %242, %244 : vector<16x32xf32>
    %c0_152 = arith.constant 0 : index
    %c0_153 = arith.constant 0 : index
    %246 = vector.load %arg21[%c0_152, %c0_153] : memref<1x32xf32, #tpu.memory_space<vmem>>, vector<1x32xf32>
    %247 = vector.broadcast %246 : vector<1x32xf32> to vector<16x32xf32>
    %248 = arith.addf %245, %247 : vector<16x32xf32>
    %249 = arith.truncf %248 : vector<16x32xf32> to vector<16x32xbf16>
    %c0_154 = arith.constant 0 : index
    %c0_155 = arith.constant 0 : index
    %c0_156 = arith.constant 0 : index
    %250 = vector.load %arg22[%c0_154, %c0_155, %c0_156] : memref<1x16x32xbf16, #tpu.memory_space<vmem>>, vector<1x16x32xbf16>
    %251 = vector.shape_cast %250 : vector<1x16x32xbf16> to vector<16x32xbf16>
    %252 = vector.shape_cast %249 : vector<16x32xbf16> to vector<1x16x32xbf16>
    tpu.vector_store %arg22[%c0_154, %c0_155, %c0_156], %252 {strides = array<i32>} : memref<1x16x32xbf16, #tpu.memory_space<vmem>>, vector<1x16x32xbf16>,
    return
  }
  func.func @transform_0(%arg0: i32, %arg1: i32) -> (i32, i32, i32) {
    %c0_i32 = arith.constant 0 : i32
    %c0_i32_0 = arith.constant 0 : i32
    return %arg0, %arg1, %c0_i32 : i32, i32, i32
  }
  func.func @transform_1(%arg0: i32, %arg1: i32) -> (i32, i32, i32) {
    %c0_i32 = arith.constant 0 : i32
    %c0_i32_0 = arith.constant 0 : i32
    %c0_i32_1 = arith.constant 0 : i32
    return %arg0, %c0_i32, %c0_i32_0 : i32, i32, i32
  }
  func.func @transform_2(%arg0: i32, %arg1: i32) -> (i32, i32, i32) {
    %c0_i32 = arith.constant 0 : i32
    %c0_i32_0 = arith.constant 0 : i32
    return %arg0, %arg1, %c0_i32 : i32, i32, i32
  }
  func.func @transform_3(%arg0: i32, %arg1: i32) -> (i32, i32, i32) {
    %c0_i32 = arith.constant 0 : i32
    %c0_i32_0 = arith.constant 0 : i32
    %c0_i32_1 = arith.constant 0 : i32
    return %arg0, %c0_i32, %c0_i32_0 : i32, i32, i32
  }
  func.func @transform_4(%arg0: i32, %arg1: i32) -> (i32, i32, i32) {
    %c0_i32 = arith.constant 0 : i32
    %c0_i32_0 = arith.constant 0 : i32
    %c0_i32_1 = arith.constant 0 : i32
    %c0_i32_2 = arith.constant 0 : i32
    return %c0_i32, %c0_i32_0, %c0_i32_1 : i32, i32, i32
  }
  func.func @transform_5(%arg0: i32, %arg1: i32) -> (i32, i32, i32) {
    %c0_i32 = arith.constant 0 : i32
    %c0_i32_0 = arith.constant 0 : i32
    %c0_i32_1 = arith.constant 0 : i32
    %c0_i32_2 = arith.constant 0 : i32
    return %c0_i32, %c0_i32_0, %c0_i32_1 : i32, i32, i32
  }
  func.func @transform_6(%arg0: i32, %arg1: i32) -> (i32, i32, i32) {
    %c0_i32 = arith.constant 0 : i32
    %c0_i32_0 = arith.constant 0 : i32
    %c0_i32_1 = arith.constant 0 : i32
    %c0_i32_2 = arith.constant 0 : i32
    return %c0_i32, %c0_i32_0, %c0_i32_1 : i32, i32, i32
  }
  func.func @transform_7(%arg0: i32, %arg1: i32) -> (i32, i32, i32) {
    %c0_i32 = arith.constant 0 : i32
    %c0_i32_0 = arith.constant 0 : i32
    %c0_i32_1 = arith.constant 0 : i32
    %c0_i32_2 = arith.constant 0 : i32
    return %c0_i32, %c0_i32_0, %c0_i32_1 : i32, i32, i32
  }
  func.func @transform_8(%arg0: i32, %arg1: i32) -> (i32, i32, i32) {
    %c0_i32 = arith.constant 0 : i32
    %c0_i32_0 = arith.constant 0 : i32
    %c0_i32_1 = arith.constant 0 : i32
    %c0_i32_2 = arith.constant 0 : i32
    return %c0_i32, %c0_i32_0, %c0_i32_1 : i32, i32, i32
  }
  func.func @transform_9(%arg0: i32, %arg1: i32) -> (i32, i32, i32) {
    %c0_i32 = arith.constant 0 : i32
    %c0_i32_0 = arith.constant 0 : i32
    %c0_i32_1 = arith.constant 0 : i32
    %c0_i32_2 = arith.constant 0 : i32
    return %c0_i32, %c0_i32_0, %c0_i32_1 : i32, i32, i32
  }
  func.func @transform_10(%arg0: i32, %arg1: i32) -> (i32, i32, i32) {
    %c0_i32 = arith.constant 0 : i32
    %c0_i32_0 = arith.constant 0 : i32
    %c0_i32_1 = arith.constant 0 : i32
    %c0_i32_2 = arith.constant 0 : i32
    return %c0_i32, %c0_i32_0, %c0_i32_1 : i32, i32, i32
  }
  func.func @transform_11(%arg0: i32, %arg1: i32) -> (i32, i32) {
    %c0_i32 = arith.constant 0 : i32
    %c0_i32_0 = arith.constant 0 : i32
    %c0_i32_1 = arith.constant 0 : i32
    return %c0_i32, %c0_i32_0 : i32, i32
  }
  func.func @transform_12(%arg0: i32, %arg1: i32) -> (i32, i32) {
    %c0_i32 = arith.constant 0 : i32
    %c0_i32_0 = arith.constant 0 : i32
    %c0_i32_1 = arith.constant 0 : i32
    return %c0_i32, %c0_i32_0 : i32, i32
  }
  func.func @transform_13(%arg0: i32, %arg1: i32) -> (i32, i32) {
    %c0_i32 = arith.constant 0 : i32
    %c0_i32_0 = arith.constant 0 : i32
    %c0_i32_1 = arith.constant 0 : i32
    return %c0_i32, %c0_i32_0 : i32, i32
  }
  func.func @transform_14(%arg0: i32, %arg1: i32) -> (i32, i32) {
    %c0_i32 = arith.constant 0 : i32
    %c0_i32_0 = arith.constant 0 : i32
    %c0_i32_1 = arith.constant 0 : i32
    return %c0_i32, %c0_i32_0 : i32, i32
  }
  func.func @transform_15(%arg0: i32, %arg1: i32) -> (i32, i32) {
    %c0_i32 = arith.constant 0 : i32
    %c0_i32_0 = arith.constant 0 : i32
    %c0_i32_1 = arith.constant 0 : i32
    return %c0_i32, %c0_i32_0 : i32, i32
  }
  func.func @transform_16(%arg0: i32, %arg1: i32) -> (i32, i32) {
    %c0_i32 = arith.constant 0 : i32
    %c0_i32_0 = arith.constant 0 : i32
    %c0_i32_1 = arith.constant 0 : i32
    return %c0_i32, %c0_i32_0 : i32, i32
  }
  func.func @transform_17(%arg0: i32, %arg1: i32) -> (i32, i32) {
    %c0_i32 = arith.constant 0 : i32
    %c0_i32_0 = arith.constant 0 : i32
    %c0_i32_1 = arith.constant 0 : i32
    return %c0_i32, %c0_i32_0 : i32, i32
  }
  func.func @transform_18(%arg0: i32, %arg1: i32) -> (i32, i32) {
    %c0_i32 = arith.constant 0 : i32
    %c0_i32_0 = arith.constant 0 : i32
    %c0_i32_1 = arith.constant 0 : i32
    return %c0_i32, %c0_i32_0 : i32, i32
  }
  func.func @transform_19(%arg0: i32, %arg1: i32) -> (i32, i32) {
    %c0_i32 = arith.constant 0 : i32
    %c0_i32_0 = arith.constant 0 : i32
    %c0_i32_1 = arith.constant 0 : i32
    return %c0_i32, %c0_i32_0 : i32, i32
  }
  func.func @transform_20(%arg0: i32, %arg1: i32) -> (i32, i32, i32) {
    %c0_i32 = arith.constant 0 : i32
    %c0_i32_0 = arith.constant 0 : i32
    return %arg0, %arg1, %c0_i32 : i32, i32, i32
  }
}

module attributes {stable_mosaic.version = 11 : i64} {
  func.func @_cross_block_kernel(%arg0: i32, %arg1: i32, %arg2: memref<1x8x32xbf16, #tpu.memory_space<vmem>>, %arg3: memref<1x16x32xbf16, #tpu.memory_space<vmem>>, %arg4: memref<1x8x32xbf16, #tpu.memory_space<vmem>>, %arg5: memref<1x1x16xf32, #tpu.memory_space<vmem>>, %arg6: memref<4x32x8xbf16, #tpu.memory_space<vmem>>, %arg7: memref<4x1x8xf32, #tpu.memory_space<vmem>>, %arg8: memref<4x32x8xbf16, #tpu.memory_space<vmem>>, %arg9: memref<4x1x8xf32, #tpu.memory_space<vmem>>, %arg10: memref<4x32x8xbf16, #tpu.memory_space<vmem>>, %arg11: memref<4x1x8xf32, #tpu.memory_space<vmem>>, %arg12: memref<4x8x32xbf16, #tpu.memory_space<vmem>>, %arg13: memref<1x32xf32, #tpu.memory_space<vmem>>, %arg14: memref<1x32xf32, #tpu.memory_space<vmem>>, %arg15: memref<1x32xf32, #tpu.memory_space<vmem>>, %arg16: memref<32x32xbf16, #tpu.memory_space<vmem>>, %arg17: memref<1x32xf32, #tpu.memory_space<vmem>>, %arg18: memref<32x32xbf16, #tpu.memory_space<vmem>>, %arg19: memref<1x32xf32, #tpu.memory_space<vmem>>, %arg20: memref<1x32xf32, #tpu.memory_space<vmem>>, %arg21: memref<1x32xf32, #tpu.memory_space<vmem>>, %arg22: memref<1x8x32xbf16, #tpu.memory_space<vmem>>) attributes {dimension_semantics = [#tpu.dimension_semantics<parallel>, #tpu.dimension_semantics<parallel>], iteration_bounds = array<i64: 2, 1>, scalar_prefetch = 0 : i64, scratch_operands = 0 : i64, tpu.core_type = #tpu.core_type<tc>, window_params = [{transform_indices = @transform_0, window_bounds = array<i64: 1, 8, 32>}, {transform_indices = @transform_1, window_bounds = array<i64: 1, 16, 32>}, {transform_indices = @transform_2, window_bounds = array<i64: 1, 8, 32>}, {transform_indices = @transform_3, window_bounds = array<i64: 1, 1, 16>}, {pipeline_mode = #tpu.pipeline_mode<synchronous>, transform_indices = @transform_4, window_bounds = array<i64: 4, 32, 8>}, {pipeline_mode = #tpu.pipeline_mode<synchronous>, transform_indices = @transform_5, window_bounds = array<i64: 4, 1, 8>}, {pipeline_mode = #tpu.pipeline_mode<synchronous>, transform_indices = @transform_6, window_bounds = array<i64: 4, 32, 8>}, {pipeline_mode = #tpu.pipeline_mode<synchronous>, transform_indices = @transform_7, window_bounds = array<i64: 4, 1, 8>}, {pipeline_mode = #tpu.pipeline_mode<synchronous>, transform_indices = @transform_8, window_bounds = array<i64: 4, 32, 8>}, {pipeline_mode = #tpu.pipeline_mode<synchronous>, transform_indices = @transform_9, window_bounds = array<i64: 4, 1, 8>}, {pipeline_mode = #tpu.pipeline_mode<synchronous>, transform_indices = @transform_10, window_bounds = array<i64: 4, 8, 32>}, {pipeline_mode = #tpu.pipeline_mode<synchronous>, transform_indices = @transform_11, window_bounds = array<i64: 1, 32>}, {pipeline_mode = #tpu.pipeline_mode<synchronous>, transform_indices = @transform_12, window_bounds = array<i64: 1, 32>}, {pipeline_mode = #tpu.pipeline_mode<synchronous>, transform_indices = @transform_13, window_bounds = array<i64: 1, 32>}, {pipeline_mode = #tpu.pipeline_mode<synchronous>, transform_indices = @transform_14, window_bounds = array<i64: 32, 32>}, {pipeline_mode = #tpu.pipeline_mode<synchronous>, transform_indices = @transform_15, window_bounds = array<i64: 1, 32>}, {pipeline_mode = #tpu.pipeline_mode<synchronous>, transform_indices = @transform_16, window_bounds = array<i64: 32, 32>}, {pipeline_mode = #tpu.pipeline_mode<synchronous>, transform_indices = @transform_17, window_bounds = array<i64: 1, 32>}, {pipeline_mode = #tpu.pipeline_mode<synchronous>, transform_indices = @transform_18, window_bounds = array<i64: 1, 32>}, {pipeline_mode = #tpu.pipeline_mode<synchronous>, transform_indices = @transform_19, window_bounds = array<i64: 1, 32>}, {transform_indices = @transform_20, window_bounds = array<i64: 1, 8, 32>}]} {
    %c0 = arith.constant 0 : index
    %c0_0 = arith.constant 0 : index
    %c0_1 = arith.constant 0 : index
    %0 = vector.load %arg2[%c0, %c0_0, %c0_1] : memref<1x8x32xbf16, #tpu.memory_space<vmem>>, vector<1x8x32xbf16>
    %1 = vector.shape_cast %0 : vector<1x8x32xbf16> to vector<8x32xbf16>
    %c0_2 = arith.constant 0 : index
    %c0_3 = arith.constant 0 : index
    %c0_4 = arith.constant 0 : index
    %2 = vector.load %arg3[%c0_2, %c0_3, %c0_4] : memref<1x16x32xbf16, #tpu.memory_space<vmem>>, vector<1x16x32xbf16>
    %3 = vector.shape_cast %2 : vector<1x16x32xbf16> to vector<16x32xbf16>
    %c0_5 = arith.constant 0 : index
    %c0_6 = arith.constant 0 : index
    %c0_7 = arith.constant 0 : index
    %4 = vector.load %arg5[%c0_5, %c0_6, %c0_7] : memref<1x1x16xf32, #tpu.memory_space<vmem>>, vector<1x1x16xf32>
    %5 = vector.shape_cast %4 : vector<1x1x16xf32> to vector<1x16xf32>
    %6 = vector.shape_cast %5 : vector<1x16xf32> to vector<1x16xf32>
    %7 = vector.broadcast %6 : vector<1x16xf32> to vector<8x16xf32>
    %c0_8 = arith.constant 0 : index
    %c0_9 = arith.constant 0 : index
    %8 = vector.load %arg13[%c0_8, %c0_9] : memref<1x32xf32, #tpu.memory_space<vmem>>, vector<1x32xf32>
    %c0_10 = arith.constant 0 : index
    %c0_11 = arith.constant 0 : index
    %c0_12 = arith.constant 0 : index
    %9 = vector.load %arg6[%c0_10, %c0_11, %c0_12] : memref<4x32x8xbf16, #tpu.memory_space<vmem>>, vector<1x32x8xbf16>
    %10 = vector.shape_cast %9 : vector<1x32x8xbf16> to vector<32x8xbf16>
    %cst = arith.constant dense<0.000000e+00> : vector<8x8xf32>
    %11 = tpu.matmul %1, %10, %cst {dimension_numbers = #tpu.dot_dimension_numbers<[1], [0], [0], [1], [0, 0, 1, 1], [], []>} : vector<8x32xbf16>, vector<32x8xbf16>, vector<8x8xf32> -> vector<8x8xf32>
    %c0_13 = arith.constant 0 : index
    %c0_14 = arith.constant 0 : index
    %c0_15 = arith.constant 0 : index
    %12 = vector.load %arg7[%c0_13, %c0_14, %c0_15] : memref<4x1x8xf32, #tpu.memory_space<vmem>>, vector<1x1x8xf32>
    %13 = vector.shape_cast %12 : vector<1x1x8xf32> to vector<1x8xf32>
    %14 = vector.broadcast %13 : vector<1x8xf32> to vector<8x8xf32>
    %15 = arith.addf %11, %14 : vector<8x8xf32>
    %16 = arith.truncf %15 : vector<8x8xf32> to vector<8x8xbf16>
    %c0_16 = arith.constant 0 : index
    %c0_17 = arith.constant 0 : index
    %c0_18 = arith.constant 0 : index
    %17 = vector.load %arg8[%c0_16, %c0_17, %c0_18] : memref<4x32x8xbf16, #tpu.memory_space<vmem>>, vector<1x32x8xbf16>
    %18 = vector.shape_cast %17 : vector<1x32x8xbf16> to vector<32x8xbf16>
    %cst_19 = arith.constant dense<0.000000e+00> : vector<16x8xf32>
    %19 = tpu.matmul %3, %18, %cst_19 {dimension_numbers = #tpu.dot_dimension_numbers<[1], [0], [0], [1], [0, 0, 1, 1], [], []>} : vector<16x32xbf16>, vector<32x8xbf16>, vector<16x8xf32> -> vector<16x8xf32>
    %c0_20 = arith.constant 0 : index
    %c0_21 = arith.constant 0 : index
    %c0_22 = arith.constant 0 : index
    %20 = vector.load %arg9[%c0_20, %c0_21, %c0_22] : memref<4x1x8xf32, #tpu.memory_space<vmem>>, vector<1x1x8xf32>
    %21 = vector.shape_cast %20 : vector<1x1x8xf32> to vector<1x8xf32>
    %22 = vector.broadcast %21 : vector<1x8xf32> to vector<16x8xf32>
    %23 = arith.addf %19, %22 : vector<16x8xf32>
    %24 = arith.truncf %23 : vector<16x8xf32> to vector<16x8xbf16>
    %c0_23 = arith.constant 0 : index
    %c0_24 = arith.constant 0 : index
    %c0_25 = arith.constant 0 : index
    %25 = vector.load %arg10[%c0_23, %c0_24, %c0_25] : memref<4x32x8xbf16, #tpu.memory_space<vmem>>, vector<1x32x8xbf16>
    %26 = vector.shape_cast %25 : vector<1x32x8xbf16> to vector<32x8xbf16>
    %cst_26 = arith.constant dense<0.000000e+00> : vector<16x8xf32>
    %27 = tpu.matmul %3, %26, %cst_26 {dimension_numbers = #tpu.dot_dimension_numbers<[1], [0], [0], [1], [0, 0, 1, 1], [], []>} : vector<16x32xbf16>, vector<32x8xbf16>, vector<16x8xf32> -> vector<16x8xf32>
    %c0_27 = arith.constant 0 : index
    %c0_28 = arith.constant 0 : index
    %c0_29 = arith.constant 0 : index
    %28 = vector.load %arg11[%c0_27, %c0_28, %c0_29] : memref<4x1x8xf32, #tpu.memory_space<vmem>>, vector<1x1x8xf32>
    %29 = vector.shape_cast %28 : vector<1x1x8xf32> to vector<1x8xf32>
    %30 = vector.broadcast %29 : vector<1x8xf32> to vector<16x8xf32>
    %31 = arith.addf %27, %30 : vector<16x8xf32>
    %32 = arith.truncf %31 : vector<16x8xf32> to vector<16x8xbf16>
    %cst_30 = arith.constant dense<0.000000e+00> : vector<8x16xf32>
    %33 = tpu.matmul %16, %24, %cst_30 {dimension_numbers = #tpu.dot_dimension_numbers<[1], [1], [0], [0], [0, 0, 1, 0], [], []>} : vector<8x8xbf16>, vector<16x8xbf16>, vector<8x16xf32> -> vector<8x16xf32>
    %34 = arith.addf %33, %7 : vector<8x16xf32>
    %cst_31 = arith.constant dense<0xFF800000> : vector<8xf32>
    %35 = vector.multi_reduction <maximumf>, %34, %cst_31 [1] : vector<8x16xf32> to vector<8xf32>
    %36 = vector.shape_cast %35 : vector<8xf32> to vector<8x1xf32>
    %37 = vector.broadcast %36 : vector<8x1xf32> to vector<8x16xf32>
    %38 = arith.subf %34, %37 : vector<8x16xf32>
    %39 = math.exp %38 : vector<8x16xf32>
    %cst_32 = arith.constant dense<0.000000e+00> : vector<8xf32>
    %40 = vector.multi_reduction <add>, %39, %cst_32 [1] : vector<8x16xf32> to vector<8xf32>
    %41 = vector.shape_cast %40 : vector<8xf32> to vector<8x1xf32>
    %42 = tpu.reciprocal %41 {approx = true} : vector<8x1xf32> -> vector<8x1xf32>
    %43 = vector.broadcast %42 : vector<8x1xf32> to vector<8x16xf32>
    %44 = arith.mulf %39, %43 : vector<8x16xf32>
    %45 = arith.truncf %44 : vector<8x16xf32> to vector<8x16xbf16>
    %cst_33 = arith.constant dense<0.000000e+00> : vector<8x8xf32>
    %46 = tpu.matmul %45, %32, %cst_33 {dimension_numbers = #tpu.dot_dimension_numbers<[1], [0], [0], [1], [0, 0, 1, 1], [], []>} : vector<8x16xbf16>, vector<16x8xbf16>, vector<8x8xf32> -> vector<8x8xf32>
    %47 = arith.truncf %46 : vector<8x8xf32> to vector<8x8xbf16>
    %c0_34 = arith.constant 0 : index
    %c0_35 = arith.constant 0 : index
    %c0_36 = arith.constant 0 : index
    %48 = vector.load %arg12[%c0_34, %c0_35, %c0_36] : memref<4x8x32xbf16, #tpu.memory_space<vmem>>, vector<1x8x32xbf16>
    %49 = vector.shape_cast %48 : vector<1x8x32xbf16> to vector<8x32xbf16>
    %cst_37 = arith.constant dense<0.000000e+00> : vector<8x32xf32>
    %50 = tpu.matmul %47, %49, %cst_37 {dimension_numbers = #tpu.dot_dimension_numbers<[1], [0], [0], [1], [0, 0, 1, 1], [], []>} : vector<8x8xbf16>, vector<8x32xbf16>, vector<8x32xf32> -> vector<8x32xf32>
    %51 = vector.broadcast %8 : vector<1x32xf32> to vector<8x32xf32>
    %52 = arith.addf %51, %50 : vector<8x32xf32>
    %c1 = arith.constant 1 : index
    %c0_38 = arith.constant 0 : index
    %c0_39 = arith.constant 0 : index
    %53 = vector.load %arg6[%c1, %c0_38, %c0_39] : memref<4x32x8xbf16, #tpu.memory_space<vmem>>, vector<1x32x8xbf16>
    %54 = vector.shape_cast %53 : vector<1x32x8xbf16> to vector<32x8xbf16>
    %cst_40 = arith.constant dense<0.000000e+00> : vector<8x8xf32>
    %55 = tpu.matmul %1, %54, %cst_40 {dimension_numbers = #tpu.dot_dimension_numbers<[1], [0], [0], [1], [0, 0, 1, 1], [], []>} : vector<8x32xbf16>, vector<32x8xbf16>, vector<8x8xf32> -> vector<8x8xf32>
    %c1_41 = arith.constant 1 : index
    %c0_42 = arith.constant 0 : index
    %c0_43 = arith.constant 0 : index
    %56 = vector.load %arg7[%c1_41, %c0_42, %c0_43] : memref<4x1x8xf32, #tpu.memory_space<vmem>>, vector<1x1x8xf32>
    %57 = vector.shape_cast %56 : vector<1x1x8xf32> to vector<1x8xf32>
    %58 = vector.broadcast %57 : vector<1x8xf32> to vector<8x8xf32>
    %59 = arith.addf %55, %58 : vector<8x8xf32>
    %60 = arith.truncf %59 : vector<8x8xf32> to vector<8x8xbf16>
    %c1_44 = arith.constant 1 : index
    %c0_45 = arith.constant 0 : index
    %c0_46 = arith.constant 0 : index
    %61 = vector.load %arg8[%c1_44, %c0_45, %c0_46] : memref<4x32x8xbf16, #tpu.memory_space<vmem>>, vector<1x32x8xbf16>
    %62 = vector.shape_cast %61 : vector<1x32x8xbf16> to vector<32x8xbf16>
    %cst_47 = arith.constant dense<0.000000e+00> : vector<16x8xf32>
    %63 = tpu.matmul %3, %62, %cst_47 {dimension_numbers = #tpu.dot_dimension_numbers<[1], [0], [0], [1], [0, 0, 1, 1], [], []>} : vector<16x32xbf16>, vector<32x8xbf16>, vector<16x8xf32> -> vector<16x8xf32>
    %c1_48 = arith.constant 1 : index
    %c0_49 = arith.constant 0 : index
    %c0_50 = arith.constant 0 : index
    %64 = vector.load %arg9[%c1_48, %c0_49, %c0_50] : memref<4x1x8xf32, #tpu.memory_space<vmem>>, vector<1x1x8xf32>
    %65 = vector.shape_cast %64 : vector<1x1x8xf32> to vector<1x8xf32>
    %66 = vector.broadcast %65 : vector<1x8xf32> to vector<16x8xf32>
    %67 = arith.addf %63, %66 : vector<16x8xf32>
    %68 = arith.truncf %67 : vector<16x8xf32> to vector<16x8xbf16>
    %c1_51 = arith.constant 1 : index
    %c0_52 = arith.constant 0 : index
    %c0_53 = arith.constant 0 : index
    %69 = vector.load %arg10[%c1_51, %c0_52, %c0_53] : memref<4x32x8xbf16, #tpu.memory_space<vmem>>, vector<1x32x8xbf16>
    %70 = vector.shape_cast %69 : vector<1x32x8xbf16> to vector<32x8xbf16>
    %cst_54 = arith.constant dense<0.000000e+00> : vector<16x8xf32>
    %71 = tpu.matmul %3, %70, %cst_54 {dimension_numbers = #tpu.dot_dimension_numbers<[1], [0], [0], [1], [0, 0, 1, 1], [], []>} : vector<16x32xbf16>, vector<32x8xbf16>, vector<16x8xf32> -> vector<16x8xf32>
    %c1_55 = arith.constant 1 : index
    %c0_56 = arith.constant 0 : index
    %c0_57 = arith.constant 0 : index
    %72 = vector.load %arg11[%c1_55, %c0_56, %c0_57] : memref<4x1x8xf32, #tpu.memory_space<vmem>>, vector<1x1x8xf32>
    %73 = vector.shape_cast %72 : vector<1x1x8xf32> to vector<1x8xf32>
    %74 = vector.broadcast %73 : vector<1x8xf32> to vector<16x8xf32>
    %75 = arith.addf %71, %74 : vector<16x8xf32>
    %76 = arith.truncf %75 : vector<16x8xf32> to vector<16x8xbf16>
    %cst_58 = arith.constant dense<0.000000e+00> : vector<8x16xf32>
    %77 = tpu.matmul %60, %68, %cst_58 {dimension_numbers = #tpu.dot_dimension_numbers<[1], [1], [0], [0], [0, 0, 1, 0], [], []>} : vector<8x8xbf16>, vector<16x8xbf16>, vector<8x16xf32> -> vector<8x16xf32>
    %78 = arith.addf %77, %7 : vector<8x16xf32>
    %cst_59 = arith.constant dense<0xFF800000> : vector<8xf32>
    %79 = vector.multi_reduction <maximumf>, %78, %cst_59 [1] : vector<8x16xf32> to vector<8xf32>
    %80 = vector.shape_cast %79 : vector<8xf32> to vector<8x1xf32>
    %81 = vector.broadcast %80 : vector<8x1xf32> to vector<8x16xf32>
    %82 = arith.subf %78, %81 : vector<8x16xf32>
    %83 = math.exp %82 : vector<8x16xf32>
    %cst_60 = arith.constant dense<0.000000e+00> : vector<8xf32>
    %84 = vector.multi_reduction <add>, %83, %cst_60 [1] : vector<8x16xf32> to vector<8xf32>
    %85 = vector.shape_cast %84 : vector<8xf32> to vector<8x1xf32>
    %86 = tpu.reciprocal %85 {approx = true} : vector<8x1xf32> -> vector<8x1xf32>
    %87 = vector.broadcast %86 : vector<8x1xf32> to vector<8x16xf32>
    %88 = arith.mulf %83, %87 : vector<8x16xf32>
    %89 = arith.truncf %88 : vector<8x16xf32> to vector<8x16xbf16>
    %cst_61 = arith.constant dense<0.000000e+00> : vector<8x8xf32>
    %90 = tpu.matmul %89, %76, %cst_61 {dimension_numbers = #tpu.dot_dimension_numbers<[1], [0], [0], [1], [0, 0, 1, 1], [], []>} : vector<8x16xbf16>, vector<16x8xbf16>, vector<8x8xf32> -> vector<8x8xf32>
    %91 = arith.truncf %90 : vector<8x8xf32> to vector<8x8xbf16>
    %c1_62 = arith.constant 1 : index
    %c0_63 = arith.constant 0 : index
    %c0_64 = arith.constant 0 : index
    %92 = vector.load %arg12[%c1_62, %c0_63, %c0_64] : memref<4x8x32xbf16, #tpu.memory_space<vmem>>, vector<1x8x32xbf16>
    %93 = vector.shape_cast %92 : vector<1x8x32xbf16> to vector<8x32xbf16>
    %cst_65 = arith.constant dense<0.000000e+00> : vector<8x32xf32>
    %94 = tpu.matmul %91, %93, %cst_65 {dimension_numbers = #tpu.dot_dimension_numbers<[1], [0], [0], [1], [0, 0, 1, 1], [], []>} : vector<8x8xbf16>, vector<8x32xbf16>, vector<8x32xf32> -> vector<8x32xf32>
    %95 = arith.addf %52, %94 : vector<8x32xf32>
    %c2 = arith.constant 2 : index
    %c0_66 = arith.constant 0 : index
    %c0_67 = arith.constant 0 : index
    %96 = vector.load %arg6[%c2, %c0_66, %c0_67] : memref<4x32x8xbf16, #tpu.memory_space<vmem>>, vector<1x32x8xbf16>
    %97 = vector.shape_cast %96 : vector<1x32x8xbf16> to vector<32x8xbf16>
    %cst_68 = arith.constant dense<0.000000e+00> : vector<8x8xf32>
    %98 = tpu.matmul %1, %97, %cst_68 {dimension_numbers = #tpu.dot_dimension_numbers<[1], [0], [0], [1], [0, 0, 1, 1], [], []>} : vector<8x32xbf16>, vector<32x8xbf16>, vector<8x8xf32> -> vector<8x8xf32>
    %c2_69 = arith.constant 2 : index
    %c0_70 = arith.constant 0 : index
    %c0_71 = arith.constant 0 : index
    %99 = vector.load %arg7[%c2_69, %c0_70, %c0_71] : memref<4x1x8xf32, #tpu.memory_space<vmem>>, vector<1x1x8xf32>
    %100 = vector.shape_cast %99 : vector<1x1x8xf32> to vector<1x8xf32>
    %101 = vector.broadcast %100 : vector<1x8xf32> to vector<8x8xf32>
    %102 = arith.addf %98, %101 : vector<8x8xf32>
    %103 = arith.truncf %102 : vector<8x8xf32> to vector<8x8xbf16>
    %c2_72 = arith.constant 2 : index
    %c0_73 = arith.constant 0 : index
    %c0_74 = arith.constant 0 : index
    %104 = vector.load %arg8[%c2_72, %c0_73, %c0_74] : memref<4x32x8xbf16, #tpu.memory_space<vmem>>, vector<1x32x8xbf16>
    %105 = vector.shape_cast %104 : vector<1x32x8xbf16> to vector<32x8xbf16>
    %cst_75 = arith.constant dense<0.000000e+00> : vector<16x8xf32>
    %106 = tpu.matmul %3, %105, %cst_75 {dimension_numbers = #tpu.dot_dimension_numbers<[1], [0], [0], [1], [0, 0, 1, 1], [], []>} : vector<16x32xbf16>, vector<32x8xbf16>, vector<16x8xf32> -> vector<16x8xf32>
    %c2_76 = arith.constant 2 : index
    %c0_77 = arith.constant 0 : index
    %c0_78 = arith.constant 0 : index
    %107 = vector.load %arg9[%c2_76, %c0_77, %c0_78] : memref<4x1x8xf32, #tpu.memory_space<vmem>>, vector<1x1x8xf32>
    %108 = vector.shape_cast %107 : vector<1x1x8xf32> to vector<1x8xf32>
    %109 = vector.broadcast %108 : vector<1x8xf32> to vector<16x8xf32>
    %110 = arith.addf %106, %109 : vector<16x8xf32>
    %111 = arith.truncf %110 : vector<16x8xf32> to vector<16x8xbf16>
    %c2_79 = arith.constant 2 : index
    %c0_80 = arith.constant 0 : index
    %c0_81 = arith.constant 0 : index
    %112 = vector.load %arg10[%c2_79, %c0_80, %c0_81] : memref<4x32x8xbf16, #tpu.memory_space<vmem>>, vector<1x32x8xbf16>
    %113 = vector.shape_cast %112 : vector<1x32x8xbf16> to vector<32x8xbf16>
    %cst_82 = arith.constant dense<0.000000e+00> : vector<16x8xf32>
    %114 = tpu.matmul %3, %113, %cst_82 {dimension_numbers = #tpu.dot_dimension_numbers<[1], [0], [0], [1], [0, 0, 1, 1], [], []>} : vector<16x32xbf16>, vector<32x8xbf16>, vector<16x8xf32> -> vector<16x8xf32>
    %c2_83 = arith.constant 2 : index
    %c0_84 = arith.constant 0 : index
    %c0_85 = arith.constant 0 : index
    %115 = vector.load %arg11[%c2_83, %c0_84, %c0_85] : memref<4x1x8xf32, #tpu.memory_space<vmem>>, vector<1x1x8xf32>
    %116 = vector.shape_cast %115 : vector<1x1x8xf32> to vector<1x8xf32>
    %117 = vector.broadcast %116 : vector<1x8xf32> to vector<16x8xf32>
    %118 = arith.addf %114, %117 : vector<16x8xf32>
    %119 = arith.truncf %118 : vector<16x8xf32> to vector<16x8xbf16>
    %cst_86 = arith.constant dense<0.000000e+00> : vector<8x16xf32>
    %120 = tpu.matmul %103, %111, %cst_86 {dimension_numbers = #tpu.dot_dimension_numbers<[1], [1], [0], [0], [0, 0, 1, 0], [], []>} : vector<8x8xbf16>, vector<16x8xbf16>, vector<8x16xf32> -> vector<8x16xf32>
    %121 = arith.addf %120, %7 : vector<8x16xf32>
    %cst_87 = arith.constant dense<0xFF800000> : vector<8xf32>
    %122 = vector.multi_reduction <maximumf>, %121, %cst_87 [1] : vector<8x16xf32> to vector<8xf32>
    %123 = vector.shape_cast %122 : vector<8xf32> to vector<8x1xf32>
    %124 = vector.broadcast %123 : vector<8x1xf32> to vector<8x16xf32>
    %125 = arith.subf %121, %124 : vector<8x16xf32>
    %126 = math.exp %125 : vector<8x16xf32>
    %cst_88 = arith.constant dense<0.000000e+00> : vector<8xf32>
    %127 = vector.multi_reduction <add>, %126, %cst_88 [1] : vector<8x16xf32> to vector<8xf32>
    %128 = vector.shape_cast %127 : vector<8xf32> to vector<8x1xf32>
    %129 = tpu.reciprocal %128 {approx = true} : vector<8x1xf32> -> vector<8x1xf32>
    %130 = vector.broadcast %129 : vector<8x1xf32> to vector<8x16xf32>
    %131 = arith.mulf %126, %130 : vector<8x16xf32>
    %132 = arith.truncf %131 : vector<8x16xf32> to vector<8x16xbf16>
    %cst_89 = arith.constant dense<0.000000e+00> : vector<8x8xf32>
    %133 = tpu.matmul %132, %119, %cst_89 {dimension_numbers = #tpu.dot_dimension_numbers<[1], [0], [0], [1], [0, 0, 1, 1], [], []>} : vector<8x16xbf16>, vector<16x8xbf16>, vector<8x8xf32> -> vector<8x8xf32>
    %134 = arith.truncf %133 : vector<8x8xf32> to vector<8x8xbf16>
    %c2_90 = arith.constant 2 : index
    %c0_91 = arith.constant 0 : index
    %c0_92 = arith.constant 0 : index
    %135 = vector.load %arg12[%c2_90, %c0_91, %c0_92] : memref<4x8x32xbf16, #tpu.memory_space<vmem>>, vector<1x8x32xbf16>
    %136 = vector.shape_cast %135 : vector<1x8x32xbf16> to vector<8x32xbf16>
    %cst_93 = arith.constant dense<0.000000e+00> : vector<8x32xf32>
    %137 = tpu.matmul %134, %136, %cst_93 {dimension_numbers = #tpu.dot_dimension_numbers<[1], [0], [0], [1], [0, 0, 1, 1], [], []>} : vector<8x8xbf16>, vector<8x32xbf16>, vector<8x32xf32> -> vector<8x32xf32>
    %138 = arith.addf %95, %137 : vector<8x32xf32>
    %c3 = arith.constant 3 : index
    %c0_94 = arith.constant 0 : index
    %c0_95 = arith.constant 0 : index
    %139 = vector.load %arg6[%c3, %c0_94, %c0_95] : memref<4x32x8xbf16, #tpu.memory_space<vmem>>, vector<1x32x8xbf16>
    %140 = vector.shape_cast %139 : vector<1x32x8xbf16> to vector<32x8xbf16>
    %cst_96 = arith.constant dense<0.000000e+00> : vector<8x8xf32>
    %141 = tpu.matmul %1, %140, %cst_96 {dimension_numbers = #tpu.dot_dimension_numbers<[1], [0], [0], [1], [0, 0, 1, 1], [], []>} : vector<8x32xbf16>, vector<32x8xbf16>, vector<8x8xf32> -> vector<8x8xf32>
    %c3_97 = arith.constant 3 : index
    %c0_98 = arith.constant 0 : index
    %c0_99 = arith.constant 0 : index
    %142 = vector.load %arg7[%c3_97, %c0_98, %c0_99] : memref<4x1x8xf32, #tpu.memory_space<vmem>>, vector<1x1x8xf32>
    %143 = vector.shape_cast %142 : vector<1x1x8xf32> to vector<1x8xf32>
    %144 = vector.broadcast %143 : vector<1x8xf32> to vector<8x8xf32>
    %145 = arith.addf %141, %144 : vector<8x8xf32>
    %146 = arith.truncf %145 : vector<8x8xf32> to vector<8x8xbf16>
    %c3_100 = arith.constant 3 : index
    %c0_101 = arith.constant 0 : index
    %c0_102 = arith.constant 0 : index
    %147 = vector.load %arg8[%c3_100, %c0_101, %c0_102] : memref<4x32x8xbf16, #tpu.memory_space<vmem>>, vector<1x32x8xbf16>
    %148 = vector.shape_cast %147 : vector<1x32x8xbf16> to vector<32x8xbf16>
    %cst_103 = arith.constant dense<0.000000e+00> : vector<16x8xf32>
    %149 = tpu.matmul %3, %148, %cst_103 {dimension_numbers = #tpu.dot_dimension_numbers<[1], [0], [0], [1], [0, 0, 1, 1], [], []>} : vector<16x32xbf16>, vector<32x8xbf16>, vector<16x8xf32> -> vector<16x8xf32>
    %c3_104 = arith.constant 3 : index
    %c0_105 = arith.constant 0 : index
    %c0_106 = arith.constant 0 : index
    %150 = vector.load %arg9[%c3_104, %c0_105, %c0_106] : memref<4x1x8xf32, #tpu.memory_space<vmem>>, vector<1x1x8xf32>
    %151 = vector.shape_cast %150 : vector<1x1x8xf32> to vector<1x8xf32>
    %152 = vector.broadcast %151 : vector<1x8xf32> to vector<16x8xf32>
    %153 = arith.addf %149, %152 : vector<16x8xf32>
    %154 = arith.truncf %153 : vector<16x8xf32> to vector<16x8xbf16>
    %c3_107 = arith.constant 3 : index
    %c0_108 = arith.constant 0 : index
    %c0_109 = arith.constant 0 : index
    %155 = vector.load %arg10[%c3_107, %c0_108, %c0_109] : memref<4x32x8xbf16, #tpu.memory_space<vmem>>, vector<1x32x8xbf16>
    %156 = vector.shape_cast %155 : vector<1x32x8xbf16> to vector<32x8xbf16>
    %cst_110 = arith.constant dense<0.000000e+00> : vector<16x8xf32>
    %157 = tpu.matmul %3, %156, %cst_110 {dimension_numbers = #tpu.dot_dimension_numbers<[1], [0], [0], [1], [0, 0, 1, 1], [], []>} : vector<16x32xbf16>, vector<32x8xbf16>, vector<16x8xf32> -> vector<16x8xf32>
    %c3_111 = arith.constant 3 : index
    %c0_112 = arith.constant 0 : index
    %c0_113 = arith.constant 0 : index
    %158 = vector.load %arg11[%c3_111, %c0_112, %c0_113] : memref<4x1x8xf32, #tpu.memory_space<vmem>>, vector<1x1x8xf32>
    %159 = vector.shape_cast %158 : vector<1x1x8xf32> to vector<1x8xf32>
    %160 = vector.broadcast %159 : vector<1x8xf32> to vector<16x8xf32>
    %161 = arith.addf %157, %160 : vector<16x8xf32>
    %162 = arith.truncf %161 : vector<16x8xf32> to vector<16x8xbf16>
    %cst_114 = arith.constant dense<0.000000e+00> : vector<8x16xf32>
    %163 = tpu.matmul %146, %154, %cst_114 {dimension_numbers = #tpu.dot_dimension_numbers<[1], [1], [0], [0], [0, 0, 1, 0], [], []>} : vector<8x8xbf16>, vector<16x8xbf16>, vector<8x16xf32> -> vector<8x16xf32>
    %164 = arith.addf %163, %7 : vector<8x16xf32>
    %cst_115 = arith.constant dense<0xFF800000> : vector<8xf32>
    %165 = vector.multi_reduction <maximumf>, %164, %cst_115 [1] : vector<8x16xf32> to vector<8xf32>
    %166 = vector.shape_cast %165 : vector<8xf32> to vector<8x1xf32>
    %167 = vector.broadcast %166 : vector<8x1xf32> to vector<8x16xf32>
    %168 = arith.subf %164, %167 : vector<8x16xf32>
    %169 = math.exp %168 : vector<8x16xf32>
    %cst_116 = arith.constant dense<0.000000e+00> : vector<8xf32>
    %170 = vector.multi_reduction <add>, %169, %cst_116 [1] : vector<8x16xf32> to vector<8xf32>
    %171 = vector.shape_cast %170 : vector<8xf32> to vector<8x1xf32>
    %172 = tpu.reciprocal %171 {approx = true} : vector<8x1xf32> -> vector<8x1xf32>
    %173 = vector.broadcast %172 : vector<8x1xf32> to vector<8x16xf32>
    %174 = arith.mulf %169, %173 : vector<8x16xf32>
    %175 = arith.truncf %174 : vector<8x16xf32> to vector<8x16xbf16>
    %cst_117 = arith.constant dense<0.000000e+00> : vector<8x8xf32>
    %176 = tpu.matmul %175, %162, %cst_117 {dimension_numbers = #tpu.dot_dimension_numbers<[1], [0], [0], [1], [0, 0, 1, 1], [], []>} : vector<8x16xbf16>, vector<16x8xbf16>, vector<8x8xf32> -> vector<8x8xf32>
    %177 = arith.truncf %176 : vector<8x8xf32> to vector<8x8xbf16>
    %c3_118 = arith.constant 3 : index
    %c0_119 = arith.constant 0 : index
    %c0_120 = arith.constant 0 : index
    %178 = vector.load %arg12[%c3_118, %c0_119, %c0_120] : memref<4x8x32xbf16, #tpu.memory_space<vmem>>, vector<1x8x32xbf16>
    %179 = vector.shape_cast %178 : vector<1x8x32xbf16> to vector<8x32xbf16>
    %cst_121 = arith.constant dense<0.000000e+00> : vector<8x32xf32>
    %180 = tpu.matmul %177, %179, %cst_121 {dimension_numbers = #tpu.dot_dimension_numbers<[1], [0], [0], [1], [0, 0, 1, 1], [], []>} : vector<8x8xbf16>, vector<8x32xbf16>, vector<8x32xf32> -> vector<8x32xf32>
    %181 = arith.addf %138, %180 : vector<8x32xf32>
    %c0_122 = arith.constant 0 : index
    %c0_123 = arith.constant 0 : index
    %c0_124 = arith.constant 0 : index
    %182 = vector.load %arg4[%c0_122, %c0_123, %c0_124] : memref<1x8x32xbf16, #tpu.memory_space<vmem>>, vector<1x8x32xbf16>
    %183 = vector.shape_cast %182 : vector<1x8x32xbf16> to vector<8x32xbf16>
    %184 = arith.extf %183 : vector<8x32xbf16> to vector<8x32xf32>
    %185 = arith.addf %184, %181 : vector<8x32xf32>
    %cst_125 = arith.constant dense<0.000000e+00> : vector<8xf32>
    %186 = vector.multi_reduction <add>, %185, %cst_125 [1] : vector<8x32xf32> to vector<8xf32>
    %187 = vector.shape_cast %186 : vector<8xf32> to vector<8x1xf32>
    %cst_126 = arith.constant 3.200000e+01 : f32
    %188 = vector.broadcast %cst_126 : f32 to vector<8x1xf32>
    %189 = arith.divf %187, %188 : vector<8x1xf32>
    %190 = vector.broadcast %189 : vector<8x1xf32> to vector<8x32xf32>
    %191 = arith.subf %185, %190 : vector<8x32xf32>
    %192 = arith.mulf %191, %191 : vector<8x32xf32>
    %cst_127 = arith.constant dense<0.000000e+00> : vector<8xf32>
    %193 = vector.multi_reduction <add>, %192, %cst_127 [1] : vector<8x32xf32> to vector<8xf32>
    %194 = vector.shape_cast %193 : vector<8xf32> to vector<8x1xf32>
    %cst_128 = arith.constant 3.200000e+01 : f32
    %195 = vector.broadcast %cst_128 : f32 to vector<8x1xf32>
    %196 = arith.divf %194, %195 : vector<8x1xf32>
    %197 = vector.broadcast %189 : vector<8x1xf32> to vector<8x32xf32>
    %198 = arith.subf %185, %197 : vector<8x32xf32>
    %cst_129 = arith.constant 9.99999974E-6 : f32
    %199 = vector.broadcast %cst_129 : f32 to vector<8x1xf32>
    %200 = arith.addf %196, %199 : vector<8x1xf32>
    %201 = math.rsqrt %200 : vector<8x1xf32>
    %202 = vector.broadcast %201 : vector<8x1xf32> to vector<8x32xf32>
    %203 = arith.mulf %198, %202 : vector<8x32xf32>
    %c0_130 = arith.constant 0 : index
    %c0_131 = arith.constant 0 : index
    %204 = vector.load %arg14[%c0_130, %c0_131] : memref<1x32xf32, #tpu.memory_space<vmem>>, vector<1x32xf32>
    %205 = vector.broadcast %204 : vector<1x32xf32> to vector<8x32xf32>
    %206 = arith.mulf %203, %205 : vector<8x32xf32>
    %c0_132 = arith.constant 0 : index
    %c0_133 = arith.constant 0 : index
    %207 = vector.load %arg15[%c0_132, %c0_133] : memref<1x32xf32, #tpu.memory_space<vmem>>, vector<1x32xf32>
    %208 = vector.broadcast %207 : vector<1x32xf32> to vector<8x32xf32>
    %209 = arith.addf %206, %208 : vector<8x32xf32>
    %210 = arith.truncf %209 : vector<8x32xf32> to vector<8x32xbf16>
    %c0_134 = arith.constant 0 : index
    %c0_135 = arith.constant 0 : index
    %211 = vector.load %arg16[%c0_134, %c0_135] : memref<32x32xbf16, #tpu.memory_space<vmem>>, vector<32x32xbf16>
    %cst_136 = arith.constant dense<0.000000e+00> : vector<8x32xf32>
    %212 = tpu.matmul %210, %211, %cst_136 {dimension_numbers = #tpu.dot_dimension_numbers<[1], [0], [0], [1], [0, 0, 1, 1], [], []>} : vector<8x32xbf16>, vector<32x32xbf16>, vector<8x32xf32> -> vector<8x32xf32>
    %c0_137 = arith.constant 0 : index
    %c0_138 = arith.constant 0 : index
    %213 = vector.load %arg17[%c0_137, %c0_138] : memref<1x32xf32, #tpu.memory_space<vmem>>, vector<1x32xf32>
    %214 = vector.broadcast %213 : vector<1x32xf32> to vector<8x32xf32>
    %215 = arith.addf %212, %214 : vector<8x32xf32>
    %cst_139 = arith.constant 0.000000e+00 : f32
    %216 = vector.broadcast %cst_139 : f32 to vector<8x32xf32>
    %217 = arith.maximumf %215, %216 : vector<8x32xf32>
    %218 = arith.truncf %217 : vector<8x32xf32> to vector<8x32xbf16>
    %c0_140 = arith.constant 0 : index
    %c0_141 = arith.constant 0 : index
    %219 = vector.load %arg18[%c0_140, %c0_141] : memref<32x32xbf16, #tpu.memory_space<vmem>>, vector<32x32xbf16>
    %cst_142 = arith.constant dense<0.000000e+00> : vector<8x32xf32>
    %220 = tpu.matmul %218, %219, %cst_142 {dimension_numbers = #tpu.dot_dimension_numbers<[1], [0], [0], [1], [0, 0, 1, 1], [], []>} : vector<8x32xbf16>, vector<32x32xbf16>, vector<8x32xf32> -> vector<8x32xf32>
    %c0_143 = arith.constant 0 : index
    %c0_144 = arith.constant 0 : index
    %221 = vector.load %arg19[%c0_143, %c0_144] : memref<1x32xf32, #tpu.memory_space<vmem>>, vector<1x32xf32>
    %222 = vector.broadcast %221 : vector<1x32xf32> to vector<8x32xf32>
    %223 = arith.addf %220, %222 : vector<8x32xf32>
    %224 = arith.addf %209, %223 : vector<8x32xf32>
    %cst_145 = arith.constant dense<0.000000e+00> : vector<8xf32>
    %225 = vector.multi_reduction <add>, %224, %cst_145 [1] : vector<8x32xf32> to vector<8xf32>
    %226 = vector.shape_cast %225 : vector<8xf32> to vector<8x1xf32>
    %cst_146 = arith.constant 3.200000e+01 : f32
    %227 = vector.broadcast %cst_146 : f32 to vector<8x1xf32>
    %228 = arith.divf %226, %227 : vector<8x1xf32>
    %229 = vector.broadcast %228 : vector<8x1xf32> to vector<8x32xf32>
    %230 = arith.subf %224, %229 : vector<8x32xf32>
    %231 = arith.mulf %230, %230 : vector<8x32xf32>
    %cst_147 = arith.constant dense<0.000000e+00> : vector<8xf32>
    %232 = vector.multi_reduction <add>, %231, %cst_147 [1] : vector<8x32xf32> to vector<8xf32>
    %233 = vector.shape_cast %232 : vector<8xf32> to vector<8x1xf32>
    %cst_148 = arith.constant 3.200000e+01 : f32
    %234 = vector.broadcast %cst_148 : f32 to vector<8x1xf32>
    %235 = arith.divf %233, %234 : vector<8x1xf32>
    %236 = vector.broadcast %228 : vector<8x1xf32> to vector<8x32xf32>
    %237 = arith.subf %224, %236 : vector<8x32xf32>
    %cst_149 = arith.constant 9.99999974E-6 : f32
    %238 = vector.broadcast %cst_149 : f32 to vector<8x1xf32>
    %239 = arith.addf %235, %238 : vector<8x1xf32>
    %240 = math.rsqrt %239 : vector<8x1xf32>
    %241 = vector.broadcast %240 : vector<8x1xf32> to vector<8x32xf32>
    %242 = arith.mulf %237, %241 : vector<8x32xf32>
    %c0_150 = arith.constant 0 : index
    %c0_151 = arith.constant 0 : index
    %243 = vector.load %arg20[%c0_150, %c0_151] : memref<1x32xf32, #tpu.memory_space<vmem>>, vector<1x32xf32>
    %244 = vector.broadcast %243 : vector<1x32xf32> to vector<8x32xf32>
    %245 = arith.mulf %242, %244 : vector<8x32xf32>
    %c0_152 = arith.constant 0 : index
    %c0_153 = arith.constant 0 : index
    %246 = vector.load %arg21[%c0_152, %c0_153] : memref<1x32xf32, #tpu.memory_space<vmem>>, vector<1x32xf32>
    %247 = vector.broadcast %246 : vector<1x32xf32> to vector<8x32xf32>
    %248 = arith.addf %245, %247 : vector<8x32xf32>
    %249 = arith.truncf %248 : vector<8x32xf32> to vector<8x32xbf16>
    %c0_154 = arith.constant 0 : index
    %c0_155 = arith.constant 0 : index
    %c0_156 = arith.constant 0 : index
    %250 = vector.load %arg22[%c0_154, %c0_155, %c0_156] : memref<1x8x32xbf16, #tpu.memory_space<vmem>>, vector<1x8x32xbf16>
    %251 = vector.shape_cast %250 : vector<1x8x32xbf16> to vector<8x32xbf16>
    %252 = vector.shape_cast %249 : vector<8x32xbf16> to vector<1x8x32xbf16>
    tpu.vector_store %arg22[%c0_154, %c0_155, %c0_156], %252 {strides = array<i32>} : memref<1x8x32xbf16, #tpu.memory_space<vmem>>, vector<1x8x32xbf16>,
    return
  }
  func.func @transform_0(%arg0: i32, %arg1: i32) -> (i32, i32, i32) {
    %c0_i32 = arith.constant 0 : i32
    %c0_i32_0 = arith.constant 0 : i32
    return %arg0, %arg1, %c0_i32 : i32, i32, i32
  }
  func.func @transform_1(%arg0: i32, %arg1: i32) -> (i32, i32, i32) {
    %c0_i32 = arith.constant 0 : i32
    %c0_i32_0 = arith.constant 0 : i32
    %c0_i32_1 = arith.constant 0 : i32
    return %arg0, %c0_i32, %c0_i32_0 : i32, i32, i32
  }
  func.func @transform_2(%arg0: i32, %arg1: i32) -> (i32, i32, i32) {
    %c0_i32 = arith.constant 0 : i32
    %c0_i32_0 = arith.constant 0 : i32
    return %arg0, %arg1, %c0_i32 : i32, i32, i32
  }
  func.func @transform_3(%arg0: i32, %arg1: i32) -> (i32, i32, i32) {
    %c0_i32 = arith.constant 0 : i32
    %c0_i32_0 = arith.constant 0 : i32
    %c0_i32_1 = arith.constant 0 : i32
    return %arg0, %c0_i32, %c0_i32_0 : i32, i32, i32
  }
  func.func @transform_4(%arg0: i32, %arg1: i32) -> (i32, i32, i32) {
    %c0_i32 = arith.constant 0 : i32
    %c0_i32_0 = arith.constant 0 : i32
    %c0_i32_1 = arith.constant 0 : i32
    %c0_i32_2 = arith.constant 0 : i32
    return %c0_i32, %c0_i32_0, %c0_i32_1 : i32, i32, i32
  }
  func.func @transform_5(%arg0: i32, %arg1: i32) -> (i32, i32, i32) {
    %c0_i32 = arith.constant 0 : i32
    %c0_i32_0 = arith.constant 0 : i32
    %c0_i32_1 = arith.constant 0 : i32
    %c0_i32_2 = arith.constant 0 : i32
    return %c0_i32, %c0_i32_0, %c0_i32_1 : i32, i32, i32
  }
  func.func @transform_6(%arg0: i32, %arg1: i32) -> (i32, i32, i32) {
    %c0_i32 = arith.constant 0 : i32
    %c0_i32_0 = arith.constant 0 : i32
    %c0_i32_1 = arith.constant 0 : i32
    %c0_i32_2 = arith.constant 0 : i32
    return %c0_i32, %c0_i32_0, %c0_i32_1 : i32, i32, i32
  }
  func.func @transform_7(%arg0: i32, %arg1: i32) -> (i32, i32, i32) {
    %c0_i32 = arith.constant 0 : i32
    %c0_i32_0 = arith.constant 0 : i32
    %c0_i32_1 = arith.constant 0 : i32
    %c0_i32_2 = arith.constant 0 : i32
    return %c0_i32, %c0_i32_0, %c0_i32_1 : i32, i32, i32
  }
  func.func @transform_8(%arg0: i32, %arg1: i32) -> (i32, i32, i32) {
    %c0_i32 = arith.constant 0 : i32
    %c0_i32_0 = arith.constant 0 : i32
    %c0_i32_1 = arith.constant 0 : i32
    %c0_i32_2 = arith.constant 0 : i32
    return %c0_i32, %c0_i32_0, %c0_i32_1 : i32, i32, i32
  }
  func.func @transform_9(%arg0: i32, %arg1: i32) -> (i32, i32, i32) {
    %c0_i32 = arith.constant 0 : i32
    %c0_i32_0 = arith.constant 0 : i32
    %c0_i32_1 = arith.constant 0 : i32
    %c0_i32_2 = arith.constant 0 : i32
    return %c0_i32, %c0_i32_0, %c0_i32_1 : i32, i32, i32
  }
  func.func @transform_10(%arg0: i32, %arg1: i32) -> (i32, i32, i32) {
    %c0_i32 = arith.constant 0 : i32
    %c0_i32_0 = arith.constant 0 : i32
    %c0_i32_1 = arith.constant 0 : i32
    %c0_i32_2 = arith.constant 0 : i32
    return %c0_i32, %c0_i32_0, %c0_i32_1 : i32, i32, i32
  }
  func.func @transform_11(%arg0: i32, %arg1: i32) -> (i32, i32) {
    %c0_i32 = arith.constant 0 : i32
    %c0_i32_0 = arith.constant 0 : i32
    %c0_i32_1 = arith.constant 0 : i32
    return %c0_i32, %c0_i32_0 : i32, i32
  }
  func.func @transform_12(%arg0: i32, %arg1: i32) -> (i32, i32) {
    %c0_i32 = arith.constant 0 : i32
    %c0_i32_0 = arith.constant 0 : i32
    %c0_i32_1 = arith.constant 0 : i32
    return %c0_i32, %c0_i32_0 : i32, i32
  }
  func.func @transform_13(%arg0: i32, %arg1: i32) -> (i32, i32) {
    %c0_i32 = arith.constant 0 : i32
    %c0_i32_0 = arith.constant 0 : i32
    %c0_i32_1 = arith.constant 0 : i32
    return %c0_i32, %c0_i32_0 : i32, i32
  }
  func.func @transform_14(%arg0: i32, %arg1: i32) -> (i32, i32) {
    %c0_i32 = arith.constant 0 : i32
    %c0_i32_0 = arith.constant 0 : i32
    %c0_i32_1 = arith.constant 0 : i32
    return %c0_i32, %c0_i32_0 : i32, i32
  }
  func.func @transform_15(%arg0: i32, %arg1: i32) -> (i32, i32) {
    %c0_i32 = arith.constant 0 : i32
    %c0_i32_0 = arith.constant 0 : i32
    %c0_i32_1 = arith.constant 0 : i32
    return %c0_i32, %c0_i32_0 : i32, i32
  }
  func.func @transform_16(%arg0: i32, %arg1: i32) -> (i32, i32) {
    %c0_i32 = arith.constant 0 : i32
    %c0_i32_0 = arith.constant 0 : i32
    %c0_i32_1 = arith.constant 0 : i32
    return %c0_i32, %c0_i32_0 : i32, i32
  }
  func.func @transform_17(%arg0: i32, %arg1: i32) -> (i32, i32) {
    %c0_i32 = arith.constant 0 : i32
    %c0_i32_0 = arith.constant 0 : i32
    %c0_i32_1 = arith.constant 0 : i32
    return %c0_i32, %c0_i32_0 : i32, i32
  }
  func.func @transform_18(%arg0: i32, %arg1: i32) -> (i32, i32) {
    %c0_i32 = arith.constant 0 : i32
    %c0_i32_0 = arith.constant 0 : i32
    %c0_i32_1 = arith.constant 0 : i32
    return %c0_i32, %c0_i32_0 : i32, i32
  }
  func.func @transform_19(%arg0: i32, %arg1: i32) -> (i32, i32) {
    %c0_i32 = arith.constant 0 : i32
    %c0_i32_0 = arith.constant 0 : i32
    %c0_i32_1 = arith.constant 0 : i32
    return %c0_i32, %c0_i32_0 : i32, i32
  }
  func.func @transform_20(%arg0: i32, %arg1: i32) -> (i32, i32, i32) {
    %c0_i32 = arith.constant 0 : i32
    %c0_i32_0 = arith.constant 0 : i32
    return %arg0, %arg1, %c0_i32 : i32, i32, i32
  }
}

</mosaic_0001>

<bundles_post_ra>
// kernel: cross_attention_layer.2
= control target key start
LH: loop header
LB: loop body
LE: loop exit
PB: predicated region body
PF: predicated region fallthrough
CT: control target
= control target key end

     0   :  { %s3584_s0 = inlined_call_operand.vmem [shape: bf16[2,8,32], index: 0, kind: input, shape index: {}, may-alias: {0,2}]   ;;  %s3585_s1 = inlined_call_operand.vmem [shape: bf16[2,16,32], index: 1, kind: input, shape index: {}]   ;;  %s3586_s2 = inlined_call_operand.vmem [shape: bf16[2,8,32], index: 2, kind: input, shape index: {}, may-alias: {0,2}]   ;;  %s3587_s3 = inlined_call_operand.vmem [shape: f32[2,1,16], index: 3, kind: input, shape index: {}]   ;;  %s3588_s4 = inlined_call_operand.vmem [shape: bf16[4,32,8], index: 4, kind: input, shape index: {}]   ;;  %s3589_s5 = inlined_call_operand.vmem [shape: f32[4,1,8], index: 5, kind: input, shape index: {}]   ;;  %s3590_s6 = inlined_call_operand.vmem [shape: bf16[4,32,8], index: 6, kind: input, shape index: {}]   ;;  %s3591_s7 = inlined_call_operand.vmem [shape: f32[4,1,8], index: 7, kind: input, shape index: {}]   ;;  %s3592_s8 = inlined_call_operand.vmem [shape: bf16[4,32,8], index: 8, kind: input, shape index: {}]   ;;  %s3593_s9 = inlined_call_operand.vmem [shape: f32[4,1,8], index: 9, kind: input, shape index: {}]   ;;  %s3594_s10 = inlined_call_operand.vmem [shape: bf16[4,8,32], index: 10, kind: input, shape index: {}]   ;;  %s3595_s11 = inlined_call_operand.vmem [shape: f32[1,32], index: 11, kind: input, shape index: {}]   ;;  %s3596_s12 = inlined_call_operand.vmem [shape: f32[1,32], index: 12, kind: input, shape index: {}]   ;;  %s3597_s13 = inlined_call_operand.vmem [shape: f32[1,32], index: 13, kind: input, shape index: {}]   ;;  %s3598_s14 = inlined_call_operand.vmem [shape: bf16[32,32], index: 14, kind: input, shape index: {}]   ;;  %s3599_s15 = inlined_call_operand.vmem [shape: f32[1,32], index: 15, kind: input, shape index: {}]   ;;  %s3600_s16 = inlined_call_operand.vmem [shape: bf16[32,32], index: 16, kind: input, shape index: {}]   ;;  %s3601_s17 = inlined_call_operand.vmem [shape: f32[1,32], index: 17, kind: input, shape index: {}]   ;;  %s3602_s18 = inlined_call_operand.vmem [shape: f32[1,32], index: 18, kind: input, shape index: {}]   ;;  %s3603_s19 = inlined_call_operand.vmem [shape: f32[1,32], index: 19, kind: input, shape index: {}]   ;;  %s3604_s20 = inlined_call_operand.hbm [shape: bf16[2,8,32], index: 20, kind: output, shape index: {}]  }
   0x1   :  { %3615 = sst [smem:[#allocation12_spill]] %s3584_s0 }
   0x2   :  { %3616 = sst [smem:[#allocation13_spill]] %s3585_s1 }
   0x3   :  { %3617 = sst [smem:[#allocation14_spill]] %s3586_s2 }
   0x4   :  { %3618 = sst [smem:[#allocation15_spill]] %s3587_s3 }
   0x5   :  { %3619 = sst [smem:[#allocation16_spill]] %s3588_s4 }
   0x6   :  { %3620 = sst [smem:[#allocation17_spill]] %s3603_s19 }
   0x7   :  { %3621 = sst [smem:[#allocation18_spill]] %s3604_s20 }
   0x8   :  { %25 = vsyncpa [#allocation3], 0 }
   0x9   :  { %27 = vsyncpa [#allocation3 + $0x1], 0  ;;  %s3145_s1 = smov 0   ;;  %s3147_s22 = smov 0  }
   0xa   :  { %s3149_s23 = smov 0   ;;  %s3151_s24 = smov 0  }
   0xb   :  { %s3153_s2 = smov 0   ;;  %s3155_s25 = smov 0  }
   0xc LB: > { %3622 = sst [smem:[#allocation5_spill]] %s3015_s1  ;;  %s2465_s3 = sadd.s32 4294967295, %s3035_s25   ;;  %s3035_s25 = sphi %s3155_s25, %s33_s25   ;;  %s3031_s2 = sphi %s3153_s2, %s3645_s2   ;;  %s3027_s24 = sphi %s3151_s24, %s3644_s24   ;;  %s3023_s23 = sphi %s3149_s23, %s3643_s23   ;;  %s3019_s22 = sphi %s3147_s22, %s3647_s22   ;;  %s3015_s1 = sphi %s3145_s1, %s3646_s1  }
   0xd   : > { %3623 = sst [smem:[#allocation6_spill]] %s3023_s23  ;;  %s2466_s26 = sadd.s32 4294967294, %s3035_s25  }
   0xe   : > { %3624 = sst [smem:[#allocation7_spill]] %s3031_s2  ;;  %s45_s27 = sadd.s32 1, %s3031_s2 }
   0xf   : > { %3625 = sst [smem:[#allocation8_spill]] %s3035_s25  ;;  %s498_s28 = sadd.s32 1, %s3023_s23 }
  0x10   : > { %p47_p0 = scmp.ge.s32.totalorder %s45_s27, 2  ;;  %p508_p1 = scmp.ne.s32.totalorder %s3023_s23, %s3019_s22 }
  0x11   : > { %p509_p2 = scmp.eq.s32.totalorder %s2465_s3, 1  ;;  %p514_p3 = scmp.ne.s32.totalorder %s3019_s22, %s3015_s1 }
  0x12   : > { %s3649_s27 = smov (%p47_p0, %s45_s27), 0  ;;  %p515_p5 = scmp.eq.s32.totalorder %s2466_s26, 1 }
  0x13   : > { %3626 = sst [smem:[#allocation9_spill]] %s3649_s27  ;;  %p3185_p4 = por %p509_p2, %p508_p1 }
  0x14   : > { %s493_s29 = ssub.s32 %s3031_s2, %s3649_s27  ;;  %p2469_p6 = scmp.ge.s32.totalorder %s3035_s25, 1 }
  0x15   : > { %p496_p7 = scmp.eq.s32.totalorder %s493_s29, 0  ;;  %p3192_p8 = por %p515_p5, %p514_p3 }
  0x16   : > { %p615_p9 = scmp.lt.s32.totalorder %s3035_s25, 3 }
  0x17   : > { %s3628_s30 = scalar_select %p3192_p8, 1, 0 }
  0x18   : > { %s3198_s0 = scalar_select %p496_p7, %s3023_s23, %s498_s28  }
  0x19   : > { %3629 = sst [smem:[#allocation10_spill]] %s3628_s30  ;;  %p616_p10 = pnand %p2469_p6, %p615_p9 }
  0x1a   : > { %3630 = sst [smem:[#allocation11_spill]] %s3198_s0  ;;  %p690_p11 = scmp.lt.s32.totalorder (!%p616_p10), %s3027_s24, 1 }
  0x1b   : > { %619 = sbr.rel (%p616_p10) target bundleno = 4943 (0x134f), region = 100  ;;  %s3631_s2 = sld [smem:[#allocation16_spill]] (!%p616_p10) }
  0x1c   : > { %s3633_s23 = sld [smem:[#allocation13_spill]] (!%p616_p10)  ;;  %s687_s3 = sand.u32 (!%p616_p10), 1, %s3019_s22  }
  0x1d   : > { %s3634_s20 = sld [smem:[#allocation12_spill]] (!%p616_p10)  ;;  %s2470_s27 = sshll.u32 (!%p616_p10), %s687_s3, 2 }
  0x1e   : > { %s3635_s28 = sld [smem:[#allocation15_spill]] (!%p616_p10) }
  0x1f   : > { %s3637_s1 = sld [smem:[#allocation17_spill]] (!%p616_p10) }
  0x20   : > { %v2910_v0 = vld [vmem:[%s3590_s6 + $0x8] sm:$0xff]   ;;  %v3037_v1 = vmov 0.0   ;;  %v2911_v2 = vld [vmem:[%s3590_s6] sm:$0xff]   ;;  %vm3038_vm0 = vmmov 0   ;;  %s3218_s21 = scalar_select %p690_p11, %s3027_s24, 1  ;;  %vm747_vm1 = vcmask 261120  }
  0x21   : > { %2677 = vmatprep.subr.bf16.mxu1 %v3037_v1  ;;  %2669 = vmatprep.subr.bf16.mxu0 %v3037_v1  ;;  %s3632_s0 = smov %s3631_s2  ;;  %v2912_v3 = vld [vmem:[%s3631_s2 + $0x8] sm:$0xff]   ;;  %v2480_v9 = vld [vmem:[%s3591_s7] ss:$0 sm:$0xff]  ;;  %vm930_vm2 = vcmask 64512   ;;  %vm977_vm3 = vcmask 130048   ;;  %vm1038_vm4 = vcmask 1043456  }
  0x22   : > { %2678 = vmatpush3.bf16.msra.mxu1 %v2910_v0  ;;  %2681 = vmatprep.mubr.msk.bf16.mxu1 %vm3038_vm0, %v3037_v1  ;;  %v2914_v4 = vld [vmem:[%s3632_s0] sm:$0xff]   ;;  %s2602_s2 = sshll.u32 %s3218_s21, 3  ;;  %s2471_s26 = sshll.u32 %s3218_s21, 2  ;;  %v2915_v23 = vld [vmem:[%s3592_s8 + $0x8] sm:$0xff]   ;;  %v2919_v51 = vld [vmem:[%s3632_s0 + $0x18] sm:$0xff]   ;;  %vm2341_vm5 = vcmask 257024  }
  0x23   : > { %2679 = vmatprep.subr.bf16.mxu1 %v3037_v1  ;;  %2673 = vmatprep.mubr.msk.bf16.mxu0 %vm3038_vm0, %v3037_v1  ;;  %s701_s30 = scalar_lea.vmem %s3633_s23, %s2602_s2  ;;  %s696_s19 = scalar_lea.vmem %s3634_s20, %s2471_s26  ;;  %v2476_v16 = vld [vmem:[%s3589_s5] ss:$0 sm:$0xff]  ;;  %v2920_v52 = vld [vmem:[%s3632_s0 + $0x10] sm:$0xff]   ;;  %v2917_v54 = vld [vmem:[%s3590_s6 + $0x18] sm:$0xff]  }
  0x24   : > { %2670 = vmatpush3.bf16.msra.mxu0 %v2912_v3  ;;  %v3235_v5 = vld [vmem:[%s701_s30] sm:$0xff]   ;;  %s711_s20 = scalar_lea.vmem %s3635_s28, %s3218_s21  ;;  %v2918_v58 = vld [vmem:[%s3590_s6 + $0x10] sm:$0xff]   ;;  %s3636_s23 = sld [smem:[#allocation14_spill]] }
  0x25   : > { %2671 = vmatprep.subr.bf16.mxu0 %v3037_v1  ;;  %v3237_v6 = vld [vmem:[%s696_s19] sm:$0xf]  ;;  %s2599_s19 = sshll.u32 %s3027_s24, 6  ;;  %s3638_s30 = sld [smem:[#allocation18_spill]] }
  0x26   : > { %2680 = vmatpush3.bf16.msra.mxu1 %v2911_v2  ;;  %v2916_v24 = vld [vmem:[%s3592_s8] sm:$0xff]   ;;  %s2344_s2 = scalar_lea.sflag [#allocation3], %s687_s3  ;;  %s3039_s28 = smov [#allocation2]  }
  0x27   : > { %2693 = vmatprep.subr.bf16.mxu1 %v3037_v1  ;;  %v3275_v25 = vld [vmem:[%s711_s20] ss:$0 sm:$0xff]  ;;  %s2963_s20 = sshll.u32 %s3039_s28, 4  ;;  %s2964_s20 = int_to_ptr.vmem [resolvable:$false] %s2963_s20 }
  0x28   : > { %2672 = vmatpush3.bf16.msra.mxu0 %v2914_v4  ;;  %v2485_v39 = vld [vmem:[%s3593_s9] ss:$0 sm:$0xff]  ;;  %s2965_s24 = scalar_lea.vmem %s2964_s20, 128 }
  0x29   : > { %2685 = vmatprep.subr.bf16.mxu0 %v3037_v1  ;;  %2682 = vmatmul.mubr.msk.bf16.vlgmr.msra.gmra.mxu1 %vm747_vm1, %v3235_v5  ;;  %v1034_v45 = vld [vmem:[%s3594_s10] sm:$0xf] }
  0x2a   : > { %2695 = vmatprep.mubr.msk.bf16.mxu1 %vm3038_vm0, %v3037_v1  ;;  %v1040_v46 = vsel %vm1038_vm4, %v1034_v45, 0  ;;  %s708_s25 = scalar_lea.vmem %s3636_s23, %s2471_s26  ;;  %s689_s23 = scalar_lea.vmem [#allocation2], %s2470_s27 }
  0x2b   : > { %2674 = vmatmul.mubr.msk.bf16.vlgmr.msra.gmra.mxu0 %vm747_vm1, %v3237_v6 }
  0x2c   : > { %2689 = vmatprep.mubr.msk.bf16.mxu0 %vm3038_vm0, %v3037_v1  ;;  %2686 = vmatpush3.bf16.msra.mxu0 %v2915_v23 }
  0x2d   : > { %2687 = vmatprep.subr.bf16.mxu0 %v3037_v1 }
  0x30   : > { %2688 = vmatpush3.bf16.msra.mxu0 %v2916_v24 }
  0x31   : > { %2699 = vmatprep.subr.bf16.mxu0 %v3037_v1 }
  0x33   : > { %2690 = vmatmul.mubr.msk.bf16.vlgmr.msra.gmra.mxu0 %vm747_vm1, %v3235_v5 }
  0x34   : > { %2701 = vmatprep.mubr.msk.bf16.mxu0 %vm3038_vm0, %v3037_v1 }
  0xe9   : > { %v857_v7 = vpop.f32.mrf.mxu1 }
  0xea   : > { %v858_v13 = vadd.f32 %v2480_v9, %v857_v7 }
  0xeb   : > { %v785_v8 = vpop.f32.mrf.mxu0  ;;  %v2683_v10 = vpop.f32.mrf.mxu1 }
  0xec   : > { %v786_v20 = vadd.f32 %v2476_v16, %v785_v8  ;;  %v2507_v8 = vld [vmem:[%s3591_s7 + $0x1] ss:$0 sm:$0xff] }
  0xed   : > { %v2675_v11 = vpop.f32.mrf.mxu0  ;;  %v860_v12 = vpop.f32.mrf.mxu1 }
  0xee   : > { %v861_v14 = vadd.f32 %v2480_v9, %v860_v12  ;;  %v791_v22 = vpack.c.bf16 %v786_v20, %v786_v20  ;;  %v2922_v20 = vld [vmem:[%s3592_s8 + $0x10] sm:$0xff]  }
  0xef   : > { %v788_v15 = vpop.f32.mrf.mxu0  ;;  %v2684_v17 = vpop.f32.mrf.mxu1 }
  0xf0   : > { %v864_v18 = vpack.c.bf16 %v861_v14, %v858_v13  ;;  %v2498_v13 = vld [vmem:[%s3589_s5 + $0x1] ss:$0 sm:$0xff] }
  0xf1   : > { %v2676_v19 = vpop.f32.mrf.mxu0 }
  0xf2   : > { %v935_v21 = vsel %vm930_vm2, %v864_v18, 0  ;;  %v2921_v19 = vld [vmem:[%s3592_s8 + $0x18] sm:$0xff]  }
  0xf3   : > { %2694 = vmatpush3.bf16.xpose.msra.mxu1 %v935_v21  ;;  %v922_v32 = vpop.f32.mrf.mxu0 }
  0xf4   : > { %2705 = vmatprep.subr.bf16.mxu1 %v3037_v1  ;;  %v923_v40 = vadd.f32 %v2485_v39, %v922_v32 }
  0xf5   : > { %v2691_v33 = vpop.f32.mrf.mxu0 }
  0xf7   : > { %v925_v41 = vpop.f32.mrf.mxu0 }
  0xf8   : > { %v926_v42 = vadd.f32 %v2485_v39, %v925_v41  ;;  %v2522_v41 = vld [vmem:[%s3594_s10 + $0x4] sm:$0xf] }
  0xf9   : > { %v2692_v43 = vpop.f32.mrf.mxu0 }
  0xfa   : > { %2696 = vmatmul.mubr.msk.bf16.vlgmr.msra.gmra.mxu1 %vm930_vm2, %v791_v22  ;;  %v929_v44 = vpack.c.bf16 %v926_v42, %v923_v40  ;;  %v1397_v42 = vsel %vm1038_vm4, %v2522_v41, 0 }
  0xfb   : > { %2707 = vmatprep.mubr.msk.bf16.mxu1 %vm3038_vm0, %v3037_v1  ;;  %2706 = vmatpush3.bf16.msra.mxu1 %v1040_v46 }
  0xfc   : > { %2700 = vmatpush3.bf16.msra.mxu0 %v929_v44  ;;  %2719 = vmatprep.subr.bf16.mxu1 %v3037_v1 }
  0xfd   : > { %2711 = vmatprep.subr.bf16.mxu0 %v3037_v1 }
 0x1ba   : > { %v971_v26 = vpop.f32.mrf.mxu1 }
 0x1bb   : > { %v972_v27 = vadd.f32 %v3275_v25, %v971_v26 }
 0x1bc   : > { %v2697_v28 = vpop.f32.mrf.mxu1 }
 0x1bd   : > { %v978_v29 = vsel %vm977_vm3, %v972_v27, -inf }
 0x1be   : > { %979 = vmax.xlane.f32.xlu0 %v978_v29  ;;  %v974_v30 = vpop.f32.mrf.mxu1 }
 0x1c0   : > { %v2698_v31 = vpop.f32.mrf.mxu1 }
 0x247   : > { %v980_v34 = vpop.xlane.xlu0 %979 }
 0x248   : > { %v981_v35 = vsub.f32 %v972_v27, %v980_v34 }
 0x24a   : > { %v982_v36 = vmul.f32 1.442695, %v981_v35  ;;  %v2516_v35 = vld [vmem:[%s3593_s9 + $0x1] ss:$0 sm:$0xff] }
 0x24c   : > { %2939 = vpow2.f32 %v982_v36 }
 0x259   : > { %v2940_v37 = vpop.eup %2939 }
 0x25a   : > { %v984_v38 = vsel %vm977_vm3, %v2940_v37, 0.0 }
 0x25b   : > { %985 = vadd.xlane.f32.xlu0 %v984_v38 }
 0x2e4   : > { %v986_v47 = vpop.xlane.xlu0 %985 }
 0x2e5   : > { %2941 = vrcp.f32 %v986_v47  ;;  %v2925_v47 = vld [vmem:[%s3632_s0 + $0x28] sm:$0xff]  }
 0x2f2   : > { %v2942_v48 = vpop.eup %2941 }
 0x2f3   : > { %v988_v49 = vmul.f32 %v2942_v48, %v2940_v37  ;;  %v2926_v48 = vld [vmem:[%s3632_s0 + $0x20] sm:$0xff]  }
 0x2f5   : > { %v989_v50 = vpack.c.bf16 %v988_v49, %v988_v49 }
 0x2f7   : > { %2702 = vmatmul.mubr.msk.bf16.vlgmr.msra.gmra.mxu0 %vm977_vm3, %v989_v50  ;;  %v2923_v50 = vld [vmem:[%s3590_s6 + $0x28] sm:$0xff]  }
 0x2f8   : > { %2715 = vmatprep.mubr.msk.bf16.mxu0 %vm3038_vm0, %v3037_v1  ;;  %2712 = vmatpush3.bf16.msra.mxu0 %v2919_v51 }
 0x2f9   : > { %2713 = vmatprep.subr.bf16.mxu0 %v3037_v1 }
 0x2fc   : > { %2714 = vmatpush3.bf16.msra.mxu0 %v2920_v52 }
 0x2fd   : > { %2727 = vmatprep.subr.bf16.mxu0 %v3037_v1 }
 0x2ff   : > { %2716 = vmatmul.mubr.msk.bf16.vlgmr.msra.gmra.mxu0 %vm747_vm1, %v3237_v6 }
 0x300   : > { %2731 = vmatprep.mubr.msk.bf16.mxu0 %vm3038_vm0, %v3037_v1  ;;  %2728 = vmatpush3.bf16.msra.mxu0 %v2921_v19  ;;  %v2928_v19 = vld [vmem:[%s3592_s8 + $0x20] sm:$0xff]  }
 0x301   : > { %2729 = vmatprep.subr.bf16.mxu0 %v3037_v1 }
 0x304   : > { %2730 = vmatpush3.bf16.msra.mxu0 %v2922_v20 }
 0x305   : > { %2741 = vmatprep.subr.bf16.mxu0 %v3037_v1 }
 0x307   : > { %2732 = vmatmul.mubr.msk.bf16.vlgmr.msra.gmra.mxu0 %vm747_vm1, %v3235_v5 }
 0x308   : > { %2743 = vmatprep.mubr.msk.bf16.mxu0 %vm3038_vm0, %v3037_v1 }
 0x3b7   : > { %v1027_v53 = vpop.f32.mrf.mxu0 }
 0x3b8   : > { %v1033_v55 = vpack.c.bf16 %v1027_v53, %v1027_v53 }
 0x3b9   : > { %v2703_v56 = vpop.f32.mrf.mxu0 }
 0x3ba   : > { %2708 = vmatmul.mubr.msk.bf16.vlgmr.msra.gmra.mxu1 %vm930_vm2, %v1033_v55 }
 0x3bb   : > { %v1030_v57 = vpop.f32.mrf.mxu0  ;;  %2720 = vmatpush3.bf16.msra.mxu1 %v2917_v54  ;;  %2723 = vmatprep.mubr.msk.bf16.mxu1 %vm3038_vm0, %v3037_v1  ;;  %v2924_v54 = vld [vmem:[%s3590_s6 + $0x20] sm:$0xff]  }
 0x3bc   : > { %2721 = vmatprep.subr.bf16.mxu1 %v3037_v1 }
 0x3bd   : > { %v2704_v59 = vpop.f32.mrf.mxu0 }
 0x3bf   : > { %2722 = vmatpush3.bf16.msra.mxu1 %v2918_v58  ;;  %v1148_v60 = vpop.f32.mrf.mxu0 }
 0x3c0   : > { %2735 = vmatprep.subr.bf16.mxu1 %v3037_v1  ;;  %v1149_v16 = vadd.f32 %v2498_v13, %v1148_v60  ;;  %v2492_v60 = vld [vmem:[%s3595_s11] ss:$0 sm:$0xff]  ;;  %v2529_v13 = vld [vmem:[%s3589_s5 + $0x2] ss:$0 sm:$0xff] }
 0x3c1   : > { %v2717_v61 = vpop.f32.mrf.mxu0 }
 0x3c2   : > { %2724 = vmatmul.mubr.msk.bf16.vlgmr.msra.gmra.mxu1 %vm747_vm1, %v3235_v5  ;;  %v1154_v18 = vpack.c.bf16 %v1149_v16, %v1149_v16 }
 0x3c3   : > { %2737 = vmatprep.mubr.msk.bf16.mxu1 %vm3038_vm0, %v3037_v1  ;;  %v1151_v62 = vpop.f32.mrf.mxu0 }
 0x3c5   : > { %v2718_v63 = vpop.f32.mrf.mxu0 }
 0x3c7   : > { %v1281_v28 = vpop.f32.mrf.mxu0 }
 0x3c8   : > { %v1282_v36 = vadd.f32 %v2516_v35, %v1281_v28 }
 0x3c9   : > { %v2733_v29 = vpop.f32.mrf.mxu0 }
 0x3cb   : > { %v1284_v37 = vpop.f32.mrf.mxu0 }
 0x3cc   : > { %v1285_v38 = vadd.f32 %v2516_v35, %v1284_v37 }
 0x3cd   : > { %v2734_v39 = vpop.f32.mrf.mxu0 }
 0x3ce   : > { %v1288_v40 = vpack.c.bf16 %v1285_v38, %v1282_v36 }
 0x3d0   : > { %2742 = vmatpush3.bf16.msra.mxu0 %v1288_v40  ;;  %v2553_v40 = vld [vmem:[%s3594_s10 + $0x8] sm:$0xf] }
 0x3d1   : > { %2753 = vmatprep.subr.bf16.mxu0 %v3037_v1  ;;  %v1748_v41 = vsel %vm1038_vm4, %v2553_v40, 0 }
 0x47a   : > { %v3319_v0 = vpop.f32.mrf.mxu1 }
 0x47b   : > { %v1088_v61 = vadd.f32 %v2492_v60, %v3319_v0 }
 0x47c   : > { %v2709_v2 = vpop.f32.mrf.mxu1 }
 0x47e   : > { %v1079_v3 = vpop.f32.mrf.mxu1 }
 0x480   : > { %v2710_v4 = vpop.f32.mrf.mxu1 }
 0x482   : > { %v1214_v7 = vpop.f32.mrf.mxu1 }
 0x483   : > { %v1215_v11 = vadd.f32 %v2507_v8, %v1214_v7 }
 0x484   : > { %v2725_v9 = vpop.f32.mrf.mxu1 }
 0x486   : > { %v1217_v10 = vpop.f32.mrf.mxu1 }
 0x487   : > { %v1218_v12 = vadd.f32 %v2507_v8, %v1217_v10  ;;  %v2538_v8 = vld [vmem:[%s3591_s7 + $0x2] ss:$0 sm:$0xff] }
 0x488   : > { %v2726_v14 = vpop.f32.mrf.mxu1 }
 0x489   : > { %v1221_v15 = vpack.c.bf16 %v1218_v12, %v1215_v11 }
 0x48b   : > { %v1293_v17 = vsel %vm930_vm2, %v1221_v15, 0 }
 0x48c   : > { %2736 = vmatpush3.bf16.xpose.msra.mxu1 %v1293_v17 }
 0x48d   : > { %2747 = vmatprep.subr.bf16.mxu1 %v3037_v1 }
 0x493   : > { %2738 = vmatmul.mubr.msk.bf16.vlgmr.msra.gmra.mxu1 %vm930_vm2, %v1154_v18  ;;  %v2927_v18 = vld [vmem:[%s3592_s8 + $0x28] sm:$0xff]  }
 0x494   : > { %2749 = vmatprep.mubr.msk.bf16.mxu1 %vm3038_vm0, %v3037_v1  ;;  %2748 = vmatpush3.bf16.msra.mxu1 %v1397_v42 }
 0x495   : > { %2761 = vmatprep.subr.bf16.mxu1 %v3037_v1 }
 0x553   : > { %v1329_v21 = vpop.f32.mrf.mxu1 }
 0x554   : > { %v1330_v22 = vadd.f32 %v3275_v25, %v1329_v21 }
 0x555   : > { %v2739_v23 = vpop.f32.mrf.mxu1 }
 0x556   : > { %v1335_v24 = vsel %vm977_vm3, %v1330_v22, -inf }
 0x557   : > { %1336 = vmax.xlane.f32.xlu1 %v1335_v24  ;;  %v1332_v26 = vpop.f32.mrf.mxu1 }
 0x559   : > { %v2740_v27 = vpop.f32.mrf.mxu1 }
 0x5e0   : > { %v1337_v30 = vpop.xlane.xlu1 %1336 }
 0x5e1   : > { %v1338_v31 = vsub.f32 %v1330_v22, %v1337_v30 }
 0x5e3   : > { %v1339_v32 = vmul.f32 1.442695, %v1338_v31 }
 0x5e5   : > { %2943 = vpow2.f32 %v1339_v32 }
 0x5f2   : > { %v2944_v33 = vpop.eup %2943 }
 0x5f3   : > { %v1341_v34 = vsel %vm977_vm3, %v2944_v33, 0.0 }
 0x5f4   : > { %1342 = vadd.xlane.f32.xlu1 %v1341_v34  ;;  %v2547_v34 = vld [vmem:[%s3593_s9 + $0x2] ss:$0 sm:$0xff] }
 0x67d   : > { %v1343_v43 = vpop.xlane.xlu1 %1342 }
 0x67e   : > { %2945 = vrcp.f32 %v1343_v43 }
 0x68b   : > { %v2946_v44 = vpop.eup %2945 }
 0x68c   : > { %v1345_v45 = vmul.f32 %v2946_v44, %v2944_v33 }
 0x68e   : > { %v1346_v46 = vpack.c.bf16 %v1345_v45, %v1345_v45 }
 0x690   : > { %2744 = vmatmul.mubr.msk.bf16.vlgmr.msra.gmra.mxu0 %vm977_vm3, %v1346_v46  ;;  %v2931_v46 = vld [vmem:[%s3632_s0 + $0x38] sm:$0xff]  }
 0x691   : > { %2757 = vmatprep.mubr.msk.bf16.mxu0 %vm3038_vm0, %v3037_v1  ;;  %2754 = vmatpush3.bf16.msra.mxu0 %v2925_v47  ;;  %v2932_v47 = vld [vmem:[%s3632_s0 + $0x30] sm:$0xff]   ;;  %s2356_s0 = scalar_lea.hbm %s3638_s30, %s2599_s19 }
 0x692   : > { %2755 = vmatprep.subr.bf16.mxu0 %v3037_v1 }
 0x695   : > { %2756 = vmatpush3.bf16.msra.mxu0 %v2926_v48 }
 0x696   : > { %2769 = vmatprep.subr.bf16.mxu0 %v3037_v1 }
 0x698   : > { %2758 = vmatmul.mubr.msk.bf16.vlgmr.msra.gmra.mxu0 %vm747_vm1, %v3237_v6 }
 0x699   : > { %2773 = vmatprep.mubr.msk.bf16.mxu0 %vm3038_vm0, %v3037_v1  ;;  %2770 = vmatpush3.bf16.msra.mxu0 %v2927_v18 }
 0x69a   : > { %2771 = vmatprep.subr.bf16.mxu0 %v3037_v1 }
 0x69d   : > { %2772 = vmatpush3.bf16.msra.mxu0 %v2928_v19 }
 0x69e   : > { %2783 = vmatprep.subr.bf16.mxu0 %v3037_v1 }
 0x6a0   : > { %2774 = vmatmul.mubr.msk.bf16.vlgmr.msra.gmra.mxu0 %vm747_vm1, %v3235_v5 }
 0x6a1   : > { %2785 = vmatprep.mubr.msk.bf16.mxu0 %vm3038_vm0, %v3037_v1 }
 0x750   : > { %v1384_v49 = vpop.f32.mrf.mxu0 }
 0x751   : > { %v1390_v51 = vpack.c.bf16 %v1384_v49, %v1384_v49  ;;  %v2929_v49 = vld [vmem:[%s3590_s6 + $0x38] sm:$0xff]  }
 0x752   : > { %v2745_v52 = vpop.f32.mrf.mxu0 }
 0x753   : > { %2750 = vmatmul.mubr.msk.bf16.vlgmr.msra.gmra.mxu1 %vm930_vm2, %v1390_v51 }
 0x754   : > { %v1387_v53 = vpop.f32.mrf.mxu0  ;;  %2762 = vmatpush3.bf16.msra.mxu1 %v2923_v50  ;;  %2765 = vmatprep.mubr.msk.bf16.mxu1 %vm3038_vm0, %v3037_v1 }
 0x755   : > { %2763 = vmatprep.subr.bf16.mxu1 %v3037_v1  ;;  %v2930_v53 = vld [vmem:[%s3590_s6 + $0x30] sm:$0xff]  }
 0x756   : > { %v2746_v55 = vpop.f32.mrf.mxu0 }
 0x758   : > { %2764 = vmatpush3.bf16.msra.mxu1 %v2924_v54  ;;  %v1499_v56 = vpop.f32.mrf.mxu0 }
 0x759   : > { %2777 = vmatprep.subr.bf16.mxu1 %v3037_v1  ;;  %v1500_v15 = vadd.f32 %v2529_v13, %v1499_v56 }
 0x75a   : > { %v2759_v57 = vpop.f32.mrf.mxu0 }
 0x75b   : > { %2766 = vmatmul.mubr.msk.bf16.vlgmr.msra.gmra.mxu1 %vm747_vm1, %v3235_v5  ;;  %v1505_v17 = vpack.c.bf16 %v1500_v15, %v1500_v15  ;;  %v2934_v15 = vld [vmem:[%s3592_s8 + $0x30] sm:$0xff]  }
 0x75c   : > { %2779 = vmatprep.mubr.msk.bf16.mxu1 %vm3038_vm0, %v3037_v1  ;;  %v1502_v58 = vpop.f32.mrf.mxu0 }
 0x75e   : > { %v2760_v59 = vpop.f32.mrf.mxu0 }
 0x760   : > { %v1632_v27 = vpop.f32.mrf.mxu0 }
 0x761   : > { %v1633_v35 = vadd.f32 %v2547_v34, %v1632_v27 }
 0x762   : > { %v2775_v28 = vpop.f32.mrf.mxu0 }
 0x764   : > { %v1635_v36 = vpop.f32.mrf.mxu0 }
 0x765   : > { %v1636_v37 = vadd.f32 %v2547_v34, %v1635_v36  ;;  %v2584_v34 = vld [vmem:[%s3594_s10 + $0xc] sm:$0xf] }
 0x766   : > { %v2776_v38 = vpop.f32.mrf.mxu0 }
 0x767   : > { %v1639_v39 = vpack.c.bf16 %v1636_v37, %v1633_v35  ;;  %v2099_v35 = vsel %vm1038_vm4, %v2584_v34, 0  ;;  %v2596_v34 = vld [vmem:[%s3602_s18] ss:$0 sm:$0xff] }
 0x769   : > { %2784 = vmatpush3.bf16.msra.mxu0 %v1639_v39 }
 0x76a   : > { %2795 = vmatprep.subr.bf16.mxu0 %v3037_v1 }
 0x813   : > { %v1433_v62 = vpop.f32.mrf.mxu1 }
 0x814   : > { %v3390_v63 = vadd.f32 %v1433_v62, %v1088_v61 }
 0x815   : > { %v2751_v2 = vpop.f32.mrf.mxu1 }
 0x817   : > { %v1436_v3 = vpop.f32.mrf.mxu1 }
 0x818   : > { %v2569_v3 = vld [vmem:[%s3591_s7 + $0x3] ss:$0 sm:$0xff] }
 0x819   : > { %v2752_v4 = vpop.f32.mrf.mxu1 }
 0x81b   : > { %v1565_v7 = vpop.f32.mrf.mxu1 }
 0x81c   : > { %v1566_v11 = vadd.f32 %v2538_v8, %v1565_v7 }
 0x81d   : > { %v2767_v9 = vpop.f32.mrf.mxu1 }
 0x81f   : > { %v1568_v10 = vpop.f32.mrf.mxu1 }
 0x820   : > { %v1569_v12 = vadd.f32 %v2538_v8, %v1568_v10 }
 0x821   : > { %v2768_v0 = vpop.f32.mrf.mxu1 }
 0x822   : > { %v1572_v14 = vpack.c.bf16 %v1569_v12, %v1566_v11  ;;  %v2560_v11 = vld [vmem:[%s3589_s5 + $0x3] ss:$0 sm:$0xff] }
 0x824   : > { %v1644_v16 = vsel %vm930_vm2, %v1572_v14, 0  ;;  %v2933_v14 = vld [vmem:[%s3592_s8 + $0x38] sm:$0xff]  }
 0x825   : > { %2778 = vmatpush3.bf16.xpose.msra.mxu1 %v1644_v16 }
 0x826   : > { %2789 = vmatprep.subr.bf16.mxu1 %v3037_v1 }
 0x82c   : > { %2780 = vmatmul.mubr.msk.bf16.vlgmr.msra.gmra.mxu1 %vm930_vm2, %v1505_v17 }
 0x82d   : > { %2791 = vmatprep.mubr.msk.bf16.mxu1 %vm3038_vm0, %v3037_v1  ;;  %2790 = vmatpush3.bf16.msra.mxu1 %v1748_v41 }
 0x82e   : > { %2803 = vmatprep.subr.bf16.mxu1 %v3037_v1 }
 0x8ec   : > { %v1680_v20 = vpop.f32.mrf.mxu1 }
 0x8ed   : > { %v1681_v21 = vadd.f32 %v3275_v25, %v1680_v20 }
 0x8ee   : > { %v2781_v22 = vpop.f32.mrf.mxu1 }
 0x8ef   : > { %v1686_v23 = vsel %vm977_vm3, %v1681_v21, -inf }
 0x8f0   : > { %1687 = vmax.xlane.f32.xlu0 %v1686_v23  ;;  %v1683_v24 = vpop.f32.mrf.mxu1 }
 0x8f2   : > { %v2782_v26 = vpop.f32.mrf.mxu1 }
 0x979   : > { %v1688_v29 = vpop.xlane.xlu0 %1687 }
 0x97a   : > { %v1689_v30 = vsub.f32 %v1681_v21, %v1688_v29 }
 0x97c   : > { %v1690_v31 = vmul.f32 1.442695, %v1689_v30 }
 0x97e   : > { %2947 = vpow2.f32 %v1690_v31 }
 0x98b   : > { %v2948_v32 = vpop.eup %2947 }
 0x98c   : > { %v1692_v33 = vsel %vm977_vm3, %v2948_v32, 0.0 }
 0x98d   : > { %1693 = vadd.xlane.f32.xlu1 %v1692_v33 }
 0xa16   : > { %v1694_v42 = vpop.xlane.xlu1 %1693 }
 0xa17   : > { %2949 = vrcp.f32 %v1694_v42 }
 0xa24   : > { %v2950_v43 = vpop.eup %2949 }
 0xa25   : > { %v1696_v44 = vmul.f32 %v2950_v43, %v2948_v32 }
 0xa27   : > { %v1697_v45 = vpack.c.bf16 %v1696_v44, %v1696_v44 }
 0xa29   : > { %2786 = vmatmul.mubr.msk.bf16.vlgmr.msra.gmra.mxu0 %vm977_vm3, %v1697_v45  ;;  %v2142_v45 = vld [vmem:[%s708_s25] sm:$0xf]  ;;  %s2358_s25 = sshll.u32 %s689_s23, 4  ;;  %s2359_s25 = int_to_ptr.vmem [resolvable:$true] %s2358_s25 }
 0xa2a   : > { %2799 = vmatprep.mubr.msk.bf16.mxu0 %vm3038_vm0, %v3037_v1  ;;  %2796 = vmatpush3.bf16.msra.mxu0 %v2931_v46  ;;  %v2143_v46 = vunpack.c.l.bf16 %v2142_v45  ;;  %s2959_s29 = scalar_lea.vmem %s2359_s25, 64  ;;  %p2966_p1 = scmp.lt.s32.totalorder %s2359_s25, %s2964_s20 }
 0xa2b   : > { %2797 = vmatprep.subr.bf16.mxu0 %v3037_v1  ;;  %p2960_p12 = scmp.ne.s32.totalorder %s2359_s25, %s2959_s29  ;;  %p2967_p2 = scmp.lt.s32.totalorder %s2965_s24, %s2959_s29 }
 0xa2d   : > { %p2961_p13 = pnand %p2960_p12, %p3185_p4  ;;  %p2968_p3 = por %p2967_p2, %p2966_p1 }
 0xa2e   : > { %2798 = vmatpush3.bf16.msra.mxu0 %v2932_v47 }
 0xa2f   : > { %2811 = vmatprep.subr.bf16.mxu0 %v3037_v1  ;;  %p2962_p0 = pneg %p2961_p13 }
 0xa31   : > { %2800 = vmatmul.mubr.msk.bf16.vlgmr.msra.gmra.mxu0 %vm747_vm1, %v3237_v6  ;;  %p2969_p5 = pnand %p2968_p3, %p2962_p0 }
 0xa32   : > { %2815 = vmatprep.mubr.msk.bf16.mxu0 %vm3038_vm0, %v3037_v1  ;;  %2812 = vmatpush3.bf16.msra.mxu0 %v2933_v14 }
 0xa33   : > { %2813 = vmatprep.subr.bf16.mxu0 %v3037_v1 }
 0xa36   : > { %2814 = vmatpush3.bf16.msra.mxu0 %v2934_v15 }
 0xa37   : > { %2825 = vmatprep.subr.bf16.mxu0 %v3037_v1 }
 0xa39   : > { %2816 = vmatmul.mubr.msk.bf16.vlgmr.msra.gmra.mxu0 %vm747_vm1, %v3235_v5 }
 0xa3a   : > { %2827 = vmatprep.mubr.msk.bf16.mxu0 %vm3038_vm0, %v3037_v1 }
 0xae9   : > { %v1735_v48 = vpop.f32.mrf.mxu0 }
 0xaea   : > { %v1741_v50 = vpack.c.bf16 %v1735_v48, %v1735_v48 }
 0xaeb   : > { %v2787_v51 = vpop.f32.mrf.mxu0 }
 0xaec   : > { %2792 = vmatmul.mubr.msk.bf16.vlgmr.msra.gmra.mxu1 %vm930_vm2, %v1741_v50 }
 0xaed   : > { %v1738_v52 = vpop.f32.mrf.mxu0  ;;  %2804 = vmatpush3.bf16.msra.mxu1 %v2929_v49  ;;  %2807 = vmatprep.mubr.msk.bf16.mxu1 %vm3038_vm0, %v3037_v1 }
 0xaee   : > { %2805 = vmatprep.subr.bf16.mxu1 %v3037_v1 }
 0xaef   : > { %v2788_v6 = vpop.f32.mrf.mxu0 }
 0xaf1   : > { %2806 = vmatpush3.bf16.msra.mxu1 %v2930_v53  ;;  %v1850_v54 = vpop.f32.mrf.mxu0 }
 0xaf2   : > { %2819 = vmatprep.subr.bf16.mxu1 %v3037_v1 }
 0xaf3   : > { %v2801_v55 = vpop.f32.mrf.mxu0 }
 0xaf4   : > { %2808 = vmatmul.mubr.msk.bf16.vlgmr.msra.gmra.mxu1 %vm747_vm1, %v3235_v5 }
 0xaf5   : > { %2821 = vmatprep.mubr.msk.bf16.mxu1 %vm3038_vm0, %v3037_v1  ;;  %v1853_v56 = vpop.f32.mrf.mxu0 }
 0xaf7   : > { %v2802_v57 = vpop.f32.mrf.mxu0 }
 0xaf9   : > { %v1983_v22 = vpop.f32.mrf.mxu0 }
 0xafb   : > { %v2817_v23 = vpop.f32.mrf.mxu0 }
 0xafd   : > { %v1986_v30 = vpop.f32.mrf.mxu0 }
 0xaff   : > { %v2818_v32 = vpop.f32.mrf.mxu0 }
 0xbac   : > { %v1784_v58 = vpop.f32.mrf.mxu1 }
 0xbad   : > { %v3458_v59 = vadd.f32 %v1784_v58, %v3390_v63  ;;  %v1851_v63 = vadd.f32 %v2560_v11, %v1850_v54  ;;  %v2935_v58 = vld [vmem:[%s3598_s14 + $0x8] sm:$0xff]  }
 0xbae   : > { %v2793_v60 = vpop.f32.mrf.mxu1  ;;  %v2937_v11 = vld [vmem:[%s3600_s16 + $0x8] sm:$0xff]  }
 0xbaf   : > { %v1856_v0 = vpack.c.bf16 %v1851_v63, %v1851_v63  ;;  %v2588_v63 = vld [vmem:[%s3599_s15] ss:$0 sm:$0xff] }
 0xbb0   : > { %v1787_v61 = vpop.f32.mrf.mxu1 }
 0xbb2   : > { %v2794_v62 = vpop.f32.mrf.mxu1 }
 0xbb4   : > { %v1916_v2 = vpop.f32.mrf.mxu1 }
 0xbb5   : > { %v1917_v8 = vadd.f32 %v2569_v3, %v1916_v2 }
 0xbb6   : > { %v2809_v4 = vpop.f32.mrf.mxu1 }
 0xbb8   : > { %v1919_v7 = vpop.f32.mrf.mxu1 }
 0xbb9   : > { %v1920_v9 = vadd.f32 %v2569_v3, %v1919_v7  ;;  %v2586_v3 = vld [vmem:[%s3596_s12] ss:$0 sm:$0xff] }
 0xbba   : > { %v2810_v10 = vpop.f32.mrf.mxu1  ;;  %v2587_v7 = vld [vmem:[%s3597_s13] ss:$0 sm:$0xff] }
 0xbbb   : > { %v1923_v12 = vpack.c.bf16 %v1920_v9, %v1917_v8 }
 0xbbd   : > { %v1995_v13 = vsel %vm930_vm2, %v1923_v12, 0  ;;  %v2938_v12 = vld [vmem:[%s3600_s16] sm:$0xff]  }
 0xbbe   : > { %2820 = vmatpush3.bf16.xpose.msra.mxu1 %v1995_v13 }
 0xbbf   : > { %2831 = vmatprep.subr.bf16.mxu1 %v3037_v1 }
 0xbc5   : > { %2822 = vmatmul.mubr.msk.bf16.vlgmr.msra.gmra.mxu1 %vm930_vm2, %v1856_v0 }
 0xbc6   : > { %2833 = vmatprep.mubr.msk.bf16.mxu1 %vm3038_vm0, %v3037_v1  ;;  %2832 = vmatpush3.bf16.msra.mxu1 %v2099_v35 }
 0xbc7   : > { %2845 = vmatprep.subr.bf16.mxu1 %v3037_v1 }
 0xc85   : > { %v2031_v16 = vpop.f32.mrf.mxu1 }
 0xc86   : > { %v2032_v17 = vadd.f32 %v3275_v25, %v2031_v16  ;;  %v2578_v25 = vld [vmem:[%s3593_s9 + $0x3] ss:$0 sm:$0xff] }
 0xc87   : > { %v2823_v18 = vpop.f32.mrf.mxu1  ;;  %v1984_v29 = vadd.f32 %v2578_v25, %v1983_v22  ;;  %v1987_v31 = vadd.f32 %v2578_v25, %v1986_v30 }
 0xc88   : > { %v2037_v19 = vsel %vm977_vm3, %v2032_v17, -inf }
 0xc89   : > { %2038 = vmax.xlane.f32.xlu0 %v2037_v19  ;;  %v2034_v20 = vpop.f32.mrf.mxu1  ;;  %v1990_v33 = vpack.c.bf16 %v1987_v31, %v1984_v29 }
 0xc8b   : > { %v2824_v21 = vpop.f32.mrf.mxu1  ;;  %2826 = vmatpush3.bf16.msra.mxu0 %v1990_v33 }
 0xc8c   : > { %2837 = vmatprep.subr.bf16.mxu0 %v3037_v1 }
 0xd12   : > { %v2039_v24 = vpop.xlane.xlu0 %2038 }
 0xd13   : > { %v2040_v26 = vsub.f32 %v2032_v17, %v2039_v24 }
 0xd15   : > { %v2041_v27 = vmul.f32 1.442695, %v2040_v26 }
 0xd17   : > { %2951 = vpow2.f32 %v2041_v27 }
 0xd24   : > { %v2952_v28 = vpop.eup %2951 }
 0xd25   : > { %v2043_v5 = vsel %vm977_vm3, %v2952_v28, 0.0 }
 0xd26   : > { %2044 = vadd.xlane.f32.xlu1 %v2043_v5 }
 0xdaf   : > { %v2045_v36 = vpop.xlane.xlu1 %2044 }
 0xdb0   : > { %2953 = vrcp.f32 %v2045_v36  ;;  %v2597_v36 = vld [vmem:[%s3637_s1] ss:$0 sm:$0xff] }
 0xdbd   : > { %v2954_v37 = vpop.eup %2953 }
 0xdbe   : > { %v2047_v38 = vmul.f32 %v2954_v37, %v2952_v28 }
 0xdc0   : > { %v2048_v39 = vpack.c.bf16 %v2047_v38, %v2047_v38 }
 0xdc2   : > { %2828 = vmatmul.mubr.msk.bf16.vlgmr.msra.gmra.mxu0 %vm977_vm3, %v2048_v39 }
 0xdc3   : > { %2841 = vmatprep.mubr.msk.bf16.mxu0 %vm3038_vm0, %v3037_v1  ;;  %2838 = vmatpush3.bf16.msra.mxu0 %v2935_v58 }
 0xdc4   : > { %2839 = vmatprep.subr.bf16.mxu0 %v3037_v1 }
 0xe82   : > { %v2086_v40 = vpop.f32.mrf.mxu0 }
 0xe83   : > { %v2092_v41 = vpack.c.bf16 %v2086_v40, %v2086_v40 }
 0xe84   : > { %v2829_v42 = vpop.f32.mrf.mxu0 }
 0xe85   : > { %2834 = vmatmul.mubr.msk.bf16.vlgmr.msra.gmra.mxu1 %vm930_vm2, %v2092_v41 }
 0xe86   : > { %v2089_v43 = vpop.f32.mrf.mxu0  ;;  %2849 = vmatprep.mubr.msk.bf16.mxu1 %vm3038_vm0, %v3037_v1  ;;  %2846 = vmatpush3.bf16.msra.mxu1 %v2937_v11 }
 0xe87   : > { %2847 = vmatprep.subr.bf16.mxu1 %v3037_v1  ;;  %v2592_v1 = vld [vmem:[%s3601_s17] ss:$0 sm:$0xff] }
 0xe88   : > { %v2830_v44 = vpop.f32.mrf.mxu0 }
 0xe8a   : > { %2848 = vmatpush3.bf16.msra.mxu1 %v2938_v12 }
 0xf45   : > { %v2135_v47 = vpop.f32.mrf.mxu1 }
 0xf46   : > { %v2141_v48 = vadd.f32 %v2135_v47, %v3458_v59  ;;  %v2936_v59 = vld [vmem:[%s3598_s14] sm:$0xff]  }
 0xf47   : > { %v2835_v49 = vpop.f32.mrf.mxu1  ;;  %2840 = vmatpush3.bf16.msra.mxu0 %v2936_v59 }
 0xf48   : > { %v2144_v50 = vadd.f32 %v2143_v46, %v2141_v48 }
 0xf49   : > { %v2138_v51 = vpop.f32.mrf.mxu1 }
 0xf4a   : > { %v2145_v52 = vsel %vm747_vm1, %v2144_v50, 0.0 }
 0xf4b   : > { %2146 = vadd.xlane.f32.xlu0 %v2145_v52  ;;  %v2836_v53 = vpop.f32.mrf.mxu1 }
 0xfd4   : > { %v2147_v6 = vpop.xlane.xlu0 %2146 }
 0xfd5   : > { %v2149_v54 = vmul.f32 0.03125, %v2147_v6 }
 0xfd7   : > { %v2150_v55 = vsub.f32 %v2144_v50, %v2149_v54 }
 0xfd9   : > { %v2151_v56 = vmul.f32 %v2150_v55, %v2150_v55 }
 0xfdb   : > { %v2152_v57 = vsel %vm747_vm1, %v2151_v56, 0.0 }
 0xfdc   : > { %2153 = vadd.xlane.f32.xlu1 %v2152_v57 }
0x1065   : > { %v2154_v60 = vpop.xlane.xlu1 %2153 }
0x1066   : > { %v2155_v61 = vmul.f32 0.03125, %v2154_v60 }
0x1068   : > { %v2156_v62 = vadd.f32 1e-05, %v2155_v61 }
0x106a   : > { %2955 = vrsqrt.f32 %v2156_v62 }
0x1077   : > { %v2956_v2 = vpop.eup %2955 }
0x1078   : > { %v2158_v4 = vmul.f32 %v2956_v2, %v2150_v55 }
0x107a   : > { %v2166_v8 = vmul.f32 %v2586_v3, %v2158_v4 }
0x107c   : > { %v2174_v9 = vadd.f32 %v2587_v7, %v2166_v8 }
0x107e   : > { %v2175_v10 = vpack.c.bf16 %v2174_v9, %v2174_v9 }
0x1080   : > { %2842 = vmatmul.mubr.msk.bf16.vlgmr.msra.gmra.mxu0 %vm747_vm1, %v2175_v10 }
0x1140   : > { %v2236_v13 = vpop.f32.mrf.mxu0 }
0x1141   : > { %v2237_v0 = vadd.f32 %v2588_v63, %v2236_v13 }
0x1142   : > { %v2843_v14 = vpop.f32.mrf.mxu0 }
0x1143   : > { %v2242_v15 = vmax.f32 %v2237_v0, 0.0 }
0x1144   : > { %v2239_v16 = vpop.f32.mrf.mxu0 }
0x1145   : > { %v2243_v17 = vpack.c.bf16 %v2242_v15, %v2242_v15 }
0x1146   : > { %v2844_v18 = vpop.f32.mrf.mxu0 }
0x1147   : > { %2850 = vmatmul.mubr.msk.bf16.vlgmr.msra.gmra.mxu1 %vm747_vm1, %v2243_v17 }
0x1207   : > { %v2304_v19 = vpop.f32.mrf.mxu1 }
0x1208   : > { %v2305_v20 = vadd.f32 %v2592_v1, %v2304_v19 }
0x1209   : > { %v2851_v21 = vpop.f32.mrf.mxu1 }
0x120a   : > { %v2310_v22 = vadd.f32 %v2305_v20, %v2174_v9 }
0x120b   : > { %v2307_v23 = vpop.f32.mrf.mxu1 }
0x120c   : > { %v2311_v24 = vsel %vm747_vm1, %v2310_v22, 0.0 }
0x120d   : > { %2312 = vadd.xlane.f32.xlu0 %v2311_v24  ;;  %v2852_v26 = vpop.f32.mrf.mxu1 }
0x1296   : > { %v2313_v27 = vpop.xlane.xlu0 %2312 }
0x1297   : > { %v2314_v28 = vmul.f32 0.03125, %v2313_v27 }
0x1299   : > { %v2315_v5 = vsub.f32 %v2310_v22, %v2314_v28 }
0x129b   : > { %v2316_v25 = vmul.f32 %v2315_v5, %v2315_v5 }
0x129d   : > { %v2317_v29 = vsel %vm747_vm1, %v2316_v25, 0.0 }
0x129e   : > { %2318 = vadd.xlane.f32.xlu1 %v2317_v29 }
0x1327   : > { %v2319_v30 = vpop.xlane.xlu1 %2318 }
0x1328   : > { %v2320_v31 = vmul.f32 0.03125, %v2319_v30 }
0x132a   : > { %v2321_v32 = vadd.f32 1e-05, %v2320_v31 }
0x132c   : > { %2957 = vrsqrt.f32 %v2321_v32 }
0x1339   : > { %v2958_v33 = vpop.eup %2957 }
0x133a   : > { %v2323_v35 = vmul.f32 %v2958_v33, %v2315_v5 }
0x133c   : > { %v2331_v37 = vmul.f32 %v2596_v34, %v2323_v35 }
0x133e   : > { %v2339_v38 = vadd.f32 %v2597_v36, %v2331_v37 }
0x1340   : > { %v2340_v39 = vpack.c.bf16 %v2339_v38, %v2339_v38 }
0x1342   : > { %2342 = vst.msk [vmem:[%s689_s23] sm:$0xf] %vm2341_vm5, %v2340_v39 }
0x1343   : > { %2972 = shalt.err (!%p2969_p5)
}
0x1344   : > { %s2973_s27 = scalar_lea.hbm %s2356_s0, 64  ;;  %s2977_s19 = scalar_lea.hbm %s3638_s30, 128 }
0x1345   : > { %p2974_p6 = scmp.ne.s32.totalorder %s2356_s0, %s2973_s27  ;;  %p2978_p10 = scmp.lt.s32.totalorder %s2356_s0, %s3638_s30 }
0x1346   : > { %p2979_p11 = scmp.lt.s32.totalorder %s2977_s19, %s2973_s27 }
0x1347   : > { %p2975_p7 = pnand %p2974_p6, %p3185_p4 }
0x1348   : > { %p2980_p12 = por %p2979_p11, %p2978_p10 }
0x1349   : > { %p2976_p9 = pneg %p2975_p7 }
0x134b   : > { %p2981_p13 = pnand %p2980_p12, %p2976_p9 }
0x134d   : > { %2984 = shalt.err (!%p2981_p13)
}
0x134e   : > { %2853 = dma.vmem_to_hbm [thread:$0]  (%p3185_p4), %s2359_s25, 64, %s2356_s0, %s2344_s2  }
0x134f PF: > { %s3639_s26 = sld [smem:[#allocation8_spill]] }
0x1350   : > { %s3640_s29 = sld [smem:[#allocation5_spill]] }
0x1355   : > { %p2859_p0 = scmp.ge.s32.totalorder %s3639_s26, 2 }
0x1356   : > { %s2370_s20 = sand.u32 1, %s3640_s29  }
0x1357   : > { %p2856_p1 = pnand %p2859_p0, %p3192_p8  ;;  %s2371_s24 = scalar_lea.sflag [#allocation3], %s2370_s20 }
0x1359   : > { %p2857_p2 = pneg %p2856_p1 }
0x135b   : > { %3010 = dma.done.wait (%p2857_p2), %s2371_s24, 64  }
0x135c   : > { %3012 = vsyncadd (%p2857_p2), %s2371_s24, 4294967232  ;;  %s33_s25 = sadd.s32 1, %s3639_s26   ;;  %s3642_s27 = sld [smem:[#allocation6_spill]] }
0x135d   : > { %p30_p3 = scmp.ge.s32.totalorder %s33_s25, 4   ;;  %s3643_s23 = sld [smem:[#allocation11_spill]] }
0x135e   : > { %s3644_s24 = sld [smem:[#allocation7_spill]]  ;;  %s3646_s1 = smov %s3019_s22 }
0x135f   : > { %s3645_s2 = sld [smem:[#allocation9_spill]]  ;;  %32 = sbr.rel (!%p30_p3) target bundleno = 12 (0xc), region = 165 }
0x1362   : > { %s3647_s22 = smov %s3642_s27 }
0x1364   :  { %2376 = vsyncpa [#allocation3], 1 }
0x1365   :  { %2378 = vsyncpa [#allocation3 + $0x1], 1 }

// kernel: cross_attention_layer.3
= control target key start
LH: loop header
LB: loop body
LE: loop exit
PB: predicated region body
PF: predicated region fallthrough
CT: control target
= control target key end

     0   :  { %s3802_s0 = inlined_call_operand.vmem [shape: bf16[2,16,32], index: 0, kind: input, shape index: {}]   ;;  %s3803_s1 = inlined_call_operand.vmem [shape: bf16[2,8,32], index: 1, kind: input, shape index: {}]   ;;  %s3804_s2 = inlined_call_operand.vmem [shape: bf16[2,16,32], index: 2, kind: input, shape index: {}]   ;;  %s3805_s3 = inlined_call_operand.vmem [shape: f32[2,1,8], index: 3, kind: input, shape index: {}]   ;;  %s3806_s4 = inlined_call_operand.vmem [shape: bf16[4,32,8], index: 4, kind: input, shape index: {}]   ;;  %s3807_s5 = inlined_call_operand.vmem [shape: f32[4,1,8], index: 5, kind: input, shape index: {}]   ;;  %s3808_s6 = inlined_call_operand.vmem [shape: bf16[4,32,8], index: 6, kind: input, shape index: {}]   ;;  %s3809_s7 = inlined_call_operand.vmem [shape: f32[4,1,8], index: 7, kind: input, shape index: {}]   ;;  %s3810_s8 = inlined_call_operand.vmem [shape: bf16[4,32,8], index: 8, kind: input, shape index: {}]   ;;  %s3811_s9 = inlined_call_operand.vmem [shape: f32[4,1,8], index: 9, kind: input, shape index: {}]   ;;  %s3812_s10 = inlined_call_operand.vmem [shape: bf16[4,8,32], index: 10, kind: input, shape index: {}]   ;;  %s3813_s11 = inlined_call_operand.vmem [shape: f32[1,32], index: 11, kind: input, shape index: {}]   ;;  %s3814_s12 = inlined_call_operand.vmem [shape: f32[1,32], index: 12, kind: input, shape index: {}]   ;;  %s3815_s13 = inlined_call_operand.vmem [shape: f32[1,32], index: 13, kind: input, shape index: {}]   ;;  %s3816_s14 = inlined_call_operand.vmem [shape: bf16[32,32], index: 14, kind: input, shape index: {}]   ;;  %s3817_s15 = inlined_call_operand.vmem [shape: f32[1,32], index: 15, kind: input, shape index: {}]   ;;  %s3818_s16 = inlined_call_operand.vmem [shape: bf16[32,32], index: 16, kind: input, shape index: {}]   ;;  %s3819_s17 = inlined_call_operand.vmem [shape: f32[1,32], index: 17, kind: input, shape index: {}]   ;;  %s3820_s18 = inlined_call_operand.vmem [shape: f32[1,32], index: 18, kind: input, shape index: {}]   ;;  %s3821_s19 = inlined_call_operand.vmem [shape: f32[1,32], index: 19, kind: input, shape index: {}]   ;;  %s3822_s20 = inlined_call_operand.hbm [shape: bf16[2,16,32], index: 20, kind: output, shape index: {}]  }
   0x1   :  { %3830 = sst [smem:[#allocation11_spill]] %s3802_s0 }
   0x2   :  { %3831 = sst [smem:[#allocation12_spill]] %s3803_s1 }
   0x3   :  { %3832 = sst [smem:[#allocation13_spill]] %s3804_s2 }
   0x4   :  { %3833 = sst [smem:[#allocation14_spill]] %s3805_s3 }
   0x5   :  { %3834 = sst [smem:[#allocation15_spill]] %s3806_s4 }
   0x6   :  { %3835 = sst [smem:[#allocation16_spill]] %s3807_s5 }
   0x7   :  { %3836 = sst [smem:[#allocation17_spill]] %s3822_s20 }
   0x8   :  { %25 = vsyncpa [#allocation3], 0 }
   0x9   :  { %27 = vsyncpa [#allocation3 + $0x1], 0  ;;  %s3319_s1 = smov 0   ;;  %s3321_s22 = smov 0  }
   0xa   :  { %s3323_s23 = smov 0   ;;  %s3325_s24 = smov 0  }
   0xb   :  { %s3327_s2 = smov 0   ;;  %s3329_s25 = smov 0  }
   0xc LB: > { %3837 = sst [smem:[#allocation5_spill]] %s3187_s1  ;;  %s2603_s3 = sadd.s32 4294967295, %s3207_s25   ;;  %s3207_s25 = sphi %s3329_s25, %s33_s25   ;;  %s3203_s2 = sphi %s3327_s2, %s3858_s2   ;;  %s3199_s24 = sphi %s3325_s24, %s3857_s24   ;;  %s3195_s23 = sphi %s3323_s23, %s3856_s23   ;;  %s3191_s22 = sphi %s3321_s22, %s3860_s22   ;;  %s3187_s1 = sphi %s3319_s1, %s3859_s1  }
   0xd   : > { %3838 = sst [smem:[#allocation6_spill]] %s3195_s23  ;;  %s2604_s26 = sadd.s32 4294967294, %s3207_s25  }
   0xe   : > { %3839 = sst [smem:[#allocation7_spill]] %s3203_s2  ;;  %s45_s27 = sadd.s32 1, %s3203_s2 }
   0xf   : > { %s498_s28 = sadd.s32 1, %s3195_s23  ;;  %p47_p0 = scmp.ge.s32.totalorder %s45_s27, 2 }
  0x10   : > { %p508_p1 = scmp.ne.s32.totalorder %s3195_s23, %s3191_s22  ;;  %p509_p2 = scmp.eq.s32.totalorder %s2603_s3, 1 }
  0x11   : > { %p514_p3 = scmp.ne.s32.totalorder %s3191_s22, %s3187_s1  ;;  %s3862_s27 = smov (%p47_p0, %s45_s27), 0 }
  0x12   : > { %3840 = sst [smem:[#allocation8_spill]] %s3862_s27  ;;  %p3359_p4 = por %p509_p2, %p508_p1 }
  0x13   : > { %p515_p5 = scmp.eq.s32.totalorder %s2604_s26, 1  ;;  %s493_s29 = ssub.s32 %s3203_s2, %s3862_s27 }
  0x14   : > { %p2607_p6 = scmp.ge.s32.totalorder %s3207_s25, 1  ;;  %p496_p7 = scmp.eq.s32.totalorder %s493_s29, 0 }
  0x15   : > { %p3366_p8 = por %p515_p5, %p514_p3  ;;  %p620_p9 = scmp.lt.s32.totalorder %s3207_s25, 3 }
  0x16   : > { %s3372_s0 = scalar_select %p496_p7, %s3195_s23, %s498_s28  }
  0x17   : > { %s3842_s30 = scalar_select %p3366_p8, 1, 0 }
  0x18   : > { %3844 = sst [smem:[#allocation10_spill]] %s3372_s0  ;;  %p621_p10 = pnand %p2607_p6, %p620_p9 }
  0x19   : > { %3843 = sst [smem:[#allocation9_spill]] %s3842_s30  ;;  %p699_p11 = scmp.lt.s32.totalorder (!%p621_p10), %s3199_s24, 1 }
  0x1a   : > { %624 = sbr.rel (%p621_p10) target bundleno = 4972 (0x136c), region = 100  ;;  %s3845_s1 = sld [smem:[#allocation15_spill]] (!%p621_p10) }
  0x1b   : > { %s3848_s23 = sld [smem:[#allocation12_spill]] (!%p621_p10)  ;;  %s695_s28 = sand.u32 (!%p621_p10), 1, %s3191_s22  }
  0x1c   : > { %s3849_s5 = sld [smem:[#allocation16_spill]] (!%p621_p10) }
  0x1d   : > { %s3850_s2 = sld [smem:[#allocation14_spill]] (!%p621_p10) }
  0x1f   : > { %v3209_v1 = vmov 0.0   ;;  %v3063_v2 = vld [vmem:[%s3808_s6 + $0x8] sm:$0xff]   ;;  %vm3210_vm0 = vmmov 0   ;;  %v3065_v4 = vld [vmem:[%s3808_s6] sm:$0xff]   ;;  %s3396_s3 = scalar_select %p699_p11, %s3199_s24, 1  ;;  %vm766_vm1 = vcmask 261120  }
  0x20   : > { %s3846_s20 = smov %s3845_s1  ;;  %v3062_v0 = vld [vmem:[%s3845_s1 + $0x8] sm:$0xff]   ;;  %2819 = vmatprep.subr.bf16.mxu0 %v3209_v1  ;;  %2827 = vmatprep.subr.bf16.mxu1 %v3209_v1  ;;  %s3847_s1 = sld [smem:[#allocation11_spill]]  ;;  %v2620_v7 = vld [vmem:[%s3809_s7] ss:$0 sm:$0xff]  ;;  %vm943_vm2 = vcmask 64512   ;;  %vm1017_vm3 = vcmask 1043456  }
  0x21   : > { %2820 = vmatpush3.bf16.msra.mxu0 %v3062_v0  ;;  %v3064_v3 = vld [vmem:[%s3846_s20] sm:$0xff]   ;;  %2823 = vmatprep.mubr.msk.bf16.mxu0 %vm3210_vm0, %v3209_v1  ;;  %s2744_s27 = sshll.u32 %s3396_s3, 3  ;;  %s2611_s26 = sshll.u32 %s3396_s3, 2  ;;  %v3067_v23 = vld [vmem:[%s3810_s8 + $0x8] sm:$0xff]   ;;  %v3069_v61 = vld [vmem:[%s3846_s20 + $0x18] sm:$0xff]   ;;  %vm2466_vm4 = vcmask 257024  }
  0x22   : > { %2828 = vmatpush3.bf16.msra.mxu1 %v3063_v2  ;;  %2821 = vmatprep.subr.bf16.mxu0 %v3209_v1  ;;  %s711_s30 = scalar_lea.vmem %s3848_s23, %s2611_s26  ;;  %v2615_v14 = vld [vmem:[%s3849_s5] ss:$0 sm:$0xff]  ;;  %v3071_v62 = vld [vmem:[%s3846_s20 + $0x10] sm:$0xff]   ;;  %s3852_s26 = sld [smem:[#allocation17_spill]] }
  0x23   : > { %2829 = vmatprep.subr.bf16.mxu1 %v3209_v1  ;;  %2831 = vmatprep.mubr.msk.bf16.mxu1 %vm3210_vm0, %v3209_v1  ;;  %v3412_v6 = vld [vmem:[%s711_s30] sm:$0xf]  ;;  %s724_s30 = scalar_lea.vmem %s3850_s2, %s3396_s3  ;;  %s2748_s3 = sshll.u32 %s3199_s24, 7 }
  0x24   : > { %v3068_v24 = vld [vmem:[%s3810_s8] sm:$0xff]   ;;  %s3211_s24 = smov [#allocation2]  }
  0x25   : > { %2822 = vmatpush3.bf16.msra.mxu0 %v3064_v3  ;;  %v3449_v25 = vld [vmem:[%s724_s30] ss:$0 sm:$0xff]  ;;  %v3070_v3 = vld [vmem:[%s3808_s6 + $0x18] sm:$0xff]  }
  0x26   : > { %2830 = vmatpush3.bf16.msra.mxu1 %v3065_v4  ;;  %s706_s21 = scalar_lea.vmem %s3847_s1, %s2744_s27  ;;  %2835 = vmatprep.subr.bf16.mxu0 %v3209_v1  ;;  %v2624_v44 = vld [vmem:[%s3811_s9] ss:$0 sm:$0xff]  ;;  %s3757_s1 = scalar_lea.sflag [#allocation3], %s695_s28 }
  0x27   : > { %v3409_v5 = vld [vmem:[%s706_s21] sm:$0xff]   ;;  %2843 = vmatprep.subr.bf16.mxu1 %v3209_v1  ;;  %s3851_s21 = sld [smem:[#allocation13_spill]] }
  0x28   : > { %2824 = vmatmul.mubr.msk.bf16.vlgmr.msra.gmra.mxu0 %vm766_vm1, %v3409_v5  ;;  %v1063_v59 = vld [vmem:[%s3812_s10] sm:$0xf]  ;;  %s3753_s29 = scalar_lea.hbm %s3852_s26, %s2748_s3 }
  0x29   : > { %2832 = vmatmul.mubr.msk.bf16.vlgmr.msra.gmra.mxu1 %vm766_vm1, %v3412_v6  ;;  %2839 = vmatprep.mubr.msk.bf16.mxu0 %vm3210_vm0, %v3209_v1  ;;  %v1068_v60 = vsel %vm1017_vm3, %v1063_v59, 0 }
  0x2a   : > { %2845 = vmatprep.mubr.msk.bf16.mxu1 %vm3210_vm0, %v3209_v1  ;;  %2836 = vmatpush3.bf16.msra.mxu0 %v3067_v23 }
  0x2b   : > { %2837 = vmatprep.subr.bf16.mxu0 %v3209_v1 }
  0x2d   : > { %s720_s23 = scalar_lea.vmem %s3851_s21, %s2744_s27 }
  0x2e   : > { %2838 = vmatpush3.bf16.msra.mxu0 %v3068_v24 }
  0x2f   : > { %2849 = vmatprep.subr.bf16.mxu0 %v3209_v1 }
  0x31   : > { %2840 = vmatmul.mubr.msk.bf16.vlgmr.msra.gmra.mxu0 %vm766_vm1, %v3412_v6 }
  0x32   : > { %2851 = vmatprep.mubr.msk.bf16.mxu0 %vm3210_vm0, %v3209_v1 }
  0xe8   : > { %v804_v8 = vpop.f32.mrf.mxu0 }
  0xe9   : > { %v872_v9 = vpop.f32.mrf.mxu1  ;;  %v805_v20 = vadd.f32 %v2615_v14, %v804_v8  ;;  %v3072_v8 = vld [vmem:[%s3808_s6 + $0x10] sm:$0xff]  }
  0xea   : > { %v873_v10 = vadd.f32 %v2620_v7, %v872_v9  ;;  %v2825_v11 = vpop.f32.mrf.mxu0 }
  0xeb   : > { %v2833_v12 = vpop.f32.mrf.mxu1 }
  0xec   : > { %v878_v13 = vpack.c.bf16 %v873_v10, %v873_v10  ;;  %v807_v15 = vpop.f32.mrf.mxu0  ;;  %v2637_v10 = vld [vmem:[%s3849_s5 + $0x1] ss:$0 sm:$0xff] }
  0xed   : > { %v875_v16 = vpop.f32.mrf.mxu1  ;;  %v808_v21 = vadd.f32 %v2615_v14, %v807_v15 }
  0xee   : > { %v948_v17 = vsel %vm943_vm2, %v878_v13, 0  ;;  %v2826_v18 = vpop.f32.mrf.mxu0 }
  0xef   : > { %v2834_v19 = vpop.f32.mrf.mxu1  ;;  %2844 = vmatpush3.bf16.xpose.msra.mxu1 %v948_v17  ;;  %v811_v22 = vpack.c.bf16 %v808_v21, %v805_v20  ;;  %v2646_v21 = vld [vmem:[%s3809_s7 + $0x1] ss:$0 sm:$0xff] }
  0xf0   : > { %2855 = vmatprep.subr.bf16.mxu1 %v3209_v1 }
  0xf1   : > { %v936_v45 = vpop.f32.mrf.mxu0 }
  0xf2   : > { %v937_v46 = vadd.f32 %v2624_v44, %v936_v45 }
  0xf3   : > { %v2841_v47 = vpop.f32.mrf.mxu0 }
  0xf4   : > { %v942_v48 = vpack.c.bf16 %v937_v46, %v937_v46 }
  0xf5   : > { %v939_v49 = vpop.f32.mrf.mxu0 }
  0xf6   : > { %2846 = vmatmul.mubr.msk.bf16.vlgmr.msra.gmra.mxu1 %vm943_vm2, %v811_v22  ;;  %v1019_v50 = vsel %vm1017_vm3, %v942_v48, 0 }
  0xf7   : > { %2857 = vmatprep.mubr.msk.bf16.mxu1 %vm3210_vm0, %v3209_v1  ;;  %v2842_v51 = vpop.f32.mrf.mxu0  ;;  %2850 = vmatpush3.bf16.msra.mxu0 %v1019_v50  ;;  %v2655_v50 = vld [vmem:[%s3811_s9 + $0x1] ss:$0 sm:$0xff] }
  0xf8   : > { %2861 = vmatprep.subr.bf16.mxu0 %v3209_v1  ;;  %2856 = vmatpush3.bf16.msra.mxu1 %v1068_v60 }
  0xf9   : > { %2869 = vmatprep.subr.bf16.mxu1 %v3209_v1 }
 0x1b6   : > { %v984_v26 = vpop.f32.mrf.mxu1 }
 0x1b7   : > { %v985_v27 = vadd.f32 %v3449_v25, %v984_v26 }
 0x1b8   : > { %v2847_v28 = vpop.f32.mrf.mxu1 }
 0x1b9   : > { %v991_v29 = vsel %vm943_vm2, %v985_v27, -inf }
 0x1ba   : > { %992 = vmax.xlane.f32.xlu0 %v991_v29  ;;  %v987_v30 = vpop.f32.mrf.mxu1 }
 0x1bb   : > { %v988_v31 = vadd.f32 %v3449_v25, %v987_v30  ;;  %v3073_v30 = vld [vmem:[%s3810_s8 + $0x18] sm:$0xff]  }
 0x1bc   : > { %v2848_v32 = vpop.f32.mrf.mxu1 }
 0x1bd   : > { %v994_v33 = vsel %vm943_vm2, %v988_v31, -inf }
 0x1be   : > { %995 = vmax.xlane.f32.xlu0 %v994_v33 }
 0x243   : > { %v993_v34 = vpop.xlane.xlu0 %992 }
 0x244   : > { %v997_v35 = vsub.f32 %v985_v27, %v993_v34 }
 0x246   : > { %v999_v36 = vmul.f32 1.442695, %v997_v35 }
 0x247   : > { %v996_v37 = vpop.xlane.xlu0 %995 }
 0x248   : > { %3091 = vpow2.f32 %v999_v36  ;;  %v998_v38 = vsub.f32 %v988_v31, %v996_v37  ;;  %v3074_v31 = vld [vmem:[%s3810_s8 + $0x10] sm:$0xff]  }
 0x24a   : > { %v1001_v39 = vmul.f32 1.442695, %v998_v38 }
 0x24c   : > { %3093 = vpow2.f32 %v1001_v39 }
 0x255   : > { %v3092_v40 = vpop.eup %3091 }
 0x256   : > { %v1003_v41 = vsel %vm943_vm2, %v3092_v40, 0.0 }
 0x257   : > { %1004 = vadd.xlane.f32.xlu1 %v1003_v41 }
 0x259   : > { %v3094_v42 = vpop.eup %3093 }
 0x25a   : > { %v1006_v43 = vsel %vm943_vm2, %v3094_v42, 0.0 }
 0x25b   : > { %1007 = vadd.xlane.f32.xlu1 %v1006_v43 }
 0x2e0   : > { %v1005_v52 = vpop.xlane.xlu1 %1004 }
 0x2e1   : > { %3095 = vrcp.f32 %v1005_v52 }
 0x2e4   : > { %v1008_v53 = vpop.xlane.xlu1 %1007 }
 0x2e5   : > { %3097 = vrcp.f32 %v1008_v53 }
 0x2ee   : > { %v3096_v54 = vpop.eup %3095 }
 0x2ef   : > { %v1011_v56 = vmul.f32 %v3096_v54, %v3092_v40 }
 0x2f2   : > { %v3098_v55 = vpop.eup %3097 }
 0x2f3   : > { %v1012_v57 = vmul.f32 %v3098_v55, %v3094_v42 }
 0x2f5   : > { %v1013_v58 = vpack.c.bf16 %v1012_v57, %v1011_v56 }
 0x2f7   : > { %2852 = vmatmul.mubr.msk.bf16.vlgmr.msra.gmra.mxu0 %vm943_vm2, %v1013_v58 }
 0x2f8   : > { %2865 = vmatprep.mubr.msk.bf16.mxu0 %vm3210_vm0, %v3209_v1  ;;  %2862 = vmatpush3.bf16.msra.mxu0 %v3069_v61 }
 0x2f9   : > { %2863 = vmatprep.subr.bf16.mxu0 %v3209_v1 }
 0x2fc   : > { %2864 = vmatpush3.bf16.msra.mxu0 %v3071_v62 }
 0x2fd   : > { %2877 = vmatprep.subr.bf16.mxu0 %v3209_v1 }
 0x2ff   : > { %2866 = vmatmul.mubr.msk.bf16.vlgmr.msra.gmra.mxu0 %vm766_vm1, %v3409_v5 }
 0x300   : > { %2881 = vmatprep.mubr.msk.bf16.mxu0 %vm3210_vm0, %v3209_v1  ;;  %2878 = vmatpush3.bf16.msra.mxu0 %v3073_v30 }
 0x301   : > { %2879 = vmatprep.subr.bf16.mxu0 %v3209_v1 }
 0x304   : > { %2880 = vmatpush3.bf16.msra.mxu0 %v3074_v31 }
 0x305   : > { %2891 = vmatprep.subr.bf16.mxu0 %v3209_v1 }
 0x307   : > { %2882 = vmatmul.mubr.msk.bf16.vlgmr.msra.gmra.mxu0 %vm766_vm1, %v3412_v6 }
 0x308   : > { %2893 = vmatprep.mubr.msk.bf16.mxu0 %vm3210_vm0, %v3209_v1 }
 0x3b7   : > { %v1055_v63 = vpop.f32.mrf.mxu0 }
 0x3b9   : > { %v2853_v0 = vpop.f32.mrf.mxu0 }
 0x3bb   : > { %v1058_v2 = vpop.f32.mrf.mxu0 }
 0x3bc   : > { %v1062_v4 = vpack.c.bf16 %v1058_v2, %v1055_v63  ;;  %v2661_v2 = vld [vmem:[%s3812_s10 + $0x4] sm:$0xf] }
 0x3bd   : > { %v2854_v7 = vpop.f32.mrf.mxu0 }
 0x3be   : > { %2858 = vmatmul.mubr.msk.bf16.vlgmr.msra.gmra.mxu1 %vm943_vm2, %v1062_v4  ;;  %v3075_v4 = vld [vmem:[%s3846_s20 + $0x28] sm:$0xff]   ;;  %v3077_v7 = vld [vmem:[%s3846_s20 + $0x20] sm:$0xff]  }
 0x3bf   : > { %2870 = vmatpush3.bf16.msra.mxu1 %v3070_v3  ;;  %2873 = vmatprep.mubr.msk.bf16.mxu1 %vm3210_vm0, %v3209_v1  ;;  %v1178_v9 = vpop.f32.mrf.mxu0  ;;  %v1442_v3 = vsel %vm1017_vm3, %v2661_v2, 0 }
 0x3c0   : > { %2871 = vmatprep.subr.bf16.mxu1 %v3209_v1  ;;  %v1179_v13 = vadd.f32 %v2637_v10, %v1178_v9 }
 0x3c1   : > { %v2867_v11 = vpop.f32.mrf.mxu0 }
 0x3c2   : > { %v3076_v11 = vld [vmem:[%s3808_s6 + $0x28] sm:$0xff]  }
 0x3c3   : > { %2872 = vmatpush3.bf16.msra.mxu1 %v3072_v8  ;;  %v1181_v12 = vpop.f32.mrf.mxu0 }
 0x3c4   : > { %2885 = vmatprep.subr.bf16.mxu1 %v3209_v1  ;;  %v1182_v15 = vadd.f32 %v2637_v10, %v1181_v12 }
 0x3c5   : > { %v2868_v14 = vpop.f32.mrf.mxu0 }
 0x3c6   : > { %2874 = vmatmul.mubr.msk.bf16.vlgmr.msra.gmra.mxu1 %vm766_vm1, %v3412_v6  ;;  %v1185_v16 = vpack.c.bf16 %v1182_v15, %v1179_v13  ;;  %v3078_v14 = vld [vmem:[%s3808_s6 + $0x20] sm:$0xff]  }
 0x3c7   : > { %2887 = vmatprep.mubr.msk.bf16.mxu1 %vm3210_vm0, %v3209_v1  ;;  %v1311_v51 = vpop.f32.mrf.mxu0 }
 0x3c8   : > { %v1312_v52 = vadd.f32 %v2655_v50, %v1311_v51 }
 0x3c9   : > { %v2883_v53 = vpop.f32.mrf.mxu0 }
 0x3ca   : > { %v1317_v54 = vpack.c.bf16 %v1312_v52, %v1312_v52 }
 0x3cb   : > { %v1314_v55 = vpop.f32.mrf.mxu0 }
 0x3cc   : > { %v1392_v56 = vsel %vm1017_vm3, %v1317_v54, 0 }
 0x3cd   : > { %v2884_v57 = vpop.f32.mrf.mxu0  ;;  %2892 = vmatpush3.bf16.msra.mxu0 %v1392_v56 }
 0x3ce   : > { %2903 = vmatprep.subr.bf16.mxu0 %v3209_v1 }
 0x47e   : > { %v3500_v17 = vpop.f32.mrf.mxu1 }
 0x480   : > { %v2859_v18 = vpop.f32.mrf.mxu1 }
 0x482   : > { %v3502_v19 = vpop.f32.mrf.mxu1 }
 0x484   : > { %v2860_v20 = vpop.f32.mrf.mxu1 }
 0x486   : > { %v1245_v22 = vpop.f32.mrf.mxu1 }
 0x487   : > { %v1246_v23 = vadd.f32 %v2646_v21, %v1245_v22 }
 0x488   : > { %v2875_v24 = vpop.f32.mrf.mxu1 }
 0x489   : > { %v1251_v26 = vpack.c.bf16 %v1246_v23, %v1246_v23 }
 0x48a   : > { %v1248_v27 = vpop.f32.mrf.mxu1 }
 0x48b   : > { %v1322_v28 = vsel %vm943_vm2, %v1251_v26, 0  ;;  %v2631_v26 = vld [vmem:[%s3813_s11] ss:$0 sm:$0xff] }
 0x48c   : > { %v2876_v29 = vpop.f32.mrf.mxu1  ;;  %2886 = vmatpush3.bf16.xpose.msra.mxu1 %v1322_v28  ;;  %v1117_v27 = vadd.f32 %v2631_v26, %v3500_v17  ;;  %v1118_v31 = vadd.f32 %v2631_v26, %v3502_v19  ;;  %v3079_v19 = vld [vmem:[%s3810_s8 + $0x28] sm:$0xff]  }
 0x48d   : > { %2897 = vmatprep.subr.bf16.mxu1 %v3209_v1 }
 0x493   : > { %2888 = vmatmul.mubr.msk.bf16.vlgmr.msra.gmra.mxu1 %vm943_vm2, %v1185_v16  ;;  %v2668_v16 = vld [vmem:[%s3849_s5 + $0x2] ss:$0 sm:$0xff] }
 0x494   : > { %2899 = vmatprep.mubr.msk.bf16.mxu1 %vm3210_vm0, %v3209_v1  ;;  %2898 = vmatpush3.bf16.msra.mxu1 %v1442_v3 }
 0x495   : > { %2911 = vmatprep.subr.bf16.mxu1 %v3209_v1 }
 0x553   : > { %v1358_v32 = vpop.f32.mrf.mxu1 }
 0x554   : > { %v1359_v33 = vadd.f32 %v3449_v25, %v1358_v32 }
 0x555   : > { %v2889_v34 = vpop.f32.mrf.mxu1 }
 0x556   : > { %v1365_v35 = vsel %vm943_vm2, %v1359_v33, -inf }
 0x557   : > { %1366 = vmax.xlane.f32.xlu0 %v1365_v35  ;;  %v1361_v36 = vpop.f32.mrf.mxu1  ;;  %v2677_v35 = vld [vmem:[%s3809_s7 + $0x2] ss:$0 sm:$0xff] }
 0x558   : > { %v1362_v37 = vadd.f32 %v3449_v25, %v1361_v36 }
 0x559   : > { %v2890_v38 = vpop.f32.mrf.mxu1 }
 0x55a   : > { %v1368_v39 = vsel %vm943_vm2, %v1362_v37, -inf }
 0x55b   : > { %1369 = vmax.xlane.f32.xlu1 %v1368_v39 }
 0x5e0   : > { %v1367_v40 = vpop.xlane.xlu0 %1366 }
 0x5e1   : > { %v1371_v41 = vsub.f32 %v1359_v33, %v1367_v40 }
 0x5e3   : > { %v1373_v42 = vmul.f32 1.442695, %v1371_v41 }
 0x5e4   : > { %v1370_v43 = vpop.xlane.xlu1 %1369 }
 0x5e5   : > { %3099 = vpow2.f32 %v1373_v42  ;;  %v1372_v44 = vsub.f32 %v1362_v37, %v1370_v43  ;;  %v3080_v42 = vld [vmem:[%s3810_s8 + $0x20] sm:$0xff]  }
 0x5e7   : > { %v1375_v45 = vmul.f32 1.442695, %v1372_v44 }
 0x5e9   : > { %3101 = vpow2.f32 %v1375_v45 }
 0x5f2   : > { %v3100_v46 = vpop.eup %3099 }
 0x5f3   : > { %v1377_v47 = vsel %vm943_vm2, %v3100_v46, 0.0 }
 0x5f4   : > { %1378 = vadd.xlane.f32.xlu0 %v1377_v47 }
 0x5f6   : > { %v3102_v48 = vpop.eup %3101 }
 0x5f7   : > { %v1380_v49 = vsel %vm943_vm2, %v3102_v48, 0.0 }
 0x5f8   : > { %1381 = vadd.xlane.f32.xlu1 %v1380_v49 }
 0x67d   : > { %v1379_v58 = vpop.xlane.xlu0 %1378 }
 0x67e   : > { %3103 = vrcp.f32 %v1379_v58 }
 0x681   : > { %v1382_v59 = vpop.xlane.xlu1 %1381 }
 0x682   : > { %3105 = vrcp.f32 %v1382_v59 }
 0x68b   : > { %v3104_v60 = vpop.eup %3103 }
 0x68c   : > { %v1385_v62 = vmul.f32 %v3104_v60, %v3100_v46 }
 0x68f   : > { %v3106_v61 = vpop.eup %3105 }
 0x690   : > { %v1386_v63 = vmul.f32 %v3106_v61, %v3102_v48  ;;  %v2686_v61 = vld [vmem:[%s3811_s9 + $0x2] ss:$0 sm:$0xff] }
 0x692   : > { %v1387_v0 = vpack.c.bf16 %v1386_v63, %v1385_v62 }
 0x694   : > { %2894 = vmatmul.mubr.msk.bf16.vlgmr.msra.gmra.mxu0 %vm943_vm2, %v1387_v0 }
 0x695   : > { %2907 = vmatprep.mubr.msk.bf16.mxu0 %vm3210_vm0, %v3209_v1  ;;  %2904 = vmatpush3.bf16.msra.mxu0 %v3075_v4 }
 0x696   : > { %2905 = vmatprep.subr.bf16.mxu0 %v3209_v1 }
 0x699   : > { %2906 = vmatpush3.bf16.msra.mxu0 %v3077_v7 }
 0x69a   : > { %2919 = vmatprep.subr.bf16.mxu0 %v3209_v1 }
 0x69c   : > { %2908 = vmatmul.mubr.msk.bf16.vlgmr.msra.gmra.mxu0 %vm766_vm1, %v3409_v5 }
 0x69d   : > { %2923 = vmatprep.mubr.msk.bf16.mxu0 %vm3210_vm0, %v3209_v1  ;;  %2920 = vmatpush3.bf16.msra.mxu0 %v3079_v19 }
 0x69e   : > { %2921 = vmatprep.subr.bf16.mxu0 %v3209_v1 }
 0x6a1   : > { %2922 = vmatpush3.bf16.msra.mxu0 %v3080_v42  ;;  %v2708_v42 = vld [vmem:[%s3809_s7 + $0x3] ss:$0 sm:$0xff] }
 0x6a2   : > { %2933 = vmatprep.subr.bf16.mxu0 %v3209_v1 }
 0x6a4   : > { %2924 = vmatmul.mubr.msk.bf16.vlgmr.msra.gmra.mxu0 %vm766_vm1, %v3412_v6 }
 0x6a5   : > { %2935 = vmatprep.mubr.msk.bf16.mxu0 %vm3210_vm0, %v3209_v1 }
 0x754   : > { %v1428_v8 = vpop.f32.mrf.mxu0 }
 0x756   : > { %v2895_v9 = vpop.f32.mrf.mxu0 }
 0x758   : > { %v1431_v10 = vpop.f32.mrf.mxu0 }
 0x759   : > { %v1435_v12 = vpack.c.bf16 %v1431_v10, %v1428_v8 }
 0x75a   : > { %v2896_v13 = vpop.f32.mrf.mxu0 }
 0x75b   : > { %2900 = vmatmul.mubr.msk.bf16.vlgmr.msra.gmra.mxu1 %vm943_vm2, %v1435_v12 }
 0x75c   : > { %2912 = vmatpush3.bf16.msra.mxu1 %v3076_v11  ;;  %2915 = vmatprep.mubr.msk.bf16.mxu1 %vm3210_vm0, %v3209_v1  ;;  %v1546_v15 = vpop.f32.mrf.mxu0 }
 0x75d   : > { %2913 = vmatprep.subr.bf16.mxu1 %v3209_v1  ;;  %v1547_v21 = vadd.f32 %v2668_v16, %v1546_v15  ;;  %v2692_v15 = vld [vmem:[%s3812_s10 + $0x8] sm:$0xf] }
 0x75e   : > { %v2909_v18 = vpop.f32.mrf.mxu0 }
 0x75f   : > { %v3081_v18 = vld [vmem:[%s3846_s20 + $0x38] sm:$0xff]  }
 0x760   : > { %2914 = vmatpush3.bf16.msra.mxu1 %v3078_v14  ;;  %v1549_v20 = vpop.f32.mrf.mxu0 }
 0x761   : > { %2927 = vmatprep.subr.bf16.mxu1 %v3209_v1  ;;  %v1550_v23 = vadd.f32 %v2668_v16, %v1549_v20  ;;  %v1810_v16 = vsel %vm1017_vm3, %v2692_v15, 0  ;;  %v3083_v20 = vld [vmem:[%s3846_s20 + $0x30] sm:$0xff]  }
 0x762   : > { %v2910_v22 = vpop.f32.mrf.mxu0 }
 0x763   : > { %2916 = vmatmul.mubr.msk.bf16.vlgmr.msra.gmra.mxu1 %vm766_vm1, %v3412_v6  ;;  %v1553_v24 = vpack.c.bf16 %v1550_v23, %v1547_v21 }
 0x764   : > { %2929 = vmatprep.mubr.msk.bf16.mxu1 %vm3210_vm0, %v3209_v1  ;;  %v1679_v62 = vpop.f32.mrf.mxu0 }
 0x765   : > { %v1680_v63 = vadd.f32 %v2686_v61, %v1679_v62 }
 0x766   : > { %v2925_v0 = vpop.f32.mrf.mxu0 }
 0x767   : > { %v1685_v2 = vpack.c.bf16 %v1680_v63, %v1680_v63 }
 0x768   : > { %v1682_v3 = vpop.f32.mrf.mxu0 }
 0x769   : > { %v1760_v4 = vsel %vm1017_vm3, %v1685_v2, 0 }
 0x76a   : > { %v2926_v7 = vpop.f32.mrf.mxu0  ;;  %2934 = vmatpush3.bf16.msra.mxu0 %v1760_v4 }
 0x76b   : > { %2945 = vmatprep.subr.bf16.mxu0 %v3209_v1 }
 0x81b   : > { %v1478_v28 = vpop.f32.mrf.mxu1 }
 0x81c   : > { %v3577_v29 = vadd.f32 %v1478_v28, %v1117_v27  ;;  %v3084_v28 = vld [vmem:[%s3808_s6 + $0x30] sm:$0xff]  }
 0x81d   : > { %v2901_v30 = vpop.f32.mrf.mxu1 }
 0x81e   : > { %v2699_v30 = vld [vmem:[%s3849_s5 + $0x3] ss:$0 sm:$0xff] }
 0x81f   : > { %v1481_v32 = vpop.f32.mrf.mxu1 }
 0x820   : > { %v3580_v33 = vadd.f32 %v1481_v32, %v1118_v31 }
 0x821   : > { %v2902_v34 = vpop.f32.mrf.mxu1 }
 0x823   : > { %v1613_v36 = vpop.f32.mrf.mxu1 }
 0x824   : > { %v1614_v37 = vadd.f32 %v2677_v35, %v1613_v36 }
 0x825   : > { %v2917_v38 = vpop.f32.mrf.mxu1 }
 0x826   : > { %v1619_v39 = vpack.c.bf16 %v1614_v37, %v1614_v37 }
 0x827   : > { %v1616_v40 = vpop.f32.mrf.mxu1 }
 0x828   : > { %v1690_v17 = vsel %vm943_vm2, %v1619_v39, 0 }
 0x829   : > { %v2918_v41 = vpop.f32.mrf.mxu1  ;;  %2928 = vmatpush3.bf16.xpose.msra.mxu1 %v1690_v17 }
 0x82a   : > { %2939 = vmatprep.subr.bf16.mxu1 %v3209_v1 }
 0x830   : > { %2930 = vmatmul.mubr.msk.bf16.vlgmr.msra.gmra.mxu1 %vm943_vm2, %v1553_v24  ;;  %v3082_v24 = vld [vmem:[%s3808_s6 + $0x38] sm:$0xff]  }
 0x831   : > { %2941 = vmatprep.mubr.msk.bf16.mxu1 %vm3210_vm0, %v3209_v1  ;;  %2940 = vmatpush3.bf16.msra.mxu1 %v1810_v16 }
 0x832   : > { %2953 = vmatprep.subr.bf16.mxu1 %v3209_v1 }
 0x8f0   : > { %v1726_v43 = vpop.f32.mrf.mxu1 }
 0x8f1   : > { %v1727_v44 = vadd.f32 %v3449_v25, %v1726_v43 }
 0x8f2   : > { %v2931_v45 = vpop.f32.mrf.mxu1 }
 0x8f3   : > { %v1733_v46 = vsel %vm943_vm2, %v1727_v44, -inf }
 0x8f4   : > { %1734 = vmax.xlane.f32.xlu0 %v1733_v46  ;;  %v1729_v47 = vpop.f32.mrf.mxu1 }
 0x8f5   : > { %v1730_v48 = vadd.f32 %v3449_v25, %v1729_v47 }
 0x8f6   : > { %v2932_v49 = vpop.f32.mrf.mxu1 }
 0x8f7   : > { %v1736_v50 = vsel %vm943_vm2, %v1730_v48, -inf }
 0x8f8   : > { %1737 = vmax.xlane.f32.xlu1 %v1736_v50 }
 0x97d   : > { %v1735_v51 = vpop.xlane.xlu0 %1734 }
 0x97e   : > { %v1739_v52 = vsub.f32 %v1727_v44, %v1735_v51 }
 0x980   : > { %v1741_v53 = vmul.f32 1.442695, %v1739_v52 }
 0x981   : > { %v1738_v54 = vpop.xlane.xlu1 %1737 }
 0x982   : > { %3107 = vpow2.f32 %v1741_v53  ;;  %v1740_v55 = vsub.f32 %v1730_v48, %v1738_v54 }
 0x984   : > { %v1743_v56 = vmul.f32 1.442695, %v1740_v55 }
 0x986   : > { %3109 = vpow2.f32 %v1743_v56 }
 0x98f   : > { %v3108_v57 = vpop.eup %3107 }
 0x990   : > { %v1745_v58 = vsel %vm943_vm2, %v3108_v57, 0.0 }
 0x991   : > { %1746 = vadd.xlane.f32.xlu0 %v1745_v58 }
 0x993   : > { %v3110_v59 = vpop.eup %3109 }
 0x994   : > { %v1748_v60 = vsel %vm943_vm2, %v3110_v59, 0.0 }
 0x995   : > { %1749 = vadd.xlane.f32.xlu1 %v1748_v60 }
 0xa1a   : > { %v1747_v8 = vpop.xlane.xlu0 %1746 }
 0xa1b   : > { %3111 = vrcp.f32 %v1747_v8 }
 0xa1e   : > { %v1750_v9 = vpop.xlane.xlu1 %1749 }
 0xa1f   : > { %3113 = vrcp.f32 %v1750_v9 }
 0xa28   : > { %v3112_v10 = vpop.eup %3111 }
 0xa29   : > { %v1753_v12 = vmul.f32 %v3112_v10, %v3108_v57 }
 0xa2c   : > { %v3114_v11 = vpop.eup %3113 }
 0xa2d   : > { %v1754_v13 = vmul.f32 %v3114_v11, %v3110_v59 }
 0xa2f   : > { %v1755_v14 = vpack.c.bf16 %v1754_v13, %v1753_v12 }
 0xa31   : > { %2936 = vmatmul.mubr.msk.bf16.vlgmr.msra.gmra.mxu0 %vm943_vm2, %v1755_v14 }
 0xa32   : > { %2949 = vmatprep.mubr.msk.bf16.mxu0 %vm3210_vm0, %v3209_v1  ;;  %2946 = vmatpush3.bf16.msra.mxu0 %v3081_v18 }
 0xa33   : > { %2947 = vmatprep.subr.bf16.mxu0 %v3209_v1 }
 0xa36   : > { %2948 = vmatpush3.bf16.msra.mxu0 %v3083_v20 }
 0xa37   : > { %2961 = vmatprep.subr.bf16.mxu0 %v3209_v1 }
 0xa39   : > { %2950 = vmatmul.mubr.msk.bf16.vlgmr.msra.gmra.mxu0 %vm766_vm1, %v3409_v5 }
 0xa3a   : > { %2965 = vmatprep.mubr.msk.bf16.mxu0 %vm3210_vm0, %v3209_v1 }
 0xaf1   : > { %v1796_v21 = vpop.f32.mrf.mxu0 }
 0xaf3   : > { %v2937_v22 = vpop.f32.mrf.mxu0 }
 0xaf4   : > { %v2723_v22 = vld [vmem:[%s3812_s10 + $0xc] sm:$0xf] }
 0xaf5   : > { %v1799_v23 = vpop.f32.mrf.mxu0 }
 0xaf6   : > { %v1803_v26 = vpack.c.bf16 %v1799_v23, %v1796_v21  ;;  %v2178_v23 = vsel %vm1017_vm3, %v2723_v22, 0 }
 0xaf7   : > { %v2938_v27 = vpop.f32.mrf.mxu0 }
 0xaf8   : > { %2942 = vmatmul.mubr.msk.bf16.vlgmr.msra.gmra.mxu1 %vm943_vm2, %v1803_v26 }
 0xaf9   : > { %2954 = vmatpush3.bf16.msra.mxu1 %v3082_v24  ;;  %2957 = vmatprep.mubr.msk.bf16.mxu1 %vm3210_vm0, %v3209_v1  ;;  %v1914_v5 = vpop.f32.mrf.mxu0 }
 0xafa   : > { %2955 = vmatprep.subr.bf16.mxu1 %v3209_v1  ;;  %v1915_v34 = vadd.f32 %v2699_v30, %v1914_v5 }
 0xafb   : > { %v2951_v31 = vpop.f32.mrf.mxu0 }
 0xafd   : > { %2956 = vmatpush3.bf16.msra.mxu1 %v3084_v28  ;;  %v1917_v32 = vpop.f32.mrf.mxu0 }
 0xafe   : > { %2969 = vmatprep.subr.bf16.mxu1 %v3209_v1  ;;  %v1918_v36 = vadd.f32 %v2699_v30, %v1917_v32  ;;  %v2750_v30 = vld [vmem:[%s720_s23] sm:$0xff]   ;;  %s2608_s23 = sshll.u32 %s695_s28, 3 }
 0xaff   : > { %v2952_v35 = vpop.f32.mrf.mxu0  ;;  %v2751_v31 = vunpack.c.l.bf16 %v2750_v30  ;;  %s697_s27 = scalar_lea.vmem [#allocation2], %s2608_s23  ;;  %s3135_s23 = sshll.u32 %s3211_s24, 4  ;;  %s3136_s23 = int_to_ptr.vmem [resolvable:$false] %s3135_s23 }
 0xb00   : > { %2958 = vmatmul.mubr.msk.bf16.vlgmr.msra.gmra.mxu1 %vm766_vm1, %v3412_v6  ;;  %v1921_v37 = vpack.c.bf16 %v1918_v36, %v1915_v34  ;;  %s2485_s2 = sshll.u32 %s697_s27, 4  ;;  %s3137_s30 = scalar_lea.vmem %s3136_s23, 256  ;;  %s3755_s2 = int_to_ptr.vmem [resolvable:$true] %s2485_s2 }
 0xb01   : > { %2971 = vmatprep.mubr.msk.bf16.mxu1 %vm3210_vm0, %v3209_v1  ;;  %s3131_s21 = scalar_lea.vmem %s3755_s2, 128  ;;  %p3138_p1 = scmp.lt.s32.totalorder %s3755_s2, %s3136_s23 }
 0xb02   : > { %p3132_p12 = scmp.ne.s32.totalorder %s3755_s2, %s3131_s21  ;;  %p3139_p2 = scmp.lt.s32.totalorder %s3137_s30, %s3131_s21 }
 0xb04   : > { %p3133_p13 = pnand %p3132_p12, %p3359_p4  ;;  %p3140_p3 = por %p3139_p2, %p3138_p1 }
 0xb06   : > { %p3134_p0 = pneg %p3133_p13 }
 0xb08   : > { %p3141_p5 = pnand %p3140_p3, %p3134_p0 }
 0xbb8   : > { %v1846_v38 = vpop.f32.mrf.mxu1 }
 0xbb9   : > { %v3652_v39 = vadd.f32 %v1846_v38, %v3577_v29  ;;  %v3085_v29 = vld [vmem:[%s3810_s8 + $0x38] sm:$0xff]  }
 0xbba   : > { %v2943_v40 = vpop.f32.mrf.mxu1  ;;  %2962 = vmatpush3.bf16.msra.mxu0 %v3085_v29 }
 0xbbb   : > { %2963 = vmatprep.subr.bf16.mxu0 %v3209_v1 }
 0xbbc   : > { %v1849_v17 = vpop.f32.mrf.mxu1 }
 0xbbd   : > { %v3655_v41 = vadd.f32 %v1849_v17, %v3580_v33  ;;  %v3086_v33 = vld [vmem:[%s3810_s8 + $0x30] sm:$0xff]  }
 0xbbe   : > { %v2944_v19 = vpop.f32.mrf.mxu1  ;;  %2964 = vmatpush3.bf16.msra.mxu0 %v3086_v33 }
 0xbbf   : > { %2975 = vmatprep.subr.bf16.mxu0 %v3209_v1 }
 0xbc0   : > { %v1981_v43 = vpop.f32.mrf.mxu1 }
 0xbc1   : > { %v1982_v44 = vadd.f32 %v2708_v42, %v1981_v43  ;;  %2966 = vmatmul.mubr.msk.bf16.vlgmr.msra.gmra.mxu0 %vm766_vm1, %v3412_v6 }
 0xbc2   : > { %v2959_v45 = vpop.f32.mrf.mxu1  ;;  %2977 = vmatprep.mubr.msk.bf16.mxu0 %vm3210_vm0, %v3209_v1 }
 0xbc3   : > { %v1987_v46 = vpack.c.bf16 %v1982_v44, %v1982_v44 }
 0xbc4   : > { %v1984_v47 = vpop.f32.mrf.mxu1 }
 0xbc5   : > { %v2058_v48 = vsel %vm943_vm2, %v1987_v46, 0 }
 0xbc6   : > { %v2960_v49 = vpop.f32.mrf.mxu1  ;;  %2970 = vmatpush3.bf16.xpose.msra.mxu1 %v2058_v48 }
 0xbc7   : > { %2981 = vmatprep.subr.bf16.mxu1 %v3209_v1 }
 0xbcd   : > { %2972 = vmatmul.mubr.msk.bf16.vlgmr.msra.gmra.mxu1 %vm943_vm2, %v1921_v37  ;;  %v2752_v37 = vunpack.c.h.bf16 %v2750_v30 }
 0xbce   : > { %2983 = vmatprep.mubr.msk.bf16.mxu1 %vm3210_vm0, %v3209_v1  ;;  %2982 = vmatpush3.bf16.msra.mxu1 %v2178_v23 }
 0xbcf   : > { %2995 = vmatprep.subr.bf16.mxu1 %v3209_v1 }
 0xc81   : > { %v2047_v4 = vpop.f32.mrf.mxu0 }
 0xc83   : > { %v2967_v8 = vpop.f32.mrf.mxu0 }
 0xc84   : > { %v2727_v8 = vld [vmem:[%s3817_s15] ss:$0 sm:$0xff] }
 0xc85   : > { %v2050_v10 = vpop.f32.mrf.mxu0 }
 0xc87   : > { %v2968_v12 = vpop.f32.mrf.mxu0 }
 0xc8d   : > { %v2094_v50 = vpop.f32.mrf.mxu1 }
 0xc8e   : > { %v2095_v51 = vadd.f32 %v3449_v25, %v2094_v50  ;;  %v3087_v50 = vld [vmem:[%s3816_s14 + $0x8] sm:$0xff]  }
 0xc8f   : > { %v2973_v52 = vpop.f32.mrf.mxu1 }
 0xc90   : > { %v2101_v53 = vsel %vm943_vm2, %v2095_v51, -inf }
 0xc91   : > { %2102 = vmax.xlane.f32.xlu0 %v2101_v53  ;;  %v2097_v54 = vpop.f32.mrf.mxu1 }
 0xc92   : > { %v2098_v55 = vadd.f32 %v3449_v25, %v2097_v54  ;;  %v2717_v25 = vld [vmem:[%s3811_s9 + $0x3] ss:$0 sm:$0xff] }
 0xc93   : > { %v2974_v56 = vpop.f32.mrf.mxu1  ;;  %v2048_v7 = vadd.f32 %v2717_v25, %v2047_v4  ;;  %v3089_v4 = vld [vmem:[%s3818_s16 + $0x8] sm:$0xff]  }
 0xc94   : > { %v2104_v57 = vsel %vm943_vm2, %v2098_v55, -inf }
 0xc95   : > { %2105 = vmax.xlane.f32.xlu1 %v2104_v57  ;;  %v2053_v9 = vpack.c.bf16 %v2048_v7, %v2048_v7  ;;  %v3090_v7 = vld [vmem:[%s3818_s16] sm:$0xff]  }
 0xc97   : > { %v2128_v11 = vsel %vm1017_vm3, %v2053_v9, 0 }
 0xc98   : > { %2976 = vmatpush3.bf16.msra.mxu0 %v2128_v11 }
 0xc99   : > { %2987 = vmatprep.subr.bf16.mxu0 %v3209_v1 }
 0xd1a   : > { %v2103_v58 = vpop.xlane.xlu0 %2102 }
 0xd1b   : > { %v2107_v59 = vsub.f32 %v2095_v51, %v2103_v58  ;;  %v3088_v51 = vld [vmem:[%s3816_s14] sm:$0xff]  }
 0xd1d   : > { %v2109_v6 = vmul.f32 1.442695, %v2107_v59 }
 0xd1e   : > { %v2106_v60 = vpop.xlane.xlu1 %2105 }
 0xd1f   : > { %3115 = vpow2.f32 %v2109_v6  ;;  %v2108_v61 = vsub.f32 %v2098_v55, %v2106_v60  ;;  %v2725_v6 = vld [vmem:[%s3814_s12] ss:$0 sm:$0xff] }
 0xd21   : > { %v2111_v62 = vmul.f32 1.442695, %v2108_v61 }
 0xd23   : > { %3117 = vpow2.f32 %v2111_v62 }
 0xd2c   : > { %v3116_v63 = vpop.eup %3115 }
 0xd2d   : > { %v2113_v0 = vsel %vm943_vm2, %v3116_v63, 0.0 }
 0xd2e   : > { %2114 = vadd.xlane.f32.xlu0 %v2113_v0 }
 0xd30   : > { %v3118_v2 = vpop.eup %3117 }
 0xd31   : > { %v2116_v3 = vsel %vm943_vm2, %v3118_v2, 0.0 }
 0xd32   : > { %2117 = vadd.xlane.f32.xlu1 %v2116_v3 }
 0xdb7   : > { %v2115_v13 = vpop.xlane.xlu0 %2114 }
 0xdb8   : > { %3119 = vrcp.f32 %v2115_v13 }
 0xdbb   : > { %v2118_v14 = vpop.xlane.xlu1 %2117 }
 0xdbc   : > { %3121 = vrcp.f32 %v2118_v14 }
 0xdc5   : > { %v3120_v15 = vpop.eup %3119 }
 0xdc6   : > { %v2121_v18 = vmul.f32 %v3120_v15, %v3116_v63  ;;  %v2726_v63 = vld [vmem:[%s3815_s13] ss:$0 sm:$0xff] }
 0xdc9   : > { %v3122_v16 = vpop.eup %3121 }
 0xdca   : > { %v2122_v20 = vmul.f32 %v3122_v16, %v3118_v2 }
 0xdcc   : > { %v2123_v21 = vpack.c.bf16 %v2122_v20, %v2121_v18 }
 0xdce   : > { %2978 = vmatmul.mubr.msk.bf16.vlgmr.msra.gmra.mxu0 %vm943_vm2, %v2123_v21 }
 0xdcf   : > { %2991 = vmatprep.mubr.msk.bf16.mxu0 %vm3210_vm0, %v3209_v1  ;;  %2988 = vmatpush3.bf16.msra.mxu0 %v3087_v50 }
 0xdd0   : > { %2989 = vmatprep.subr.bf16.mxu0 %v3209_v1 }
 0xdd3   : > { %2990 = vmatpush3.bf16.msra.mxu0 %v3088_v51 }
 0xe8e   : > { %v2164_v24 = vpop.f32.mrf.mxu0 }
 0xe90   : > { %v2979_v26 = vpop.f32.mrf.mxu0 }
 0xe92   : > { %v2167_v27 = vpop.f32.mrf.mxu0 }
 0xe93   : > { %v2171_v28 = vpack.c.bf16 %v2167_v27, %v2164_v24 }
 0xe94   : > { %v2980_v5 = vpop.f32.mrf.mxu0 }
 0xe95   : > { %2984 = vmatmul.mubr.msk.bf16.vlgmr.msra.gmra.mxu1 %vm943_vm2, %v2171_v28 }
 0xe96   : > { %2999 = vmatprep.mubr.msk.bf16.mxu1 %vm3210_vm0, %v3209_v1  ;;  %2996 = vmatpush3.bf16.msra.mxu1 %v3089_v4 }
 0xe97   : > { %2997 = vmatprep.subr.bf16.mxu1 %v3209_v1  ;;  %v2731_v1 = vld [vmem:[%s3819_s17] ss:$0 sm:$0xff] }
 0xe9a   : > { %2998 = vmatpush3.bf16.msra.mxu1 %v3090_v7 }
 0xf55   : > { %v2214_v32 = vpop.f32.mrf.mxu1 }
 0xf56   : > { %v2221_v34 = vadd.f32 %v2214_v32, %v3652_v39 }
 0xf57   : > { %v2985_v35 = vpop.f32.mrf.mxu1 }
 0xf58   : > { %v2227_v36 = vadd.f32 %v2751_v31, %v2221_v34 }
 0xf59   : > { %v2217_v38 = vpop.f32.mrf.mxu1 }
 0xf5a   : > { %v2222_v40 = vadd.f32 %v2217_v38, %v3655_v41  ;;  %v2229_v17 = vsel %vm766_vm1, %v2227_v36, 0.0 }
 0xf5b   : > { %2230 = vadd.xlane.f32.xlu0 %v2229_v17  ;;  %v2986_v19 = vpop.f32.mrf.mxu1 }
 0xf5c   : > { %v2228_v42 = vadd.f32 %v2752_v37, %v2222_v40 }
 0xf5e   : > { %v2232_v43 = vsel %vm766_vm1, %v2228_v42, 0.0 }
 0xf5f   : > { %2233 = vadd.xlane.f32.xlu1 %v2232_v43 }
 0xfe4   : > { %v2231_v44 = vpop.xlane.xlu0 %2230 }
 0xfe5   : > { %v2236_v45 = vmul.f32 0.03125, %v2231_v44 }
 0xfe7   : > { %v2238_v46 = vsub.f32 %v2227_v36, %v2236_v45 }
 0xfe8   : > { %v2234_v47 = vpop.xlane.xlu1 %2233 }
 0xfe9   : > { %v2237_v48 = vmul.f32 0.03125, %v2234_v47  ;;  %v2240_v39 = vmul.f32 %v2238_v46, %v2238_v46 }
 0xfeb   : > { %v2239_v49 = vsub.f32 %v2228_v42, %v2237_v48  ;;  %v2242_v29 = vsel %vm766_vm1, %v2240_v39, 0.0  ;;  %v2735_v39 = vld [vmem:[%s3820_s18] ss:$0 sm:$0xff] }
 0xfec   : > { %2243 = vadd.xlane.f32.xlu0 %v2242_v29  ;;  %v2736_v29 = vld [vmem:[%s3821_s19] ss:$0 sm:$0xff] }
 0xfed   : > { %v2241_v33 = vmul.f32 %v2239_v49, %v2239_v49 }
 0xfef   : > { %v2245_v41 = vsel %vm766_vm1, %v2241_v33, 0.0 }
 0xff0   : > { %2246 = vadd.xlane.f32.xlu1 %v2245_v41 }
0x1075   : > { %v2244_v52 = vpop.xlane.xlu0 %2243 }
0x1076   : > { %v2248_v53 = vmul.f32 0.03125, %v2244_v52 }
0x1078   : > { %v2250_v54 = vadd.f32 1e-05, %v2248_v53 }
0x1079   : > { %v2247_v55 = vpop.xlane.xlu1 %2246 }
0x107a   : > { %3123 = vrsqrt.f32 %v2250_v54  ;;  %v2249_v56 = vmul.f32 0.03125, %v2247_v55 }
0x107c   : > { %v2251_v57 = vadd.f32 1e-05, %v2249_v56 }
0x107e   : > { %3125 = vrsqrt.f32 %v2251_v57 }
0x1087   : > { %v3124_v58 = vpop.eup %3123 }
0x1088   : > { %v2254_v59 = vmul.f32 %v3124_v58, %v2238_v46 }
0x108a   : > { %v2263_v62 = vmul.f32 %v2725_v6, %v2254_v59 }
0x108b   : > { %v3126_v60 = vpop.eup %3125 }
0x108c   : > { %v2255_v61 = vmul.f32 %v3126_v60, %v2239_v49  ;;  %v2272_v2 = vadd.f32 %v2726_v63, %v2263_v62 }
0x108e   : > { %v2264_v0 = vmul.f32 %v2725_v6, %v2255_v61 }
0x1090   : > { %v2273_v3 = vadd.f32 %v2726_v63, %v2264_v0 }
0x1092   : > { %v2274_v25 = vpack.c.bf16 %v2273_v3, %v2272_v2 }
0x1094   : > { %2992 = vmatmul.mubr.msk.bf16.vlgmr.msra.gmra.mxu0 %vm766_vm1, %v2274_v25 }
0x1154   : > { %v2335_v9 = vpop.f32.mrf.mxu0 }
0x1155   : > { %v2336_v11 = vadd.f32 %v2727_v8, %v2335_v9 }
0x1156   : > { %v2993_v10 = vpop.f32.mrf.mxu0 }
0x1157   : > { %v2342_v15 = vmax.f32 %v2336_v11, 0.0 }
0x1158   : > { %v2338_v12 = vpop.f32.mrf.mxu0 }
0x1159   : > { %v2339_v13 = vadd.f32 %v2727_v8, %v2338_v12 }
0x115a   : > { %v2994_v14 = vpop.f32.mrf.mxu0 }
0x115b   : > { %v2343_v16 = vmax.f32 %v2339_v13, 0.0 }
0x115d   : > { %v2344_v18 = vpack.c.bf16 %v2343_v16, %v2342_v15 }
0x115f   : > { %3000 = vmatmul.mubr.msk.bf16.vlgmr.msra.gmra.mxu1 %vm766_vm1, %v2344_v18 }
0x121f   : > { %v2405_v20 = vpop.f32.mrf.mxu1 }
0x1220   : > { %v2406_v21 = vadd.f32 %v2731_v1, %v2405_v20 }
0x1221   : > { %v3001_v22 = vpop.f32.mrf.mxu1 }
0x1222   : > { %v2412_v23 = vadd.f32 %v2406_v21, %v2272_v2 }
0x1223   : > { %v2408_v24 = vpop.f32.mrf.mxu1 }
0x1224   : > { %v2409_v26 = vadd.f32 %v2731_v1, %v2408_v24  ;;  %v2414_v27 = vsel %vm766_vm1, %v2412_v23, 0.0 }
0x1225   : > { %2415 = vadd.xlane.f32.xlu0 %v2414_v27  ;;  %v3002_v28 = vpop.f32.mrf.mxu1 }
0x1226   : > { %v2413_v5 = vadd.f32 %v2409_v26, %v2273_v3 }
0x1228   : > { %v2417_v30 = vsel %vm766_vm1, %v2413_v5, 0.0 }
0x1229   : > { %2418 = vadd.xlane.f32.xlu1 %v2417_v30 }
0x12ae   : > { %v2416_v31 = vpop.xlane.xlu0 %2415 }
0x12af   : > { %v2420_v32 = vmul.f32 0.03125, %v2416_v31 }
0x12b1   : > { %v2422_v34 = vsub.f32 %v2412_v23, %v2420_v32 }
0x12b2   : > { %v2419_v35 = vpop.xlane.xlu1 %2418 }
0x12b3   : > { %v2421_v36 = vmul.f32 0.03125, %v2419_v35  ;;  %v2424_v37 = vmul.f32 %v2422_v34, %v2422_v34 }
0x12b5   : > { %v2423_v38 = vsub.f32 %v2413_v5, %v2421_v36  ;;  %v2426_v40 = vsel %vm766_vm1, %v2424_v37, 0.0 }
0x12b6   : > { %2427 = vadd.xlane.f32.xlu0 %v2426_v40 }
0x12b7   : > { %v2425_v17 = vmul.f32 %v2423_v38, %v2423_v38 }
0x12b9   : > { %v2429_v19 = vsel %vm766_vm1, %v2425_v17, 0.0 }
0x12ba   : > { %2430 = vadd.xlane.f32.xlu1 %v2429_v19 }
0x133f   : > { %v2428_v42 = vpop.xlane.xlu0 %2427 }
0x1340   : > { %v2432_v43 = vmul.f32 0.03125, %v2428_v42 }
0x1342   : > { %v2434_v44 = vadd.f32 1e-05, %v2432_v43 }
0x1343   : > { %v2431_v45 = vpop.xlane.xlu1 %2430 }
0x1344   : > { %3127 = vrsqrt.f32 %v2434_v44  ;;  %v2433_v46 = vmul.f32 0.03125, %v2431_v45 }
0x1346   : > { %v2435_v47 = vadd.f32 1e-05, %v2433_v46 }
0x1348   : > { %3129 = vrsqrt.f32 %v2435_v47 }
0x1351   : > { %v3128_v48 = vpop.eup %3127 }
0x1352   : > { %v2438_v49 = vmul.f32 %v3128_v48, %v2422_v34 }
0x1354   : > { %v2447_v33 = vmul.f32 %v2735_v39, %v2438_v49 }
0x1355   : > { %v3130_v41 = vpop.eup %3129 }
0x1356   : > { %v2439_v50 = vmul.f32 %v3130_v41, %v2423_v38  ;;  %v2456_v51 = vadd.f32 %v2736_v29, %v2447_v33 }
0x1358   : > { %v2448_v52 = vmul.f32 %v2735_v39, %v2439_v50  ;;  %v2746_v53 = vpack.c.bf16 %v2456_v51, %v2456_v51 }
0x135a   : > { %v2457_v54 = vadd.f32 %v2736_v29, %v2448_v52  ;;  %2467 = vst.msk [vmem:[%s697_s27] sm:$0xf] %vm2466_vm4, %v2746_v53 }
0x135c   : > { %v2747_v55 = vpack.c.bf16 %v2457_v54, %v2457_v54 }
0x135e   : > { %2468 = vst.msk [vmem:[%s697_s27 + $0x4] sm:$0xf] %vm2466_vm4, %v2747_v55 }
0x135f   : > { %3144 = shalt.err (!%p3141_p5)
}
0x1360   : > { %s3145_s28 = scalar_lea.hbm %s3753_s29, 128  ;;  %s3149_s0 = scalar_lea.hbm %s3852_s26, 256 }
0x1361   : > { %p3146_p6 = scmp.ne.s32.totalorder %s3753_s29, %s3145_s28  ;;  %p3150_p10 = scmp.lt.s32.totalorder %s3753_s29, %s3852_s26 }
0x1362   : > { %p3151_p11 = scmp.lt.s32.totalorder %s3149_s0, %s3145_s28 }
0x1363   : > { %p3147_p7 = pnand %p3146_p6, %p3359_p4 }
0x1364   : > { %p3152_p12 = por %p3151_p11, %p3150_p10 }
0x1365   : > { %p3148_p9 = pneg %p3147_p7 }
0x1367   : > { %p3153_p13 = pnand %p3152_p12, %p3148_p9 }
0x1369   : > { %3156 = shalt.err (!%p3153_p13)
}
0x136a   : > { %s3212_s21 = smov 64   ;;  %s3213_s23 = smov 4  }
0x136b   : > { %3003 = dma.vmem_to_hbm [thread:$0]  (%p3359_p4), %s3755_s2, 128, %s3753_s29, %s3757_s1, %s3212_s21, %s3212_s21, %s3213_s23  }
0x136c PF: > { %s3853_s30 = sld [smem:[#allocation5_spill]]  ;;  %p3009_p0 = scmp.ge.s32.totalorder %s3207_s25, 2 }
0x136e   : > { %p3006_p1 = pnand %p3009_p0, %p3366_p8 }
0x1370   : > { %p3007_p2 = pneg %p3006_p1 }
0x1372   : > { %s2500_s27 = sand.u32 1, %s3853_s30  }
0x1373   : > { %s2501_s5 = scalar_lea.sflag [#allocation3], %s2500_s27 }
0x1374   : > { %3182 = dma.done.wait (%p3007_p2), %s2501_s5, 128  }
0x1375   : > { %3184 = vsyncadd (%p3007_p2), %s2501_s5, 4294967168  ;;  %s33_s25 = sadd.s32 1, %s3207_s25   ;;  %s3855_s28 = sld [smem:[#allocation6_spill]] }
0x1376   : > { %p30_p3 = scmp.ge.s32.totalorder %s33_s25, 4   ;;  %s3856_s23 = sld [smem:[#allocation10_spill]] }
0x1377   : > { %s3857_s24 = sld [smem:[#allocation7_spill]]  ;;  %s3859_s1 = smov %s3191_s22 }
0x1378   : > { %s3858_s2 = sld [smem:[#allocation8_spill]]  ;;  %32 = sbr.rel (!%p30_p3) target bundleno = 12 (0xc), region = 165 }
0x137b   : > { %s3860_s22 = smov %s3855_s28 }
0x137d   :  { %2506 = vsyncpa [#allocation3], 1 }
0x137e   :  { %2508 = vsyncpa [#allocation3 + $0x1], 1 }

// kernel: cross_attention_layer.3
= control target key start
LH: loop header
LB: loop body
LE: loop exit
PB: predicated region body
PF: predicated region fallthrough
CT: control target
= control target key end

     0   :  { %s3802_s0 = inlined_call_operand.vmem [shape: bf16[2,16,32], index: 0, kind: input, shape index: {}]   ;;  %s3803_s1 = inlined_call_operand.vmem [shape: bf16[2,8,32], index: 1, kind: input, shape index: {}]   ;;  %s3804_s2 = inlined_call_operand.vmem [shape: bf16[2,16,32], index: 2, kind: input, shape index: {}]   ;;  %s3805_s3 = inlined_call_operand.vmem [shape: f32[2,1,8], index: 3, kind: input, shape index: {}]   ;;  %s3806_s4 = inlined_call_operand.vmem [shape: bf16[4,32,8], index: 4, kind: input, shape index: {}]   ;;  %s3807_s5 = inlined_call_operand.vmem [shape: f32[4,1,8], index: 5, kind: input, shape index: {}]   ;;  %s3808_s6 = inlined_call_operand.vmem [shape: bf16[4,32,8], index: 6, kind: input, shape index: {}]   ;;  %s3809_s7 = inlined_call_operand.vmem [shape: f32[4,1,8], index: 7, kind: input, shape index: {}]   ;;  %s3810_s8 = inlined_call_operand.vmem [shape: bf16[4,32,8], index: 8, kind: input, shape index: {}]   ;;  %s3811_s9 = inlined_call_operand.vmem [shape: f32[4,1,8], index: 9, kind: input, shape index: {}]   ;;  %s3812_s10 = inlined_call_operand.vmem [shape: bf16[4,8,32], index: 10, kind: input, shape index: {}]   ;;  %s3813_s11 = inlined_call_operand.vmem [shape: f32[1,32], index: 11, kind: input, shape index: {}]   ;;  %s3814_s12 = inlined_call_operand.vmem [shape: f32[1,32], index: 12, kind: input, shape index: {}]   ;;  %s3815_s13 = inlined_call_operand.vmem [shape: f32[1,32], index: 13, kind: input, shape index: {}]   ;;  %s3816_s14 = inlined_call_operand.vmem [shape: bf16[32,32], index: 14, kind: input, shape index: {}]   ;;  %s3817_s15 = inlined_call_operand.vmem [shape: f32[1,32], index: 15, kind: input, shape index: {}]   ;;  %s3818_s16 = inlined_call_operand.vmem [shape: bf16[32,32], index: 16, kind: input, shape index: {}]   ;;  %s3819_s17 = inlined_call_operand.vmem [shape: f32[1,32], index: 17, kind: input, shape index: {}]   ;;  %s3820_s18 = inlined_call_operand.vmem [shape: f32[1,32], index: 18, kind: input, shape index: {}]   ;;  %s3821_s19 = inlined_call_operand.vmem [shape: f32[1,32], index: 19, kind: input, shape index: {}]   ;;  %s3822_s20 = inlined_call_operand.hbm [shape: bf16[2,16,32], index: 20, kind: output, shape index: {}]  }
   0x1   :  { %3830 = sst [smem:[#allocation11_spill]] %s3802_s0 }
   0x2   :  { %3831 = sst [smem:[#allocation12_spill]] %s3803_s1 }
   0x3   :  { %3832 = sst [smem:[#allocation13_spill]] %s3804_s2 }
   0x4   :  { %3833 = sst [smem:[#allocation14_spill]] %s3805_s3 }
   0x5   :  { %3834 = sst [smem:[#allocation15_spill]] %s3806_s4 }
   0x6   :  { %3835 = sst [smem:[#allocation16_spill]] %s3807_s5 }
   0x7   :  { %3836 = sst [smem:[#allocation17_spill]] %s3822_s20 }
   0x8   :  { %25 = vsyncpa [#allocation3], 0 }
   0x9   :  { %27 = vsyncpa [#allocation3 + $0x1], 0  ;;  %s3319_s1 = smov 0   ;;  %s3321_s22 = smov 0  }
   0xa   :  { %s3323_s23 = smov 0   ;;  %s3325_s24 = smov 0  }
   0xb   :  { %s3327_s2 = smov 0   ;;  %s3329_s25 = smov 0  }
   0xc LB: > { %3837 = sst [smem:[#allocation5_spill]] %s3187_s1  ;;  %s2603_s3 = sadd.s32 4294967295, %s3207_s25   ;;  %s3207_s25 = sphi %s3329_s25, %s33_s25   ;;  %s3203_s2 = sphi %s3327_s2, %s3858_s2   ;;  %s3199_s24 = sphi %s3325_s24, %s3857_s24   ;;  %s3195_s23 = sphi %s3323_s23, %s3856_s23   ;;  %s3191_s22 = sphi %s3321_s22, %s3860_s22   ;;  %s3187_s1 = sphi %s3319_s1, %s3859_s1  }
   0xd   : > { %3838 = sst [smem:[#allocation6_spill]] %s3195_s23  ;;  %s2604_s26 = sadd.s32 4294967294, %s3207_s25  }
   0xe   : > { %3839 = sst [smem:[#allocation7_spill]] %s3203_s2  ;;  %s45_s27 = sadd.s32 1, %s3203_s2 }
   0xf   : > { %s498_s28 = sadd.s32 1, %s3195_s23  ;;  %p47_p0 = scmp.ge.s32.totalorder %s45_s27, 2 }
  0x10   : > { %p508_p1 = scmp.ne.s32.totalorder %s3195_s23, %s3191_s22  ;;  %p509_p2 = scmp.eq.s32.totalorder %s2603_s3, 1 }
  0x11   : > { %p514_p3 = scmp.ne.s32.totalorder %s3191_s22, %s3187_s1  ;;  %s3862_s27 = smov (%p47_p0, %s45_s27), 0 }
  0x12   : > { %3840 = sst [smem:[#allocation8_spill]] %s3862_s27  ;;  %p3359_p4 = por %p509_p2, %p508_p1 }
  0x13   : > { %p515_p5 = scmp.eq.s32.totalorder %s2604_s26, 1  ;;  %s493_s29 = ssub.s32 %s3203_s2, %s3862_s27 }
  0x14   : > { %p2607_p6 = scmp.ge.s32.totalorder %s3207_s25, 1  ;;  %p496_p7 = scmp.eq.s32.totalorder %s493_s29, 0 }
  0x15   : > { %p3366_p8 = por %p515_p5, %p514_p3  ;;  %p620_p9 = scmp.lt.s32.totalorder %s3207_s25, 3 }
  0x16   : > { %s3372_s0 = scalar_select %p496_p7, %s3195_s23, %s498_s28  }
  0x17   : > { %s3842_s30 = scalar_select %p3366_p8, 1, 0 }
  0x18   : > { %3844 = sst [smem:[#allocation10_spill]] %s3372_s0  ;;  %p621_p10 = pnand %p2607_p6, %p620_p9 }
  0x19   : > { %3843 = sst [smem:[#allocation9_spill]] %s3842_s30  ;;  %p699_p11 = scmp.lt.s32.totalorder (!%p621_p10), %s3199_s24, 1 }
  0x1a   : > { %624 = sbr.rel (%p621_p10) target bundleno = 4972 (0x136c), region = 100  ;;  %s3845_s1 = sld [smem:[#allocation15_spill]] (!%p621_p10) }
  0x1b   : > { %s3848_s23 = sld [smem:[#allocation12_spill]] (!%p621_p10)  ;;  %s695_s28 = sand.u32 (!%p621_p10), 1, %s3191_s22  }
  0x1c   : > { %s3849_s5 = sld [smem:[#allocation16_spill]] (!%p621_p10) }
  0x1d   : > { %s3850_s2 = sld [smem:[#allocation14_spill]] (!%p621_p10) }
  0x1f   : > { %v3209_v1 = vmov 0.0   ;;  %v3063_v2 = vld [vmem:[%s3808_s6 + $0x8] sm:$0xff]   ;;  %vm3210_vm0 = vmmov 0   ;;  %v3065_v4 = vld [vmem:[%s3808_s6] sm:$0xff]   ;;  %s3396_s3 = scalar_select %p699_p11, %s3199_s24, 1  ;;  %vm766_vm1 = vcmask 261120  }
  0x20   : > { %s3846_s20 = smov %s3845_s1  ;;  %v3062_v0 = vld [vmem:[%s3845_s1 + $0x8] sm:$0xff]   ;;  %2819 = vmatprep.subr.bf16.mxu0 %v3209_v1  ;;  %2827 = vmatprep.subr.bf16.mxu1 %v3209_v1  ;;  %s3847_s1 = sld [smem:[#allocation11_spill]]  ;;  %v2620_v7 = vld [vmem:[%s3809_s7] ss:$0 sm:$0xff]  ;;  %vm943_vm2 = vcmask 64512   ;;  %vm1017_vm3 = vcmask 1043456  }
  0x21   : > { %2820 = vmatpush3.bf16.msra.mxu0 %v3062_v0  ;;  %v3064_v3 = vld [vmem:[%s3846_s20] sm:$0xff]   ;;  %2823 = vmatprep.mubr.msk.bf16.mxu0 %vm3210_vm0, %v3209_v1  ;;  %s2744_s27 = sshll.u32 %s3396_s3, 3  ;;  %s2611_s26 = sshll.u32 %s3396_s3, 2  ;;  %v3067_v23 = vld [vmem:[%s3810_s8 + $0x8] sm:$0xff]   ;;  %v3069_v61 = vld [vmem:[%s3846_s20 + $0x18] sm:$0xff]   ;;  %vm2466_vm4 = vcmask 257024  }
  0x22   : > { %2828 = vmatpush3.bf16.msra.mxu1 %v3063_v2  ;;  %2821 = vmatprep.subr.bf16.mxu0 %v3209_v1  ;;  %s711_s30 = scalar_lea.vmem %s3848_s23, %s2611_s26  ;;  %v2615_v14 = vld [vmem:[%s3849_s5] ss:$0 sm:$0xff]  ;;  %v3071_v62 = vld [vmem:[%s3846_s20 + $0x10] sm:$0xff]   ;;  %s3852_s26 = sld [smem:[#allocation17_spill]] }
  0x23   : > { %2829 = vmatprep.subr.bf16.mxu1 %v3209_v1  ;;  %2831 = vmatprep.mubr.msk.bf16.mxu1 %vm3210_vm0, %v3209_v1  ;;  %v3412_v6 = vld [vmem:[%s711_s30] sm:$0xf]  ;;  %s724_s30 = scalar_lea.vmem %s3850_s2, %s3396_s3  ;;  %s2748_s3 = sshll.u32 %s3199_s24, 7 }
  0x24   : > { %v3068_v24 = vld [vmem:[%s3810_s8] sm:$0xff]   ;;  %s3211_s24 = smov [#allocation2]  }
  0x25   : > { %2822 = vmatpush3.bf16.msra.mxu0 %v3064_v3  ;;  %v3449_v25 = vld [vmem:[%s724_s30] ss:$0 sm:$0xff]  ;;  %v3070_v3 = vld [vmem:[%s3808_s6 + $0x18] sm:$0xff]  }
  0x26   : > { %2830 = vmatpush3.bf16.msra.mxu1 %v3065_v4  ;;  %s706_s21 = scalar_lea.vmem %s3847_s1, %s2744_s27  ;;  %2835 = vmatprep.subr.bf16.mxu0 %v3209_v1  ;;  %v2624_v44 = vld [vmem:[%s3811_s9] ss:$0 sm:$0xff]  ;;  %s3757_s1 = scalar_lea.sflag [#allocation3], %s695_s28 }
  0x27   : > { %v3409_v5 = vld [vmem:[%s706_s21] sm:$0xff]   ;;  %2843 = vmatprep.subr.bf16.mxu1 %v3209_v1  ;;  %s3851_s21 = sld [smem:[#allocation13_spill]] }
  0x28   : > { %2824 = vmatmul.mubr.msk.bf16.vlgmr.msra.gmra.mxu0 %vm766_vm1, %v3409_v5  ;;  %v1063_v59 = vld [vmem:[%s3812_s10] sm:$0xf]  ;;  %s3753_s29 = scalar_lea.hbm %s3852_s26, %s2748_s3 }
  0x29   : > { %2832 = vmatmul.mubr.msk.bf16.vlgmr.msra.gmra.mxu1 %vm766_vm1, %v3412_v6  ;;  %2839 = vmatprep.mubr.msk.bf16.mxu0 %vm3210_vm0, %v3209_v1  ;;  %v1068_v60 = vsel %vm1017_vm3, %v1063_v59, 0 }
  0x2a   : > { %2845 = vmatprep.mubr.msk.bf16.mxu1 %vm3210_vm0, %v3209_v1  ;;  %2836 = vmatpush3.bf16.msra.mxu0 %v3067_v23 }
  0x2b   : > { %2837 = vmatprep.subr.bf16.mxu0 %v3209_v1 }
  0x2d   : > { %s720_s23 = scalar_lea.vmem %s3851_s21, %s2744_s27 }
  0x2e   : > { %2838 = vmatpush3.bf16.msra.mxu0 %v3068_v24 }
  0x2f   : > { %2849 = vmatprep.subr.bf16.mxu0 %v3209_v1 }
  0x31   : > { %2840 = vmatmul.mubr.msk.bf16.vlgmr.msra.gmra.mxu0 %vm766_vm1, %v3412_v6 }
  0x32   : > { %2851 = vmatprep.mubr.msk.bf16.mxu0 %vm3210_vm0, %v3209_v1 }
  0xe8   : > { %v804_v8 = vpop.f32.mrf.mxu0 }
  0xe9   : > { %v872_v9 = vpop.f32.mrf.mxu1  ;;  %v805_v20 = vadd.f32 %v2615_v14, %v804_v8  ;;  %v3072_v8 = vld [vmem:[%s3808_s6 + $0x10] sm:$0xff]  }
  0xea   : > { %v873_v10 = vadd.f32 %v2620_v7, %v872_v9  ;;  %v2825_v11 = vpop.f32.mrf.mxu0 }
  0xeb   : > { %v2833_v12 = vpop.f32.mrf.mxu1 }
  0xec   : > { %v878_v13 = vpack.c.bf16 %v873_v10, %v873_v10  ;;  %v807_v15 = vpop.f32.mrf.mxu0  ;;  %v2637_v10 = vld [vmem:[%s3849_s5 + $0x1] ss:$0 sm:$0xff] }
  0xed   : > { %v875_v16 = vpop.f32.mrf.mxu1  ;;  %v808_v21 = vadd.f32 %v2615_v14, %v807_v15 }
  0xee   : > { %v948_v17 = vsel %vm943_vm2, %v878_v13, 0  ;;  %v2826_v18 = vpop.f32.mrf.mxu0 }
  0xef   : > { %v2834_v19 = vpop.f32.mrf.mxu1  ;;  %2844 = vmatpush3.bf16.xpose.msra.mxu1 %v948_v17  ;;  %v811_v22 = vpack.c.bf16 %v808_v21, %v805_v20  ;;  %v2646_v21 = vld [vmem:[%s3809_s7 + $0x1] ss:$0 sm:$0xff] }
  0xf0   : > { %2855 = vmatprep.subr.bf16.mxu1 %v3209_v1 }
  0xf1   : > { %v936_v45 = vpop.f32.mrf.mxu0 }
  0xf2   : > { %v937_v46 = vadd.f32 %v2624_v44, %v936_v45 }
  0xf3   : > { %v2841_v47 = vpop.f32.mrf.mxu0 }
  0xf4   : > { %v942_v48 = vpack.c.bf16 %v937_v46, %v937_v46 }
  0xf5   : > { %v939_v49 = vpop.f32.mrf.mxu0 }
  0xf6   : > { %2846 = vmatmul.mubr.msk.bf16.vlgmr.msra.gmra.mxu1 %vm943_vm2, %v811_v22  ;;  %v1019_v50 = vsel %vm1017_vm3, %v942_v48, 0 }
  0xf7   : > { %2857 = vmatprep.mubr.msk.bf16.mxu1 %vm3210_vm0, %v3209_v1  ;;  %v2842_v51 = vpop.f32.mrf.mxu0  ;;  %2850 = vmatpush3.bf16.msra.mxu0 %v1019_v50  ;;  %v2655_v50 = vld [vmem:[%s3811_s9 + $0x1] ss:$0 sm:$0xff] }
  0xf8   : > { %2861 = vmatprep.subr.bf16.mxu0 %v3209_v1  ;;  %2856 = vmatpush3.bf16.msra.mxu1 %v1068_v60 }
  0xf9   : > { %2869 = vmatprep.subr.bf16.mxu1 %v3209_v1 }
 0x1b6   : > { %v984_v26 = vpop.f32.mrf.mxu1 }
 0x1b7   : > { %v985_v27 = vadd.f32 %v3449_v25, %v984_v26 }
 0x1b8   : > { %v2847_v28 = vpop.f32.mrf.mxu1 }
 0x1b9   : > { %v991_v29 = vsel %vm943_vm2, %v985_v27, -inf }
 0x1ba   : > { %992 = vmax.xlane.f32.xlu0 %v991_v29  ;;  %v987_v30 = vpop.f32.mrf.mxu1 }
 0x1bb   : > { %v988_v31 = vadd.f32 %v3449_v25, %v987_v30  ;;  %v3073_v30 = vld [vmem:[%s3810_s8 + $0x18] sm:$0xff]  }
 0x1bc   : > { %v2848_v32 = vpop.f32.mrf.mxu1 }
 0x1bd   : > { %v994_v33 = vsel %vm943_vm2, %v988_v31, -inf }
 0x1be   : > { %995 = vmax.xlane.f32.xlu0 %v994_v33 }
 0x243   : > { %v993_v34 = vpop.xlane.xlu0 %992 }
 0x244   : > { %v997_v35 = vsub.f32 %v985_v27, %v993_v34 }
 0x246   : > { %v999_v36 = vmul.f32 1.442695, %v997_v35 }
 0x247   : > { %v996_v37 = vpop.xlane.xlu0 %995 }
 0x248   : > { %3091 = vpow2.f32 %v999_v36  ;;  %v998_v38 = vsub.f32 %v988_v31, %v996_v37  ;;  %v3074_v31 = vld [vmem:[%s3810_s8 + $0x10] sm:$0xff]  }
 0x24a   : > { %v1001_v39 = vmul.f32 1.442695, %v998_v38 }
 0x24c   : > { %3093 = vpow2.f32 %v1001_v39 }
 0x255   : > { %v3092_v40 = vpop.eup %3091 }
 0x256   : > { %v1003_v41 = vsel %vm943_vm2, %v3092_v40, 0.0 }
 0x257   : > { %1004 = vadd.xlane.f32.xlu1 %v1003_v41 }
 0x259   : > { %v3094_v42 = vpop.eup %3093 }
 0x25a   : > { %v1006_v43 = vsel %vm943_vm2, %v3094_v42, 0.0 }
 0x25b   : > { %1007 = vadd.xlane.f32.xlu1 %v1006_v43 }
 0x2e0   : > { %v1005_v52 = vpop.xlane.xlu1 %1004 }
 0x2e1   : > { %3095 = vrcp.f32 %v1005_v52 }
 0x2e4   : > { %v1008_v53 = vpop.xlane.xlu1 %1007 }
 0x2e5   : > { %3097 = vrcp.f32 %v1008_v53 }
 0x2ee   : > { %v3096_v54 = vpop.eup %3095 }
 0x2ef   : > { %v1011_v56 = vmul.f32 %v3096_v54, %v3092_v40 }
 0x2f2   : > { %v3098_v55 = vpop.eup %3097 }
 0x2f3   : > { %v1012_v57 = vmul.f32 %v3098_v55, %v3094_v42 }
 0x2f5   : > { %v1013_v58 = vpack.c.bf16 %v1012_v57, %v1011_v56 }
 0x2f7   : > { %2852 = vmatmul.mubr.msk.bf16.vlgmr.msra.gmra.mxu0 %vm943_vm2, %v1013_v58 }
 0x2f8   : > { %2865 = vmatprep.mubr.msk.bf16.mxu0 %vm3210_vm0, %v3209_v1  ;;  %2862 = vmatpush3.bf16.msra.mxu0 %v3069_v61 }
 0x2f9   : > { %2863 = vmatprep.subr.bf16.mxu0 %v3209_v1 }
 0x2fc   : > { %2864 = vmatpush3.bf16.msra.mxu0 %v3071_v62 }
 0x2fd   : > { %2877 = vmatprep.subr.bf16.mxu0 %v3209_v1 }
 0x2ff   : > { %2866 = vmatmul.mubr.msk.bf16.vlgmr.msra.gmra.mxu0 %vm766_vm1, %v3409_v5 }
 0x300   : > { %2881 = vmatprep.mubr.msk.bf16.mxu0 %vm3210_vm0, %v3209_v1  ;;  %2878 = vmatpush3.bf16.msra.mxu0 %v3073_v30 }
 0x301   : > { %2879 = vmatprep.subr.bf16.mxu0 %v3209_v1 }
 0x304   : > { %2880 = vmatpush3.bf16.msra.mxu0 %v3074_v31 }
 0x305   : > { %2891 = vmatprep.subr.bf16.mxu0 %v3209_v1 }
 0x307   : > { %2882 = vmatmul.mubr.msk.bf16.vlgmr.msra.gmra.mxu0 %vm766_vm1, %v3412_v6 }
 0x308   : > { %2893 = vmatprep.mubr.msk.bf16.mxu0 %vm3210_vm0, %v3209_v1 }
 0x3b7   : > { %v1055_v63 = vpop.f32.mrf.mxu0 }
 0x3b9   : > { %v2853_v0 = vpop.f32.mrf.mxu0 }
 0x3bb   : > { %v1058_v2 = vpop.f32.mrf.mxu0 }
 0x3bc   : > { %v1062_v4 = vpack.c.bf16 %v1058_v2, %v1055_v63  ;;  %v2661_v2 = vld [vmem:[%s3812_s10 + $0x4] sm:$0xf] }
 0x3bd   : > { %v2854_v7 = vpop.f32.mrf.mxu0 }
 0x3be   : > { %2858 = vmatmul.mubr.msk.bf16.vlgmr.msra.gmra.mxu1 %vm943_vm2, %v1062_v4  ;;  %v3075_v4 = vld [vmem:[%s3846_s20 + $0x28] sm:$0xff]   ;;  %v3077_v7 = vld [vmem:[%s3846_s20 + $0x20] sm:$0xff]  }
 0x3bf   : > { %2870 = vmatpush3.bf16.msra.mxu1 %v3070_v3  ;;  %2873 = vmatprep.mubr.msk.bf16.mxu1 %vm3210_vm0, %v3209_v1  ;;  %v1178_v9 = vpop.f32.mrf.mxu0  ;;  %v1442_v3 = vsel %vm1017_vm3, %v2661_v2, 0 }
 0x3c0   : > { %2871 = vmatprep.subr.bf16.mxu1 %v3209_v1  ;;  %v1179_v13 = vadd.f32 %v2637_v10, %v1178_v9 }
 0x3c1   : > { %v2867_v11 = vpop.f32.mrf.mxu0 }
 0x3c2   : > { %v3076_v11 = vld [vmem:[%s3808_s6 + $0x28] sm:$0xff]  }
 0x3c3   : > { %2872 = vmatpush3.bf16.msra.mxu1 %v3072_v8  ;;  %v1181_v12 = vpop.f32.mrf.mxu0 }
 0x3c4   : > { %2885 = vmatprep.subr.bf16.mxu1 %v3209_v1  ;;  %v1182_v15 = vadd.f32 %v2637_v10, %v1181_v12 }
 0x3c5   : > { %v2868_v14 = vpop.f32.mrf.mxu0 }
 0x3c6   : > { %2874 = vmatmul.mubr.msk.bf16.vlgmr.msra.gmra.mxu1 %vm766_vm1, %v3412_v6  ;;  %v1185_v16 = vpack.c.bf16 %v1182_v15, %v1179_v13  ;;  %v3078_v14 = vld [vmem:[%s3808_s6 + $0x20] sm:$0xff]  }
 0x3c7   : > { %2887 = vmatprep.mubr.msk.bf16.mxu1 %vm3210_vm0, %v3209_v1  ;;  %v1311_v51 = vpop.f32.mrf.mxu0 }
 0x3c8   : > { %v1312_v52 = vadd.f32 %v2655_v50, %v1311_v51 }
 0x3c9   : > { %v2883_v53 = vpop.f32.mrf.mxu0 }
 0x3ca   : > { %v1317_v54 = vpack.c.bf16 %v1312_v52, %v1312_v52 }
 0x3cb   : > { %v1314_v55 = vpop.f32.mrf.mxu0 }
 0x3cc   : > { %v1392_v56 = vsel %vm1017_vm3, %v1317_v54, 0 }
 0x3cd   : > { %v2884_v57 = vpop.f32.mrf.mxu0  ;;  %2892 = vmatpush3.bf16.msra.mxu0 %v1392_v56 }
 0x3ce   : > { %2903 = vmatprep.subr.bf16.mxu0 %v3209_v1 }
 0x47e   : > { %v3500_v17 = vpop.f32.mrf.mxu1 }
 0x480   : > { %v2859_v18 = vpop.f32.mrf.mxu1 }
 0x482   : > { %v3502_v19 = vpop.f32.mrf.mxu1 }
 0x484   : > { %v2860_v20 = vpop.f32.mrf.mxu1 }
 0x486   : > { %v1245_v22 = vpop.f32.mrf.mxu1 }
 0x487   : > { %v1246_v23 = vadd.f32 %v2646_v21, %v1245_v22 }
 0x488   : > { %v2875_v24 = vpop.f32.mrf.mxu1 }
 0x489   : > { %v1251_v26 = vpack.c.bf16 %v1246_v23, %v1246_v23 }
 0x48a   : > { %v1248_v27 = vpop.f32.mrf.mxu1 }
 0x48b   : > { %v1322_v28 = vsel %vm943_vm2, %v1251_v26, 0  ;;  %v2631_v26 = vld [vmem:[%s3813_s11] ss:$0 sm:$0xff] }
 0x48c   : > { %v2876_v29 = vpop.f32.mrf.mxu1  ;;  %2886 = vmatpush3.bf16.xpose.msra.mxu1 %v1322_v28  ;;  %v1117_v27 = vadd.f32 %v2631_v26, %v3500_v17  ;;  %v1118_v31 = vadd.f32 %v2631_v26, %v3502_v19  ;;  %v3079_v19 = vld [vmem:[%s3810_s8 + $0x28] sm:$0xff]  }
 0x48d   : > { %2897 = vmatprep.subr.bf16.mxu1 %v3209_v1 }
 0x493   : > { %2888 = vmatmul.mubr.msk.bf16.vlgmr.msra.gmra.mxu1 %vm943_vm2, %v1185_v16  ;;  %v2668_v16 = vld [vmem:[%s3849_s5 + $0x2] ss:$0 sm:$0xff] }
 0x494   : > { %2899 = vmatprep.mubr.msk.bf16.mxu1 %vm3210_vm0, %v3209_v1  ;;  %2898 = vmatpush3.bf16.msra.mxu1 %v1442_v3 }
 0x495   : > { %2911 = vmatprep.subr.bf16.mxu1 %v3209_v1 }
 0x553   : > { %v1358_v32 = vpop.f32.mrf.mxu1 }
 0x554   : > { %v1359_v33 = vadd.f32 %v3449_v25, %v1358_v32 }
 0x555   : > { %v2889_v34 = vpop.f32.mrf.mxu1 }
 0x556   : > { %v1365_v35 = vsel %vm943_vm2, %v1359_v33, -inf }
 0x557   : > { %1366 = vmax.xlane.f32.xlu0 %v1365_v35  ;;  %v1361_v36 = vpop.f32.mrf.mxu1  ;;  %v2677_v35 = vld [vmem:[%s3809_s7 + $0x2] ss:$0 sm:$0xff] }
 0x558   : > { %v1362_v37 = vadd.f32 %v3449_v25, %v1361_v36 }
 0x559   : > { %v2890_v38 = vpop.f32.mrf.mxu1 }
 0x55a   : > { %v1368_v39 = vsel %vm943_vm2, %v1362_v37, -inf }
 0x55b   : > { %1369 = vmax.xlane.f32.xlu1 %v1368_v39 }
 0x5e0   : > { %v1367_v40 = vpop.xlane.xlu0 %1366 }
 0x5e1   : > { %v1371_v41 = vsub.f32 %v1359_v33, %v1367_v40 }
 0x5e3   : > { %v1373_v42 = vmul.f32 1.442695, %v1371_v41 }
 0x5e4   : > { %v1370_v43 = vpop.xlane.xlu1 %1369 }
 0x5e5   : > { %3099 = vpow2.f32 %v1373_v42  ;;  %v1372_v44 = vsub.f32 %v1362_v37, %v1370_v43  ;;  %v3080_v42 = vld [vmem:[%s3810_s8 + $0x20] sm:$0xff]  }
 0x5e7   : > { %v1375_v45 = vmul.f32 1.442695, %v1372_v44 }
 0x5e9   : > { %3101 = vpow2.f32 %v1375_v45 }
 0x5f2   : > { %v3100_v46 = vpop.eup %3099 }
 0x5f3   : > { %v1377_v47 = vsel %vm943_vm2, %v3100_v46, 0.0 }
 0x5f4   : > { %1378 = vadd.xlane.f32.xlu0 %v1377_v47 }
 0x5f6   : > { %v3102_v48 = vpop.eup %3101 }
 0x5f7   : > { %v1380_v49 = vsel %vm943_vm2, %v3102_v48, 0.0 }
 0x5f8   : > { %1381 = vadd.xlane.f32.xlu1 %v1380_v49 }
 0x67d   : > { %v1379_v58 = vpop.xlane.xlu0 %1378 }
 0x67e   : > { %3103 = vrcp.f32 %v1379_v58 }
 0x681   : > { %v1382_v59 = vpop.xlane.xlu1 %1381 }
 0x682   : > { %3105 = vrcp.f32 %v1382_v59 }
 0x68b   : > { %v3104_v60 = vpop.eup %3103 }
 0x68c   : > { %v1385_v62 = vmul.f32 %v3104_v60, %v3100_v46 }
 0x68f   : > { %v3106_v61 = vpop.eup %3105 }
 0x690   : > { %v1386_v63 = vmul.f32 %v3106_v61, %v3102_v48  ;;  %v2686_v61 = vld [vmem:[%s3811_s9 + $0x2] ss:$0 sm:$0xff] }
 0x692   : > { %v1387_v0 = vpack.c.bf16 %v1386_v63, %v1385_v62 }
 0x694   : > { %2894 = vmatmul.mubr.msk.bf16.vlgmr.msra.gmra.mxu0 %vm943_vm2, %v1387_v0 }
 0x695   : > { %2907 = vmatprep.mubr.msk.bf16.mxu0 %vm3210_vm0, %v3209_v1  ;;  %2904 = vmatpush3.bf16.msra.mxu0 %v3075_v4 }
 0x696   : > { %2905 = vmatprep.subr.bf16.mxu0 %v3209_v1 }
 0x699   : > { %2906 = vmatpush3.bf16.msra.mxu0 %v3077_v7 }
 0x69a   : > { %2919 = vmatprep.subr.bf16.mxu0 %v3209_v1 }
 0x69c   : > { %2908 = vmatmul.mubr.msk.bf16.vlgmr.msra.gmra.mxu0 %vm766_vm1, %v3409_v5 }
 0x69d   : > { %2923 = vmatprep.mubr.msk.bf16.mxu0 %vm3210_vm0, %v3209_v1  ;;  %2920 = vmatpush3.bf16.msra.mxu0 %v3079_v19 }
 0x69e   : > { %2921 = vmatprep.subr.bf16.mxu0 %v3209_v1 }
 0x6a1   : > { %2922 = vmatpush3.bf16.msra.mxu0 %v3080_v42  ;;  %v2708_v42 = vld [vmem:[%s3809_s7 + $0x3] ss:$0 sm:$0xff] }
 0x6a2   : > { %2933 = vmatprep.subr.bf16.mxu0 %v3209_v1 }
 0x6a4   : > { %2924 = vmatmul.mubr.msk.bf16.vlgmr.msra.gmra.mxu0 %vm766_vm1, %v3412_v6 }
 0x6a5   : > { %2935 = vmatprep.mubr.msk.bf16.mxu0 %vm3210_vm0, %v3209_v1 }
 0x754   : > { %v1428_v8 = vpop.f32.mrf.mxu0 }
 0x756   : > { %v2895_v9 = vpop.f32.mrf.mxu0 }
 0x758   : > { %v1431_v10 = vpop.f32.mrf.mxu0 }
 0x759   : > { %v1435_v12 = vpack.c.bf16 %v1431_v10, %v1428_v8 }
 0x75a   : > { %v2896_v13 = vpop.f32.mrf.mxu0 }
 0x75b   : > { %2900 = vmatmul.mubr.msk.bf16.vlgmr.msra.gmra.mxu1 %vm943_vm2, %v1435_v12 }
 0x75c   : > { %2912 = vmatpush3.bf16.msra.mxu1 %v3076_v11  ;;  %2915 = vmatprep.mubr.msk.bf16.mxu1 %vm3210_vm0, %v3209_v1  ;;  %v1546_v15 = vpop.f32.mrf.mxu0 }
 0x75d   : > { %2913 = vmatprep.subr.bf16.mxu1 %v3209_v1  ;;  %v1547_v21 = vadd.f32 %v2668_v16, %v1546_v15  ;;  %v2692_v15 = vld [vmem:[%s3812_s10 + $0x8] sm:$0xf] }
 0x75e   : > { %v2909_v18 = vpop.f32.mrf.mxu0 }
 0x75f   : > { %v3081_v18 = vld [vmem:[%s3846_s20 + $0x38] sm:$0xff]  }
 0x760   : > { %2914 = vmatpush3.bf16.msra.mxu1 %v3078_v14  ;;  %v1549_v20 = vpop.f32.mrf.mxu0 }
 0x761   : > { %2927 = vmatprep.subr.bf16.mxu1 %v3209_v1  ;;  %v1550_v23 = vadd.f32 %v2668_v16, %v1549_v20  ;;  %v1810_v16 = vsel %vm1017_vm3, %v2692_v15, 0  ;;  %v3083_v20 = vld [vmem:[%s3846_s20 + $0x30] sm:$0xff]  }
 0x762   : > { %v2910_v22 = vpop.f32.mrf.mxu0 }
 0x763   : > { %2916 = vmatmul.mubr.msk.bf16.vlgmr.msra.gmra.mxu1 %vm766_vm1, %v3412_v6  ;;  %v1553_v24 = vpack.c.bf16 %v1550_v23, %v1547_v21 }
 0x764   : > { %2929 = vmatprep.mubr.msk.bf16.mxu1 %vm3210_vm0, %v3209_v1  ;;  %v1679_v62 = vpop.f32.mrf.mxu0 }
 0x765   : > { %v1680_v63 = vadd.f32 %v2686_v61, %v1679_v62 }
 0x766   : > { %v2925_v0 = vpop.f32.mrf.mxu0 }
 0x767   : > { %v1685_v2 = vpack.c.bf16 %v1680_v63, %v1680_v63 }
 0x768   : > { %v1682_v3 = vpop.f32.mrf.mxu0 }
 0x769   : > { %v1760_v4 = vsel %vm1017_vm3, %v1685_v2, 0 }
 0x76a   : > { %v2926_v7 = vpop.f32.mrf.mxu0  ;;  %2934 = vmatpush3.bf16.msra.mxu0 %v1760_v4 }
 0x76b   : > { %2945 = vmatprep.subr.bf16.mxu0 %v3209_v1 }
 0x81b   : > { %v1478_v28 = vpop.f32.mrf.mxu1 }
 0x81c   : > { %v3577_v29 = vadd.f32 %v1478_v28, %v1117_v27  ;;  %v3084_v28 = vld [vmem:[%s3808_s6 + $0x30] sm:$0xff]  }
 0x81d   : > { %v2901_v30 = vpop.f32.mrf.mxu1 }
 0x81e   : > { %v2699_v30 = vld [vmem:[%s3849_s5 + $0x3] ss:$0 sm:$0xff] }
 0x81f   : > { %v1481_v32 = vpop.f32.mrf.mxu1 }
 0x820   : > { %v3580_v33 = vadd.f32 %v1481_v32, %v1118_v31 }
 0x821   : > { %v2902_v34 = vpop.f32.mrf.mxu1 }
 0x823   : > { %v1613_v36 = vpop.f32.mrf.mxu1 }
 0x824   : > { %v1614_v37 = vadd.f32 %v2677_v35, %v1613_v36 }
 0x825   : > { %v2917_v38 = vpop.f32.mrf.mxu1 }
 0x826   : > { %v1619_v39 = vpack.c.bf16 %v1614_v37, %v1614_v37 }
 0x827   : > { %v1616_v40 = vpop.f32.mrf.mxu1 }
 0x828   : > { %v1690_v17 = vsel %vm943_vm2, %v1619_v39, 0 }
 0x829   : > { %v2918_v41 = vpop.f32.mrf.mxu1  ;;  %2928 = vmatpush3.bf16.xpose.msra.mxu1 %v1690_v17 }
 0x82a   : > { %2939 = vmatprep.subr.bf16.mxu1 %v3209_v1 }
 0x830   : > { %2930 = vmatmul.mubr.msk.bf16.vlgmr.msra.gmra.mxu1 %vm943_vm2, %v1553_v24  ;;  %v3082_v24 = vld [vmem:[%s3808_s6 + $0x38] sm:$0xff]  }
 0x831   : > { %2941 = vmatprep.mubr.msk.bf16.mxu1 %vm3210_vm0, %v3209_v1  ;;  %2940 = vmatpush3.bf16.msra.mxu1 %v1810_v16 }
 0x832   : > { %2953 = vmatprep.subr.bf16.mxu1 %v3209_v1 }
 0x8f0   : > { %v1726_v43 = vpop.f32.mrf.mxu1 }
 0x8f1   : > { %v1727_v44 = vadd.f32 %v3449_v25, %v1726_v43 }
 0x8f2   : > { %v2931_v45 = vpop.f32.mrf.mxu1 }
 0x8f3   : > { %v1733_v46 = vsel %vm943_vm2, %v1727_v44, -inf }
 0x8f4   : > { %1734 = vmax.xlane.f32.xlu0 %v1733_v46  ;;  %v1729_v47 = vpop.f32.mrf.mxu1 }
 0x8f5   : > { %v1730_v48 = vadd.f32 %v3449_v25, %v1729_v47 }
 0x8f6   : > { %v2932_v49 = vpop.f32.mrf.mxu1 }
 0x8f7   : > { %v1736_v50 = vsel %vm943_vm2, %v1730_v48, -inf }
 0x8f8   : > { %1737 = vmax.xlane.f32.xlu1 %v1736_v50 }
 0x97d   : > { %v1735_v51 = vpop.xlane.xlu0 %1734 }
 0x97e   : > { %v1739_v52 = vsub.f32 %v1727_v44, %v1735_v51 }
 0x980   : > { %v1741_v53 = vmul.f32 1.442695, %v1739_v52 }
 0x981   : > { %v1738_v54 = vpop.xlane.xlu1 %1737 }
 0x982   : > { %3107 = vpow2.f32 %v1741_v53  ;;  %v1740_v55 = vsub.f32 %v1730_v48, %v1738_v54 }
 0x984   : > { %v1743_v56 = vmul.f32 1.442695, %v1740_v55 }
 0x986   : > { %3109 = vpow2.f32 %v1743_v56 }
 0x98f   : > { %v3108_v57 = vpop.eup %3107 }
 0x990   : > { %v1745_v58 = vsel %vm943_vm2, %v3108_v57, 0.0 }
 0x991   : > { %1746 = vadd.xlane.f32.xlu0 %v1745_v58 }
 0x993   : > { %v3110_v59 = vpop.eup %3109 }
 0x994   : > { %v1748_v60 = vsel %vm943_vm2, %v3110_v59, 0.0 }
 0x995   : > { %1749 = vadd.xlane.f32.xlu1 %v1748_v60 }
 0xa1a   : > { %v1747_v8 = vpop.xlane.xlu0 %1746 }
 0xa1b   : > { %3111 = vrcp.f32 %v1747_v8 }
 0xa1e   : > { %v1750_v9 = vpop.xlane.xlu1 %1749 }
 0xa1f   : > { %3113 = vrcp.f32 %v1750_v9 }
 0xa28   : > { %v3112_v10 = vpop.eup %3111 }
 0xa29   : > { %v1753_v12 = vmul.f32 %v3112_v10, %v3108_v57 }
 0xa2c   : > { %v3114_v11 = vpop.eup %3113 }
 0xa2d   : > { %v1754_v13 = vmul.f32 %v3114_v11, %v3110_v59 }
 0xa2f   : > { %v1755_v14 = vpack.c.bf16 %v1754_v13, %v1753_v12 }
 0xa31   : > { %2936 = vmatmul.mubr.msk.bf16.vlgmr.msra.gmra.mxu0 %vm943_vm2, %v1755_v14 }
 0xa32   : > { %2949 = vmatprep.mubr.msk.bf16.mxu0 %vm3210_vm0, %v3209_v1  ;;  %2946 = vmatpush3.bf16.msra.mxu0 %v3081_v18 }
 0xa33   : > { %2947 = vmatprep.subr.bf16.mxu0 %v3209_v1 }
 0xa36   : > { %2948 = vmatpush3.bf16.msra.mxu0 %v3083_v20 }
 0xa37   : > { %2961 = vmatprep.subr.bf16.mxu0 %v3209_v1 }
 0xa39   : > { %2950 = vmatmul.mubr.msk.bf16.vlgmr.msra.gmra.mxu0 %vm766_vm1, %v3409_v5 }
 0xa3a   : > { %2965 = vmatprep.mubr.msk.bf16.mxu0 %vm3210_vm0, %v3209_v1 }
 0xaf1   : > { %v1796_v21 = vpop.f32.mrf.mxu0 }
 0xaf3   : > { %v2937_v22 = vpop.f32.mrf.mxu0 }
 0xaf4   : > { %v2723_v22 = vld [vmem:[%s3812_s10 + $0xc] sm:$0xf] }
 0xaf5   : > { %v1799_v23 = vpop.f32.mrf.mxu0 }
 0xaf6   : > { %v1803_v26 = vpack.c.bf16 %v1799_v23, %v1796_v21  ;;  %v2178_v23 = vsel %vm1017_vm3, %v2723_v22, 0 }
 0xaf7   : > { %v2938_v27 = vpop.f32.mrf.mxu0 }
 0xaf8   : > { %2942 = vmatmul.mubr.msk.bf16.vlgmr.msra.gmra.mxu1 %vm943_vm2, %v1803_v26 }
 0xaf9   : > { %2954 = vmatpush3.bf16.msra.mxu1 %v3082_v24  ;;  %2957 = vmatprep.mubr.msk.bf16.mxu1 %vm3210_vm0, %v3209_v1  ;;  %v1914_v5 = vpop.f32.mrf.mxu0 }
 0xafa   : > { %2955 = vmatprep.subr.bf16.mxu1 %v3209_v1  ;;  %v1915_v34 = vadd.f32 %v2699_v30, %v1914_v5 }
 0xafb   : > { %v2951_v31 = vpop.f32.mrf.mxu0 }
 0xafd   : > { %2956 = vmatpush3.bf16.msra.mxu1 %v3084_v28  ;;  %v1917_v32 = vpop.f32.mrf.mxu0 }
 0xafe   : > { %2969 = vmatprep.subr.bf16.mxu1 %v3209_v1  ;;  %v1918_v36 = vadd.f32 %v2699_v30, %v1917_v32  ;;  %v2750_v30 = vld [vmem:[%s720_s23] sm:$0xff]   ;;  %s2608_s23 = sshll.u32 %s695_s28, 3 }
 0xaff   : > { %v2952_v35 = vpop.f32.mrf.mxu0  ;;  %v2751_v31 = vunpack.c.l.bf16 %v2750_v30  ;;  %s697_s27 = scalar_lea.vmem [#allocation2], %s2608_s23  ;;  %s3135_s23 = sshll.u32 %s3211_s24, 4  ;;  %s3136_s23 = int_to_ptr.vmem [resolvable:$false] %s3135_s23 }
 0xb00   : > { %2958 = vmatmul.mubr.msk.bf16.vlgmr.msra.gmra.mxu1 %vm766_vm1, %v3412_v6  ;;  %v1921_v37 = vpack.c.bf16 %v1918_v36, %v1915_v34  ;;  %s2485_s2 = sshll.u32 %s697_s27, 4  ;;  %s3137_s30 = scalar_lea.vmem %s3136_s23, 256  ;;  %s3755_s2 = int_to_ptr.vmem [resolvable:$true] %s2485_s2 }
 0xb01   : > { %2971 = vmatprep.mubr.msk.bf16.mxu1 %vm3210_vm0, %v3209_v1  ;;  %s3131_s21 = scalar_lea.vmem %s3755_s2, 128  ;;  %p3138_p1 = scmp.lt.s32.totalorder %s3755_s2, %s3136_s23 }
 0xb02   : > { %p3132_p12 = scmp.ne.s32.totalorder %s3755_s2, %s3131_s21  ;;  %p3139_p2 = scmp.lt.s32.totalorder %s3137_s30, %s3131_s21 }
 0xb04   : > { %p3133_p13 = pnand %p3132_p12, %p3359_p4  ;;  %p3140_p3 = por %p3139_p2, %p3138_p1 }
 0xb06   : > { %p3134_p0 = pneg %p3133_p13 }
 0xb08   : > { %p3141_p5 = pnand %p3140_p3, %p3134_p0 }
 0xbb8   : > { %v1846_v38 = vpop.f32.mrf.mxu1 }
 0xbb9   : > { %v3652_v39 = vadd.f32 %v1846_v38, %v3577_v29  ;;  %v3085_v29 = vld [vmem:[%s3810_s8 + $0x38] sm:$0xff]  }
 0xbba   : > { %v2943_v40 = vpop.f32.mrf.mxu1  ;;  %2962 = vmatpush3.bf16.msra.mxu0 %v3085_v29 }
 0xbbb   : > { %2963 = vmatprep.subr.bf16.mxu0 %v3209_v1 }
 0xbbc   : > { %v1849_v17 = vpop.f32.mrf.mxu1 }
 0xbbd   : > { %v3655_v41 = vadd.f32 %v1849_v17, %v3580_v33  ;;  %v3086_v33 = vld [vmem:[%s3810_s8 + $0x30] sm:$0xff]  }
 0xbbe   : > { %v2944_v19 = vpop.f32.mrf.mxu1  ;;  %2964 = vmatpush3.bf16.msra.mxu0 %v3086_v33 }
 0xbbf   : > { %2975 = vmatprep.subr.bf16.mxu0 %v3209_v1 }
 0xbc0   : > { %v1981_v43 = vpop.f32.mrf.mxu1 }
 0xbc1   : > { %v1982_v44 = vadd.f32 %v2708_v42, %v1981_v43  ;;  %2966 = vmatmul.mubr.msk.bf16.vlgmr.msra.gmra.mxu0 %vm766_vm1, %v3412_v6 }
 0xbc2   : > { %v2959_v45 = vpop.f32.mrf.mxu1  ;;  %2977 = vmatprep.mubr.msk.bf16.mxu0 %vm3210_vm0, %v3209_v1 }
 0xbc3   : > { %v1987_v46 = vpack.c.bf16 %v1982_v44, %v1982_v44 }
 0xbc4   : > { %v1984_v47 = vpop.f32.mrf.mxu1 }
 0xbc5   : > { %v2058_v48 = vsel %vm943_vm2, %v1987_v46, 0 }
 0xbc6   : > { %v2960_v49 = vpop.f32.mrf.mxu1  ;;  %2970 = vmatpush3.bf16.xpose.msra.mxu1 %v2058_v48 }
 0xbc7   : > { %2981 = vmatprep.subr.bf16.mxu1 %v3209_v1 }
 0xbcd   : > { %2972 = vmatmul.mubr.msk.bf16.vlgmr.msra.gmra.mxu1 %vm943_vm2, %v1921_v37  ;;  %v2752_v37 = vunpack.c.h.bf16 %v2750_v30 }
 0xbce   : > { %2983 = vmatprep.mubr.msk.bf16.mxu1 %vm3210_vm0, %v3209_v1  ;;  %2982 = vmatpush3.bf16.msra.mxu1 %v2178_v23 }
 0xbcf   : > { %2995 = vmatprep.subr.bf16.mxu1 %v3209_v1 }
 0xc81   : > { %v2047_v4 = vpop.f32.mrf.mxu0 }
 0xc83   : > { %v2967_v8 = vpop.f32.mrf.mxu0 }
 0xc84   : > { %v2727_v8 = vld [vmem:[%s3817_s15] ss:$0 sm:$0xff] }
 0xc85   : > { %v2050_v10 = vpop.f32.mrf.mxu0 }
 0xc87   : > { %v2968_v12 = vpop.f32.mrf.mxu0 }
 0xc8d   : > { %v2094_v50 = vpop.f32.mrf.mxu1 }
 0xc8e   : > { %v2095_v51 = vadd.f32 %v3449_v25, %v2094_v50  ;;  %v3087_v50 = vld [vmem:[%s3816_s14 + $0x8] sm:$0xff]  }
 0xc8f   : > { %v2973_v52 = vpop.f32.mrf.mxu1 }
 0xc90   : > { %v2101_v53 = vsel %vm943_vm2, %v2095_v51, -inf }
 0xc91   : > { %2102 = vmax.xlane.f32.xlu0 %v2101_v53  ;;  %v2097_v54 = vpop.f32.mrf.mxu1 }
 0xc92   : > { %v2098_v55 = vadd.f32 %v3449_v25, %v2097_v54  ;;  %v2717_v25 = vld [vmem:[%s3811_s9 + $0x3] ss:$0 sm:$0xff] }
 0xc93   : > { %v2974_v56 = vpop.f32.mrf.mxu1  ;;  %v2048_v7 = vadd.f32 %v2717_v25, %v2047_v4  ;;  %v3089_v4 = vld [vmem:[%s3818_s16 + $0x8] sm:$0xff]  }
 0xc94   : > { %v2104_v57 = vsel %vm943_vm2, %v2098_v55, -inf }
 0xc95   : > { %2105 = vmax.xlane.f32.xlu1 %v2104_v57  ;;  %v2053_v9 = vpack.c.bf16 %v2048_v7, %v2048_v7  ;;  %v3090_v7 = vld [vmem:[%s3818_s16] sm:$0xff]  }
 0xc97   : > { %v2128_v11 = vsel %vm1017_vm3, %v2053_v9, 0 }
 0xc98   : > { %2976 = vmatpush3.bf16.msra.mxu0 %v2128_v11 }
 0xc99   : > { %2987 = vmatprep.subr.bf16.mxu0 %v3209_v1 }
 0xd1a   : > { %v2103_v58 = vpop.xlane.xlu0 %2102 }
 0xd1b   : > { %v2107_v59 = vsub.f32 %v2095_v51, %v2103_v58  ;;  %v3088_v51 = vld [vmem:[%s3816_s14] sm:$0xff]  }
 0xd1d   : > { %v2109_v6 = vmul.f32 1.442695, %v2107_v59 }
 0xd1e   : > { %v2106_v60 = vpop.xlane.xlu1 %2105 }
 0xd1f   : > { %3115 = vpow2.f32 %v2109_v6  ;;  %v2108_v61 = vsub.f32 %v2098_v55, %v2106_v60  ;;  %v2725_v6 = vld [vmem:[%s3814_s12] ss:$0 sm:$0xff] }
 0xd21   : > { %v2111_v62 = vmul.f32 1.442695, %v2108_v61 }
 0xd23   : > { %3117 = vpow2.f32 %v2111_v62 }
 0xd2c   : > { %v3116_v63 = vpop.eup %3115 }
 0xd2d   : > { %v2113_v0 = vsel %vm943_vm2, %v3116_v63, 0.0 }
 0xd2e   : > { %2114 = vadd.xlane.f32.xlu0 %v2113_v0 }
 0xd30   : > { %v3118_v2 = vpop.eup %3117 }
 0xd31   : > { %v2116_v3 = vsel %vm943_vm2, %v3118_v2, 0.0 }
 0xd32   : > { %2117 = vadd.xlane.f32.xlu1 %v2116_v3 }
 0xdb7   : > { %v2115_v13 = vpop.xlane.xlu0 %2114 }
 0xdb8   : > { %3119 = vrcp.f32 %v2115_v13 }
 0xdbb   : > { %v2118_v14 = vpop.xlane.xlu1 %2117 }
 0xdbc   : > { %3121 = vrcp.f32 %v2118_v14 }
 0xdc5   : > { %v3120_v15 = vpop.eup %3119 }
 0xdc6   : > { %v2121_v18 = vmul.f32 %v3120_v15, %v3116_v63  ;;  %v2726_v63 = vld [vmem:[%s3815_s13] ss:$0 sm:$0xff] }
 0xdc9   : > { %v3122_v16 = vpop.eup %3121 }
 0xdca   : > { %v2122_v20 = vmul.f32 %v3122_v16, %v3118_v2 }
 0xdcc   : > { %v2123_v21 = vpack.c.bf16 %v2122_v20, %v2121_v18 }
 0xdce   : > { %2978 = vmatmul.mubr.msk.bf16.vlgmr.msra.gmra.mxu0 %vm943_vm2, %v2123_v21 }
 0xdcf   : > { %2991 = vmatprep.mubr.msk.bf16.mxu0 %vm3210_vm0, %v3209_v1  ;;  %2988 = vmatpush3.bf16.msra.mxu0 %v3087_v50 }
 0xdd0   : > { %2989 = vmatprep.subr.bf16.mxu0 %v3209_v1 }
 0xdd3   : > { %2990 = vmatpush3.bf16.msra.mxu0 %v3088_v51 }
 0xe8e   : > { %v2164_v24 = vpop.f32.mrf.mxu0 }
 0xe90   : > { %v2979_v26 = vpop.f32.mrf.mxu0 }
 0xe92   : > { %v2167_v27 = vpop.f32.mrf.mxu0 }
 0xe93   : > { %v2171_v28 = vpack.c.bf16 %v2167_v27, %v2164_v24 }
 0xe94   : > { %v2980_v5 = vpop.f32.mrf.mxu0 }
 0xe95   : > { %2984 = vmatmul.mubr.msk.bf16.vlgmr.msra.gmra.mxu1 %vm943_vm2, %v2171_v28 }
 0xe96   : > { %2999 = vmatprep.mubr.msk.bf16.mxu1 %vm3210_vm0, %v3209_v1  ;;  %2996 = vmatpush3.bf16.msra.mxu1 %v3089_v4 }
 0xe97   : > { %2997 = vmatprep.subr.bf16.mxu1 %v3209_v1  ;;  %v2731_v1 = vld [vmem:[%s3819_s17] ss:$0 sm:$0xff] }
 0xe9a   : > { %2998 = vmatpush3.bf16.msra.mxu1 %v3090_v7 }
 0xf55   : > { %v2214_v32 = vpop.f32.mrf.mxu1 }
 0xf56   : > { %v2221_v34 = vadd.f32 %v2214_v32, %v3652_v39 }
 0xf57   : > { %v2985_v35 = vpop.f32.mrf.mxu1 }
 0xf58   : > { %v2227_v36 = vadd.f32 %v2751_v31, %v2221_v34 }
 0xf59   : > { %v2217_v38 = vpop.f32.mrf.mxu1 }
 0xf5a   : > { %v2222_v40 = vadd.f32 %v2217_v38, %v3655_v41  ;;  %v2229_v17 = vsel %vm766_vm1, %v2227_v36, 0.0 }
 0xf5b   : > { %2230 = vadd.xlane.f32.xlu0 %v2229_v17  ;;  %v2986_v19 = vpop.f32.mrf.mxu1 }
 0xf5c   : > { %v2228_v42 = vadd.f32 %v2752_v37, %v2222_v40 }
 0xf5e   : > { %v2232_v43 = vsel %vm766_vm1, %v2228_v42, 0.0 }
 0xf5f   : > { %2233 = vadd.xlane.f32.xlu1 %v2232_v43 }
 0xfe4   : > { %v2231_v44 = vpop.xlane.xlu0 %2230 }
 0xfe5   : > { %v2236_v45 = vmul.f32 0.03125, %v2231_v44 }
 0xfe7   : > { %v2238_v46 = vsub.f32 %v2227_v36, %v2236_v45 }
 0xfe8   : > { %v2234_v47 = vpop.xlane.xlu1 %2233 }
 0xfe9   : > { %v2237_v48 = vmul.f32 0.03125, %v2234_v47  ;;  %v2240_v39 = vmul.f32 %v2238_v46, %v2238_v46 }
 0xfeb   : > { %v2239_v49 = vsub.f32 %v2228_v42, %v2237_v48  ;;  %v2242_v29 = vsel %vm766_vm1, %v2240_v39, 0.0  ;;  %v2735_v39 = vld [vmem:[%s3820_s18] ss:$0 sm:$0xff] }
 0xfec   : > { %2243 = vadd.xlane.f32.xlu0 %v2242_v29  ;;  %v2736_v29 = vld [vmem:[%s3821_s19] ss:$0 sm:$0xff] }
 0xfed   : > { %v2241_v33 = vmul.f32 %v2239_v49, %v2239_v49 }
 0xfef   : > { %v2245_v41 = vsel %vm766_vm1, %v2241_v33, 0.0 }
 0xff0   : > { %2246 = vadd.xlane.f32.xlu1 %v2245_v41 }
0x1075   : > { %v2244_v52 = vpop.xlane.xlu0 %2243 }
0x1076   : > { %v2248_v53 = vmul.f32 0.03125, %v2244_v52 }
0x1078   : > { %v2250_v54 = vadd.f32 1e-05, %v2248_v53 }
0x1079   : > { %v2247_v55 = vpop.xlane.xlu1 %2246 }
0x107a   : > { %3123 = vrsqrt.f32 %v2250_v54  ;;  %v2249_v56 = vmul.f32 0.03125, %v2247_v55 }
0x107c   : > { %v2251_v57 = vadd.f32 1e-05, %v2249_v56 }
0x107e   : > { %3125 = vrsqrt.f32 %v2251_v57 }
0x1087   : > { %v3124_v58 = vpop.eup %3123 }
0x1088   : > { %v2254_v59 = vmul.f32 %v3124_v58, %v2238_v46 }
0x108a   : > { %v2263_v62 = vmul.f32 %v2725_v6, %v2254_v59 }
0x108b   : > { %v3126_v60 = vpop.eup %3125 }
0x108c   : > { %v2255_v61 = vmul.f32 %v3126_v60, %v2239_v49  ;;  %v2272_v2 = vadd.f32 %v2726_v63, %v2263_v62 }
0x108e   : > { %v2264_v0 = vmul.f32 %v2725_v6, %v2255_v61 }
0x1090   : > { %v2273_v3 = vadd.f32 %v2726_v63, %v2264_v0 }
0x1092   : > { %v2274_v25 = vpack.c.bf16 %v2273_v3, %v2272_v2 }
0x1094   : > { %2992 = vmatmul.mubr.msk.bf16.vlgmr.msra.gmra.mxu0 %vm766_vm1, %v2274_v25 }
0x1154   : > { %v2335_v9 = vpop.f32.mrf.mxu0 }
0x1155   : > { %v2336_v11 = vadd.f32 %v2727_v8, %v2335_v9 }
0x1156   : > { %v2993_v10 = vpop.f32.mrf.mxu0 }
0x1157   : > { %v2342_v15 = vmax.f32 %v2336_v11, 0.0 }
0x1158   : > { %v2338_v12 = vpop.f32.mrf.mxu0 }
0x1159   : > { %v2339_v13 = vadd.f32 %v2727_v8, %v2338_v12 }
0x115a   : > { %v2994_v14 = vpop.f32.mrf.mxu0 }
0x115b   : > { %v2343_v16 = vmax.f32 %v2339_v13, 0.0 }
0x115d   : > { %v2344_v18 = vpack.c.bf16 %v2343_v16, %v2342_v15 }
0x115f   : > { %3000 = vmatmul.mubr.msk.bf16.vlgmr.msra.gmra.mxu1 %vm766_vm1, %v2344_v18 }
0x121f   : > { %v2405_v20 = vpop.f32.mrf.mxu1 }
0x1220   : > { %v2406_v21 = vadd.f32 %v2731_v1, %v2405_v20 }
0x1221   : > { %v3001_v22 = vpop.f32.mrf.mxu1 }
0x1222   : > { %v2412_v23 = vadd.f32 %v2406_v21, %v2272_v2 }
0x1223   : > { %v2408_v24 = vpop.f32.mrf.mxu1 }
0x1224   : > { %v2409_v26 = vadd.f32 %v2731_v1, %v2408_v24  ;;  %v2414_v27 = vsel %vm766_vm1, %v2412_v23, 0.0 }
0x1225   : > { %2415 = vadd.xlane.f32.xlu0 %v2414_v27  ;;  %v3002_v28 = vpop.f32.mrf.mxu1 }
0x1226   : > { %v2413_v5 = vadd.f32 %v2409_v26, %v2273_v3 }
0x1228   : > { %v2417_v30 = vsel %vm766_vm1, %v2413_v5, 0.0 }
0x1229   : > { %2418 = vadd.xlane.f32.xlu1 %v2417_v30 }
0x12ae   : > { %v2416_v31 = vpop.xlane.xlu0 %2415 }
0x12af   : > { %v2420_v32 = vmul.f32 0.03125, %v2416_v31 }
0x12b1   : > { %v2422_v34 = vsub.f32 %v2412_v23, %v2420_v32 }
0x12b2   : > { %v2419_v35 = vpop.xlane.xlu1 %2418 }
0x12b3   : > { %v2421_v36 = vmul.f32 0.03125, %v2419_v35  ;;  %v2424_v37 = vmul.f32 %v2422_v34, %v2422_v34 }
0x12b5   : > { %v2423_v38 = vsub.f32 %v2413_v5, %v2421_v36  ;;  %v2426_v40 = vsel %vm766_vm1, %v2424_v37, 0.0 }
0x12b6   : > { %2427 = vadd.xlane.f32.xlu0 %v2426_v40 }
0x12b7   : > { %v2425_v17 = vmul.f32 %v2423_v38, %v2423_v38 }
0x12b9   : > { %v2429_v19 = vsel %vm766_vm1, %v2425_v17, 0.0 }
0x12ba   : > { %2430 = vadd.xlane.f32.xlu1 %v2429_v19 }
0x133f   : > { %v2428_v42 = vpop.xlane.xlu0 %2427 }
0x1340   : > { %v2432_v43 = vmul.f32 0.03125, %v2428_v42 }
0x1342   : > { %v2434_v44 = vadd.f32 1e-05, %v2432_v43 }
0x1343   : > { %v2431_v45 = vpop.xlane.xlu1 %2430 }
0x1344   : > { %3127 = vrsqrt.f32 %v2434_v44  ;;  %v2433_v46 = vmul.f32 0.03125, %v2431_v45 }
0x1346   : > { %v2435_v47 = vadd.f32 1e-05, %v2433_v46 }
0x1348   : > { %3129 = vrsqrt.f32 %v2435_v47 }
0x1351   : > { %v3128_v48 = vpop.eup %3127 }
0x1352   : > { %v2438_v49 = vmul.f32 %v3128_v48, %v2422_v34 }
0x1354   : > { %v2447_v33 = vmul.f32 %v2735_v39, %v2438_v49 }
0x1355   : > { %v3130_v41 = vpop.eup %3129 }
0x1356   : > { %v2439_v50 = vmul.f32 %v3130_v41, %v2423_v38  ;;  %v2456_v51 = vadd.f32 %v2736_v29, %v2447_v33 }
0x1358   : > { %v2448_v52 = vmul.f32 %v2735_v39, %v2439_v50  ;;  %v2746_v53 = vpack.c.bf16 %v2456_v51, %v2456_v51 }
0x135a   : > { %v2457_v54 = vadd.f32 %v2736_v29, %v2448_v52  ;;  %2467 = vst.msk [vmem:[%s697_s27] sm:$0xf] %vm2466_vm4, %v2746_v53 }
0x135c   : > { %v2747_v55 = vpack.c.bf16 %v2457_v54, %v2457_v54 }
0x135e   : > { %2468 = vst.msk [vmem:[%s697_s27 + $0x4] sm:$0xf] %vm2466_vm4, %v2747_v55 }
0x135f   : > { %3144 = shalt.err (!%p3141_p5)
}
0x1360   : > { %s3145_s28 = scalar_lea.hbm %s3753_s29, 128  ;;  %s3149_s0 = scalar_lea.hbm %s3852_s26, 256 }
0x1361   : > { %p3146_p6 = scmp.ne.s32.totalorder %s3753_s29, %s3145_s28  ;;  %p3150_p10 = scmp.lt.s32.totalorder %s3753_s29, %s3852_s26 }
0x1362   : > { %p3151_p11 = scmp.lt.s32.totalorder %s3149_s0, %s3145_s28 }
0x1363   : > { %p3147_p7 = pnand %p3146_p6, %p3359_p4 }
0x1364   : > { %p3152_p12 = por %p3151_p11, %p3150_p10 }
0x1365   : > { %p3148_p9 = pneg %p3147_p7 }
0x1367   : > { %p3153_p13 = pnand %p3152_p12, %p3148_p9 }
0x1369   : > { %3156 = shalt.err (!%p3153_p13)
}
0x136a   : > { %s3212_s21 = smov 64   ;;  %s3213_s23 = smov 4  }
0x136b   : > { %3003 = dma.vmem_to_hbm [thread:$0]  (%p3359_p4), %s3755_s2, 128, %s3753_s29, %s3757_s1, %s3212_s21, %s3212_s21, %s3213_s23  }
0x136c PF: > { %s3853_s30 = sld [smem:[#allocation5_spill]]  ;;  %p3009_p0 = scmp.ge.s32.totalorder %s3207_s25, 2 }
0x136e   : > { %p3006_p1 = pnand %p3009_p0, %p3366_p8 }
0x1370   : > { %p3007_p2 = pneg %p3006_p1 }
0x1372   : > { %s2500_s27 = sand.u32 1, %s3853_s30  }
0x1373   : > { %s2501_s5 = scalar_lea.sflag [#allocation3], %s2500_s27 }
0x1374   : > { %3182 = dma.done.wait (%p3007_p2), %s2501_s5, 128  }
0x1375   : > { %3184 = vsyncadd (%p3007_p2), %s2501_s5, 4294967168  ;;  %s33_s25 = sadd.s32 1, %s3207_s25   ;;  %s3855_s28 = sld [smem:[#allocation6_spill]] }
0x1376   : > { %p30_p3 = scmp.ge.s32.totalorder %s33_s25, 4   ;;  %s3856_s23 = sld [smem:[#allocation10_spill]] }
0x1377   : > { %s3857_s24 = sld [smem:[#allocation7_spill]]  ;;  %s3859_s1 = smov %s3191_s22 }
0x1378   : > { %s3858_s2 = sld [smem:[#allocation8_spill]]  ;;  %32 = sbr.rel (!%p30_p3) target bundleno = 12 (0xc), region = 165 }
0x137b   : > { %s3860_s22 = smov %s3855_s28 }
0x137d   :  { %2506 = vsyncpa [#allocation3], 1 }
0x137e   :  { %2508 = vsyncpa [#allocation3 + $0x1], 1 }

// kernel: cross_attention_layer.2
= control target key start
LH: loop header
LB: loop body
LE: loop exit
PB: predicated region body
PF: predicated region fallthrough
CT: control target
= control target key end

     0   :  { %s3584_s0 = inlined_call_operand.vmem [shape: bf16[2,8,32], index: 0, kind: input, shape index: {}, may-alias: {0,2}]   ;;  %s3585_s1 = inlined_call_operand.vmem [shape: bf16[2,16,32], index: 1, kind: input, shape index: {}]   ;;  %s3586_s2 = inlined_call_operand.vmem [shape: bf16[2,8,32], index: 2, kind: input, shape index: {}, may-alias: {0,2}]   ;;  %s3587_s3 = inlined_call_operand.vmem [shape: f32[2,1,16], index: 3, kind: input, shape index: {}]   ;;  %s3588_s4 = inlined_call_operand.vmem [shape: bf16[4,32,8], index: 4, kind: input, shape index: {}]   ;;  %s3589_s5 = inlined_call_operand.vmem [shape: f32[4,1,8], index: 5, kind: input, shape index: {}]   ;;  %s3590_s6 = inlined_call_operand.vmem [shape: bf16[4,32,8], index: 6, kind: input, shape index: {}]   ;;  %s3591_s7 = inlined_call_operand.vmem [shape: f32[4,1,8], index: 7, kind: input, shape index: {}]   ;;  %s3592_s8 = inlined_call_operand.vmem [shape: bf16[4,32,8], index: 8, kind: input, shape index: {}]   ;;  %s3593_s9 = inlined_call_operand.vmem [shape: f32[4,1,8], index: 9, kind: input, shape index: {}]   ;;  %s3594_s10 = inlined_call_operand.vmem [shape: bf16[4,8,32], index: 10, kind: input, shape index: {}]   ;;  %s3595_s11 = inlined_call_operand.vmem [shape: f32[1,32], index: 11, kind: input, shape index: {}]   ;;  %s3596_s12 = inlined_call_operand.vmem [shape: f32[1,32], index: 12, kind: input, shape index: {}]   ;;  %s3597_s13 = inlined_call_operand.vmem [shape: f32[1,32], index: 13, kind: input, shape index: {}]   ;;  %s3598_s14 = inlined_call_operand.vmem [shape: bf16[32,32], index: 14, kind: input, shape index: {}]   ;;  %s3599_s15 = inlined_call_operand.vmem [shape: f32[1,32], index: 15, kind: input, shape index: {}]   ;;  %s3600_s16 = inlined_call_operand.vmem [shape: bf16[32,32], index: 16, kind: input, shape index: {}]   ;;  %s3601_s17 = inlined_call_operand.vmem [shape: f32[1,32], index: 17, kind: input, shape index: {}]   ;;  %s3602_s18 = inlined_call_operand.vmem [shape: f32[1,32], index: 18, kind: input, shape index: {}]   ;;  %s3603_s19 = inlined_call_operand.vmem [shape: f32[1,32], index: 19, kind: input, shape index: {}]   ;;  %s3604_s20 = inlined_call_operand.hbm [shape: bf16[2,8,32], index: 20, kind: output, shape index: {}]  }
   0x1   :  { %3615 = sst [smem:[#allocation12_spill]] %s3584_s0 }
   0x2   :  { %3616 = sst [smem:[#allocation13_spill]] %s3585_s1 }
   0x3   :  { %3617 = sst [smem:[#allocation14_spill]] %s3586_s2 }
   0x4   :  { %3618 = sst [smem:[#allocation15_spill]] %s3587_s3 }
   0x5   :  { %3619 = sst [smem:[#allocation16_spill]] %s3588_s4 }
   0x6   :  { %3620 = sst [smem:[#allocation17_spill]] %s3603_s19 }
   0x7   :  { %3621 = sst [smem:[#allocation18_spill]] %s3604_s20 }
   0x8   :  { %25 = vsyncpa [#allocation3], 0 }
   0x9   :  { %27 = vsyncpa [#allocation3 + $0x1], 0  ;;  %s3145_s1 = smov 0   ;;  %s3147_s22 = smov 0  }
   0xa   :  { %s3149_s23 = smov 0   ;;  %s3151_s24 = smov 0  }
   0xb   :  { %s3153_s2 = smov 0   ;;  %s3155_s25 = smov 0  }
   0xc LB: > { %3622 = sst [smem:[#allocation5_spill]] %s3015_s1  ;;  %s2465_s3 = sadd.s32 4294967295, %s3035_s25   ;;  %s3035_s25 = sphi %s3155_s25, %s33_s25   ;;  %s3031_s2 = sphi %s3153_s2, %s3645_s2   ;;  %s3027_s24 = sphi %s3151_s24, %s3644_s24   ;;  %s3023_s23 = sphi %s3149_s23, %s3643_s23   ;;  %s3019_s22 = sphi %s3147_s22, %s3647_s22   ;;  %s3015_s1 = sphi %s3145_s1, %s3646_s1  }
   0xd   : > { %3623 = sst [smem:[#allocation6_spill]] %s3023_s23  ;;  %s2466_s26 = sadd.s32 4294967294, %s3035_s25  }
   0xe   : > { %3624 = sst [smem:[#allocation7_spill]] %s3031_s2  ;;  %s45_s27 = sadd.s32 1, %s3031_s2 }
   0xf   : > { %3625 = sst [smem:[#allocation8_spill]] %s3035_s25  ;;  %s498_s28 = sadd.s32 1, %s3023_s23 }
  0x10   : > { %p47_p0 = scmp.ge.s32.totalorder %s45_s27, 2  ;;  %p508_p1 = scmp.ne.s32.totalorder %s3023_s23, %s3019_s22 }
  0x11   : > { %p509_p2 = scmp.eq.s32.totalorder %s2465_s3, 1  ;;  %p514_p3 = scmp.ne.s32.totalorder %s3019_s22, %s3015_s1 }
  0x12   : > { %s3649_s27 = smov (%p47_p0, %s45_s27), 0  ;;  %p515_p5 = scmp.eq.s32.totalorder %s2466_s26, 1 }
  0x13   : > { %3626 = sst [smem:[#allocation9_spill]] %s3649_s27  ;;  %p3185_p4 = por %p509_p2, %p508_p1 }
  0x14   : > { %s493_s29 = ssub.s32 %s3031_s2, %s3649_s27  ;;  %p2469_p6 = scmp.ge.s32.totalorder %s3035_s25, 1 }
  0x15   : > { %p496_p7 = scmp.eq.s32.totalorder %s493_s29, 0  ;;  %p3192_p8 = por %p515_p5, %p514_p3 }
  0x16   : > { %p615_p9 = scmp.lt.s32.totalorder %s3035_s25, 3 }
  0x17   : > { %s3628_s30 = scalar_select %p3192_p8, 1, 0 }
  0x18   : > { %s3198_s0 = scalar_select %p496_p7, %s3023_s23, %s498_s28  }
  0x19   : > { %3629 = sst [smem:[#allocation10_spill]] %s3628_s30  ;;  %p616_p10 = pnand %p2469_p6, %p615_p9 }
  0x1a   : > { %3630 = sst [smem:[#allocation11_spill]] %s3198_s0  ;;  %p690_p11 = scmp.lt.s32.totalorder (!%p616_p10), %s3027_s24, 1 }
  0x1b   : > { %619 = sbr.rel (%p616_p10) target bundleno = 4943 (0x134f), region = 100  ;;  %s3631_s2 = sld [smem:[#allocation16_spill]] (!%p616_p10) }
  0x1c   : > { %s3633_s23 = sld [smem:[#allocation13_spill]] (!%p616_p10)  ;;  %s687_s3 = sand.u32 (!%p616_p10), 1, %s3019_s22  }
  0x1d   : > { %s3634_s20 = sld [smem:[#allocation12_spill]] (!%p616_p10)  ;;  %s2470_s27 = sshll.u32 (!%p616_p10), %s687_s3, 2 }
  0x1e   : > { %s3635_s28 = sld [smem:[#allocation15_spill]] (!%p616_p10) }
  0x1f   : > { %s3637_s1 = sld [smem:[#allocation17_spill]] (!%p616_p10) }
  0x20   : > { %v2910_v0 = vld [vmem:[%s3590_s6 + $0x8] sm:$0xff]   ;;  %v3037_v1 = vmov 0.0   ;;  %v2911_v2 = vld [vmem:[%s3590_s6] sm:$0xff]   ;;  %vm3038_vm0 = vmmov 0   ;;  %s3218_s21 = scalar_select %p690_p11, %s3027_s24, 1  ;;  %vm747_vm1 = vcmask 261120  }
  0x21   : > { %2677 = vmatprep.subr.bf16.mxu1 %v3037_v1  ;;  %2669 = vmatprep.subr.bf16.mxu0 %v3037_v1  ;;  %s3632_s0 = smov %s3631_s2  ;;  %v2912_v3 = vld [vmem:[%s3631_s2 + $0x8] sm:$0xff]   ;;  %v2480_v9 = vld [vmem:[%s3591_s7] ss:$0 sm:$0xff]  ;;  %vm930_vm2 = vcmask 64512   ;;  %vm977_vm3 = vcmask 130048   ;;  %vm1038_vm4 = vcmask 1043456  }
  0x22   : > { %2678 = vmatpush3.bf16.msra.mxu1 %v2910_v0  ;;  %2681 = vmatprep.mubr.msk.bf16.mxu1 %vm3038_vm0, %v3037_v1  ;;  %v2914_v4 = vld [vmem:[%s3632_s0] sm:$0xff]   ;;  %s2602_s2 = sshll.u32 %s3218_s21, 3  ;;  %s2471_s26 = sshll.u32 %s3218_s21, 2  ;;  %v2915_v23 = vld [vmem:[%s3592_s8 + $0x8] sm:$0xff]   ;;  %v2919_v51 = vld [vmem:[%s3632_s0 + $0x18] sm:$0xff]   ;;  %vm2341_vm5 = vcmask 257024  }
  0x23   : > { %2679 = vmatprep.subr.bf16.mxu1 %v3037_v1  ;;  %2673 = vmatprep.mubr.msk.bf16.mxu0 %vm3038_vm0, %v3037_v1  ;;  %s701_s30 = scalar_lea.vmem %s3633_s23, %s2602_s2  ;;  %s696_s19 = scalar_lea.vmem %s3634_s20, %s2471_s26  ;;  %v2476_v16 = vld [vmem:[%s3589_s5] ss:$0 sm:$0xff]  ;;  %v2920_v52 = vld [vmem:[%s3632_s0 + $0x10] sm:$0xff]   ;;  %v2917_v54 = vld [vmem:[%s3590_s6 + $0x18] sm:$0xff]  }
  0x24   : > { %2670 = vmatpush3.bf16.msra.mxu0 %v2912_v3  ;;  %v3235_v5 = vld [vmem:[%s701_s30] sm:$0xff]   ;;  %s711_s20 = scalar_lea.vmem %s3635_s28, %s3218_s21  ;;  %v2918_v58 = vld [vmem:[%s3590_s6 + $0x10] sm:$0xff]   ;;  %s3636_s23 = sld [smem:[#allocation14_spill]] }
  0x25   : > { %2671 = vmatprep.subr.bf16.mxu0 %v3037_v1  ;;  %v3237_v6 = vld [vmem:[%s696_s19] sm:$0xf]  ;;  %s2599_s19 = sshll.u32 %s3027_s24, 6  ;;  %s3638_s30 = sld [smem:[#allocation18_spill]] }
  0x26   : > { %2680 = vmatpush3.bf16.msra.mxu1 %v2911_v2  ;;  %v2916_v24 = vld [vmem:[%s3592_s8] sm:$0xff]   ;;  %s2344_s2 = scalar_lea.sflag [#allocation3], %s687_s3  ;;  %s3039_s28 = smov [#allocation2]  }
  0x27   : > { %2693 = vmatprep.subr.bf16.mxu1 %v3037_v1  ;;  %v3275_v25 = vld [vmem:[%s711_s20] ss:$0 sm:$0xff]  ;;  %s2963_s20 = sshll.u32 %s3039_s28, 4  ;;  %s2964_s20 = int_to_ptr.vmem [resolvable:$false] %s2963_s20 }
  0x28   : > { %2672 = vmatpush3.bf16.msra.mxu0 %v2914_v4  ;;  %v2485_v39 = vld [vmem:[%s3593_s9] ss:$0 sm:$0xff]  ;;  %s2965_s24 = scalar_lea.vmem %s2964_s20, 128 }
  0x29   : > { %2685 = vmatprep.subr.bf16.mxu0 %v3037_v1  ;;  %2682 = vmatmul.mubr.msk.bf16.vlgmr.msra.gmra.mxu1 %vm747_vm1, %v3235_v5  ;;  %v1034_v45 = vld [vmem:[%s3594_s10] sm:$0xf] }
  0x2a   : > { %2695 = vmatprep.mubr.msk.bf16.mxu1 %vm3038_vm0, %v3037_v1  ;;  %v1040_v46 = vsel %vm1038_vm4, %v1034_v45, 0  ;;  %s708_s25 = scalar_lea.vmem %s3636_s23, %s2471_s26  ;;  %s689_s23 = scalar_lea.vmem [#allocation2], %s2470_s27 }
  0x2b   : > { %2674 = vmatmul.mubr.msk.bf16.vlgmr.msra.gmra.mxu0 %vm747_vm1, %v3237_v6 }
  0x2c   : > { %2689 = vmatprep.mubr.msk.bf16.mxu0 %vm3038_vm0, %v3037_v1  ;;  %2686 = vmatpush3.bf16.msra.mxu0 %v2915_v23 }
  0x2d   : > { %2687 = vmatprep.subr.bf16.mxu0 %v3037_v1 }
  0x30   : > { %2688 = vmatpush3.bf16.msra.mxu0 %v2916_v24 }
  0x31   : > { %2699 = vmatprep.subr.bf16.mxu0 %v3037_v1 }
  0x33   : > { %2690 = vmatmul.mubr.msk.bf16.vlgmr.msra.gmra.mxu0 %vm747_vm1, %v3235_v5 }
  0x34   : > { %2701 = vmatprep.mubr.msk.bf16.mxu0 %vm3038_vm0, %v3037_v1 }
  0xe9   : > { %v857_v7 = vpop.f32.mrf.mxu1 }
  0xea   : > { %v858_v13 = vadd.f32 %v2480_v9, %v857_v7 }
  0xeb   : > { %v785_v8 = vpop.f32.mrf.mxu0  ;;  %v2683_v10 = vpop.f32.mrf.mxu1 }
  0xec   : > { %v786_v20 = vadd.f32 %v2476_v16, %v785_v8  ;;  %v2507_v8 = vld [vmem:[%s3591_s7 + $0x1] ss:$0 sm:$0xff] }
  0xed   : > { %v2675_v11 = vpop.f32.mrf.mxu0  ;;  %v860_v12 = vpop.f32.mrf.mxu1 }
  0xee   : > { %v861_v14 = vadd.f32 %v2480_v9, %v860_v12  ;;  %v791_v22 = vpack.c.bf16 %v786_v20, %v786_v20  ;;  %v2922_v20 = vld [vmem:[%s3592_s8 + $0x10] sm:$0xff]  }
  0xef   : > { %v788_v15 = vpop.f32.mrf.mxu0  ;;  %v2684_v17 = vpop.f32.mrf.mxu1 }
  0xf0   : > { %v864_v18 = vpack.c.bf16 %v861_v14, %v858_v13  ;;  %v2498_v13 = vld [vmem:[%s3589_s5 + $0x1] ss:$0 sm:$0xff] }
  0xf1   : > { %v2676_v19 = vpop.f32.mrf.mxu0 }
  0xf2   : > { %v935_v21 = vsel %vm930_vm2, %v864_v18, 0  ;;  %v2921_v19 = vld [vmem:[%s3592_s8 + $0x18] sm:$0xff]  }
  0xf3   : > { %2694 = vmatpush3.bf16.xpose.msra.mxu1 %v935_v21  ;;  %v922_v32 = vpop.f32.mrf.mxu0 }
  0xf4   : > { %2705 = vmatprep.subr.bf16.mxu1 %v3037_v1  ;;  %v923_v40 = vadd.f32 %v2485_v39, %v922_v32 }
  0xf5   : > { %v2691_v33 = vpop.f32.mrf.mxu0 }
  0xf7   : > { %v925_v41 = vpop.f32.mrf.mxu0 }
  0xf8   : > { %v926_v42 = vadd.f32 %v2485_v39, %v925_v41  ;;  %v2522_v41 = vld [vmem:[%s3594_s10 + $0x4] sm:$0xf] }
  0xf9   : > { %v2692_v43 = vpop.f32.mrf.mxu0 }
  0xfa   : > { %2696 = vmatmul.mubr.msk.bf16.vlgmr.msra.gmra.mxu1 %vm930_vm2, %v791_v22  ;;  %v929_v44 = vpack.c.bf16 %v926_v42, %v923_v40  ;;  %v1397_v42 = vsel %vm1038_vm4, %v2522_v41, 0 }
  0xfb   : > { %2707 = vmatprep.mubr.msk.bf16.mxu1 %vm3038_vm0, %v3037_v1  ;;  %2706 = vmatpush3.bf16.msra.mxu1 %v1040_v46 }
  0xfc   : > { %2700 = vmatpush3.bf16.msra.mxu0 %v929_v44  ;;  %2719 = vmatprep.subr.bf16.mxu1 %v3037_v1 }
  0xfd   : > { %2711 = vmatprep.subr.bf16.mxu0 %v3037_v1 }
 0x1ba   : > { %v971_v26 = vpop.f32.mrf.mxu1 }
 0x1bb   : > { %v972_v27 = vadd.f32 %v3275_v25, %v971_v26 }
 0x1bc   : > { %v2697_v28 = vpop.f32.mrf.mxu1 }
 0x1bd   : > { %v978_v29 = vsel %vm977_vm3, %v972_v27, -inf }
 0x1be   : > { %979 = vmax.xlane.f32.xlu0 %v978_v29  ;;  %v974_v30 = vpop.f32.mrf.mxu1 }
 0x1c0   : > { %v2698_v31 = vpop.f32.mrf.mxu1 }
 0x247   : > { %v980_v34 = vpop.xlane.xlu0 %979 }
 0x248   : > { %v981_v35 = vsub.f32 %v972_v27, %v980_v34 }
 0x24a   : > { %v982_v36 = vmul.f32 1.442695, %v981_v35  ;;  %v2516_v35 = vld [vmem:[%s3593_s9 + $0x1] ss:$0 sm:$0xff] }
 0x24c   : > { %2939 = vpow2.f32 %v982_v36 }
 0x259   : > { %v2940_v37 = vpop.eup %2939 }
 0x25a   : > { %v984_v38 = vsel %vm977_vm3, %v2940_v37, 0.0 }
 0x25b   : > { %985 = vadd.xlane.f32.xlu0 %v984_v38 }
 0x2e4   : > { %v986_v47 = vpop.xlane.xlu0 %985 }
 0x2e5   : > { %2941 = vrcp.f32 %v986_v47  ;;  %v2925_v47 = vld [vmem:[%s3632_s0 + $0x28] sm:$0xff]  }
 0x2f2   : > { %v2942_v48 = vpop.eup %2941 }
 0x2f3   : > { %v988_v49 = vmul.f32 %v2942_v48, %v2940_v37  ;;  %v2926_v48 = vld [vmem:[%s3632_s0 + $0x20] sm:$0xff]  }
 0x2f5   : > { %v989_v50 = vpack.c.bf16 %v988_v49, %v988_v49 }
 0x2f7   : > { %2702 = vmatmul.mubr.msk.bf16.vlgmr.msra.gmra.mxu0 %vm977_vm3, %v989_v50  ;;  %v2923_v50 = vld [vmem:[%s3590_s6 + $0x28] sm:$0xff]  }
 0x2f8   : > { %2715 = vmatprep.mubr.msk.bf16.mxu0 %vm3038_vm0, %v3037_v1  ;;  %2712 = vmatpush3.bf16.msra.mxu0 %v2919_v51 }
 0x2f9   : > { %2713 = vmatprep.subr.bf16.mxu0 %v3037_v1 }
 0x2fc   : > { %2714 = vmatpush3.bf16.msra.mxu0 %v2920_v52 }
 0x2fd   : > { %2727 = vmatprep.subr.bf16.mxu0 %v3037_v1 }
 0x2ff   : > { %2716 = vmatmul.mubr.msk.bf16.vlgmr.msra.gmra.mxu0 %vm747_vm1, %v3237_v6 }
 0x300   : > { %2731 = vmatprep.mubr.msk.bf16.mxu0 %vm3038_vm0, %v3037_v1  ;;  %2728 = vmatpush3.bf16.msra.mxu0 %v2921_v19  ;;  %v2928_v19 = vld [vmem:[%s3592_s8 + $0x20] sm:$0xff]  }
 0x301   : > { %2729 = vmatprep.subr.bf16.mxu0 %v3037_v1 }
 0x304   : > { %2730 = vmatpush3.bf16.msra.mxu0 %v2922_v20 }
 0x305   : > { %2741 = vmatprep.subr.bf16.mxu0 %v3037_v1 }
 0x307   : > { %2732 = vmatmul.mubr.msk.bf16.vlgmr.msra.gmra.mxu0 %vm747_vm1, %v3235_v5 }
 0x308   : > { %2743 = vmatprep.mubr.msk.bf16.mxu0 %vm3038_vm0, %v3037_v1 }
 0x3b7   : > { %v1027_v53 = vpop.f32.mrf.mxu0 }
 0x3b8   : > { %v1033_v55 = vpack.c.bf16 %v1027_v53, %v1027_v53 }
 0x3b9   : > { %v2703_v56 = vpop.f32.mrf.mxu0 }
 0x3ba   : > { %2708 = vmatmul.mubr.msk.bf16.vlgmr.msra.gmra.mxu1 %vm930_vm2, %v1033_v55 }
 0x3bb   : > { %v1030_v57 = vpop.f32.mrf.mxu0  ;;  %2720 = vmatpush3.bf16.msra.mxu1 %v2917_v54  ;;  %2723 = vmatprep.mubr.msk.bf16.mxu1 %vm3038_vm0, %v3037_v1  ;;  %v2924_v54 = vld [vmem:[%s3590_s6 + $0x20] sm:$0xff]  }
 0x3bc   : > { %2721 = vmatprep.subr.bf16.mxu1 %v3037_v1 }
 0x3bd   : > { %v2704_v59 = vpop.f32.mrf.mxu0 }
 0x3bf   : > { %2722 = vmatpush3.bf16.msra.mxu1 %v2918_v58  ;;  %v1148_v60 = vpop.f32.mrf.mxu0 }
 0x3c0   : > { %2735 = vmatprep.subr.bf16.mxu1 %v3037_v1  ;;  %v1149_v16 = vadd.f32 %v2498_v13, %v1148_v60  ;;  %v2492_v60 = vld [vmem:[%s3595_s11] ss:$0 sm:$0xff]  ;;  %v2529_v13 = vld [vmem:[%s3589_s5 + $0x2] ss:$0 sm:$0xff] }
 0x3c1   : > { %v2717_v61 = vpop.f32.mrf.mxu0 }
 0x3c2   : > { %2724 = vmatmul.mubr.msk.bf16.vlgmr.msra.gmra.mxu1 %vm747_vm1, %v3235_v5  ;;  %v1154_v18 = vpack.c.bf16 %v1149_v16, %v1149_v16 }
 0x3c3   : > { %2737 = vmatprep.mubr.msk.bf16.mxu1 %vm3038_vm0, %v3037_v1  ;;  %v1151_v62 = vpop.f32.mrf.mxu0 }
 0x3c5   : > { %v2718_v63 = vpop.f32.mrf.mxu0 }
 0x3c7   : > { %v1281_v28 = vpop.f32.mrf.mxu0 }
 0x3c8   : > { %v1282_v36 = vadd.f32 %v2516_v35, %v1281_v28 }
 0x3c9   : > { %v2733_v29 = vpop.f32.mrf.mxu0 }
 0x3cb   : > { %v1284_v37 = vpop.f32.mrf.mxu0 }
 0x3cc   : > { %v1285_v38 = vadd.f32 %v2516_v35, %v1284_v37 }
 0x3cd   : > { %v2734_v39 = vpop.f32.mrf.mxu0 }
 0x3ce   : > { %v1288_v40 = vpack.c.bf16 %v1285_v38, %v1282_v36 }
 0x3d0   : > { %2742 = vmatpush3.bf16.msra.mxu0 %v1288_v40  ;;  %v2553_v40 = vld [vmem:[%s3594_s10 + $0x8] sm:$0xf] }
 0x3d1   : > { %2753 = vmatprep.subr.bf16.mxu0 %v3037_v1  ;;  %v1748_v41 = vsel %vm1038_vm4, %v2553_v40, 0 }
 0x47a   : > { %v3319_v0 = vpop.f32.mrf.mxu1 }
 0x47b   : > { %v1088_v61 = vadd.f32 %v2492_v60, %v3319_v0 }
 0x47c   : > { %v2709_v2 = vpop.f32.mrf.mxu1 }
 0x47e   : > { %v1079_v3 = vpop.f32.mrf.mxu1 }
 0x480   : > { %v2710_v4 = vpop.f32.mrf.mxu1 }
 0x482   : > { %v1214_v7 = vpop.f32.mrf.mxu1 }
 0x483   : > { %v1215_v11 = vadd.f32 %v2507_v8, %v1214_v7 }
 0x484   : > { %v2725_v9 = vpop.f32.mrf.mxu1 }
 0x486   : > { %v1217_v10 = vpop.f32.mrf.mxu1 }
 0x487   : > { %v1218_v12 = vadd.f32 %v2507_v8, %v1217_v10  ;;  %v2538_v8 = vld [vmem:[%s3591_s7 + $0x2] ss:$0 sm:$0xff] }
 0x488   : > { %v2726_v14 = vpop.f32.mrf.mxu1 }
 0x489   : > { %v1221_v15 = vpack.c.bf16 %v1218_v12, %v1215_v11 }
 0x48b   : > { %v1293_v17 = vsel %vm930_vm2, %v1221_v15, 0 }
 0x48c   : > { %2736 = vmatpush3.bf16.xpose.msra.mxu1 %v1293_v17 }
 0x48d   : > { %2747 = vmatprep.subr.bf16.mxu1 %v3037_v1 }
 0x493   : > { %2738 = vmatmul.mubr.msk.bf16.vlgmr.msra.gmra.mxu1 %vm930_vm2, %v1154_v18  ;;  %v2927_v18 = vld [vmem:[%s3592_s8 + $0x28] sm:$0xff]  }
 0x494   : > { %2749 = vmatprep.mubr.msk.bf16.mxu1 %vm3038_vm0, %v3037_v1  ;;  %2748 = vmatpush3.bf16.msra.mxu1 %v1397_v42 }
 0x495   : > { %2761 = vmatprep.subr.bf16.mxu1 %v3037_v1 }
 0x553   : > { %v1329_v21 = vpop.f32.mrf.mxu1 }
 0x554   : > { %v1330_v22 = vadd.f32 %v3275_v25, %v1329_v21 }
 0x555   : > { %v2739_v23 = vpop.f32.mrf.mxu1 }
 0x556   : > { %v1335_v24 = vsel %vm977_vm3, %v1330_v22, -inf }
 0x557   : > { %1336 = vmax.xlane.f32.xlu1 %v1335_v24  ;;  %v1332_v26 = vpop.f32.mrf.mxu1 }
 0x559   : > { %v2740_v27 = vpop.f32.mrf.mxu1 }
 0x5e0   : > { %v1337_v30 = vpop.xlane.xlu1 %1336 }
 0x5e1   : > { %v1338_v31 = vsub.f32 %v1330_v22, %v1337_v30 }
 0x5e3   : > { %v1339_v32 = vmul.f32 1.442695, %v1338_v31 }
 0x5e5   : > { %2943 = vpow2.f32 %v1339_v32 }
 0x5f2   : > { %v2944_v33 = vpop.eup %2943 }
 0x5f3   : > { %v1341_v34 = vsel %vm977_vm3, %v2944_v33, 0.0 }
 0x5f4   : > { %1342 = vadd.xlane.f32.xlu1 %v1341_v34  ;;  %v2547_v34 = vld [vmem:[%s3593_s9 + $0x2] ss:$0 sm:$0xff] }
 0x67d   : > { %v1343_v43 = vpop.xlane.xlu1 %1342 }
 0x67e   : > { %2945 = vrcp.f32 %v1343_v43 }
 0x68b   : > { %v2946_v44 = vpop.eup %2945 }
 0x68c   : > { %v1345_v45 = vmul.f32 %v2946_v44, %v2944_v33 }
 0x68e   : > { %v1346_v46 = vpack.c.bf16 %v1345_v45, %v1345_v45 }
 0x690   : > { %2744 = vmatmul.mubr.msk.bf16.vlgmr.msra.gmra.mxu0 %vm977_vm3, %v1346_v46  ;;  %v2931_v46 = vld [vmem:[%s3632_s0 + $0x38] sm:$0xff]  }
 0x691   : > { %2757 = vmatprep.mubr.msk.bf16.mxu0 %vm3038_vm0, %v3037_v1  ;;  %2754 = vmatpush3.bf16.msra.mxu0 %v2925_v47  ;;  %v2932_v47 = vld [vmem:[%s3632_s0 + $0x30] sm:$0xff]   ;;  %s2356_s0 = scalar_lea.hbm %s3638_s30, %s2599_s19 }
 0x692   : > { %2755 = vmatprep.subr.bf16.mxu0 %v3037_v1 }
 0x695   : > { %2756 = vmatpush3.bf16.msra.mxu0 %v2926_v48 }
 0x696   : > { %2769 = vmatprep.subr.bf16.mxu0 %v3037_v1 }
 0x698   : > { %2758 = vmatmul.mubr.msk.bf16.vlgmr.msra.gmra.mxu0 %vm747_vm1, %v3237_v6 }
 0x699   : > { %2773 = vmatprep.mubr.msk.bf16.mxu0 %vm3038_vm0, %v3037_v1  ;;  %2770 = vmatpush3.bf16.msra.mxu0 %v2927_v18 }
 0x69a   : > { %2771 = vmatprep.subr.bf16.mxu0 %v3037_v1 }
 0x69d   : > { %2772 = vmatpush3.bf16.msra.mxu0 %v2928_v19 }
 0x69e   : > { %2783 = vmatprep.subr.bf16.mxu0 %v3037_v1 }
 0x6a0   : > { %2774 = vmatmul.mubr.msk.bf16.vlgmr.msra.gmra.mxu0 %vm747_vm1, %v3235_v5 }
 0x6a1   : > { %2785 = vmatprep.mubr.msk.bf16.mxu0 %vm3038_vm0, %v3037_v1 }
 0x750   : > { %v1384_v49 = vpop.f32.mrf.mxu0 }
 0x751   : > { %v1390_v51 = vpack.c.bf16 %v1384_v49, %v1384_v49  ;;  %v2929_v49 = vld [vmem:[%s3590_s6 + $0x38] sm:$0xff]  }
 0x752   : > { %v2745_v52 = vpop.f32.mrf.mxu0 }
 0x753   : > { %2750 = vmatmul.mubr.msk.bf16.vlgmr.msra.gmra.mxu1 %vm930_vm2, %v1390_v51 }
 0x754   : > { %v1387_v53 = vpop.f32.mrf.mxu0  ;;  %2762 = vmatpush3.bf16.msra.mxu1 %v2923_v50  ;;  %2765 = vmatprep.mubr.msk.bf16.mxu1 %vm3038_vm0, %v3037_v1 }
 0x755   : > { %2763 = vmatprep.subr.bf16.mxu1 %v3037_v1  ;;  %v2930_v53 = vld [vmem:[%s3590_s6 + $0x30] sm:$0xff]  }
 0x756   : > { %v2746_v55 = vpop.f32.mrf.mxu0 }
 0x758   : > { %2764 = vmatpush3.bf16.msra.mxu1 %v2924_v54  ;;  %v1499_v56 = vpop.f32.mrf.mxu0 }
 0x759   : > { %2777 = vmatprep.subr.bf16.mxu1 %v3037_v1  ;;  %v1500_v15 = vadd.f32 %v2529_v13, %v1499_v56 }
 0x75a   : > { %v2759_v57 = vpop.f32.mrf.mxu0 }
 0x75b   : > { %2766 = vmatmul.mubr.msk.bf16.vlgmr.msra.gmra.mxu1 %vm747_vm1, %v3235_v5  ;;  %v1505_v17 = vpack.c.bf16 %v1500_v15, %v1500_v15  ;;  %v2934_v15 = vld [vmem:[%s3592_s8 + $0x30] sm:$0xff]  }
 0x75c   : > { %2779 = vmatprep.mubr.msk.bf16.mxu1 %vm3038_vm0, %v3037_v1  ;;  %v1502_v58 = vpop.f32.mrf.mxu0 }
 0x75e   : > { %v2760_v59 = vpop.f32.mrf.mxu0 }
 0x760   : > { %v1632_v27 = vpop.f32.mrf.mxu0 }
 0x761   : > { %v1633_v35 = vadd.f32 %v2547_v34, %v1632_v27 }
 0x762   : > { %v2775_v28 = vpop.f32.mrf.mxu0 }
 0x764   : > { %v1635_v36 = vpop.f32.mrf.mxu0 }
 0x765   : > { %v1636_v37 = vadd.f32 %v2547_v34, %v1635_v36  ;;  %v2584_v34 = vld [vmem:[%s3594_s10 + $0xc] sm:$0xf] }
 0x766   : > { %v2776_v38 = vpop.f32.mrf.mxu0 }
 0x767   : > { %v1639_v39 = vpack.c.bf16 %v1636_v37, %v1633_v35  ;;  %v2099_v35 = vsel %vm1038_vm4, %v2584_v34, 0  ;;  %v2596_v34 = vld [vmem:[%s3602_s18] ss:$0 sm:$0xff] }
 0x769   : > { %2784 = vmatpush3.bf16.msra.mxu0 %v1639_v39 }
 0x76a   : > { %2795 = vmatprep.subr.bf16.mxu0 %v3037_v1 }
 0x813   : > { %v1433_v62 = vpop.f32.mrf.mxu1 }
 0x814   : > { %v3390_v63 = vadd.f32 %v1433_v62, %v1088_v61 }
 0x815   : > { %v2751_v2 = vpop.f32.mrf.mxu1 }
 0x817   : > { %v1436_v3 = vpop.f32.mrf.mxu1 }
 0x818   : > { %v2569_v3 = vld [vmem:[%s3591_s7 + $0x3] ss:$0 sm:$0xff] }
 0x819   : > { %v2752_v4 = vpop.f32.mrf.mxu1 }
 0x81b   : > { %v1565_v7 = vpop.f32.mrf.mxu1 }
 0x81c   : > { %v1566_v11 = vadd.f32 %v2538_v8, %v1565_v7 }
 0x81d   : > { %v2767_v9 = vpop.f32.mrf.mxu1 }
 0x81f   : > { %v1568_v10 = vpop.f32.mrf.mxu1 }
 0x820   : > { %v1569_v12 = vadd.f32 %v2538_v8, %v1568_v10 }
 0x821   : > { %v2768_v0 = vpop.f32.mrf.mxu1 }
 0x822   : > { %v1572_v14 = vpack.c.bf16 %v1569_v12, %v1566_v11  ;;  %v2560_v11 = vld [vmem:[%s3589_s5 + $0x3] ss:$0 sm:$0xff] }
 0x824   : > { %v1644_v16 = vsel %vm930_vm2, %v1572_v14, 0  ;;  %v2933_v14 = vld [vmem:[%s3592_s8 + $0x38] sm:$0xff]  }
 0x825   : > { %2778 = vmatpush3.bf16.xpose.msra.mxu1 %v1644_v16 }
 0x826   : > { %2789 = vmatprep.subr.bf16.mxu1 %v3037_v1 }
 0x82c   : > { %2780 = vmatmul.mubr.msk.bf16.vlgmr.msra.gmra.mxu1 %vm930_vm2, %v1505_v17 }
 0x82d   : > { %2791 = vmatprep.mubr.msk.bf16.mxu1 %vm3038_vm0, %v3037_v1  ;;  %2790 = vmatpush3.bf16.msra.mxu1 %v1748_v41 }
 0x82e   : > { %2803 = vmatprep.subr.bf16.mxu1 %v3037_v1 }
 0x8ec   : > { %v1680_v20 = vpop.f32.mrf.mxu1 }
 0x8ed   : > { %v1681_v21 = vadd.f32 %v3275_v25, %v1680_v20 }
 0x8ee   : > { %v2781_v22 = vpop.f32.mrf.mxu1 }
 0x8ef   : > { %v1686_v23 = vsel %vm977_vm3, %v1681_v21, -inf }
 0x8f0   : > { %1687 = vmax.xlane.f32.xlu0 %v1686_v23  ;;  %v1683_v24 = vpop.f32.mrf.mxu1 }
 0x8f2   : > { %v2782_v26 = vpop.f32.mrf.mxu1 }
 0x979   : > { %v1688_v29 = vpop.xlane.xlu0 %1687 }
 0x97a   : > { %v1689_v30 = vsub.f32 %v1681_v21, %v1688_v29 }
 0x97c   : > { %v1690_v31 = vmul.f32 1.442695, %v1689_v30 }
 0x97e   : > { %2947 = vpow2.f32 %v1690_v31 }
 0x98b   : > { %v2948_v32 = vpop.eup %2947 }
 0x98c   : > { %v1692_v33 = vsel %vm977_vm3, %v2948_v32, 0.0 }
 0x98d   : > { %1693 = vadd.xlane.f32.xlu1 %v1692_v33 }
 0xa16   : > { %v1694_v42 = vpop.xlane.xlu1 %1693 }
 0xa17   : > { %2949 = vrcp.f32 %v1694_v42 }
 0xa24   : > { %v2950_v43 = vpop.eup %2949 }
 0xa25   : > { %v1696_v44 = vmul.f32 %v2950_v43, %v2948_v32 }
 0xa27   : > { %v1697_v45 = vpack.c.bf16 %v1696_v44, %v1696_v44 }
 0xa29   : > { %2786 = vmatmul.mubr.msk.bf16.vlgmr.msra.gmra.mxu0 %vm977_vm3, %v1697_v45  ;;  %v2142_v45 = vld [vmem:[%s708_s25] sm:$0xf]  ;;  %s2358_s25 = sshll.u32 %s689_s23, 4  ;;  %s2359_s25 = int_to_ptr.vmem [resolvable:$true] %s2358_s25 }
 0xa2a   : > { %2799 = vmatprep.mubr.msk.bf16.mxu0 %vm3038_vm0, %v3037_v1  ;;  %2796 = vmatpush3.bf16.msra.mxu0 %v2931_v46  ;;  %v2143_v46 = vunpack.c.l.bf16 %v2142_v45  ;;  %s2959_s29 = scalar_lea.vmem %s2359_s25, 64  ;;  %p2966_p1 = scmp.lt.s32.totalorder %s2359_s25, %s2964_s20 }
 0xa2b   : > { %2797 = vmatprep.subr.bf16.mxu0 %v3037_v1  ;;  %p2960_p12 = scmp.ne.s32.totalorder %s2359_s25, %s2959_s29  ;;  %p2967_p2 = scmp.lt.s32.totalorder %s2965_s24, %s2959_s29 }
 0xa2d   : > { %p2961_p13 = pnand %p2960_p12, %p3185_p4  ;;  %p2968_p3 = por %p2967_p2, %p2966_p1 }
 0xa2e   : > { %2798 = vmatpush3.bf16.msra.mxu0 %v2932_v47 }
 0xa2f   : > { %2811 = vmatprep.subr.bf16.mxu0 %v3037_v1  ;;  %p2962_p0 = pneg %p2961_p13 }
 0xa31   : > { %2800 = vmatmul.mubr.msk.bf16.vlgmr.msra.gmra.mxu0 %vm747_vm1, %v3237_v6  ;;  %p2969_p5 = pnand %p2968_p3, %p2962_p0 }
 0xa32   : > { %2815 = vmatprep.mubr.msk.bf16.mxu0 %vm3038_vm0, %v3037_v1  ;;  %2812 = vmatpush3.bf16.msra.mxu0 %v2933_v14 }
 0xa33   : > { %2813 = vmatprep.subr.bf16.mxu0 %v3037_v1 }
 0xa36   : > { %2814 = vmatpush3.bf16.msra.mxu0 %v2934_v15 }
 0xa37   : > { %2825 = vmatprep.subr.bf16.mxu0 %v3037_v1 }
 0xa39   : > { %2816 = vmatmul.mubr.msk.bf16.vlgmr.msra.gmra.mxu0 %vm747_vm1, %v3235_v5 }
 0xa3a   : > { %2827 = vmatprep.mubr.msk.bf16.mxu0 %vm3038_vm0, %v3037_v1 }
 0xae9   : > { %v1735_v48 = vpop.f32.mrf.mxu0 }
 0xaea   : > { %v1741_v50 = vpack.c.bf16 %v1735_v48, %v1735_v48 }
 0xaeb   : > { %v2787_v51 = vpop.f32.mrf.mxu0 }
 0xaec   : > { %2792 = vmatmul.mubr.msk.bf16.vlgmr.msra.gmra.mxu1 %vm930_vm2, %v1741_v50 }
 0xaed   : > { %v1738_v52 = vpop.f32.mrf.mxu0  ;;  %2804 = vmatpush3.bf16.msra.mxu1 %v2929_v49  ;;  %2807 = vmatprep.mubr.msk.bf16.mxu1 %vm3038_vm0, %v3037_v1 }
 0xaee   : > { %2805 = vmatprep.subr.bf16.mxu1 %v3037_v1 }
 0xaef   : > { %v2788_v6 = vpop.f32.mrf.mxu0 }
 0xaf1   : > { %2806 = vmatpush3.bf16.msra.mxu1 %v2930_v53  ;;  %v1850_v54 = vpop.f32.mrf.mxu0 }
 0xaf2   : > { %2819 = vmatprep.subr.bf16.mxu1 %v3037_v1 }
 0xaf3   : > { %v2801_v55 = vpop.f32.mrf.mxu0 }
 0xaf4   : > { %2808 = vmatmul.mubr.msk.bf16.vlgmr.msra.gmra.mxu1 %vm747_vm1, %v3235_v5 }
 0xaf5   : > { %2821 = vmatprep.mubr.msk.bf16.mxu1 %vm3038_vm0, %v3037_v1  ;;  %v1853_v56 = vpop.f32.mrf.mxu0 }
 0xaf7   : > { %v2802_v57 = vpop.f32.mrf.mxu0 }
 0xaf9   : > { %v1983_v22 = vpop.f32.mrf.mxu0 }
 0xafb   : > { %v2817_v23 = vpop.f32.mrf.mxu0 }
 0xafd   : > { %v1986_v30 = vpop.f32.mrf.mxu0 }
 0xaff   : > { %v2818_v32 = vpop.f32.mrf.mxu0 }
 0xbac   : > { %v1784_v58 = vpop.f32.mrf.mxu1 }
 0xbad   : > { %v3458_v59 = vadd.f32 %v1784_v58, %v3390_v63  ;;  %v1851_v63 = vadd.f32 %v2560_v11, %v1850_v54  ;;  %v2935_v58 = vld [vmem:[%s3598_s14 + $0x8] sm:$0xff]  }
 0xbae   : > { %v2793_v60 = vpop.f32.mrf.mxu1  ;;  %v2937_v11 = vld [vmem:[%s3600_s16 + $0x8] sm:$0xff]  }
 0xbaf   : > { %v1856_v0 = vpack.c.bf16 %v1851_v63, %v1851_v63  ;;  %v2588_v63 = vld [vmem:[%s3599_s15] ss:$0 sm:$0xff] }
 0xbb0   : > { %v1787_v61 = vpop.f32.mrf.mxu1 }
 0xbb2   : > { %v2794_v62 = vpop.f32.mrf.mxu1 }
 0xbb4   : > { %v1916_v2 = vpop.f32.mrf.mxu1 }
 0xbb5   : > { %v1917_v8 = vadd.f32 %v2569_v3, %v1916_v2 }
 0xbb6   : > { %v2809_v4 = vpop.f32.mrf.mxu1 }
 0xbb8   : > { %v1919_v7 = vpop.f32.mrf.mxu1 }
 0xbb9   : > { %v1920_v9 = vadd.f32 %v2569_v3, %v1919_v7  ;;  %v2586_v3 = vld [vmem:[%s3596_s12] ss:$0 sm:$0xff] }
 0xbba   : > { %v2810_v10 = vpop.f32.mrf.mxu1  ;;  %v2587_v7 = vld [vmem:[%s3597_s13] ss:$0 sm:$0xff] }
 0xbbb   : > { %v1923_v12 = vpack.c.bf16 %v1920_v9, %v1917_v8 }
 0xbbd   : > { %v1995_v13 = vsel %vm930_vm2, %v1923_v12, 0  ;;  %v2938_v12 = vld [vmem:[%s3600_s16] sm:$0xff]  }
 0xbbe   : > { %2820 = vmatpush3.bf16.xpose.msra.mxu1 %v1995_v13 }
 0xbbf   : > { %2831 = vmatprep.subr.bf16.mxu1 %v3037_v1 }
 0xbc5   : > { %2822 = vmatmul.mubr.msk.bf16.vlgmr.msra.gmra.mxu1 %vm930_vm2, %v1856_v0 }
 0xbc6   : > { %2833 = vmatprep.mubr.msk.bf16.mxu1 %vm3038_vm0, %v3037_v1  ;;  %2832 = vmatpush3.bf16.msra.mxu1 %v2099_v35 }
 0xbc7   : > { %2845 = vmatprep.subr.bf16.mxu1 %v3037_v1 }
 0xc85   : > { %v2031_v16 = vpop.f32.mrf.mxu1 }
 0xc86   : > { %v2032_v17 = vadd.f32 %v3275_v25, %v2031_v16  ;;  %v2578_v25 = vld [vmem:[%s3593_s9 + $0x3] ss:$0 sm:$0xff] }
 0xc87   : > { %v2823_v18 = vpop.f32.mrf.mxu1  ;;  %v1984_v29 = vadd.f32 %v2578_v25, %v1983_v22  ;;  %v1987_v31 = vadd.f32 %v2578_v25, %v1986_v30 }
 0xc88   : > { %v2037_v19 = vsel %vm977_vm3, %v2032_v17, -inf }
 0xc89   : > { %2038 = vmax.xlane.f32.xlu0 %v2037_v19  ;;  %v2034_v20 = vpop.f32.mrf.mxu1  ;;  %v1990_v33 = vpack.c.bf16 %v1987_v31, %v1984_v29 }
 0xc8b   : > { %v2824_v21 = vpop.f32.mrf.mxu1  ;;  %2826 = vmatpush3.bf16.msra.mxu0 %v1990_v33 }
 0xc8c   : > { %2837 = vmatprep.subr.bf16.mxu0 %v3037_v1 }
 0xd12   : > { %v2039_v24 = vpop.xlane.xlu0 %2038 }
 0xd13   : > { %v2040_v26 = vsub.f32 %v2032_v17, %v2039_v24 }
 0xd15   : > { %v2041_v27 = vmul.f32 1.442695, %v2040_v26 }
 0xd17   : > { %2951 = vpow2.f32 %v2041_v27 }
 0xd24   : > { %v2952_v28 = vpop.eup %2951 }
 0xd25   : > { %v2043_v5 = vsel %vm977_vm3, %v2952_v28, 0.0 }
 0xd26   : > { %2044 = vadd.xlane.f32.xlu1 %v2043_v5 }
 0xdaf   : > { %v2045_v36 = vpop.xlane.xlu1 %2044 }
 0xdb0   : > { %2953 = vrcp.f32 %v2045_v36  ;;  %v2597_v36 = vld [vmem:[%s3637_s1] ss:$0 sm:$0xff] }
 0xdbd   : > { %v2954_v37 = vpop.eup %2953 }
 0xdbe   : > { %v2047_v38 = vmul.f32 %v2954_v37, %v2952_v28 }
 0xdc0   : > { %v2048_v39 = vpack.c.bf16 %v2047_v38, %v2047_v38 }
 0xdc2   : > { %2828 = vmatmul.mubr.msk.bf16.vlgmr.msra.gmra.mxu0 %vm977_vm3, %v2048_v39 }
 0xdc3   : > { %2841 = vmatprep.mubr.msk.bf16.mxu0 %vm3038_vm0, %v3037_v1  ;;  %2838 = vmatpush3.bf16.msra.mxu0 %v2935_v58 }
 0xdc4   : > { %2839 = vmatprep.subr.bf16.mxu0 %v3037_v1 }
 0xe82   : > { %v2086_v40 = vpop.f32.mrf.mxu0 }
 0xe83   : > { %v2092_v41 = vpack.c.bf16 %v2086_v40, %v2086_v40 }
 0xe84   : > { %v2829_v42 = vpop.f32.mrf.mxu0 }
 0xe85   : > { %2834 = vmatmul.mubr.msk.bf16.vlgmr.msra.gmra.mxu1 %vm930_vm2, %v2092_v41 }
 0xe86   : > { %v2089_v43 = vpop.f32.mrf.mxu0  ;;  %2849 = vmatprep.mubr.msk.bf16.mxu1 %vm3038_vm0, %v3037_v1  ;;  %2846 = vmatpush3.bf16.msra.mxu1 %v2937_v11 }
 0xe87   : > { %2847 = vmatprep.subr.bf16.mxu1 %v3037_v1  ;;  %v2592_v1 = vld [vmem:[%s3601_s17] ss:$0 sm:$0xff] }
 0xe88   : > { %v2830_v44 = vpop.f32.mrf.mxu0 }
 0xe8a   : > { %2848 = vmatpush3.bf16.msra.mxu1 %v2938_v12 }
 0xf45   : > { %v2135_v47 = vpop.f32.mrf.mxu1 }
 0xf46   : > { %v2141_v48 = vadd.f32 %v2135_v47, %v3458_v59  ;;  %v2936_v59 = vld [vmem:[%s3598_s14] sm:$0xff]  }
 0xf47   : > { %v2835_v49 = vpop.f32.mrf.mxu1  ;;  %2840 = vmatpush3.bf16.msra.mxu0 %v2936_v59 }
 0xf48   : > { %v2144_v50 = vadd.f32 %v2143_v46, %v2141_v48 }
 0xf49   : > { %v2138_v51 = vpop.f32.mrf.mxu1 }
 0xf4a   : > { %v2145_v52 = vsel %vm747_vm1, %v2144_v50, 0.0 }
 0xf4b   : > { %2146 = vadd.xlane.f32.xlu0 %v2145_v52  ;;  %v2836_v53 = vpop.f32.mrf.mxu1 }
 0xfd4   : > { %v2147_v6 = vpop.xlane.xlu0 %2146 }
 0xfd5   : > { %v2149_v54 = vmul.f32 0.03125, %v2147_v6 }
 0xfd7   : > { %v2150_v55 = vsub.f32 %v2144_v50, %v2149_v54 }
 0xfd9   : > { %v2151_v56 = vmul.f32 %v2150_v55, %v2150_v55 }
 0xfdb   : > { %v2152_v57 = vsel %vm747_vm1, %v2151_v56, 0.0 }
 0xfdc   : > { %2153 = vadd.xlane.f32.xlu1 %v2152_v57 }
0x1065   : > { %v2154_v60 = vpop.xlane.xlu1 %2153 }
0x1066   : > { %v2155_v61 = vmul.f32 0.03125, %v2154_v60 }
0x1068   : > { %v2156_v62 = vadd.f32 1e-05, %v2155_v61 }
0x106a   : > { %2955 = vrsqrt.f32 %v2156_v62 }
0x1077   : > { %v2956_v2 = vpop.eup %2955 }
0x1078   : > { %v2158_v4 = vmul.f32 %v2956_v2, %v2150_v55 }
0x107a   : > { %v2166_v8 = vmul.f32 %v2586_v3, %v2158_v4 }
0x107c   : > { %v2174_v9 = vadd.f32 %v2587_v7, %v2166_v8 }
0x107e   : > { %v2175_v10 = vpack.c.bf16 %v2174_v9, %v2174_v9 }
0x1080   : > { %2842 = vmatmul.mubr.msk.bf16.vlgmr.msra.gmra.mxu0 %vm747_vm1, %v2175_v10 }
0x1140   : > { %v2236_v13 = vpop.f32.mrf.mxu0 }
0x1141   : > { %v2237_v0 = vadd.f32 %v2588_v63, %v2236_v13 }
0x1142   : > { %v2843_v14 = vpop.f32.mrf.mxu0 }
0x1143   : > { %v2242_v15 = vmax.f32 %v2237_v0, 0.0 }
0x1144   : > { %v2239_v16 = vpop.f32.mrf.mxu0 }
0x1145   : > { %v2243_v17 = vpack.c.bf16 %v2242_v15, %v2242_v15 }
0x1146   : > { %v2844_v18 = vpop.f32.mrf.mxu0 }
0x1147   : > { %2850 = vmatmul.mubr.msk.bf16.vlgmr.msra.gmra.mxu1 %vm747_vm1, %v2243_v17 }
0x1207   : > { %v2304_v19 = vpop.f32.mrf.mxu1 }
0x1208   : > { %v2305_v20 = vadd.f32 %v2592_v1, %v2304_v19 }
0x1209   : > { %v2851_v21 = vpop.f32.mrf.mxu1 }
0x120a   : > { %v2310_v22 = vadd.f32 %v2305_v20, %v2174_v9 }
0x120b   : > { %v2307_v23 = vpop.f32.mrf.mxu1 }
0x120c   : > { %v2311_v24 = vsel %vm747_vm1, %v2310_v22, 0.0 }
0x120d   : > { %2312 = vadd.xlane.f32.xlu0 %v2311_v24  ;;  %v2852_v26 = vpop.f32.mrf.mxu1 }
0x1296   : > { %v2313_v27 = vpop.xlane.xlu0 %2312 }
0x1297   : > { %v2314_v28 = vmul.f32 0.03125, %v2313_v27 }
0x1299   : > { %v2315_v5 = vsub.f32 %v2310_v22, %v2314_v28 }
0x129b   : > { %v2316_v25 = vmul.f32 %v2315_v5, %v2315_v5 }
0x129d   : > { %v2317_v29 = vsel %vm747_vm1, %v2316_v25, 0.0 }
0x129e   : > { %2318 = vadd.xlane.f32.xlu1 %v2317_v29 }
0x1327   : > { %v2319_v30 = vpop.xlane.xlu1 %2318 }
0x1328   : > { %v2320_v31 = vmul.f32 0.03125, %v2319_v30 }
0x132a   : > { %v2321_v32 = vadd.f32 1e-05, %v2320_v31 }
0x132c   : > { %2957 = vrsqrt.f32 %v2321_v32 }
0x1339   : > { %v2958_v33 = vpop.eup %2957 }
0x133a   : > { %v2323_v35 = vmul.f32 %v2958_v33, %v2315_v5 }
0x133c   : > { %v2331_v37 = vmul.f32 %v2596_v34, %v2323_v35 }
0x133e   : > { %v2339_v38 = vadd.f32 %v2597_v36, %v2331_v37 }
0x1340   : > { %v2340_v39 = vpack.c.bf16 %v2339_v38, %v2339_v38 }
0x1342   : > { %2342 = vst.msk [vmem:[%s689_s23] sm:$0xf] %vm2341_vm5, %v2340_v39 }
0x1343   : > { %2972 = shalt.err (!%p2969_p5)
}
0x1344   : > { %s2973_s27 = scalar_lea.hbm %s2356_s0, 64  ;;  %s2977_s19 = scalar_lea.hbm %s3638_s30, 128 }
0x1345   : > { %p2974_p6 = scmp.ne.s32.totalorder %s2356_s0, %s2973_s27  ;;  %p2978_p10 = scmp.lt.s32.totalorder %s2356_s0, %s3638_s30 }
0x1346   : > { %p2979_p11 = scmp.lt.s32.totalorder %s2977_s19, %s2973_s27 }
0x1347   : > { %p2975_p7 = pnand %p2974_p6, %p3185_p4 }
0x1348   : > { %p2980_p12 = por %p2979_p11, %p2978_p10 }
0x1349   : > { %p2976_p9 = pneg %p2975_p7 }
0x134b   : > { %p2981_p13 = pnand %p2980_p12, %p2976_p9 }
0x134d   : > { %2984 = shalt.err (!%p2981_p13)
}
0x134e   : > { %2853 = dma.vmem_to_hbm [thread:$0]  (%p3185_p4), %s2359_s25, 64, %s2356_s0, %s2344_s2  }
0x134f PF: > { %s3639_s26 = sld [smem:[#allocation8_spill]] }
0x1350   : > { %s3640_s29 = sld [smem:[#allocation5_spill]] }
0x1355   : > { %p2859_p0 = scmp.ge.s32.totalorder %s3639_s26, 2 }
0x1356   : > { %s2370_s20 = sand.u32 1, %s3640_s29  }
0x1357   : > { %p2856_p1 = pnand %p2859_p0, %p3192_p8  ;;  %s2371_s24 = scalar_lea.sflag [#allocation3], %s2370_s20 }
0x1359   : > { %p2857_p2 = pneg %p2856_p1 }
0x135b   : > { %3010 = dma.done.wait (%p2857_p2), %s2371_s24, 64  }
0x135c   : > { %3012 = vsyncadd (%p2857_p2), %s2371_s24, 4294967232  ;;  %s33_s25 = sadd.s32 1, %s3639_s26   ;;  %s3642_s27 = sld [smem:[#allocation6_spill]] }
0x135d   : > { %p30_p3 = scmp.ge.s32.totalorder %s33_s25, 4   ;;  %s3643_s23 = sld [smem:[#allocation11_spill]] }
0x135e   : > { %s3644_s24 = sld [smem:[#allocation7_spill]]  ;;  %s3646_s1 = smov %s3019_s22 }
0x135f   : > { %s3645_s2 = sld [smem:[#allocation9_spill]]  ;;  %32 = sbr.rel (!%p30_p3) target bundleno = 12 (0xc), region = 165 }
0x1362   : > { %s3647_s22 = smov %s3642_s27 }
0x1364   :  { %2376 = vsyncpa [#allocation3], 1 }
0x1365   :  { %2378 = vsyncpa [#allocation3 + $0x1], 1 }

</bundles_post_ra>
